<compile_context>
chip_gen: v7x
topology: tpu7x:2x2x1
jax: 0.10.0
libtpu: 0.0.40
codegen_flags: <defaults>
</compile_context>

<pallas_src>
import functools

import jax
import jax.numpy as jnp
from jax.experimental import pallas as pl
from jax.experimental.pallas import tpu as pltpu


# ----------------------------------------------------------------------------
# In-kernel helpers (pure value math, called from the fused stage kernels)
# ----------------------------------------------------------------------------

def _gn_silu(v, pmat, gamma, beta, cnt, eps):
    """GroupNorm + SiLU on an (HW, C) float32 value (channels on lanes).

    Per-group statistics are combined with one small matmul against the 0/1
    'same-group' matrix `pmat` (no lane<->sublane relayouts).  Centered
    (two-pass) variance in f32."""
    s = jnp.sum(v, axis=0, keepdims=True)                                    # (1, C)
    mean = jnp.dot(s, pmat, preferred_element_type=jnp.float32) / cnt        # per-group mean
    d = v - mean
    ss = jnp.sum(d * d, axis=0, keepdims=True)
    var = jnp.dot(ss, pmat, preferred_element_type=jnp.float32) / cnt
    y = d * jax.lax.rsqrt(var + eps) * gamma + beta
    return y * jax.nn.sigmoid(y)


def _shift_down(v, k):
    # result[i] = v[i - k]  (first k rows zero-filled)
    z = jnp.zeros((k,) + v.shape[1:], v.dtype)
    return jnp.concatenate([z, v[: v.shape[0] - k]], axis=0)


def _shift_up(v, k):
    # result[i] = v[i + k]  (last k rows zero-filled)
    z = jnp.zeros((k,) + v.shape[1:], v.dtype)
    return jnp.concatenate([v[k:], z], axis=0)


def _conv3x3(y, w_ref, b_ref, pk_ref, col, H, W, C):
    """Same-padded 3x3 conv of y (HW, C) f32 -> (HW, C) f32, K-stacked.

    The three kw taps are packed along lanes into an (HW, 3C) bf16 slab stored
    once into the pk scratch (zero halo of W rows top and bottom); the three kh
    taps are aligned row-shifted reads of that slab (offsets 0, W, 2W; W % 8 == 0),
    giving 3 MXU matmuls of K=3C with register accumulation."""
    HW = H * W
    ym1 = jnp.where(col == 0, 0.0, _shift_down(y, 1))          # reads (h, w-1)
    yp1 = jnp.where(col == W - 1, 0.0, _shift_up(y, 1))        # reads (h, w+1)
    pk_ref[W:W + HW, 0:C] = ym1.astype(jnp.bfloat16)
    pk_ref[W:W + HW, C:2 * C] = y.astype(jnp.bfloat16)
    pk_ref[W:W + HW, 2 * C:3 * C] = yp1.astype(jnp.bfloat16)

    acc = None
    for kh in range(3):
        start = kh * W                                          # aligned read
        slab = pk_ref[start:start + HW, :]                      # (HW, 3C) bf16
        part = jnp.dot(slab, w_ref[kh], preferred_element_type=jnp.float32)
        acc = part if acc is None else acc + part
    return acc + b_ref[...]                                     # bias broadcast (1, C)


def _resblock(v, pmat, prm, pk_ref, col, H, W, C, cnt, eps):
    """Pre-activation residual block: v + conv2(GN/SiLU(conv1(GN/SiLU(v))))."""
    n1g, n1b, w1, b1, n2g, n2b, w2, b2 = prm
    y = _gn_silu(v, pmat, n1g[...], n1b[...], cnt, eps)
    h = _conv3x3(y, w1, b1, pk_ref, col, H, W, C)
    y = _gn_silu(h, pmat, n2g[...], n2b[...], cnt, eps)
    h = _conv3x3(y, w2, b2, pk_ref, col, H, W, C)
    return v + h


# ----------------------------------------------------------------------------
# Fused stage kernels
# ----------------------------------------------------------------------------

def _make_starter_kernel(n_blocks, H, W, C, eps):
    HW = H * W
    cnt = float(HW * (C // min(32, C)))

    def kernel(*refs):
        x_ref, win_ref, pmat_ref = refs[0], refs[1], refs[2]
        blocks = [refs[3 + 8 * b: 3 + 8 * (b + 1)] for b in range(n_blocks)]
        o_ref = refs[3 + 8 * n_blocks]
        pk_ref = refs[4 + 8 * n_blocks]

        # Zero only the halo rows once; the interior is overwritten by every conv.
        pk_ref[0:W, :] = jnp.zeros((W, 3 * C), jnp.bfloat16)
        pk_ref[W + HW:W + HW + W, :] = jnp.zeros((W, 3 * C), jnp.bfloat16)
        col = jax.lax.broadcasted_iota(jnp.int32, (HW, 1), 0) % W
        pmat = pmat_ref[...]

        # conv_in (1x1, bias=False) folded with the channel-repeat residual.
        h = jnp.dot(x_ref[0], win_ref[...], preferred_element_type=jnp.float32)  # (HW, C)
        s = h
        for prm in blocks:
            s = _resblock(s, pmat, prm, pk_ref, col, H, W, C, cnt, eps)
        o_ref[0] = (s + h).astype(o_ref.dtype)                  # SameBlock outer skip

    return kernel


def _make_up_kernel(n_blocks, H, W, C, eps):
    HW = H * W
    cnt = float(HW * (C // min(32, C)))

    def kernel(*refs):
        x_ref, pmat_ref = refs[0], refs[1]
        blocks = [refs[2 + 8 * b: 2 + 8 * (b + 1)] for b in range(n_blocks)]
        wproj_ref = refs[2 + 8 * n_blocks]
        wrep_ref = refs[3 + 8 * n_blocks]
        o_ref = refs[4 + 8 * n_blocks]
        pk_ref = refs[5 + 8 * n_blocks]

        pk_ref[0:W, :] = jnp.zeros((W, 3 * C), jnp.bfloat16)
        pk_ref[W + HW:W + HW + W, :] = jnp.zeros((W, 3 * C), jnp.bfloat16)
        col = jax.lax.broadcasted_iota(jnp.int32, (HW, 1), 0) % W
        pmat = pmat_ref[...]

        xb = x_ref[0]                                            # bf16, reused for the shortcut
        s = xb.astype(jnp.float32)
        for prm in blocks:
            s = _resblock(s, pmat, prm, pk_ref, col, H, W, C, cnt, eps)
        # UpBlock 1x1 projection fused with the ChannelToSpace channel-repeat shortcut.
        p4 = jnp.dot(s.astype(jnp.bfloat16), wproj_ref[...],
                     preferred_element_type=jnp.float32)
        p4 = p4 + jnp.dot(xb, wrep_ref[...], preferred_element_type=jnp.float32)
        o_ref[0] = p4.astype(o_ref.dtype)

    return kernel


def _make_head_kernel(C, HW, eps):
    cnt = float(HW * (C // min(32, C)))

    def kernel(x_ref, pmat_ref, g_ref, b_ref, w_ref, o_ref):
        v = x_ref[0].astype(jnp.float32)                         # (C, HW) channel-major
        s = jnp.sum(v, axis=1, keepdims=True)                    # (C, 1)
        mean = jnp.dot(pmat_ref[...], s, preferred_element_type=jnp.float32) / cnt
        d = v - mean
        ss = jnp.sum(d * d, axis=1, keepdims=True)
        var = jnp.dot(pmat_ref[...], ss, preferred_element_type=jnp.float32) / cnt
        y = d * jax.lax.rsqrt(var + eps) * g_ref[...] + b_ref[...]
        y = y * jax.nn.sigmoid(y)
        # conv_out: (3, C) @ (C, HW) -> (3, HW); lane-dense (HW on lanes), no masked
        # lane stores, and the result is already NCHW-ordered (no trailing transpose).
        o_ref[0] = jnp.dot(w_ref[...], y.astype(jnp.bfloat16),
                           preferred_element_type=jnp.float32).astype(o_ref.dtype)

    return kernel


# ----------------------------------------------------------------------------
# pallas_call wrappers
# ----------------------------------------------------------------------------

def _parallel():
    return pltpu.CompilerParams(dimension_semantics=("parallel",))


def _const_spec(shape):
    nd = len(shape)
    return pl.BlockSpec(shape, lambda i: (0,) * nd)


def _res_specs(C):
    vec = _const_spec((1, C))
    wsp = _const_spec((3, 3 * C, C))
    return [vec, vec, wsp, vec, vec, vec, wsp, vec]


def _res_args(prm):
    return [prm["n1_g"], prm["n1_b"], prm["w1"], prm["b1"],
            prm["n2_g"], prm["n2_b"], prm["w2"], prm["b2"]]


def starter_call(x, sp, H, W, eps=1e-5):
    B, HW, lc = x.shape
    C = sp["w_in"].shape[1]
    n = len(sp["blocks"])
    in_specs = [pl.BlockSpec((1, HW, lc), lambda i: (i, 0, 0)),
                _const_spec((lc, C)), _const_spec((C, C))]
    args = [x, sp["w_in"], sp["pmat"]]
    for prm in sp["blocks"]:
        in_specs += _res_specs(C)
        args += _res_args(prm)
    return pl.pallas_call(
        _make_starter_kernel(n, H, W, C, eps),
        out_shape=jax.ShapeDtypeStruct((B, HW, C), jnp.bfloat16),
        grid=(B,),
        in_specs=in_specs,
        out_specs=pl.BlockSpec((1, HW, C), lambda i: (i, 0, 0)),
        scratch_shapes=[pltpu.VMEM((HW + 2 * W, 3 * C), jnp.bfloat16)],
        compiler_params=_parallel(),
    )(*args)


def up_call(x, bp, H, W, eps=1e-5):
    B, HW, C = x.shape
    Co4 = bp["proj_w"].shape[1]
    n = len(bp["blocks"])
    in_specs = [pl.BlockSpec((1, HW, C), lambda i: (i, 0, 0)), _const_spec((C, C))]
    args = [x, bp["pmat"]]
    for prm in bp["blocks"]:
        in_specs += _res_specs(C)
        args += _res_args(prm)
    in_specs += [_const_spec((C, Co4)), _const_spec((C, Co4))]
    args += [bp["proj_w"], bp["rep_w"]]
    return pl.pallas_call(
        _make_up_kernel(n, H, W, C, eps),
        out_shape=jax.ShapeDtypeStruct((B, HW, Co4), jnp.bfloat16),
        grid=(B,),
        in_specs=in_specs,
        out_specs=pl.BlockSpec((1, HW, Co4), lambda i: (i, 0, 0)),
        scratch_shapes=[pltpu.VMEM((HW + 2 * W, 3 * C), jnp.bfloat16)],
        compiler_params=_parallel(),
    )(*args)


def head_call(x_chw, hp, eps=1e-5):
    B, C, HW = x_chw.shape
    return pl.pallas_call(
        _make_head_kernel(C, HW, eps),
        out_shape=jax.ShapeDtypeStruct((B, 3, HW), jnp.float32),
        grid=(B,),
        in_specs=[pl.BlockSpec((1, C, HW), lambda i: (i, 0, 0)),
                  _const_spec((C, C)), _const_spec((C, 1)),
                  _const_spec((C, 1)), _const_spec((3, C))],
        out_specs=pl.BlockSpec((1, 3, HW), lambda i: (i, 0, 0)),
        compiler_params=_parallel(),
    )(x_chw, hp["pmat"], hp["g"], hp["b"], hp["w"])


# ----------------------------------------------------------------------------
# XLA glue: pixel shuffle (pure fixed permutation) and conditional resample
# ----------------------------------------------------------------------------

def pixel_shuffle_flat(p4, H, W):
    # (B, HW, 4*Co) torch-ordered channels (co, r1, r2) -> NHWC-flat (B, 4*HW, Co)
    B, HW, C4 = p4.shape
    Co = C4 // 4
    x = p4.reshape(B, H, W, Co, 2, 2)
    x = x.transpose(0, 1, 4, 2, 5, 3)                   # (B, H, r1, W, r2, Co)
    return x.reshape(B, 4 * HW, Co)


def pixel_shuffle_flat_chw(p4, H, W):
    # same shuffle, emitted channel-major for the lane-dense output head
    B, HW, C4 = p4.shape
    Co = C4 // 4
    x = p4.reshape(B, H, W, Co, 2, 2)
    x = x.transpose(0, 3, 1, 4, 2, 5)                   # (B, Co, H, r1, W, r2)
    return x.reshape(B, Co, 4 * HW)


def cond_resample_flat(h, H, W, src=(40, 64), dst=(45, 80)):
    # TODO(synk): only fires when spatial == (40, 64); statically a no-op for this config.
    if (H, W) != src:
        return h, H, W
    B, HW, C = h.shape
    img = jax.image.resize(h.reshape(B, H, W, C), (B, dst[0], dst[1], C), "bilinear")
    return img.reshape(B, dst[0] * dst[1], C), dst[0], dst[1]


# ----------------------------------------------------------------------------
# Parameters: synthetic init (PyTorch-like layout) + conversion to kernel layout
# ----------------------------------------------------------------------------

def _w(key, shape, fan_in):
    return jax.random.normal(key, shape, jnp.float32) * (1.0 / jnp.sqrt(float(fan_in)))


def init_resblock(key, ch):
    k1, k2, k3, k4 = jax.random.split(key, 4)
    return dict(
        n1_g=jnp.ones((ch,), jnp.float32), n1_b=jnp.zeros((ch,), jnp.float32),
        c1_w=_w(k1, (ch, ch, 3, 3), ch * 9), c1_b=_w(k2, (ch,), ch * 9),
        n2_g=jnp.ones((ch,), jnp.float32), n2_b=jnp.zeros((ch,), jnp.float32),
        c2_w=_w(k3, (ch, ch, 3, 3), ch * 9), c2_b=_w(k4, (ch,), ch * 9))


def decoder_up_specs(cfg):
    """Static (ch_in, ch_out, n_blocks) per UpBlock in module order (Python ints only)."""
    specs = []
    ch = cfg["ch_0"]
    for n in reversed(cfg["decoder_blocks_per_stage"][:-1]):
        nc = min(ch * 2, cfg["ch_max"])
        specs.append((nc, ch, n))
        ch = nc
    return list(reversed(specs))


def init_decoder(key, cfg):
    lc, ch_0, ch_max = cfg["latent_channels"], cfg["ch_0"], cfg["ch_max"]
    bps = cfg["decoder_blocks_per_stage"]
    keys = iter(jax.random.split(key, 128))
    raw = dict(conv_in_w=_w(next(keys), (ch_max, lc), lc),                 # bias=False
               starter=[init_resblock(next(keys), ch_max) for _ in range(bps[-1])],
               blocks=[])
    for ci, co, n in decoder_up_specs(cfg):
        raw["blocks"].append(dict(res=[init_resblock(next(keys), ci) for _ in range(n)],
                                  proj_w=_w(next(keys), (4 * co, ci), ci)))  # bias=False
    raw["norm_out_g"] = jnp.ones((ch_0,), jnp.float32)
    raw["norm_out_b"] = jnp.zeros((ch_0,), jnp.float32)
    raw["conv_out_w"] = _w(next(keys), (3, ch_0), ch_0)                    # bias=False
    return raw


def _group_same_matrix(C):
    G = min(32, C)
    gid = jnp.arange(C) // (C // G)
    return (gid[:, None] == gid[None, :]).astype(jnp.float32)              # (C, C)


def _repeat_matrix(c_in, c_out):
    # 0/1 matrix R with (x @ R)[:, j] = x[:, j % c_in]  (einops '(rep c)' channel repeat)
    cols = jnp.arange(c_out) % c_in
    return (jnp.arange(c_in)[:, None] == cols[None, :]).astype(jnp.float32)


def _prep_resblock(p, C):
    def taps(w):
        # torch conv weight (Cout, Cin, 3, 3) -> (3 [kh], 3*Cin [kw*Cin+cin], Cout)
        return jnp.transpose(w, (2, 3, 1, 0)).reshape(3, 3 * C, C).astype(jnp.bfloat16)

    def row(v):
        return v.reshape(1, C).astype(jnp.float32)

    return dict(n1_g=row(p["n1_g"]), n1_b=row(p["n1_b"]), w1=taps(p["c1_w"]), b1=row(p["c1_b"]),
                n2_g=row(p["n2_g"]), n2_b=row(p["n2_b"]), w2=taps(p["c2_w"]), b2=row(p["c2_b"]))


def prepare_decoder_params(raw, cfg):
    lc, ch_0, ch_max = cfg["latent_channels"], cfg["ch_0"], cfg["ch_max"]
    prep = dict(
        starter=dict(
            # conv_in folded with the channel-repeat residual: x @ (W^T + R)
            w_in=(jnp.transpose(raw["conv_in_w"]) + _repeat_matrix(lc, ch_max)).astype(jnp.bfloat16),
            pmat=_group_same_matrix(ch_max),
            blocks=[_prep_resblock(p, ch_max) for p in raw["starter"]]),
        blocks=[],
        head=dict(pmat=_group_same_matrix(ch_0),
                  g=raw["norm_out_g"].reshape(ch_0, 1).astype(jnp.float32),
                  b=raw["norm_out_b"].reshape(ch_0, 1).astype(jnp.float32),
                  w=raw["conv_out_w"].astype(jnp.bfloat16)))                 # (3, ch_0)
    for rb, (ci, co, _n) in zip(raw["blocks"], decoder_up_specs(cfg)):
        prep["blocks"].append(dict(
            pmat=_group_same_matrix(ci),
            blocks=[_prep_resblock(p, ci) for p in rb["res"]],
            proj_w=jnp.transpose(rb["proj_w"]).astype(jnp.bfloat16),         # (ci, 4*co)
            rep_w=_repeat_matrix(ci, 4 * co).astype(jnp.bfloat16)))          # ChannelToSpace repeat
    return prep


# ----------------------------------------------------------------------------
# Decoder forward
# ----------------------------------------------------------------------------

def decoder_forward(params, x_nchw):
    # decoder_only=False -> the torch.randn_like noise branch is never taken.
    B, lc, H, W = x_nchw.shape
    x = jnp.transpose(x_nchw, (0, 2, 3, 1)).reshape(B, H * W, lc).astype(jnp.bfloat16)

    # Stage 0: conv_in + repeat fold + starter SameBlock + outer skip (one kernel)
    h = starter_call(x, params["starter"], H, W)

    n_up = len(params["blocks"])
    chw = None
    if n_up == 0:
        chw = jnp.transpose(h.reshape(B, H, W, -1), (0, 3, 1, 2)).reshape(B, -1, H * W)
    for si, bp in enumerate(params["blocks"]):
        p4 = up_call(h, bp, H, W)                    # resblocks + fused proj/shortcut
        last = si == n_up - 1
        if last and (2 * H, 2 * W) != (40, 64):
            # cond_resample is statically a no-op here; shuffle straight to the
            # channel-major layout the output head consumes (saves a transpose).
            chw = pixel_shuffle_flat_chw(p4, H, W)
            H, W = 2 * H, 2 * W
        else:
            h = pixel_shuffle_flat(p4, H, W)
            H, W = 2 * H, 2 * W
            h, H, W = cond_resample_flat(h, H, W)
            if last:
                chw = jnp.transpose(h.reshape(B, H, W, -1), (0, 3, 1, 2)).reshape(B, -1, H * W)

    # norm_out + act_out + conv_out (bias=False), lane-dense output already in NCHW order
    out = head_call(chw, params["head"])             # (B, 3, H*W) f32
    return out.reshape(B, 3, H, W)


# ----------------------------------------------------------------------------
# Main
# ----------------------------------------------------------------------------

if __name__ == "__main__":
    cfg = dict(
        sample_size=32,
        latent_size=8,
        latent_channels=4,
        ch_0=16,
        ch_max=64,
        decoder_blocks_per_stage=[1, 1, 1],
        noise_decoder_inputs=0.0,
    )

    key = jax.random.PRNGKey(0)
    k_param, k_x = jax.random.split(key)
    raw = init_decoder(k_param, cfg)
    params = prepare_decoder_params(raw, cfg)

    # latent input: (B, latent_channels, latent_size, latent_size)
    x = jax.random.normal(
        k_x, (2, cfg["latent_channels"], cfg["latent_size"], cfg["latent_size"]),
        jnp.float32)

    fwd = jax.jit(decoder_forward)
    out = jax.block_until_ready(fwd(params, x))

    assert out.shape == (2, 3, cfg["sample_size"], cfg["sample_size"]), out.shape
    assert bool(jnp.all(jnp.isfinite(out)))
    print("KERNEL_OK")
</pallas_src>

<mosaic_0001>
module attributes {stable_mosaic.version = 11 : i64} {
  func.func @kernel(%arg0: i32, %arg1: memref<1x64x64xbf16, #tpu.memory_space<vmem>>, %arg2: memref<64x64xf32, #tpu.memory_space<vmem>>, %arg3: memref<1x64xf32, #tpu.memory_space<vmem>>, %arg4: memref<1x64xf32, #tpu.memory_space<vmem>>, %arg5: memref<3x192x64xbf16, #tpu.memory_space<vmem>>, %arg6: memref<1x64xf32, #tpu.memory_space<vmem>>, %arg7: memref<1x64xf32, #tpu.memory_space<vmem>>, %arg8: memref<1x64xf32, #tpu.memory_space<vmem>>, %arg9: memref<3x192x64xbf16, #tpu.memory_space<vmem>>, %arg10: memref<1x64xf32, #tpu.memory_space<vmem>>, %arg11: memref<64x128xbf16, #tpu.memory_space<vmem>>, %arg12: memref<64x128xbf16, #tpu.memory_space<vmem>>, %arg13: memref<1x64x128xbf16, #tpu.memory_space<vmem>>, %arg14: memref<80x192xbf16, #tpu.memory_space<vmem>>) attributes {dimension_semantics = [#tpu.dimension_semantics<parallel>], iteration_bounds = array<i64: 2>, scalar_prefetch = 0 : i64, scratch_operands = 1 : i64, tpu.core_type = #tpu.core_type<tc>, window_params = [{transform_indices = @transform_0, window_bounds = array<i64: 1, 64, 64>}, {pipeline_mode = #tpu.pipeline_mode<synchronous>, transform_indices = @transform_1, window_bounds = array<i64: 64, 64>}, {pipeline_mode = #tpu.pipeline_mode<synchronous>, transform_indices = @transform_2, window_bounds = array<i64: 1, 64>}, {pipeline_mode = #tpu.pipeline_mode<synchronous>, transform_indices = @transform_3, window_bounds = array<i64: 1, 64>}, {pipeline_mode = #tpu.pipeline_mode<synchronous>, transform_indices = @transform_4, window_bounds = array<i64: 3, 192, 64>}, {pipeline_mode = #tpu.pipeline_mode<synchronous>, transform_indices = @transform_5, window_bounds = array<i64: 1, 64>}, {pipeline_mode = #tpu.pipeline_mode<synchronous>, transform_indices = @transform_6, window_bounds = array<i64: 1, 64>}, {pipeline_mode = #tpu.pipeline_mode<synchronous>, transform_indices = @transform_7, window_bounds = array<i64: 1, 64>}, {pipeline_mode = #tpu.pipeline_mode<synchronous>, transform_indices = @transform_8, window_bounds = array<i64: 3, 192, 64>}, {pipeline_mode = #tpu.pipeline_mode<synchronous>, transform_indices = @transform_9, window_bounds = array<i64: 1, 64>}, {pipeline_mode = #tpu.pipeline_mode<synchronous>, transform_indices = @transform_10, window_bounds = array<i64: 64, 128>}, {pipeline_mode = #tpu.pipeline_mode<synchronous>, transform_indices = @transform_11, window_bounds = array<i64: 64, 128>}, {transform_indices = @transform_12, window_bounds = array<i64: 1, 64, 128>}]} {
    %cst = arith.constant 0.000000e+00 : bf16
    %0 = vector.broadcast %cst : bf16 to vector<8x192xbf16>
    %c0 = arith.constant 0 : index
    %c0_0 = arith.constant 0 : index
    %1 = vector.load %arg14[%c0, %c0_0] : memref<80x192xbf16, #tpu.memory_space<vmem>>, vector<8x192xbf16>
    tpu.vector_store %arg14[%c0, %c0_0], %0 {strides = array<i32>} : memref<80x192xbf16, #tpu.memory_space<vmem>>, vector<8x192xbf16>,
    %cst_1 = arith.constant 0.000000e+00 : bf16
    %2 = vector.broadcast %cst_1 : bf16 to vector<8x192xbf16>
    %c72 = arith.constant 72 : index
    %c0_2 = arith.constant 0 : index
    %3 = vector.load %arg14[%c72, %c0_2] : memref<80x192xbf16, #tpu.memory_space<vmem>>, vector<8x192xbf16>
    tpu.vector_store %arg14[%c72, %c0_2], %2 {strides = array<i32>} : memref<80x192xbf16, #tpu.memory_space<vmem>>, vector<8x192xbf16>,
    %4 = tpu.iota {dimensions = array<i32: 0>} : vector<64x1xi32>
    %c8_i32 = arith.constant 8 : i32
    %c0_i32 = arith.constant 0 : i32
    %5 = arith.cmpi eq, %c8_i32, %c0_i32 : i32
    %c1_i32 = arith.constant 1 : i32
    %6 = arith.select %5, %c1_i32, %c8_i32 : i32
    %7 = vector.broadcast %6 : i32 to vector<64x1xi32>
    %8 = arith.remsi %4, %7 : vector<64x1xi32>
    %c0_i32_3 = arith.constant 0 : i32
    %9 = vector.broadcast %c0_i32_3 : i32 to vector<64x1xi32>
    %10 = arith.cmpi ne, %8, %9 : vector<64x1xi32>
    %c0_i32_4 = arith.constant 0 : i32
    %11 = vector.broadcast %c0_i32_4 : i32 to vector<64x1xi32>
    %12 = arith.cmpi slt, %8, %11 : vector<64x1xi32>
    %c0_i32_5 = arith.constant 0 : i32
    %13 = arith.cmpi slt, %6, %c0_i32_5 : i32
    %14 = vector.broadcast %13 : i1 to vector<64x1xi1>
    %15 = vector.broadcast %14 : vector<64x1xi1> to vector<64x1xi1>
    %16 = arith.xori %12, %15 : vector<64x1xi1>
    %17 = arith.andi %16, %10 : vector<64x1xi1>
    %18 = vector.broadcast %6 : i32 to vector<64x1xi32>
    %19 = arith.addi %8, %18 : vector<64x1xi32>
    %20 = arith.select %17, %19, %8 : vector<64x1xi1>, vector<64x1xi32>
    %c0_6 = arith.constant 0 : index
    %c0_7 = arith.constant 0 : index
    %21 = vector.load %arg2[%c0_6, %c0_7] : memref<64x64xf32, #tpu.memory_space<vmem>>, vector<64x64xf32>
    %c0_8 = arith.constant 0 : index
    %c0_9 = arith.constant 0 : index
    %c0_10 = arith.constant 0 : index
    %22 = vector.load %arg1[%c0_8, %c0_9, %c0_10] : memref<1x64x64xbf16, #tpu.memory_space<vmem>>, vector<1x64x64xbf16>
    %23 = vector.shape_cast %22 : vector<1x64x64xbf16> to vector<64x64xbf16>
    %24 = arith.extf %23 : vector<64x64xbf16> to vector<64x64xf32>
    %c0_11 = arith.constant 0 : index
    %c0_12 = arith.constant 0 : index
    %25 = vector.load %arg3[%c0_11, %c0_12] : memref<1x64xf32, #tpu.memory_space<vmem>>, vector<1x64xf32>
    %c0_13 = arith.constant 0 : index
    %c0_14 = arith.constant 0 : index
    %26 = vector.load %arg4[%c0_13, %c0_14] : memref<1x64xf32, #tpu.memory_space<vmem>>, vector<1x64xf32>
    %cst_15 = arith.constant dense<0.000000e+00> : vector<64xf32>
    %27 = vector.multi_reduction <add>, %24, %cst_15 [0] : vector<64x64xf32> to vector<64xf32>
    %28 = vector.shape_cast %27 : vector<64xf32> to vector<1x64xf32>
    %cst_16 = arith.constant dense<0.000000e+00> : vector<1x64xf32>
    %29 = tpu.matmul %28, %21, %cst_16 {dimension_numbers = #tpu.dot_dimension_numbers<[1], [0], [0], [1], [0, 0, 1, 1], [], []>} : vector<1x64xf32>, vector<64x64xf32>, vector<1x64xf32> -> vector<1x64xf32>
    %cst_17 = arith.constant 1.280000e+02 : f32
    %30 = vector.broadcast %cst_17 : f32 to vector<1x64xf32>
    %31 = arith.divf %29, %30 : vector<1x64xf32>
    %32 = vector.broadcast %31 : vector<1x64xf32> to vector<64x64xf32>
    %33 = arith.subf %24, %32 : vector<64x64xf32>
    %34 = arith.mulf %33, %33 : vector<64x64xf32>
    %cst_18 = arith.constant dense<0.000000e+00> : vector<64xf32>
    %35 = vector.multi_reduction <add>, %34, %cst_18 [0] : vector<64x64xf32> to vector<64xf32>
    %36 = vector.shape_cast %35 : vector<64xf32> to vector<1x64xf32>
    %cst_19 = arith.constant dense<0.000000e+00> : vector<1x64xf32>
    %37 = tpu.matmul %36, %21, %cst_19 {dimension_numbers = #tpu.dot_dimension_numbers<[1], [0], [0], [1], [0, 0, 1, 1], [], []>} : vector<1x64xf32>, vector<64x64xf32>, vector<1x64xf32> -> vector<1x64xf32>
    %cst_20 = arith.constant 1.280000e+02 : f32
    %38 = vector.broadcast %cst_20 : f32 to vector<1x64xf32>
    %39 = arith.divf %37, %38 : vector<1x64xf32>
    %cst_21 = arith.constant 9.99999974E-6 : f32
    %40 = vector.broadcast %cst_21 : f32 to vector<1x64xf32>
    %41 = arith.addf %39, %40 : vector<1x64xf32>
    %42 = math.rsqrt %41 : vector<1x64xf32>
    %43 = vector.broadcast %42 : vector<1x64xf32> to vector<64x64xf32>
    %44 = arith.mulf %33, %43 : vector<64x64xf32>
    %45 = vector.broadcast %25 : vector<1x64xf32> to vector<64x64xf32>
    %46 = arith.mulf %44, %45 : vector<64x64xf32>
    %47 = vector.broadcast %26 : vector<1x64xf32> to vector<64x64xf32>
    %48 = arith.addf %46, %47 : vector<64x64xf32>
    %49 = arith.negf %48 : vector<64x64xf32>
    %50 = math.exp %49 : vector<64x64xf32>
    %cst_22 = arith.constant 1.000000e+00 : f32
    %51 = vector.broadcast %cst_22 : f32 to vector<64x64xf32>
    %52 = arith.addf %51, %50 : vector<64x64xf32>
    %53 = arith.divf %51, %52 : vector<64x64xf32>
    %54 = arith.mulf %48, %53 : vector<64x64xf32>
    %c0_i32_23 = arith.constant 0 : i32
    %55 = vector.broadcast %c0_i32_23 : i32 to vector<64x1xi32>
    %56 = arith.cmpi eq, %20, %55 : vector<64x1xi32>
    %cst_24 = arith.constant 0.000000e+00 : f32
    %57 = vector.broadcast %cst_24 : f32 to vector<1x64xf32>
    %58 = vector.extract_strided_slice %54 {offsets = [0, 0], sizes = [63, 64], strides = [1, 1]} : vector<64x64xf32> to vector<63x64xf32>
    %59 = tpu.concatenate %57, %58 in 0 : vector<1x64xf32>, vector<63x64xf32> -> vector<64x64xf32>
    %cst_25 = arith.constant 0.000000e+00 : f32
    %60 = vector.shape_cast %56 : vector<64x1xi1> to vector<64x1xi1>
    %61 = vector.broadcast %60 : vector<64x1xi1> to vector<64x64xi1>
    %62 = vector.broadcast %cst_25 : f32 to vector<64x64xf32>
    %63 = arith.select %61, %62, %59 : vector<64x64xi1>, vector<64x64xf32>
    %c7_i32 = arith.constant 7 : i32
    %64 = vector.broadcast %c7_i32 : i32 to vector<64x1xi32>
    %65 = arith.cmpi eq, %20, %64 : vector<64x1xi32>
    %cst_26 = arith.constant 0.000000e+00 : f32
    %66 = vector.broadcast %cst_26 : f32 to vector<1x64xf32>
    %67 = vector.extract_strided_slice %54 {offsets = [1, 0], sizes = [63, 64], strides = [1, 1]} : vector<64x64xf32> to vector<63x64xf32>
    %68 = tpu.concatenate %67, %66 in 0 : vector<63x64xf32>, vector<1x64xf32> -> vector<64x64xf32>
    %cst_27 = arith.constant 0.000000e+00 : f32
    %69 = vector.shape_cast %65 : vector<64x1xi1> to vector<64x1xi1>
    %70 = vector.broadcast %69 : vector<64x1xi1> to vector<64x64xi1>
    %71 = vector.broadcast %cst_27 : f32 to vector<64x64xf32>
    %72 = arith.select %70, %71, %68 : vector<64x64xi1>, vector<64x64xf32>
    %73 = arith.truncf %63 : vector<64x64xf32> to vector<64x64xbf16>
    %c8 = arith.constant 8 : index
    %c0_28 = arith.constant 0 : index
    %74 = vector.load %arg14[%c8, %c0_28] : memref<80x192xbf16, #tpu.memory_space<vmem>>, vector<64x64xbf16>
    tpu.vector_store %arg14[%c8, %c0_28], %73 {strides = array<i32>} : memref<80x192xbf16, #tpu.memory_space<vmem>>, vector<64x64xbf16>,
    %75 = arith.truncf %54 : vector<64x64xf32> to vector<64x64xbf16>
    %c8_29 = arith.constant 8 : index
    %c64 = arith.constant 64 : index
    %76 = vector.load %arg14[%c8_29, %c64] : memref<80x192xbf16, #tpu.memory_space<vmem>>, vector<64x64xbf16>
    tpu.vector_store %arg14[%c8_29, %c64], %75 {strides = array<i32>} : memref<80x192xbf16, #tpu.memory_space<vmem>>, vector<64x64xbf16>,
    %77 = arith.truncf %72 : vector<64x64xf32> to vector<64x64xbf16>
    %c8_30 = arith.constant 8 : index
    %c128 = arith.constant 128 : index
    %78 = vector.load %arg14[%c8_30, %c128] : memref<80x192xbf16, #tpu.memory_space<vmem>>, vector<64x64xbf16>
    tpu.vector_store %arg14[%c8_30, %c128], %77 {strides = array<i32>} : memref<80x192xbf16, #tpu.memory_space<vmem>>, vector<64x64xbf16>,
    %c0_31 = arith.constant 0 : index
    %c0_32 = arith.constant 0 : index
    %79 = vector.load %arg14[%c0_31, %c0_32] : memref<80x192xbf16, #tpu.memory_space<vmem>>, vector<64x192xbf16>
    %c0_33 = arith.constant 0 : index
    %c0_34 = arith.constant 0 : index
    %c0_35 = arith.constant 0 : index
    %80 = vector.load %arg5[%c0_33, %c0_34, %c0_35] : memref<3x192x64xbf16, #tpu.memory_space<vmem>>, vector<1x192x64xbf16>
    %81 = vector.shape_cast %80 : vector<1x192x64xbf16> to vector<192x64xbf16>
    %cst_36 = arith.constant dense<0.000000e+00> : vector<64x64xf32>
    %82 = tpu.matmul %79, %81, %cst_36 {dimension_numbers = #tpu.dot_dimension_numbers<[1], [0], [0], [1], [0, 0, 1, 1], [], []>} : vector<64x192xbf16>, vector<192x64xbf16>, vector<64x64xf32> -> vector<64x64xf32>
    %c8_37 = arith.constant 8 : index
    %c0_38 = arith.constant 0 : index
    %83 = vector.load %arg14[%c8_37, %c0_38] : memref<80x192xbf16, #tpu.memory_space<vmem>>, vector<64x192xbf16>
    %c1 = arith.constant 1 : index
    %c0_39 = arith.constant 0 : index
    %c0_40 = arith.constant 0 : index
    %84 = vector.load %arg5[%c1, %c0_39, %c0_40] : memref<3x192x64xbf16, #tpu.memory_space<vmem>>, vector<1x192x64xbf16>
    %85 = vector.shape_cast %84 : vector<1x192x64xbf16> to vector<192x64xbf16>
    %cst_41 = arith.constant dense<0.000000e+00> : vector<64x64xf32>
    %86 = tpu.matmul %83, %85, %cst_41 {dimension_numbers = #tpu.dot_dimension_numbers<[1], [0], [0], [1], [0, 0, 1, 1], [], []>} : vector<64x192xbf16>, vector<192x64xbf16>, vector<64x64xf32> -> vector<64x64xf32>
    %87 = arith.addf %82, %86 : vector<64x64xf32>
    %c16 = arith.constant 16 : index
    %c0_42 = arith.constant 0 : index
    %88 = vector.load %arg14[%c16, %c0_42] : memref<80x192xbf16, #tpu.memory_space<vmem>>, vector<64x192xbf16>
    %c2 = arith.constant 2 : index
    %c0_43 = arith.constant 0 : index
    %c0_44 = arith.constant 0 : index
    %89 = vector.load %arg5[%c2, %c0_43, %c0_44] : memref<3x192x64xbf16, #tpu.memory_space<vmem>>, vector<1x192x64xbf16>
    %90 = vector.shape_cast %89 : vector<1x192x64xbf16> to vector<192x64xbf16>
    %cst_45 = arith.constant dense<0.000000e+00> : vector<64x64xf32>
    %91 = tpu.matmul %88, %90, %cst_45 {dimension_numbers = #tpu.dot_dimension_numbers<[1], [0], [0], [1], [0, 0, 1, 1], [], []>} : vector<64x192xbf16>, vector<192x64xbf16>, vector<64x64xf32> -> vector<64x64xf32>
    %92 = arith.addf %87, %91 : vector<64x64xf32>
    %c0_46 = arith.constant 0 : index
    %c0_47 = arith.constant 0 : index
    %93 = vector.load %arg6[%c0_46, %c0_47] : memref<1x64xf32, #tpu.memory_space<vmem>>, vector<1x64xf32>
    %94 = vector.broadcast %93 : vector<1x64xf32> to vector<64x64xf32>
    %95 = arith.addf %92, %94 : vector<64x64xf32>
    %c0_48 = arith.constant 0 : index
    %c0_49 = arith.constant 0 : index
    %96 = vector.load %arg7[%c0_48, %c0_49] : memref<1x64xf32, #tpu.memory_space<vmem>>, vector<1x64xf32>
    %c0_50 = arith.constant 0 : index
    %c0_51 = arith.constant 0 : index
    %97 = vector.load %arg8[%c0_50, %c0_51] : memref<1x64xf32, #tpu.memory_space<vmem>>, vector<1x64xf32>
    %cst_52 = arith.constant dense<0.000000e+00> : vector<64xf32>
    %98 = vector.multi_reduction <add>, %95, %cst_52 [0] : vector<64x64xf32> to vector<64xf32>
    %99 = vector.shape_cast %98 : vector<64xf32> to vector<1x64xf32>
    %cst_53 = arith.constant dense<0.000000e+00> : vector<1x64xf32>
    %100 = tpu.matmul %99, %21, %cst_53 {dimension_numbers = #tpu.dot_dimension_numbers<[1], [0], [0], [1], [0, 0, 1, 1], [], []>} : vector<1x64xf32>, vector<64x64xf32>, vector<1x64xf32> -> vector<1x64xf32>
    %cst_54 = arith.constant 1.280000e+02 : f32
    %101 = vector.broadcast %cst_54 : f32 to vector<1x64xf32>
    %102 = arith.divf %100, %101 : vector<1x64xf32>
    %103 = vector.broadcast %102 : vector<1x64xf32> to vector<64x64xf32>
    %104 = arith.subf %95, %103 : vector<64x64xf32>
    %105 = arith.mulf %104, %104 : vector<64x64xf32>
    %cst_55 = arith.constant dense<0.000000e+00> : vector<64xf32>
    %106 = vector.multi_reduction <add>, %105, %cst_55 [0] : vector<64x64xf32> to vector<64xf32>
    %107 = vector.shape_cast %106 : vector<64xf32> to vector<1x64xf32>
    %cst_56 = arith.constant dense<0.000000e+00> : vector<1x64xf32>
    %108 = tpu.matmul %107, %21, %cst_56 {dimension_numbers = #tpu.dot_dimension_numbers<[1], [0], [0], [1], [0, 0, 1, 1], [], []>} : vector<1x64xf32>, vector<64x64xf32>, vector<1x64xf32> -> vector<1x64xf32>
    %cst_57 = arith.constant 1.280000e+02 : f32
    %109 = vector.broadcast %cst_57 : f32 to vector<1x64xf32>
    %110 = arith.divf %108, %109 : vector<1x64xf32>
    %cst_58 = arith.constant 9.99999974E-6 : f32
    %111 = vector.broadcast %cst_58 : f32 to vector<1x64xf32>
    %112 = arith.addf %110, %111 : vector<1x64xf32>
    %113 = math.rsqrt %112 : vector<1x64xf32>
    %114 = vector.broadcast %113 : vector<1x64xf32> to vector<64x64xf32>
    %115 = arith.mulf %104, %114 : vector<64x64xf32>
    %116 = vector.broadcast %96 : vector<1x64xf32> to vector<64x64xf32>
    %117 = arith.mulf %115, %116 : vector<64x64xf32>
    %118 = vector.broadcast %97 : vector<1x64xf32> to vector<64x64xf32>
    %119 = arith.addf %117, %118 : vector<64x64xf32>
    %120 = arith.negf %119 : vector<64x64xf32>
    %121 = math.exp %120 : vector<64x64xf32>
    %cst_59 = arith.constant 1.000000e+00 : f32
    %122 = vector.broadcast %cst_59 : f32 to vector<64x64xf32>
    %123 = arith.addf %122, %121 : vector<64x64xf32>
    %124 = arith.divf %122, %123 : vector<64x64xf32>
    %125 = arith.mulf %119, %124 : vector<64x64xf32>
    %c0_i32_60 = arith.constant 0 : i32
    %126 = vector.broadcast %c0_i32_60 : i32 to vector<64x1xi32>
    %127 = arith.cmpi eq, %20, %126 : vector<64x1xi32>
    %cst_61 = arith.constant 0.000000e+00 : f32
    %128 = vector.broadcast %cst_61 : f32 to vector<1x64xf32>
    %129 = vector.extract_strided_slice %125 {offsets = [0, 0], sizes = [63, 64], strides = [1, 1]} : vector<64x64xf32> to vector<63x64xf32>
    %130 = tpu.concatenate %128, %129 in 0 : vector<1x64xf32>, vector<63x64xf32> -> vector<64x64xf32>
    %cst_62 = arith.constant 0.000000e+00 : f32
    %131 = vector.shape_cast %127 : vector<64x1xi1> to vector<64x1xi1>
    %132 = vector.broadcast %131 : vector<64x1xi1> to vector<64x64xi1>
    %133 = vector.broadcast %cst_62 : f32 to vector<64x64xf32>
    %134 = arith.select %132, %133, %130 : vector<64x64xi1>, vector<64x64xf32>
    %c7_i32_63 = arith.constant 7 : i32
    %135 = vector.broadcast %c7_i32_63 : i32 to vector<64x1xi32>
    %136 = arith.cmpi eq, %20, %135 : vector<64x1xi32>
    %cst_64 = arith.constant 0.000000e+00 : f32
    %137 = vector.broadcast %cst_64 : f32 to vector<1x64xf32>
    %138 = vector.extract_strided_slice %125 {offsets = [1, 0], sizes = [63, 64], strides = [1, 1]} : vector<64x64xf32> to vector<63x64xf32>
    %139 = tpu.concatenate %138, %137 in 0 : vector<63x64xf32>, vector<1x64xf32> -> vector<64x64xf32>
    %cst_65 = arith.constant 0.000000e+00 : f32
    %140 = vector.shape_cast %136 : vector<64x1xi1> to vector<64x1xi1>
    %141 = vector.broadcast %140 : vector<64x1xi1> to vector<64x64xi1>
    %142 = vector.broadcast %cst_65 : f32 to vector<64x64xf32>
    %143 = arith.select %141, %142, %139 : vector<64x64xi1>, vector<64x64xf32>
    %144 = arith.truncf %134 : vector<64x64xf32> to vector<64x64xbf16>
    %c8_66 = arith.constant 8 : index
    %c0_67 = arith.constant 0 : index
    %145 = vector.load %arg14[%c8_66, %c0_67] : memref<80x192xbf16, #tpu.memory_space<vmem>>, vector<64x64xbf16>
    tpu.vector_store %arg14[%c8_66, %c0_67], %144 {strides = array<i32>} : memref<80x192xbf16, #tpu.memory_space<vmem>>, vector<64x64xbf16>,
    %146 = arith.truncf %125 : vector<64x64xf32> to vector<64x64xbf16>
    %c8_68 = arith.constant 8 : index
    %c64_69 = arith.constant 64 : index
    %147 = vector.load %arg14[%c8_68, %c64_69] : memref<80x192xbf16, #tpu.memory_space<vmem>>, vector<64x64xbf16>
    tpu.vector_store %arg14[%c8_68, %c64_69], %146 {strides = array<i32>} : memref<80x192xbf16, #tpu.memory_space<vmem>>, vector<64x64xbf16>,
    %148 = arith.truncf %143 : vector<64x64xf32> to vector<64x64xbf16>
    %c8_70 = arith.constant 8 : index
    %c128_71 = arith.constant 128 : index
    %149 = vector.load %arg14[%c8_70, %c128_71] : memref<80x192xbf16, #tpu.memory_space<vmem>>, vector<64x64xbf16>
    tpu.vector_store %arg14[%c8_70, %c128_71], %148 {strides = array<i32>} : memref<80x192xbf16, #tpu.memory_space<vmem>>, vector<64x64xbf16>,
    %c0_72 = arith.constant 0 : index
    %c0_73 = arith.constant 0 : index
    %150 = vector.load %arg14[%c0_72, %c0_73] : memref<80x192xbf16, #tpu.memory_space<vmem>>, vector<64x192xbf16>
    %c0_74 = arith.constant 0 : index
    %c0_75 = arith.constant 0 : index
    %c0_76 = arith.constant 0 : index
    %151 = vector.load %arg9[%c0_74, %c0_75, %c0_76] : memref<3x192x64xbf16, #tpu.memory_space<vmem>>, vector<1x192x64xbf16>
    %152 = vector.shape_cast %151 : vector<1x192x64xbf16> to vector<192x64xbf16>
    %cst_77 = arith.constant dense<0.000000e+00> : vector<64x64xf32>
    %153 = tpu.matmul %150, %152, %cst_77 {dimension_numbers = #tpu.dot_dimension_numbers<[1], [0], [0], [1], [0, 0, 1, 1], [], []>} : vector<64x192xbf16>, vector<192x64xbf16>, vector<64x64xf32> -> vector<64x64xf32>
    %c8_78 = arith.constant 8 : index
    %c0_79 = arith.constant 0 : index
    %154 = vector.load %arg14[%c8_78, %c0_79] : memref<80x192xbf16, #tpu.memory_space<vmem>>, vector<64x192xbf16>
    %c1_80 = arith.constant 1 : index
    %c0_81 = arith.constant 0 : index
    %c0_82 = arith.constant 0 : index
    %155 = vector.load %arg9[%c1_80, %c0_81, %c0_82] : memref<3x192x64xbf16, #tpu.memory_space<vmem>>, vector<1x192x64xbf16>
    %156 = vector.shape_cast %155 : vector<1x192x64xbf16> to vector<192x64xbf16>
    %cst_83 = arith.constant dense<0.000000e+00> : vector<64x64xf32>
    %157 = tpu.matmul %154, %156, %cst_83 {dimension_numbers = #tpu.dot_dimension_numbers<[1], [0], [0], [1], [0, 0, 1, 1], [], []>} : vector<64x192xbf16>, vector<192x64xbf16>, vector<64x64xf32> -> vector<64x64xf32>
    %158 = arith.addf %153, %157 : vector<64x64xf32>
    %c16_84 = arith.constant 16 : index
    %c0_85 = arith.constant 0 : index
    %159 = vector.load %arg14[%c16_84, %c0_85] : memref<80x192xbf16, #tpu.memory_space<vmem>>, vector<64x192xbf16>
    %c2_86 = arith.constant 2 : index
    %c0_87 = arith.constant 0 : index
    %c0_88 = arith.constant 0 : index
    %160 = vector.load %arg9[%c2_86, %c0_87, %c0_88] : memref<3x192x64xbf16, #tpu.memory_space<vmem>>, vector<1x192x64xbf16>
    %161 = vector.shape_cast %160 : vector<1x192x64xbf16> to vector<192x64xbf16>
    %cst_89 = arith.constant dense<0.000000e+00> : vector<64x64xf32>
    %162 = tpu.matmul %159, %161, %cst_89 {dimension_numbers = #tpu.dot_dimension_numbers<[1], [0], [0], [1], [0, 0, 1, 1], [], []>} : vector<64x192xbf16>, vector<192x64xbf16>, vector<64x64xf32> -> vector<64x64xf32>
    %163 = arith.addf %158, %162 : vector<64x64xf32>
    %c0_90 = arith.constant 0 : index
    %c0_91 = arith.constant 0 : index
    %164 = vector.load %arg10[%c0_90, %c0_91] : memref<1x64xf32, #tpu.memory_space<vmem>>, vector<1x64xf32>
    %165 = vector.broadcast %164 : vector<1x64xf32> to vector<64x64xf32>
    %166 = arith.addf %163, %165 : vector<64x64xf32>
    %167 = arith.addf %24, %166 : vector<64x64xf32>
    %168 = arith.truncf %167 : vector<64x64xf32> to vector<64x64xbf16>
    %c0_92 = arith.constant 0 : index
    %c0_93 = arith.constant 0 : index
    %169 = vector.load %arg11[%c0_92, %c0_93] : memref<64x128xbf16, #tpu.memory_space<vmem>>, vector<64x128xbf16>
    %cst_94 = arith.constant dense<0.000000e+00> : vector<64x128xf32>
    %170 = tpu.matmul %168, %169, %cst_94 {dimension_numbers = #tpu.dot_dimension_numbers<[1], [0], [0], [1], [0, 0, 1, 1], [], []>} : vector<64x64xbf16>, vector<64x128xbf16>, vector<64x128xf32> -> vector<64x128xf32>
    %c0_95 = arith.constant 0 : index
    %c0_96 = arith.constant 0 : index
    %171 = vector.load %arg12[%c0_95, %c0_96] : memref<64x128xbf16, #tpu.memory_space<vmem>>, vector<64x128xbf16>
    %cst_97 = arith.constant dense<0.000000e+00> : vector<64x128xf32>
    %172 = tpu.matmul %23, %171, %cst_97 {dimension_numbers = #tpu.dot_dimension_numbers<[1], [0], [0], [1], [0, 0, 1, 1], [], []>} : vector<64x64xbf16>, vector<64x128xbf16>, vector<64x128xf32> -> vector<64x128xf32>
    %173 = arith.addf %170, %172 : vector<64x128xf32>
    %174 = arith.truncf %173 : vector<64x128xf32> to vector<64x128xbf16>
    %c0_98 = arith.constant 0 : index
    %c0_99 = arith.constant 0 : index
    %c0_100 = arith.constant 0 : index
    %175 = vector.load %arg13[%c0_98, %c0_99, %c0_100] : memref<1x64x128xbf16, #tpu.memory_space<vmem>>, vector<1x64x128xbf16>
    %176 = vector.shape_cast %175 : vector<1x64x128xbf16> to vector<64x128xbf16>
    %177 = vector.shape_cast %174 : vector<64x128xbf16> to vector<1x64x128xbf16>
    tpu.vector_store %arg13[%c0_98, %c0_99, %c0_100], %177 {strides = array<i32>} : memref<1x64x128xbf16, #tpu.memory_space<vmem>>, vector<1x64x128xbf16>,
    return
  }
  func.func @transform_0(%arg0: i32) -> (i32, i32, i32) {
    %c0_i32 = arith.constant 0 : i32
    %c0_i32_0 = arith.constant 0 : i32
    %c0_i32_1 = arith.constant 0 : i32
    return %arg0, %c0_i32, %c0_i32_0 : i32, i32, i32
  }
  func.func @transform_1(%arg0: i32) -> (i32, i32) {
    %c0_i32 = arith.constant 0 : i32
    %c0_i32_0 = arith.constant 0 : i32
    %c0_i32_1 = arith.constant 0 : i32
    return %c0_i32, %c0_i32_0 : i32, i32
  }
  func.func @transform_2(%arg0: i32) -> (i32, i32) {
    %c0_i32 = arith.constant 0 : i32
    %c0_i32_0 = arith.constant 0 : i32
    %c0_i32_1 = arith.constant 0 : i32
    return %c0_i32, %c0_i32_0 : i32, i32
  }
  func.func @transform_3(%arg0: i32) -> (i32, i32) {
    %c0_i32 = arith.constant 0 : i32
    %c0_i32_0 = arith.constant 0 : i32
    %c0_i32_1 = arith.constant 0 : i32
    return %c0_i32, %c0_i32_0 : i32, i32
  }
  func.func @transform_4(%arg0: i32) -> (i32, i32, i32) {
    %c0_i32 = arith.constant 0 : i32
    %c0_i32_0 = arith.constant 0 : i32
    %c0_i32_1 = arith.constant 0 : i32
    %c0_i32_2 = arith.constant 0 : i32
    return %c0_i32, %c0_i32_0, %c0_i32_1 : i32, i32, i32
  }
  func.func @transform_5(%arg0: i32) -> (i32, i32) {
    %c0_i32 = arith.constant 0 : i32
    %c0_i32_0 = arith.constant 0 : i32
    %c0_i32_1 = arith.constant 0 : i32
    return %c0_i32, %c0_i32_0 : i32, i32
  }
  func.func @transform_6(%arg0: i32) -> (i32, i32) {
    %c0_i32 = arith.constant 0 : i32
    %c0_i32_0 = arith.constant 0 : i32
    %c0_i32_1 = arith.constant 0 : i32
    return %c0_i32, %c0_i32_0 : i32, i32
  }
  func.func @transform_7(%arg0: i32) -> (i32, i32) {
    %c0_i32 = arith.constant 0 : i32
    %c0_i32_0 = arith.constant 0 : i32
    %c0_i32_1 = arith.constant 0 : i32
    return %c0_i32, %c0_i32_0 : i32, i32
  }
  func.func @transform_8(%arg0: i32) -> (i32, i32, i32) {
    %c0_i32 = arith.constant 0 : i32
    %c0_i32_0 = arith.constant 0 : i32
    %c0_i32_1 = arith.constant 0 : i32
    %c0_i32_2 = arith.constant 0 : i32
    return %c0_i32, %c0_i32_0, %c0_i32_1 : i32, i32, i32
  }
  func.func @transform_9(%arg0: i32) -> (i32, i32) {
    %c0_i32 = arith.constant 0 : i32
    %c0_i32_0 = arith.constant 0 : i32
    %c0_i32_1 = arith.constant 0 : i32
    return %c0_i32, %c0_i32_0 : i32, i32
  }
  func.func @transform_10(%arg0: i32) -> (i32, i32) {
    %c0_i32 = arith.constant 0 : i32
    %c0_i32_0 = arith.constant 0 : i32
    %c0_i32_1 = arith.constant 0 : i32
    return %c0_i32, %c0_i32_0 : i32, i32
  }
  func.func @transform_11(%arg0: i32) -> (i32, i32) {
    %c0_i32 = arith.constant 0 : i32
    %c0_i32_0 = arith.constant 0 : i32
    %c0_i32_1 = arith.constant 0 : i32
    return %c0_i32, %c0_i32_0 : i32, i32
  }
  func.func @transform_12(%arg0: i32) -> (i32, i32, i32) {
    %c0_i32 = arith.constant 0 : i32
    %c0_i32_0 = arith.constant 0 : i32
    %c0_i32_1 = arith.constant 0 : i32
    return %arg0, %c0_i32, %c0_i32_0 : i32, i32, i32
  }
}

module attributes {stable_mosaic.version = 11 : i64} {
  func.func @kernel(%arg0: i32, %arg1: memref<1x64x4xbf16, #tpu.memory_space<vmem>>, %arg2: memref<4x64xbf16, #tpu.memory_space<vmem>>, %arg3: memref<64x64xf32, #tpu.memory_space<vmem>>, %arg4: memref<1x64xf32, #tpu.memory_space<vmem>>, %arg5: memref<1x64xf32, #tpu.memory_space<vmem>>, %arg6: memref<3x192x64xbf16, #tpu.memory_space<vmem>>, %arg7: memref<1x64xf32, #tpu.memory_space<vmem>>, %arg8: memref<1x64xf32, #tpu.memory_space<vmem>>, %arg9: memref<1x64xf32, #tpu.memory_space<vmem>>, %arg10: memref<3x192x64xbf16, #tpu.memory_space<vmem>>, %arg11: memref<1x64xf32, #tpu.memory_space<vmem>>, %arg12: memref<1x64x64xbf16, #tpu.memory_space<vmem>>, %arg13: memref<80x192xbf16, #tpu.memory_space<vmem>>) attributes {dimension_semantics = [#tpu.dimension_semantics<parallel>], iteration_bounds = array<i64: 2>, scalar_prefetch = 0 : i64, scratch_operands = 1 : i64, tpu.core_type = #tpu.core_type<tc>, window_params = [{transform_indices = @transform_0, window_bounds = array<i64: 1, 64, 4>}, {pipeline_mode = #tpu.pipeline_mode<synchronous>, transform_indices = @transform_1, window_bounds = array<i64: 4, 64>}, {pipeline_mode = #tpu.pipeline_mode<synchronous>, transform_indices = @transform_2, window_bounds = array<i64: 64, 64>}, {pipeline_mode = #tpu.pipeline_mode<synchronous>, transform_indices = @transform_3, window_bounds = array<i64: 1, 64>}, {pipeline_mode = #tpu.pipeline_mode<synchronous>, transform_indices = @transform_4, window_bounds = array<i64: 1, 64>}, {pipeline_mode = #tpu.pipeline_mode<synchronous>, transform_indices = @transform_5, window_bounds = array<i64: 3, 192, 64>}, {pipeline_mode = #tpu.pipeline_mode<synchronous>, transform_indices = @transform_6, window_bounds = array<i64: 1, 64>}, {pipeline_mode = #tpu.pipeline_mode<synchronous>, transform_indices = @transform_7, window_bounds = array<i64: 1, 64>}, {pipeline_mode = #tpu.pipeline_mode<synchronous>, transform_indices = @transform_8, window_bounds = array<i64: 1, 64>}, {pipeline_mode = #tpu.pipeline_mode<synchronous>, transform_indices = @transform_9, window_bounds = array<i64: 3, 192, 64>}, {pipeline_mode = #tpu.pipeline_mode<synchronous>, transform_indices = @transform_10, window_bounds = array<i64: 1, 64>}, {transform_indices = @transform_11, window_bounds = array<i64: 1, 64, 64>}]} {
    %cst = arith.constant 0.000000e+00 : bf16
    %0 = vector.broadcast %cst : bf16 to vector<8x192xbf16>
    %c0 = arith.constant 0 : index
    %c0_0 = arith.constant 0 : index
    %1 = vector.load %arg13[%c0, %c0_0] : memref<80x192xbf16, #tpu.memory_space<vmem>>, vector<8x192xbf16>
    tpu.vector_store %arg13[%c0, %c0_0], %0 {strides = array<i32>} : memref<80x192xbf16, #tpu.memory_space<vmem>>, vector<8x192xbf16>,
    %cst_1 = arith.constant 0.000000e+00 : bf16
    %2 = vector.broadcast %cst_1 : bf16 to vector<8x192xbf16>
    %c72 = arith.constant 72 : index
    %c0_2 = arith.constant 0 : index
    %3 = vector.load %arg13[%c72, %c0_2] : memref<80x192xbf16, #tpu.memory_space<vmem>>, vector<8x192xbf16>
    tpu.vector_store %arg13[%c72, %c0_2], %2 {strides = array<i32>} : memref<80x192xbf16, #tpu.memory_space<vmem>>, vector<8x192xbf16>,
    %4 = tpu.iota {dimensions = array<i32: 0>} : vector<64x1xi32>
    %c8_i32 = arith.constant 8 : i32
    %c0_i32 = arith.constant 0 : i32
    %5 = arith.cmpi eq, %c8_i32, %c0_i32 : i32
    %c1_i32 = arith.constant 1 : i32
    %6 = arith.select %5, %c1_i32, %c8_i32 : i32
    %7 = vector.broadcast %6 : i32 to vector<64x1xi32>
    %8 = arith.remsi %4, %7 : vector<64x1xi32>
    %c0_i32_3 = arith.constant 0 : i32
    %9 = vector.broadcast %c0_i32_3 : i32 to vector<64x1xi32>
    %10 = arith.cmpi ne, %8, %9 : vector<64x1xi32>
    %c0_i32_4 = arith.constant 0 : i32
    %11 = vector.broadcast %c0_i32_4 : i32 to vector<64x1xi32>
    %12 = arith.cmpi slt, %8, %11 : vector<64x1xi32>
    %c0_i32_5 = arith.constant 0 : i32
    %13 = arith.cmpi slt, %6, %c0_i32_5 : i32
    %14 = vector.broadcast %13 : i1 to vector<64x1xi1>
    %15 = vector.broadcast %14 : vector<64x1xi1> to vector<64x1xi1>
    %16 = arith.xori %12, %15 : vector<64x1xi1>
    %17 = arith.andi %16, %10 : vector<64x1xi1>
    %18 = vector.broadcast %6 : i32 to vector<64x1xi32>
    %19 = arith.addi %8, %18 : vector<64x1xi32>
    %20 = arith.select %17, %19, %8 : vector<64x1xi1>, vector<64x1xi32>
    %c0_6 = arith.constant 0 : index
    %c0_7 = arith.constant 0 : index
    %21 = vector.load %arg3[%c0_6, %c0_7] : memref<64x64xf32, #tpu.memory_space<vmem>>, vector<64x64xf32>
    %c0_8 = arith.constant 0 : index
    %c0_9 = arith.constant 0 : index
    %c0_10 = arith.constant 0 : index
    %22 = vector.load %arg1[%c0_8, %c0_9, %c0_10] : memref<1x64x4xbf16, #tpu.memory_space<vmem>>, vector<1x64x4xbf16>
    %23 = vector.shape_cast %22 : vector<1x64x4xbf16> to vector<64x4xbf16>
    %c0_11 = arith.constant 0 : index
    %c0_12 = arith.constant 0 : index
    %24 = vector.load %arg2[%c0_11, %c0_12] : memref<4x64xbf16, #tpu.memory_space<vmem>>, vector<4x64xbf16>
    %cst_13 = arith.constant dense<0.000000e+00> : vector<64x64xf32>
    %25 = tpu.matmul %23, %24, %cst_13 {dimension_numbers = #tpu.dot_dimension_numbers<[1], [0], [0], [1], [0, 0, 1, 1], [], []>} : vector<64x4xbf16>, vector<4x64xbf16>, vector<64x64xf32> -> vector<64x64xf32>
    %c0_14 = arith.constant 0 : index
    %c0_15 = arith.constant 0 : index
    %26 = vector.load %arg4[%c0_14, %c0_15] : memref<1x64xf32, #tpu.memory_space<vmem>>, vector<1x64xf32>
    %c0_16 = arith.constant 0 : index
    %c0_17 = arith.constant 0 : index
    %27 = vector.load %arg5[%c0_16, %c0_17] : memref<1x64xf32, #tpu.memory_space<vmem>>, vector<1x64xf32>
    %cst_18 = arith.constant dense<0.000000e+00> : vector<64xf32>
    %28 = vector.multi_reduction <add>, %25, %cst_18 [0] : vector<64x64xf32> to vector<64xf32>
    %29 = vector.shape_cast %28 : vector<64xf32> to vector<1x64xf32>
    %cst_19 = arith.constant dense<0.000000e+00> : vector<1x64xf32>
    %30 = tpu.matmul %29, %21, %cst_19 {dimension_numbers = #tpu.dot_dimension_numbers<[1], [0], [0], [1], [0, 0, 1, 1], [], []>} : vector<1x64xf32>, vector<64x64xf32>, vector<1x64xf32> -> vector<1x64xf32>
    %cst_20 = arith.constant 1.280000e+02 : f32
    %31 = vector.broadcast %cst_20 : f32 to vector<1x64xf32>
    %32 = arith.divf %30, %31 : vector<1x64xf32>
    %33 = vector.broadcast %32 : vector<1x64xf32> to vector<64x64xf32>
    %34 = arith.subf %25, %33 : vector<64x64xf32>
    %35 = arith.mulf %34, %34 : vector<64x64xf32>
    %cst_21 = arith.constant dense<0.000000e+00> : vector<64xf32>
    %36 = vector.multi_reduction <add>, %35, %cst_21 [0] : vector<64x64xf32> to vector<64xf32>
    %37 = vector.shape_cast %36 : vector<64xf32> to vector<1x64xf32>
    %cst_22 = arith.constant dense<0.000000e+00> : vector<1x64xf32>
    %38 = tpu.matmul %37, %21, %cst_22 {dimension_numbers = #tpu.dot_dimension_numbers<[1], [0], [0], [1], [0, 0, 1, 1], [], []>} : vector<1x64xf32>, vector<64x64xf32>, vector<1x64xf32> -> vector<1x64xf32>
    %cst_23 = arith.constant 1.280000e+02 : f32
    %39 = vector.broadcast %cst_23 : f32 to vector<1x64xf32>
    %40 = arith.divf %38, %39 : vector<1x64xf32>
    %cst_24 = arith.constant 9.99999974E-6 : f32
    %41 = vector.broadcast %cst_24 : f32 to vector<1x64xf32>
    %42 = arith.addf %40, %41 : vector<1x64xf32>
    %43 = math.rsqrt %42 : vector<1x64xf32>
    %44 = vector.broadcast %43 : vector<1x64xf32> to vector<64x64xf32>
    %45 = arith.mulf %34, %44 : vector<64x64xf32>
    %46 = vector.broadcast %26 : vector<1x64xf32> to vector<64x64xf32>
    %47 = arith.mulf %45, %46 : vector<64x64xf32>
    %48 = vector.broadcast %27 : vector<1x64xf32> to vector<64x64xf32>
    %49 = arith.addf %47, %48 : vector<64x64xf32>
    %50 = arith.negf %49 : vector<64x64xf32>
    %51 = math.exp %50 : vector<64x64xf32>
    %cst_25 = arith.constant 1.000000e+00 : f32
    %52 = vector.broadcast %cst_25 : f32 to vector<64x64xf32>
    %53 = arith.addf %52, %51 : vector<64x64xf32>
    %54 = arith.divf %52, %53 : vector<64x64xf32>
    %55 = arith.mulf %49, %54 : vector<64x64xf32>
    %c0_i32_26 = arith.constant 0 : i32
    %56 = vector.broadcast %c0_i32_26 : i32 to vector<64x1xi32>
    %57 = arith.cmpi eq, %20, %56 : vector<64x1xi32>
    %cst_27 = arith.constant 0.000000e+00 : f32
    %58 = vector.broadcast %cst_27 : f32 to vector<1x64xf32>
    %59 = vector.extract_strided_slice %55 {offsets = [0, 0], sizes = [63, 64], strides = [1, 1]} : vector<64x64xf32> to vector<63x64xf32>
    %60 = tpu.concatenate %58, %59 in 0 : vector<1x64xf32>, vector<63x64xf32> -> vector<64x64xf32>
    %cst_28 = arith.constant 0.000000e+00 : f32
    %61 = vector.shape_cast %57 : vector<64x1xi1> to vector<64x1xi1>
    %62 = vector.broadcast %61 : vector<64x1xi1> to vector<64x64xi1>
    %63 = vector.broadcast %cst_28 : f32 to vector<64x64xf32>
    %64 = arith.select %62, %63, %60 : vector<64x64xi1>, vector<64x64xf32>
    %c7_i32 = arith.constant 7 : i32
    %65 = vector.broadcast %c7_i32 : i32 to vector<64x1xi32>
    %66 = arith.cmpi eq, %20, %65 : vector<64x1xi32>
    %cst_29 = arith.constant 0.000000e+00 : f32
    %67 = vector.broadcast %cst_29 : f32 to vector<1x64xf32>
    %68 = vector.extract_strided_slice %55 {offsets = [1, 0], sizes = [63, 64], strides = [1, 1]} : vector<64x64xf32> to vector<63x64xf32>
    %69 = tpu.concatenate %68, %67 in 0 : vector<63x64xf32>, vector<1x64xf32> -> vector<64x64xf32>
    %cst_30 = arith.constant 0.000000e+00 : f32
    %70 = vector.shape_cast %66 : vector<64x1xi1> to vector<64x1xi1>
    %71 = vector.broadcast %70 : vector<64x1xi1> to vector<64x64xi1>
    %72 = vector.broadcast %cst_30 : f32 to vector<64x64xf32>
    %73 = arith.select %71, %72, %69 : vector<64x64xi1>, vector<64x64xf32>
    %74 = arith.truncf %64 : vector<64x64xf32> to vector<64x64xbf16>
    %c8 = arith.constant 8 : index
    %c0_31 = arith.constant 0 : index
    %75 = vector.load %arg13[%c8, %c0_31] : memref<80x192xbf16, #tpu.memory_space<vmem>>, vector<64x64xbf16>
    tpu.vector_store %arg13[%c8, %c0_31], %74 {strides = array<i32>} : memref<80x192xbf16, #tpu.memory_space<vmem>>, vector<64x64xbf16>,
    %76 = arith.truncf %55 : vector<64x64xf32> to vector<64x64xbf16>
    %c8_32 = arith.constant 8 : index
    %c64 = arith.constant 64 : index
    %77 = vector.load %arg13[%c8_32, %c64] : memref<80x192xbf16, #tpu.memory_space<vmem>>, vector<64x64xbf16>
    tpu.vector_store %arg13[%c8_32, %c64], %76 {strides = array<i32>} : memref<80x192xbf16, #tpu.memory_space<vmem>>, vector<64x64xbf16>,
    %78 = arith.truncf %73 : vector<64x64xf32> to vector<64x64xbf16>
    %c8_33 = arith.constant 8 : index
    %c128 = arith.constant 128 : index
    %79 = vector.load %arg13[%c8_33, %c128] : memref<80x192xbf16, #tpu.memory_space<vmem>>, vector<64x64xbf16>
    tpu.vector_store %arg13[%c8_33, %c128], %78 {strides = array<i32>} : memref<80x192xbf16, #tpu.memory_space<vmem>>, vector<64x64xbf16>,
    %c0_34 = arith.constant 0 : index
    %c0_35 = arith.constant 0 : index
    %80 = vector.load %arg13[%c0_34, %c0_35] : memref<80x192xbf16, #tpu.memory_space<vmem>>, vector<64x192xbf16>
    %c0_36 = arith.constant 0 : index
    %c0_37 = arith.constant 0 : index
    %c0_38 = arith.constant 0 : index
    %81 = vector.load %arg6[%c0_36, %c0_37, %c0_38] : memref<3x192x64xbf16, #tpu.memory_space<vmem>>, vector<1x192x64xbf16>
    %82 = vector.shape_cast %81 : vector<1x192x64xbf16> to vector<192x64xbf16>
    %cst_39 = arith.constant dense<0.000000e+00> : vector<64x64xf32>
    %83 = tpu.matmul %80, %82, %cst_39 {dimension_numbers = #tpu.dot_dimension_numbers<[1], [0], [0], [1], [0, 0, 1, 1], [], []>} : vector<64x192xbf16>, vector<192x64xbf16>, vector<64x64xf32> -> vector<64x64xf32>
    %c8_40 = arith.constant 8 : index
    %c0_41 = arith.constant 0 : index
    %84 = vector.load %arg13[%c8_40, %c0_41] : memref<80x192xbf16, #tpu.memory_space<vmem>>, vector<64x192xbf16>
    %c1 = arith.constant 1 : index
    %c0_42 = arith.constant 0 : index
    %c0_43 = arith.constant 0 : index
    %85 = vector.load %arg6[%c1, %c0_42, %c0_43] : memref<3x192x64xbf16, #tpu.memory_space<vmem>>, vector<1x192x64xbf16>
    %86 = vector.shape_cast %85 : vector<1x192x64xbf16> to vector<192x64xbf16>
    %cst_44 = arith.constant dense<0.000000e+00> : vector<64x64xf32>
    %87 = tpu.matmul %84, %86, %cst_44 {dimension_numbers = #tpu.dot_dimension_numbers<[1], [0], [0], [1], [0, 0, 1, 1], [], []>} : vector<64x192xbf16>, vector<192x64xbf16>, vector<64x64xf32> -> vector<64x64xf32>
    %88 = arith.addf %83, %87 : vector<64x64xf32>
    %c16 = arith.constant 16 : index
    %c0_45 = arith.constant 0 : index
    %89 = vector.load %arg13[%c16, %c0_45] : memref<80x192xbf16, #tpu.memory_space<vmem>>, vector<64x192xbf16>
    %c2 = arith.constant 2 : index
    %c0_46 = arith.constant 0 : index
    %c0_47 = arith.constant 0 : index
    %90 = vector.load %arg6[%c2, %c0_46, %c0_47] : memref<3x192x64xbf16, #tpu.memory_space<vmem>>, vector<1x192x64xbf16>
    %91 = vector.shape_cast %90 : vector<1x192x64xbf16> to vector<192x64xbf16>
    %cst_48 = arith.constant dense<0.000000e+00> : vector<64x64xf32>
    %92 = tpu.matmul %89, %91, %cst_48 {dimension_numbers = #tpu.dot_dimension_numbers<[1], [0], [0], [1], [0, 0, 1, 1], [], []>} : vector<64x192xbf16>, vector<192x64xbf16>, vector<64x64xf32> -> vector<64x64xf32>
    %93 = arith.addf %88, %92 : vector<64x64xf32>
    %c0_49 = arith.constant 0 : index
    %c0_50 = arith.constant 0 : index
    %94 = vector.load %arg7[%c0_49, %c0_50] : memref<1x64xf32, #tpu.memory_space<vmem>>, vector<1x64xf32>
    %95 = vector.broadcast %94 : vector<1x64xf32> to vector<64x64xf32>
    %96 = arith.addf %93, %95 : vector<64x64xf32>
    %c0_51 = arith.constant 0 : index
    %c0_52 = arith.constant 0 : index
    %97 = vector.load %arg8[%c0_51, %c0_52] : memref<1x64xf32, #tpu.memory_space<vmem>>, vector<1x64xf32>
    %c0_53 = arith.constant 0 : index
    %c0_54 = arith.constant 0 : index
    %98 = vector.load %arg9[%c0_53, %c0_54] : memref<1x64xf32, #tpu.memory_space<vmem>>, vector<1x64xf32>
    %cst_55 = arith.constant dense<0.000000e+00> : vector<64xf32>
    %99 = vector.multi_reduction <add>, %96, %cst_55 [0] : vector<64x64xf32> to vector<64xf32>
    %100 = vector.shape_cast %99 : vector<64xf32> to vector<1x64xf32>
    %cst_56 = arith.constant dense<0.000000e+00> : vector<1x64xf32>
    %101 = tpu.matmul %100, %21, %cst_56 {dimension_numbers = #tpu.dot_dimension_numbers<[1], [0], [0], [1], [0, 0, 1, 1], [], []>} : vector<1x64xf32>, vector<64x64xf32>, vector<1x64xf32> -> vector<1x64xf32>
    %cst_57 = arith.constant 1.280000e+02 : f32
    %102 = vector.broadcast %cst_57 : f32 to vector<1x64xf32>
    %103 = arith.divf %101, %102 : vector<1x64xf32>
    %104 = vector.broadcast %103 : vector<1x64xf32> to vector<64x64xf32>
    %105 = arith.subf %96, %104 : vector<64x64xf32>
    %106 = arith.mulf %105, %105 : vector<64x64xf32>
    %cst_58 = arith.constant dense<0.000000e+00> : vector<64xf32>
    %107 = vector.multi_reduction <add>, %106, %cst_58 [0] : vector<64x64xf32> to vector<64xf32>
    %108 = vector.shape_cast %107 : vector<64xf32> to vector<1x64xf32>
    %cst_59 = arith.constant dense<0.000000e+00> : vector<1x64xf32>
    %109 = tpu.matmul %108, %21, %cst_59 {dimension_numbers = #tpu.dot_dimension_numbers<[1], [0], [0], [1], [0, 0, 1, 1], [], []>} : vector<1x64xf32>, vector<64x64xf32>, vector<1x64xf32> -> vector<1x64xf32>
    %cst_60 = arith.constant 1.280000e+02 : f32
    %110 = vector.broadcast %cst_60 : f32 to vector<1x64xf32>
    %111 = arith.divf %109, %110 : vector<1x64xf32>
    %cst_61 = arith.constant 9.99999974E-6 : f32
    %112 = vector.broadcast %cst_61 : f32 to vector<1x64xf32>
    %113 = arith.addf %111, %112 : vector<1x64xf32>
    %114 = math.rsqrt %113 : vector<1x64xf32>
    %115 = vector.broadcast %114 : vector<1x64xf32> to vector<64x64xf32>
    %116 = arith.mulf %105, %115 : vector<64x64xf32>
    %117 = vector.broadcast %97 : vector<1x64xf32> to vector<64x64xf32>
    %118 = arith.mulf %116, %117 : vector<64x64xf32>
    %119 = vector.broadcast %98 : vector<1x64xf32> to vector<64x64xf32>
    %120 = arith.addf %118, %119 : vector<64x64xf32>
    %121 = arith.negf %120 : vector<64x64xf32>
    %122 = math.exp %121 : vector<64x64xf32>
    %cst_62 = arith.constant 1.000000e+00 : f32
    %123 = vector.broadcast %cst_62 : f32 to vector<64x64xf32>
    %124 = arith.addf %123, %122 : vector<64x64xf32>
    %125 = arith.divf %123, %124 : vector<64x64xf32>
    %126 = arith.mulf %120, %125 : vector<64x64xf32>
    %c0_i32_63 = arith.constant 0 : i32
    %127 = vector.broadcast %c0_i32_63 : i32 to vector<64x1xi32>
    %128 = arith.cmpi eq, %20, %127 : vector<64x1xi32>
    %cst_64 = arith.constant 0.000000e+00 : f32
    %129 = vector.broadcast %cst_64 : f32 to vector<1x64xf32>
    %130 = vector.extract_strided_slice %126 {offsets = [0, 0], sizes = [63, 64], strides = [1, 1]} : vector<64x64xf32> to vector<63x64xf32>
    %131 = tpu.concatenate %129, %130 in 0 : vector<1x64xf32>, vector<63x64xf32> -> vector<64x64xf32>
    %cst_65 = arith.constant 0.000000e+00 : f32
    %132 = vector.shape_cast %128 : vector<64x1xi1> to vector<64x1xi1>
    %133 = vector.broadcast %132 : vector<64x1xi1> to vector<64x64xi1>
    %134 = vector.broadcast %cst_65 : f32 to vector<64x64xf32>
    %135 = arith.select %133, %134, %131 : vector<64x64xi1>, vector<64x64xf32>
    %c7_i32_66 = arith.constant 7 : i32
    %136 = vector.broadcast %c7_i32_66 : i32 to vector<64x1xi32>
    %137 = arith.cmpi eq, %20, %136 : vector<64x1xi32>
    %cst_67 = arith.constant 0.000000e+00 : f32
    %138 = vector.broadcast %cst_67 : f32 to vector<1x64xf32>
    %139 = vector.extract_strided_slice %126 {offsets = [1, 0], sizes = [63, 64], strides = [1, 1]} : vector<64x64xf32> to vector<63x64xf32>
    %140 = tpu.concatenate %139, %138 in 0 : vector<63x64xf32>, vector<1x64xf32> -> vector<64x64xf32>
    %cst_68 = arith.constant 0.000000e+00 : f32
    %141 = vector.shape_cast %137 : vector<64x1xi1> to vector<64x1xi1>
    %142 = vector.broadcast %141 : vector<64x1xi1> to vector<64x64xi1>
    %143 = vector.broadcast %cst_68 : f32 to vector<64x64xf32>
    %144 = arith.select %142, %143, %140 : vector<64x64xi1>, vector<64x64xf32>
    %145 = arith.truncf %135 : vector<64x64xf32> to vector<64x64xbf16>
    %c8_69 = arith.constant 8 : index
    %c0_70 = arith.constant 0 : index
    %146 = vector.load %arg13[%c8_69, %c0_70] : memref<80x192xbf16, #tpu.memory_space<vmem>>, vector<64x64xbf16>
    tpu.vector_store %arg13[%c8_69, %c0_70], %145 {strides = array<i32>} : memref<80x192xbf16, #tpu.memory_space<vmem>>, vector<64x64xbf16>,
    %147 = arith.truncf %126 : vector<64x64xf32> to vector<64x64xbf16>
    %c8_71 = arith.constant 8 : index
    %c64_72 = arith.constant 64 : index
    %148 = vector.load %arg13[%c8_71, %c64_72] : memref<80x192xbf16, #tpu.memory_space<vmem>>, vector<64x64xbf16>
    tpu.vector_store %arg13[%c8_71, %c64_72], %147 {strides = array<i32>} : memref<80x192xbf16, #tpu.memory_space<vmem>>, vector<64x64xbf16>,
    %149 = arith.truncf %144 : vector<64x64xf32> to vector<64x64xbf16>
    %c8_73 = arith.constant 8 : index
    %c128_74 = arith.constant 128 : index
    %150 = vector.load %arg13[%c8_73, %c128_74] : memref<80x192xbf16, #tpu.memory_space<vmem>>, vector<64x64xbf16>
    tpu.vector_store %arg13[%c8_73, %c128_74], %149 {strides = array<i32>} : memref<80x192xbf16, #tpu.memory_space<vmem>>, vector<64x64xbf16>,
    %c0_75 = arith.constant 0 : index
    %c0_76 = arith.constant 0 : index
    %151 = vector.load %arg13[%c0_75, %c0_76] : memref<80x192xbf16, #tpu.memory_space<vmem>>, vector<64x192xbf16>
    %c0_77 = arith.constant 0 : index
    %c0_78 = arith.constant 0 : index
    %c0_79 = arith.constant 0 : index
    %152 = vector.load %arg10[%c0_77, %c0_78, %c0_79] : memref<3x192x64xbf16, #tpu.memory_space<vmem>>, vector<1x192x64xbf16>
    %153 = vector.shape_cast %152 : vector<1x192x64xbf16> to vector<192x64xbf16>
    %cst_80 = arith.constant dense<0.000000e+00> : vector<64x64xf32>
    %154 = tpu.matmul %151, %153, %cst_80 {dimension_numbers = #tpu.dot_dimension_numbers<[1], [0], [0], [1], [0, 0, 1, 1], [], []>} : vector<64x192xbf16>, vector<192x64xbf16>, vector<64x64xf32> -> vector<64x64xf32>
    %c8_81 = arith.constant 8 : index
    %c0_82 = arith.constant 0 : index
    %155 = vector.load %arg13[%c8_81, %c0_82] : memref<80x192xbf16, #tpu.memory_space<vmem>>, vector<64x192xbf16>
    %c1_83 = arith.constant 1 : index
    %c0_84 = arith.constant 0 : index
    %c0_85 = arith.constant 0 : index
    %156 = vector.load %arg10[%c1_83, %c0_84, %c0_85] : memref<3x192x64xbf16, #tpu.memory_space<vmem>>, vector<1x192x64xbf16>
    %157 = vector.shape_cast %156 : vector<1x192x64xbf16> to vector<192x64xbf16>
    %cst_86 = arith.constant dense<0.000000e+00> : vector<64x64xf32>
    %158 = tpu.matmul %155, %157, %cst_86 {dimension_numbers = #tpu.dot_dimension_numbers<[1], [0], [0], [1], [0, 0, 1, 1], [], []>} : vector<64x192xbf16>, vector<192x64xbf16>, vector<64x64xf32> -> vector<64x64xf32>
    %159 = arith.addf %154, %158 : vector<64x64xf32>
    %c16_87 = arith.constant 16 : index
    %c0_88 = arith.constant 0 : index
    %160 = vector.load %arg13[%c16_87, %c0_88] : memref<80x192xbf16, #tpu.memory_space<vmem>>, vector<64x192xbf16>
    %c2_89 = arith.constant 2 : index
    %c0_90 = arith.constant 0 : index
    %c0_91 = arith.constant 0 : index
    %161 = vector.load %arg10[%c2_89, %c0_90, %c0_91] : memref<3x192x64xbf16, #tpu.memory_space<vmem>>, vector<1x192x64xbf16>
    %162 = vector.shape_cast %161 : vector<1x192x64xbf16> to vector<192x64xbf16>
    %cst_92 = arith.constant dense<0.000000e+00> : vector<64x64xf32>
    %163 = tpu.matmul %160, %162, %cst_92 {dimension_numbers = #tpu.dot_dimension_numbers<[1], [0], [0], [1], [0, 0, 1, 1], [], []>} : vector<64x192xbf16>, vector<192x64xbf16>, vector<64x64xf32> -> vector<64x64xf32>
    %164 = arith.addf %159, %163 : vector<64x64xf32>
    %c0_93 = arith.constant 0 : index
    %c0_94 = arith.constant 0 : index
    %165 = vector.load %arg11[%c0_93, %c0_94] : memref<1x64xf32, #tpu.memory_space<vmem>>, vector<1x64xf32>
    %166 = vector.broadcast %165 : vector<1x64xf32> to vector<64x64xf32>
    %167 = arith.addf %164, %166 : vector<64x64xf32>
    %168 = arith.addf %25, %167 : vector<64x64xf32>
    %169 = arith.addf %168, %25 : vector<64x64xf32>
    %170 = arith.truncf %169 : vector<64x64xf32> to vector<64x64xbf16>
    %c0_95 = arith.constant 0 : index
    %c0_96 = arith.constant 0 : index
    %c0_97 = arith.constant 0 : index
    %171 = vector.load %arg12[%c0_95, %c0_96, %c0_97] : memref<1x64x64xbf16, #tpu.memory_space<vmem>>, vector<1x64x64xbf16>
    %172 = vector.shape_cast %171 : vector<1x64x64xbf16> to vector<64x64xbf16>
    %173 = vector.shape_cast %170 : vector<64x64xbf16> to vector<1x64x64xbf16>
    tpu.vector_store %arg12[%c0_95, %c0_96, %c0_97], %173 {strides = array<i32>} : memref<1x64x64xbf16, #tpu.memory_space<vmem>>, vector<1x64x64xbf16>,
    return
  }
  func.func @transform_0(%arg0: i32) -> (i32, i32, i32) {
    %c0_i32 = arith.constant 0 : i32
    %c0_i32_0 = arith.constant 0 : i32
    %c0_i32_1 = arith.constant 0 : i32
    return %arg0, %c0_i32, %c0_i32_0 : i32, i32, i32
  }
  func.func @transform_1(%arg0: i32) -> (i32, i32) {
    %c0_i32 = arith.constant 0 : i32
    %c0_i32_0 = arith.constant 0 : i32
    %c0_i32_1 = arith.constant 0 : i32
    return %c0_i32, %c0_i32_0 : i32, i32
  }
  func.func @transform_2(%arg0: i32) -> (i32, i32) {
    %c0_i32 = arith.constant 0 : i32
    %c0_i32_0 = arith.constant 0 : i32
    %c0_i32_1 = arith.constant 0 : i32
    return %c0_i32, %c0_i32_0 : i32, i32
  }
  func.func @transform_3(%arg0: i32) -> (i32, i32) {
    %c0_i32 = arith.constant 0 : i32
    %c0_i32_0 = arith.constant 0 : i32
    %c0_i32_1 = arith.constant 0 : i32
    return %c0_i32, %c0_i32_0 : i32, i32
  }
  func.func @transform_4(%arg0: i32) -> (i32, i32) {
    %c0_i32 = arith.constant 0 : i32
    %c0_i32_0 = arith.constant 0 : i32
    %c0_i32_1 = arith.constant 0 : i32
    return %c0_i32, %c0_i32_0 : i32, i32
  }
  func.func @transform_5(%arg0: i32) -> (i32, i32, i32) {
    %c0_i32 = arith.constant 0 : i32
    %c0_i32_0 = arith.constant 0 : i32
    %c0_i32_1 = arith.constant 0 : i32
    %c0_i32_2 = arith.constant 0 : i32
    return %c0_i32, %c0_i32_0, %c0_i32_1 : i32, i32, i32
  }
  func.func @transform_6(%arg0: i32) -> (i32, i32) {
    %c0_i32 = arith.constant 0 : i32
    %c0_i32_0 = arith.constant 0 : i32
    %c0_i32_1 = arith.constant 0 : i32
    return %c0_i32, %c0_i32_0 : i32, i32
  }
  func.func @transform_7(%arg0: i32) -> (i32, i32) {
    %c0_i32 = arith.constant 0 : i32
    %c0_i32_0 = arith.constant 0 : i32
    %c0_i32_1 = arith.constant 0 : i32
    return %c0_i32, %c0_i32_0 : i32, i32
  }
  func.func @transform_8(%arg0: i32) -> (i32, i32) {
    %c0_i32 = arith.constant 0 : i32
    %c0_i32_0 = arith.constant 0 : i32
    %c0_i32_1 = arith.constant 0 : i32
    return %c0_i32, %c0_i32_0 : i32, i32
  }
  func.func @transform_9(%arg0: i32) -> (i32, i32, i32) {
    %c0_i32 = arith.constant 0 : i32
    %c0_i32_0 = arith.constant 0 : i32
    %c0_i32_1 = arith.constant 0 : i32
    %c0_i32_2 = arith.constant 0 : i32
    return %c0_i32, %c0_i32_0, %c0_i32_1 : i32, i32, i32
  }
  func.func @transform_10(%arg0: i32) -> (i32, i32) {
    %c0_i32 = arith.constant 0 : i32
    %c0_i32_0 = arith.constant 0 : i32
    %c0_i32_1 = arith.constant 0 : i32
    return %c0_i32, %c0_i32_0 : i32, i32
  }
  func.func @transform_11(%arg0: i32) -> (i32, i32, i32) {
    %c0_i32 = arith.constant 0 : i32
    %c0_i32_0 = arith.constant 0 : i32
    %c0_i32_1 = arith.constant 0 : i32
    return %arg0, %c0_i32, %c0_i32_0 : i32, i32, i32
  }
}

module attributes {stable_mosaic.version = 11 : i64} {
  func.func @kernel(%arg0: i32, %arg1: memref<1x256x32xbf16, #tpu.memory_space<vmem>>, %arg2: memref<32x32xf32, #tpu.memory_space<vmem>>, %arg3: memref<1x32xf32, #tpu.memory_space<vmem>>, %arg4: memref<1x32xf32, #tpu.memory_space<vmem>>, %arg5: memref<3x96x32xbf16, #tpu.memory_space<vmem>>, %arg6: memref<1x32xf32, #tpu.memory_space<vmem>>, %arg7: memref<1x32xf32, #tpu.memory_space<vmem>>, %arg8: memref<1x32xf32, #tpu.memory_space<vmem>>, %arg9: memref<3x96x32xbf16, #tpu.memory_space<vmem>>, %arg10: memref<1x32xf32, #tpu.memory_space<vmem>>, %arg11: memref<32x64xbf16, #tpu.memory_space<vmem>>, %arg12: memref<32x64xbf16, #tpu.memory_space<vmem>>, %arg13: memref<1x256x64xbf16, #tpu.memory_space<vmem>>, %arg14: memref<288x96xbf16, #tpu.memory_space<vmem>>) attributes {dimension_semantics = [#tpu.dimension_semantics<parallel>], iteration_bounds = array<i64: 2>, scalar_prefetch = 0 : i64, scratch_operands = 1 : i64, tpu.core_type = #tpu.core_type<tc>, window_params = [{transform_indices = @transform_0, window_bounds = array<i64: 1, 256, 32>}, {pipeline_mode = #tpu.pipeline_mode<synchronous>, transform_indices = @transform_1, window_bounds = array<i64: 32, 32>}, {pipeline_mode = #tpu.pipeline_mode<synchronous>, transform_indices = @transform_2, window_bounds = array<i64: 1, 32>}, {pipeline_mode = #tpu.pipeline_mode<synchronous>, transform_indices = @transform_3, window_bounds = array<i64: 1, 32>}, {pipeline_mode = #tpu.pipeline_mode<synchronous>, transform_indices = @transform_4, window_bounds = array<i64: 3, 96, 32>}, {pipeline_mode = #tpu.pipeline_mode<synchronous>, transform_indices = @transform_5, window_bounds = array<i64: 1, 32>}, {pipeline_mode = #tpu.pipeline_mode<synchronous>, transform_indices = @transform_6, window_bounds = array<i64: 1, 32>}, {pipeline_mode = #tpu.pipeline_mode<synchronous>, transform_indices = @transform_7, window_bounds = array<i64: 1, 32>}, {pipeline_mode = #tpu.pipeline_mode<synchronous>, transform_indices = @transform_8, window_bounds = array<i64: 3, 96, 32>}, {pipeline_mode = #tpu.pipeline_mode<synchronous>, transform_indices = @transform_9, window_bounds = array<i64: 1, 32>}, {pipeline_mode = #tpu.pipeline_mode<synchronous>, transform_indices = @transform_10, window_bounds = array<i64: 32, 64>}, {pipeline_mode = #tpu.pipeline_mode<synchronous>, transform_indices = @transform_11, window_bounds = array<i64: 32, 64>}, {transform_indices = @transform_12, window_bounds = array<i64: 1, 256, 64>}]} {
    %cst = arith.constant 0.000000e+00 : bf16
    %0 = vector.broadcast %cst : bf16 to vector<16x96xbf16>
    %c0 = arith.constant 0 : index
    %c0_0 = arith.constant 0 : index
    %1 = vector.load %arg14[%c0, %c0_0] : memref<288x96xbf16, #tpu.memory_space<vmem>>, vector<16x96xbf16>
    tpu.vector_store %arg14[%c0, %c0_0], %0 {strides = array<i32>} : memref<288x96xbf16, #tpu.memory_space<vmem>>, vector<16x96xbf16>,
    %cst_1 = arith.constant 0.000000e+00 : bf16
    %2 = vector.broadcast %cst_1 : bf16 to vector<16x96xbf16>
    %c272 = arith.constant 272 : index
    %c0_2 = arith.constant 0 : index
    %3 = vector.load %arg14[%c272, %c0_2] : memref<288x96xbf16, #tpu.memory_space<vmem>>, vector<16x96xbf16>
    tpu.vector_store %arg14[%c272, %c0_2], %2 {strides = array<i32>} : memref<288x96xbf16, #tpu.memory_space<vmem>>, vector<16x96xbf16>,
    %4 = tpu.iota {dimensions = array<i32: 0>} : vector<256x1xi32>
    %c16_i32 = arith.constant 16 : i32
    %c0_i32 = arith.constant 0 : i32
    %5 = arith.cmpi eq, %c16_i32, %c0_i32 : i32
    %c1_i32 = arith.constant 1 : i32
    %6 = arith.select %5, %c1_i32, %c16_i32 : i32
    %7 = vector.broadcast %6 : i32 to vector<256x1xi32>
    %8 = arith.remsi %4, %7 : vector<256x1xi32>
    %c0_i32_3 = arith.constant 0 : i32
    %9 = vector.broadcast %c0_i32_3 : i32 to vector<256x1xi32>
    %10 = arith.cmpi ne, %8, %9 : vector<256x1xi32>
    %c0_i32_4 = arith.constant 0 : i32
    %11 = vector.broadcast %c0_i32_4 : i32 to vector<256x1xi32>
    %12 = arith.cmpi slt, %8, %11 : vector<256x1xi32>
    %c0_i32_5 = arith.constant 0 : i32
    %13 = arith.cmpi slt, %6, %c0_i32_5 : i32
    %14 = vector.broadcast %13 : i1 to vector<256x1xi1>
    %15 = vector.broadcast %14 : vector<256x1xi1> to vector<256x1xi1>
    %16 = arith.xori %12, %15 : vector<256x1xi1>
    %17 = arith.andi %16, %10 : vector<256x1xi1>
    %18 = vector.broadcast %6 : i32 to vector<256x1xi32>
    %19 = arith.addi %8, %18 : vector<256x1xi32>
    %20 = arith.select %17, %19, %8 : vector<256x1xi1>, vector<256x1xi32>
    %c0_6 = arith.constant 0 : index
    %c0_7 = arith.constant 0 : index
    %21 = vector.load %arg2[%c0_6, %c0_7] : memref<32x32xf32, #tpu.memory_space<vmem>>, vector<32x32xf32>
    %c0_8 = arith.constant 0 : index
    %c0_9 = arith.constant 0 : index
    %c0_10 = arith.constant 0 : index
    %22 = vector.load %arg1[%c0_8, %c0_9, %c0_10] : memref<1x256x32xbf16, #tpu.memory_space<vmem>>, vector<1x256x32xbf16>
    %23 = vector.shape_cast %22 : vector<1x256x32xbf16> to vector<256x32xbf16>
    %24 = arith.extf %23 : vector<256x32xbf16> to vector<256x32xf32>
    %c0_11 = arith.constant 0 : index
    %c0_12 = arith.constant 0 : index
    %25 = vector.load %arg3[%c0_11, %c0_12] : memref<1x32xf32, #tpu.memory_space<vmem>>, vector<1x32xf32>
    %c0_13 = arith.constant 0 : index
    %c0_14 = arith.constant 0 : index
    %26 = vector.load %arg4[%c0_13, %c0_14] : memref<1x32xf32, #tpu.memory_space<vmem>>, vector<1x32xf32>
    %cst_15 = arith.constant dense<0.000000e+00> : vector<32xf32>
    %27 = vector.multi_reduction <add>, %24, %cst_15 [0] : vector<256x32xf32> to vector<32xf32>
    %28 = vector.shape_cast %27 : vector<32xf32> to vector<1x32xf32>
    %cst_16 = arith.constant dense<0.000000e+00> : vector<1x32xf32>
    %29 = tpu.matmul %28, %21, %cst_16 {dimension_numbers = #tpu.dot_dimension_numbers<[1], [0], [0], [1], [0, 0, 1, 1], [], []>} : vector<1x32xf32>, vector<32x32xf32>, vector<1x32xf32> -> vector<1x32xf32>
    %cst_17 = arith.constant 2.560000e+02 : f32
    %30 = vector.broadcast %cst_17 : f32 to vector<1x32xf32>
    %31 = arith.divf %29, %30 : vector<1x32xf32>
    %32 = vector.broadcast %31 : vector<1x32xf32> to vector<256x32xf32>
    %33 = arith.subf %24, %32 : vector<256x32xf32>
    %34 = arith.mulf %33, %33 : vector<256x32xf32>
    %cst_18 = arith.constant dense<0.000000e+00> : vector<32xf32>
    %35 = vector.multi_reduction <add>, %34, %cst_18 [0] : vector<256x32xf32> to vector<32xf32>
    %36 = vector.shape_cast %35 : vector<32xf32> to vector<1x32xf32>
    %cst_19 = arith.constant dense<0.000000e+00> : vector<1x32xf32>
    %37 = tpu.matmul %36, %21, %cst_19 {dimension_numbers = #tpu.dot_dimension_numbers<[1], [0], [0], [1], [0, 0, 1, 1], [], []>} : vector<1x32xf32>, vector<32x32xf32>, vector<1x32xf32> -> vector<1x32xf32>
    %cst_20 = arith.constant 2.560000e+02 : f32
    %38 = vector.broadcast %cst_20 : f32 to vector<1x32xf32>
    %39 = arith.divf %37, %38 : vector<1x32xf32>
    %cst_21 = arith.constant 9.99999974E-6 : f32
    %40 = vector.broadcast %cst_21 : f32 to vector<1x32xf32>
    %41 = arith.addf %39, %40 : vector<1x32xf32>
    %42 = math.rsqrt %41 : vector<1x32xf32>
    %43 = vector.broadcast %42 : vector<1x32xf32> to vector<256x32xf32>
    %44 = arith.mulf %33, %43 : vector<256x32xf32>
    %45 = vector.broadcast %25 : vector<1x32xf32> to vector<256x32xf32>
    %46 = arith.mulf %44, %45 : vector<256x32xf32>
    %47 = vector.broadcast %26 : vector<1x32xf32> to vector<256x32xf32>
    %48 = arith.addf %46, %47 : vector<256x32xf32>
    %49 = arith.negf %48 : vector<256x32xf32>
    %50 = math.exp %49 : vector<256x32xf32>
    %cst_22 = arith.constant 1.000000e+00 : f32
    %51 = vector.broadcast %cst_22 : f32 to vector<256x32xf32>
    %52 = arith.addf %51, %50 : vector<256x32xf32>
    %53 = arith.divf %51, %52 : vector<256x32xf32>
    %54 = arith.mulf %48, %53 : vector<256x32xf32>
    %c0_i32_23 = arith.constant 0 : i32
    %55 = vector.broadcast %c0_i32_23 : i32 to vector<256x1xi32>
    %56 = arith.cmpi eq, %20, %55 : vector<256x1xi32>
    %cst_24 = arith.constant 0.000000e+00 : f32
    %57 = vector.broadcast %cst_24 : f32 to vector<1x32xf32>
    %58 = vector.extract_strided_slice %54 {offsets = [0, 0], sizes = [255, 32], strides = [1, 1]} : vector<256x32xf32> to vector<255x32xf32>
    %59 = tpu.concatenate %57, %58 in 0 : vector<1x32xf32>, vector<255x32xf32> -> vector<256x32xf32>
    %cst_25 = arith.constant 0.000000e+00 : f32
    %60 = vector.shape_cast %56 : vector<256x1xi1> to vector<256x1xi1>
    %61 = vector.broadcast %60 : vector<256x1xi1> to vector<256x32xi1>
    %62 = vector.broadcast %cst_25 : f32 to vector<256x32xf32>
    %63 = arith.select %61, %62, %59 : vector<256x32xi1>, vector<256x32xf32>
    %c15_i32 = arith.constant 15 : i32
    %64 = vector.broadcast %c15_i32 : i32 to vector<256x1xi32>
    %65 = arith.cmpi eq, %20, %64 : vector<256x1xi32>
    %cst_26 = arith.constant 0.000000e+00 : f32
    %66 = vector.broadcast %cst_26 : f32 to vector<1x32xf32>
    %67 = vector.extract_strided_slice %54 {offsets = [1, 0], sizes = [255, 32], strides = [1, 1]} : vector<256x32xf32> to vector<255x32xf32>
    %68 = tpu.concatenate %67, %66 in 0 : vector<255x32xf32>, vector<1x32xf32> -> vector<256x32xf32>
    %cst_27 = arith.constant 0.000000e+00 : f32
    %69 = vector.shape_cast %65 : vector<256x1xi1> to vector<256x1xi1>
    %70 = vector.broadcast %69 : vector<256x1xi1> to vector<256x32xi1>
    %71 = vector.broadcast %cst_27 : f32 to vector<256x32xf32>
    %72 = arith.select %70, %71, %68 : vector<256x32xi1>, vector<256x32xf32>
    %73 = arith.truncf %63 : vector<256x32xf32> to vector<256x32xbf16>
    %c16 = arith.constant 16 : index
    %c0_28 = arith.constant 0 : index
    %74 = vector.load %arg14[%c16, %c0_28] : memref<288x96xbf16, #tpu.memory_space<vmem>>, vector<256x32xbf16>
    tpu.vector_store %arg14[%c16, %c0_28], %73 {strides = array<i32>} : memref<288x96xbf16, #tpu.memory_space<vmem>>, vector<256x32xbf16>,
    %75 = arith.truncf %54 : vector<256x32xf32> to vector<256x32xbf16>
    %c16_29 = arith.constant 16 : index
    %c32 = arith.constant 32 : index
    %76 = vector.load %arg14[%c16_29, %c32] : memref<288x96xbf16, #tpu.memory_space<vmem>>, vector<256x32xbf16>
    tpu.vector_store %arg14[%c16_29, %c32], %75 {strides = array<i32>} : memref<288x96xbf16, #tpu.memory_space<vmem>>, vector<256x32xbf16>,
    %77 = arith.truncf %72 : vector<256x32xf32> to vector<256x32xbf16>
    %c16_30 = arith.constant 16 : index
    %c64 = arith.constant 64 : index
    %78 = vector.load %arg14[%c16_30, %c64] : memref<288x96xbf16, #tpu.memory_space<vmem>>, vector<256x32xbf16>
    tpu.vector_store %arg14[%c16_30, %c64], %77 {strides = array<i32>} : memref<288x96xbf16, #tpu.memory_space<vmem>>, vector<256x32xbf16>,
    %c0_31 = arith.constant 0 : index
    %c0_32 = arith.constant 0 : index
    %79 = vector.load %arg14[%c0_31, %c0_32] : memref<288x96xbf16, #tpu.memory_space<vmem>>, vector<256x96xbf16>
    %c0_33 = arith.constant 0 : index
    %c0_34 = arith.constant 0 : index
    %c0_35 = arith.constant 0 : index
    %80 = vector.load %arg5[%c0_33, %c0_34, %c0_35] : memref<3x96x32xbf16, #tpu.memory_space<vmem>>, vector<1x96x32xbf16>
    %81 = vector.shape_cast %80 : vector<1x96x32xbf16> to vector<96x32xbf16>
    %cst_36 = arith.constant dense<0.000000e+00> : vector<256x32xf32>
    %82 = tpu.matmul %79, %81, %cst_36 {dimension_numbers = #tpu.dot_dimension_numbers<[1], [0], [0], [1], [0, 0, 1, 1], [], []>} : vector<256x96xbf16>, vector<96x32xbf16>, vector<256x32xf32> -> vector<256x32xf32>
    %c16_37 = arith.constant 16 : index
    %c0_38 = arith.constant 0 : index
    %83 = vector.load %arg14[%c16_37, %c0_38] : memref<288x96xbf16, #tpu.memory_space<vmem>>, vector<256x96xbf16>
    %c1 = arith.constant 1 : index
    %c0_39 = arith.constant 0 : index
    %c0_40 = arith.constant 0 : index
    %84 = vector.load %arg5[%c1, %c0_39, %c0_40] : memref<3x96x32xbf16, #tpu.memory_space<vmem>>, vector<1x96x32xbf16>
    %85 = vector.shape_cast %84 : vector<1x96x32xbf16> to vector<96x32xbf16>
    %cst_41 = arith.constant dense<0.000000e+00> : vector<256x32xf32>
    %86 = tpu.matmul %83, %85, %cst_41 {dimension_numbers = #tpu.dot_dimension_numbers<[1], [0], [0], [1], [0, 0, 1, 1], [], []>} : vector<256x96xbf16>, vector<96x32xbf16>, vector<256x32xf32> -> vector<256x32xf32>
    %87 = arith.addf %82, %86 : vector<256x32xf32>
    %c32_42 = arith.constant 32 : index
    %c0_43 = arith.constant 0 : index
    %88 = vector.load %arg14[%c32_42, %c0_43] : memref<288x96xbf16, #tpu.memory_space<vmem>>, vector<256x96xbf16>
    %c2 = arith.constant 2 : index
    %c0_44 = arith.constant 0 : index
    %c0_45 = arith.constant 0 : index
    %89 = vector.load %arg5[%c2, %c0_44, %c0_45] : memref<3x96x32xbf16, #tpu.memory_space<vmem>>, vector<1x96x32xbf16>
    %90 = vector.shape_cast %89 : vector<1x96x32xbf16> to vector<96x32xbf16>
    %cst_46 = arith.constant dense<0.000000e+00> : vector<256x32xf32>
    %91 = tpu.matmul %88, %90, %cst_46 {dimension_numbers = #tpu.dot_dimension_numbers<[1], [0], [0], [1], [0, 0, 1, 1], [], []>} : vector<256x96xbf16>, vector<96x32xbf16>, vector<256x32xf32> -> vector<256x32xf32>
    %92 = arith.addf %87, %91 : vector<256x32xf32>
    %c0_47 = arith.constant 0 : index
    %c0_48 = arith.constant 0 : index
    %93 = vector.load %arg6[%c0_47, %c0_48] : memref<1x32xf32, #tpu.memory_space<vmem>>, vector<1x32xf32>
    %94 = vector.broadcast %93 : vector<1x32xf32> to vector<256x32xf32>
    %95 = arith.addf %92, %94 : vector<256x32xf32>
    %c0_49 = arith.constant 0 : index
    %c0_50 = arith.constant 0 : index
    %96 = vector.load %arg7[%c0_49, %c0_50] : memref<1x32xf32, #tpu.memory_space<vmem>>, vector<1x32xf32>
    %c0_51 = arith.constant 0 : index
    %c0_52 = arith.constant 0 : index
    %97 = vector.load %arg8[%c0_51, %c0_52] : memref<1x32xf32, #tpu.memory_space<vmem>>, vector<1x32xf32>
    %cst_53 = arith.constant dense<0.000000e+00> : vector<32xf32>
    %98 = vector.multi_reduction <add>, %95, %cst_53 [0] : vector<256x32xf32> to vector<32xf32>
    %99 = vector.shape_cast %98 : vector<32xf32> to vector<1x32xf32>
    %cst_54 = arith.constant dense<0.000000e+00> : vector<1x32xf32>
    %100 = tpu.matmul %99, %21, %cst_54 {dimension_numbers = #tpu.dot_dimension_numbers<[1], [0], [0], [1], [0, 0, 1, 1], [], []>} : vector<1x32xf32>, vector<32x32xf32>, vector<1x32xf32> -> vector<1x32xf32>
    %cst_55 = arith.constant 2.560000e+02 : f32
    %101 = vector.broadcast %cst_55 : f32 to vector<1x32xf32>
    %102 = arith.divf %100, %101 : vector<1x32xf32>
    %103 = vector.broadcast %102 : vector<1x32xf32> to vector<256x32xf32>
    %104 = arith.subf %95, %103 : vector<256x32xf32>
    %105 = arith.mulf %104, %104 : vector<256x32xf32>
    %cst_56 = arith.constant dense<0.000000e+00> : vector<32xf32>
    %106 = vector.multi_reduction <add>, %105, %cst_56 [0] : vector<256x32xf32> to vector<32xf32>
    %107 = vector.shape_cast %106 : vector<32xf32> to vector<1x32xf32>
    %cst_57 = arith.constant dense<0.000000e+00> : vector<1x32xf32>
    %108 = tpu.matmul %107, %21, %cst_57 {dimension_numbers = #tpu.dot_dimension_numbers<[1], [0], [0], [1], [0, 0, 1, 1], [], []>} : vector<1x32xf32>, vector<32x32xf32>, vector<1x32xf32> -> vector<1x32xf32>
    %cst_58 = arith.constant 2.560000e+02 : f32
    %109 = vector.broadcast %cst_58 : f32 to vector<1x32xf32>
    %110 = arith.divf %108, %109 : vector<1x32xf32>
    %cst_59 = arith.constant 9.99999974E-6 : f32
    %111 = vector.broadcast %cst_59 : f32 to vector<1x32xf32>
    %112 = arith.addf %110, %111 : vector<1x32xf32>
    %113 = math.rsqrt %112 : vector<1x32xf32>
    %114 = vector.broadcast %113 : vector<1x32xf32> to vector<256x32xf32>
    %115 = arith.mulf %104, %114 : vector<256x32xf32>
    %116 = vector.broadcast %96 : vector<1x32xf32> to vector<256x32xf32>
    %117 = arith.mulf %115, %116 : vector<256x32xf32>
    %118 = vector.broadcast %97 : vector<1x32xf32> to vector<256x32xf32>
    %119 = arith.addf %117, %118 : vector<256x32xf32>
    %120 = arith.negf %119 : vector<256x32xf32>
    %121 = math.exp %120 : vector<256x32xf32>
    %cst_60 = arith.constant 1.000000e+00 : f32
    %122 = vector.broadcast %cst_60 : f32 to vector<256x32xf32>
    %123 = arith.addf %122, %121 : vector<256x32xf32>
    %124 = arith.divf %122, %123 : vector<256x32xf32>
    %125 = arith.mulf %119, %124 : vector<256x32xf32>
    %c0_i32_61 = arith.constant 0 : i32
    %126 = vector.broadcast %c0_i32_61 : i32 to vector<256x1xi32>
    %127 = arith.cmpi eq, %20, %126 : vector<256x1xi32>
    %cst_62 = arith.constant 0.000000e+00 : f32
    %128 = vector.broadcast %cst_62 : f32 to vector<1x32xf32>
    %129 = vector.extract_strided_slice %125 {offsets = [0, 0], sizes = [255, 32], strides = [1, 1]} : vector<256x32xf32> to vector<255x32xf32>
    %130 = tpu.concatenate %128, %129 in 0 : vector<1x32xf32>, vector<255x32xf32> -> vector<256x32xf32>
    %cst_63 = arith.constant 0.000000e+00 : f32
    %131 = vector.shape_cast %127 : vector<256x1xi1> to vector<256x1xi1>
    %132 = vector.broadcast %131 : vector<256x1xi1> to vector<256x32xi1>
    %133 = vector.broadcast %cst_63 : f32 to vector<256x32xf32>
    %134 = arith.select %132, %133, %130 : vector<256x32xi1>, vector<256x32xf32>
    %c15_i32_64 = arith.constant 15 : i32
    %135 = vector.broadcast %c15_i32_64 : i32 to vector<256x1xi32>
    %136 = arith.cmpi eq, %20, %135 : vector<256x1xi32>
    %cst_65 = arith.constant 0.000000e+00 : f32
    %137 = vector.broadcast %cst_65 : f32 to vector<1x32xf32>
    %138 = vector.extract_strided_slice %125 {offsets = [1, 0], sizes = [255, 32], strides = [1, 1]} : vector<256x32xf32> to vector<255x32xf32>
    %139 = tpu.concatenate %138, %137 in 0 : vector<255x32xf32>, vector<1x32xf32> -> vector<256x32xf32>
    %cst_66 = arith.constant 0.000000e+00 : f32
    %140 = vector.shape_cast %136 : vector<256x1xi1> to vector<256x1xi1>
    %141 = vector.broadcast %140 : vector<256x1xi1> to vector<256x32xi1>
    %142 = vector.broadcast %cst_66 : f32 to vector<256x32xf32>
    %143 = arith.select %141, %142, %139 : vector<256x32xi1>, vector<256x32xf32>
    %144 = arith.truncf %134 : vector<256x32xf32> to vector<256x32xbf16>
    %c16_67 = arith.constant 16 : index
    %c0_68 = arith.constant 0 : index
    %145 = vector.load %arg14[%c16_67, %c0_68] : memref<288x96xbf16, #tpu.memory_space<vmem>>, vector<256x32xbf16>
    tpu.vector_store %arg14[%c16_67, %c0_68], %144 {strides = array<i32>} : memref<288x96xbf16, #tpu.memory_space<vmem>>, vector<256x32xbf16>,
    %146 = arith.truncf %125 : vector<256x32xf32> to vector<256x32xbf16>
    %c16_69 = arith.constant 16 : index
    %c32_70 = arith.constant 32 : index
    %147 = vector.load %arg14[%c16_69, %c32_70] : memref<288x96xbf16, #tpu.memory_space<vmem>>, vector<256x32xbf16>
    tpu.vector_store %arg14[%c16_69, %c32_70], %146 {strides = array<i32>} : memref<288x96xbf16, #tpu.memory_space<vmem>>, vector<256x32xbf16>,
    %148 = arith.truncf %143 : vector<256x32xf32> to vector<256x32xbf16>
    %c16_71 = arith.constant 16 : index
    %c64_72 = arith.constant 64 : index
    %149 = vector.load %arg14[%c16_71, %c64_72] : memref<288x96xbf16, #tpu.memory_space<vmem>>, vector<256x32xbf16>
    tpu.vector_store %arg14[%c16_71, %c64_72], %148 {strides = array<i32>} : memref<288x96xbf16, #tpu.memory_space<vmem>>, vector<256x32xbf16>,
    %c0_73 = arith.constant 0 : index
    %c0_74 = arith.constant 0 : index
    %150 = vector.load %arg14[%c0_73, %c0_74] : memref<288x96xbf16, #tpu.memory_space<vmem>>, vector<256x96xbf16>
    %c0_75 = arith.constant 0 : index
    %c0_76 = arith.constant 0 : index
    %c0_77 = arith.constant 0 : index
    %151 = vector.load %arg9[%c0_75, %c0_76, %c0_77] : memref<3x96x32xbf16, #tpu.memory_space<vmem>>, vector<1x96x32xbf16>
    %152 = vector.shape_cast %151 : vector<1x96x32xbf16> to vector<96x32xbf16>
    %cst_78 = arith.constant dense<0.000000e+00> : vector<256x32xf32>
    %153 = tpu.matmul %150, %152, %cst_78 {dimension_numbers = #tpu.dot_dimension_numbers<[1], [0], [0], [1], [0, 0, 1, 1], [], []>} : vector<256x96xbf16>, vector<96x32xbf16>, vector<256x32xf32> -> vector<256x32xf32>
    %c16_79 = arith.constant 16 : index
    %c0_80 = arith.constant 0 : index
    %154 = vector.load %arg14[%c16_79, %c0_80] : memref<288x96xbf16, #tpu.memory_space<vmem>>, vector<256x96xbf16>
    %c1_81 = arith.constant 1 : index
    %c0_82 = arith.constant 0 : index
    %c0_83 = arith.constant 0 : index
    %155 = vector.load %arg9[%c1_81, %c0_82, %c0_83] : memref<3x96x32xbf16, #tpu.memory_space<vmem>>, vector<1x96x32xbf16>
    %156 = vector.shape_cast %155 : vector<1x96x32xbf16> to vector<96x32xbf16>
    %cst_84 = arith.constant dense<0.000000e+00> : vector<256x32xf32>
    %157 = tpu.matmul %154, %156, %cst_84 {dimension_numbers = #tpu.dot_dimension_numbers<[1], [0], [0], [1], [0, 0, 1, 1], [], []>} : vector<256x96xbf16>, vector<96x32xbf16>, vector<256x32xf32> -> vector<256x32xf32>
    %158 = arith.addf %153, %157 : vector<256x32xf32>
    %c32_85 = arith.constant 32 : index
    %c0_86 = arith.constant 0 : index
    %159 = vector.load %arg14[%c32_85, %c0_86] : memref<288x96xbf16, #tpu.memory_space<vmem>>, vector<256x96xbf16>
    %c2_87 = arith.constant 2 : index
    %c0_88 = arith.constant 0 : index
    %c0_89 = arith.constant 0 : index
    %160 = vector.load %arg9[%c2_87, %c0_88, %c0_89] : memref<3x96x32xbf16, #tpu.memory_space<vmem>>, vector<1x96x32xbf16>
    %161 = vector.shape_cast %160 : vector<1x96x32xbf16> to vector<96x32xbf16>
    %cst_90 = arith.constant dense<0.000000e+00> : vector<256x32xf32>
    %162 = tpu.matmul %159, %161, %cst_90 {dimension_numbers = #tpu.dot_dimension_numbers<[1], [0], [0], [1], [0, 0, 1, 1], [], []>} : vector<256x96xbf16>, vector<96x32xbf16>, vector<256x32xf32> -> vector<256x32xf32>
    %163 = arith.addf %158, %162 : vector<256x32xf32>
    %c0_91 = arith.constant 0 : index
    %c0_92 = arith.constant 0 : index
    %164 = vector.load %arg10[%c0_91, %c0_92] : memref<1x32xf32, #tpu.memory_space<vmem>>, vector<1x32xf32>
    %165 = vector.broadcast %164 : vector<1x32xf32> to vector<256x32xf32>
    %166 = arith.addf %163, %165 : vector<256x32xf32>
    %167 = arith.addf %24, %166 : vector<256x32xf32>
    %168 = arith.truncf %167 : vector<256x32xf32> to vector<256x32xbf16>
    %c0_93 = arith.constant 0 : index
    %c0_94 = arith.constant 0 : index
    %169 = vector.load %arg11[%c0_93, %c0_94] : memref<32x64xbf16, #tpu.memory_space<vmem>>, vector<32x64xbf16>
    %cst_95 = arith.constant dense<0.000000e+00> : vector<256x64xf32>
    %170 = tpu.matmul %168, %169, %cst_95 {dimension_numbers = #tpu.dot_dimension_numbers<[1], [0], [0], [1], [0, 0, 1, 1], [], []>} : vector<256x32xbf16>, vector<32x64xbf16>, vector<256x64xf32> -> vector<256x64xf32>
    %c0_96 = arith.constant 0 : index
    %c0_97 = arith.constant 0 : index
    %171 = vector.load %arg12[%c0_96, %c0_97] : memref<32x64xbf16, #tpu.memory_space<vmem>>, vector<32x64xbf16>
    %cst_98 = arith.constant dense<0.000000e+00> : vector<256x64xf32>
    %172 = tpu.matmul %23, %171, %cst_98 {dimension_numbers = #tpu.dot_dimension_numbers<[1], [0], [0], [1], [0, 0, 1, 1], [], []>} : vector<256x32xbf16>, vector<32x64xbf16>, vector<256x64xf32> -> vector<256x64xf32>
    %173 = arith.addf %170, %172 : vector<256x64xf32>
    %174 = arith.truncf %173 : vector<256x64xf32> to vector<256x64xbf16>
    %c0_99 = arith.constant 0 : index
    %c0_100 = arith.constant 0 : index
    %c0_101 = arith.constant 0 : index
    %175 = vector.load %arg13[%c0_99, %c0_100, %c0_101] : memref<1x256x64xbf16, #tpu.memory_space<vmem>>, vector<1x256x64xbf16>
    %176 = vector.shape_cast %175 : vector<1x256x64xbf16> to vector<256x64xbf16>
    %177 = vector.shape_cast %174 : vector<256x64xbf16> to vector<1x256x64xbf16>
    tpu.vector_store %arg13[%c0_99, %c0_100, %c0_101], %177 {strides = array<i32>} : memref<1x256x64xbf16, #tpu.memory_space<vmem>>, vector<1x256x64xbf16>,
    return
  }
  func.func @transform_0(%arg0: i32) -> (i32, i32, i32) {
    %c0_i32 = arith.constant 0 : i32
    %c0_i32_0 = arith.constant 0 : i32
    %c0_i32_1 = arith.constant 0 : i32
    return %arg0, %c0_i32, %c0_i32_0 : i32, i32, i32
  }
  func.func @transform_1(%arg0: i32) -> (i32, i32) {
    %c0_i32 = arith.constant 0 : i32
    %c0_i32_0 = arith.constant 0 : i32
    %c0_i32_1 = arith.constant 0 : i32
    return %c0_i32, %c0_i32_0 : i32, i32
  }
  func.func @transform_2(%arg0: i32) -> (i32, i32) {
    %c0_i32 = arith.constant 0 : i32
    %c0_i32_0 = arith.constant 0 : i32
    %c0_i32_1 = arith.constant 0 : i32
    return %c0_i32, %c0_i32_0 : i32, i32
  }
  func.func @transform_3(%arg0: i32) -> (i32, i32) {
    %c0_i32 = arith.constant 0 : i32
    %c0_i32_0 = arith.constant 0 : i32
    %c0_i32_1 = arith.constant 0 : i32
    return %c0_i32, %c0_i32_0 : i32, i32
  }
  func.func @transform_4(%arg0: i32) -> (i32, i32, i32) {
    %c0_i32 = arith.constant 0 : i32
    %c0_i32_0 = arith.constant 0 : i32
    %c0_i32_1 = arith.constant 0 : i32
    %c0_i32_2 = arith.constant 0 : i32
    return %c0_i32, %c0_i32_0, %c0_i32_1 : i32, i32, i32
  }
  func.func @transform_5(%arg0: i32) -> (i32, i32) {
    %c0_i32 = arith.constant 0 : i32
    %c0_i32_0 = arith.constant 0 : i32
    %c0_i32_1 = arith.constant 0 : i32
    return %c0_i32, %c0_i32_0 : i32, i32
  }
  func.func @transform_6(%arg0: i32) -> (i32, i32) {
    %c0_i32 = arith.constant 0 : i32
    %c0_i32_0 = arith.constant 0 : i32
    %c0_i32_1 = arith.constant 0 : i32
    return %c0_i32, %c0_i32_0 : i32, i32
  }
  func.func @transform_7(%arg0: i32) -> (i32, i32) {
    %c0_i32 = arith.constant 0 : i32
    %c0_i32_0 = arith.constant 0 : i32
    %c0_i32_1 = arith.constant 0 : i32
    return %c0_i32, %c0_i32_0 : i32, i32
  }
  func.func @transform_8(%arg0: i32) -> (i32, i32, i32) {
    %c0_i32 = arith.constant 0 : i32
    %c0_i32_0 = arith.constant 0 : i32
    %c0_i32_1 = arith.constant 0 : i32
    %c0_i32_2 = arith.constant 0 : i32
    return %c0_i32, %c0_i32_0, %c0_i32_1 : i32, i32, i32
  }
  func.func @transform_9(%arg0: i32) -> (i32, i32) {
    %c0_i32 = arith.constant 0 : i32
    %c0_i32_0 = arith.constant 0 : i32
    %c0_i32_1 = arith.constant 0 : i32
    return %c0_i32, %c0_i32_0 : i32, i32
  }
  func.func @transform_10(%arg0: i32) -> (i32, i32) {
    %c0_i32 = arith.constant 0 : i32
    %c0_i32_0 = arith.constant 0 : i32
    %c0_i32_1 = arith.constant 0 : i32
    return %c0_i32, %c0_i32_0 : i32, i32
  }
  func.func @transform_11(%arg0: i32) -> (i32, i32) {
    %c0_i32 = arith.constant 0 : i32
    %c0_i32_0 = arith.constant 0 : i32
    %c0_i32_1 = arith.constant 0 : i32
    return %c0_i32, %c0_i32_0 : i32, i32
  }
  func.func @transform_12(%arg0: i32) -> (i32, i32, i32) {
    %c0_i32 = arith.constant 0 : i32
    %c0_i32_0 = arith.constant 0 : i32
    %c0_i32_1 = arith.constant 0 : i32
    return %arg0, %c0_i32, %c0_i32_0 : i32, i32, i32
  }
}

module attributes {stable_mosaic.version = 11 : i64} {
  func.func @kernel(%arg0: i32, %arg1: memref<1x16x1024xbf16, #tpu.memory_space<vmem>>, %arg2: memref<16x16xf32, #tpu.memory_space<vmem>>, %arg3: memref<16x1xf32, #tpu.memory_space<vmem>>, %arg4: memref<16x1xf32, #tpu.memory_space<vmem>>, %arg5: memref<3x16xbf16, #tpu.memory_space<vmem>>, %arg6: memref<1x3x1024xf32, #tpu.memory_space<vmem>>) attributes {dimension_semantics = [#tpu.dimension_semantics<parallel>], iteration_bounds = array<i64: 2>, scalar_prefetch = 0 : i64, scratch_operands = 0 : i64, tpu.core_type = #tpu.core_type<tc>, window_params = [{transform_indices = @transform_0, window_bounds = array<i64: 1, 16, 1024>}, {pipeline_mode = #tpu.pipeline_mode<synchronous>, transform_indices = @transform_1, window_bounds = array<i64: 16, 16>}, {pipeline_mode = #tpu.pipeline_mode<synchronous>, transform_indices = @transform_2, window_bounds = array<i64: 16, 1>}, {pipeline_mode = #tpu.pipeline_mode<synchronous>, transform_indices = @transform_3, window_bounds = array<i64: 16, 1>}, {pipeline_mode = #tpu.pipeline_mode<synchronous>, transform_indices = @transform_4, window_bounds = array<i64: 3, 16>}, {transform_indices = @transform_5, window_bounds = array<i64: 1, 3, 1024>}]} {
    %c0 = arith.constant 0 : index
    %c0_0 = arith.constant 0 : index
    %c0_1 = arith.constant 0 : index
    %0 = vector.load %arg1[%c0, %c0_0, %c0_1] : memref<1x16x1024xbf16, #tpu.memory_space<vmem>>, vector<1x16x1024xbf16>
    %1 = vector.shape_cast %0 : vector<1x16x1024xbf16> to vector<16x1024xbf16>
    %2 = arith.extf %1 : vector<16x1024xbf16> to vector<16x1024xf32>
    %cst = arith.constant dense<0.000000e+00> : vector<16xf32>
    %3 = vector.multi_reduction <add>, %2, %cst [1] : vector<16x1024xf32> to vector<16xf32>
    %4 = vector.shape_cast %3 : vector<16xf32> to vector<16x1xf32>
    %c0_2 = arith.constant 0 : index
    %c0_3 = arith.constant 0 : index
    %5 = vector.load %arg2[%c0_2, %c0_3] : memref<16x16xf32, #tpu.memory_space<vmem>>, vector<16x16xf32>
    %cst_4 = arith.constant dense<0.000000e+00> : vector<16x1xf32>
    %6 = tpu.matmul %5, %4, %cst_4 {dimension_numbers = #tpu.dot_dimension_numbers<[1], [0], [0], [1], [0, 0, 1, 1], [], []>} : vector<16x16xf32>, vector<16x1xf32>, vector<16x1xf32> -> vector<16x1xf32>
    %cst_5 = arith.constant 1.024000e+03 : f32
    %7 = vector.broadcast %cst_5 : f32 to vector<16x1xf32>
    %8 = arith.divf %6, %7 : vector<16x1xf32>
    %9 = vector.broadcast %8 : vector<16x1xf32> to vector<16x1024xf32>
    %10 = arith.subf %2, %9 : vector<16x1024xf32>
    %11 = arith.mulf %10, %10 : vector<16x1024xf32>
    %cst_6 = arith.constant dense<0.000000e+00> : vector<16xf32>
    %12 = vector.multi_reduction <add>, %11, %cst_6 [1] : vector<16x1024xf32> to vector<16xf32>
    %13 = vector.shape_cast %12 : vector<16xf32> to vector<16x1xf32>
    %c0_7 = arith.constant 0 : index
    %c0_8 = arith.constant 0 : index
    %14 = vector.load %arg2[%c0_7, %c0_8] : memref<16x16xf32, #tpu.memory_space<vmem>>, vector<16x16xf32>
    %cst_9 = arith.constant dense<0.000000e+00> : vector<16x1xf32>
    %15 = tpu.matmul %14, %13, %cst_9 {dimension_numbers = #tpu.dot_dimension_numbers<[1], [0], [0], [1], [0, 0, 1, 1], [], []>} : vector<16x16xf32>, vector<16x1xf32>, vector<16x1xf32> -> vector<16x1xf32>
    %cst_10 = arith.constant 1.024000e+03 : f32
    %16 = vector.broadcast %cst_10 : f32 to vector<16x1xf32>
    %17 = arith.divf %15, %16 : vector<16x1xf32>
    %cst_11 = arith.constant 9.99999974E-6 : f32
    %18 = vector.broadcast %cst_11 : f32 to vector<16x1xf32>
    %19 = arith.addf %17, %18 : vector<16x1xf32>
    %20 = math.rsqrt %19 : vector<16x1xf32>
    %21 = vector.broadcast %20 : vector<16x1xf32> to vector<16x1024xf32>
    %22 = arith.mulf %10, %21 : vector<16x1024xf32>
    %c0_12 = arith.constant 0 : index
    %c0_13 = arith.constant 0 : index
    %23 = vector.load %arg3[%c0_12, %c0_13] : memref<16x1xf32, #tpu.memory_space<vmem>>, vector<16x1xf32>
    %24 = vector.broadcast %23 : vector<16x1xf32> to vector<16x1024xf32>
    %25 = arith.mulf %22, %24 : vector<16x1024xf32>
    %c0_14 = arith.constant 0 : index
    %c0_15 = arith.constant 0 : index
    %26 = vector.load %arg4[%c0_14, %c0_15] : memref<16x1xf32, #tpu.memory_space<vmem>>, vector<16x1xf32>
    %27 = vector.broadcast %26 : vector<16x1xf32> to vector<16x1024xf32>
    %28 = arith.addf %25, %27 : vector<16x1024xf32>
    %29 = arith.negf %28 : vector<16x1024xf32>
    %30 = math.exp %29 : vector<16x1024xf32>
    %cst_16 = arith.constant 1.000000e+00 : f32
    %31 = vector.broadcast %cst_16 : f32 to vector<16x1024xf32>
    %32 = arith.addf %31, %30 : vector<16x1024xf32>
    %33 = arith.divf %31, %32 : vector<16x1024xf32>
    %34 = arith.mulf %28, %33 : vector<16x1024xf32>
    %c0_17 = arith.constant 0 : index
    %c0_18 = arith.constant 0 : index
    %35 = vector.load %arg5[%c0_17, %c0_18] : memref<3x16xbf16, #tpu.memory_space<vmem>>, vector<3x16xbf16>
    %36 = arith.truncf %34 : vector<16x1024xf32> to vector<16x1024xbf16>
    %cst_19 = arith.constant dense<0.000000e+00> : vector<3x1024xf32>
    %37 = tpu.matmul %35, %36, %cst_19 {dimension_numbers = #tpu.dot_dimension_numbers<[1], [0], [0], [1], [0, 0, 1, 1], [], []>} : vector<3x16xbf16>, vector<16x1024xbf16>, vector<3x1024xf32> -> vector<3x1024xf32>
    %c0_20 = arith.constant 0 : index
    %c0_21 = arith.constant 0 : index
    %c0_22 = arith.constant 0 : index
    %38 = vector.load %arg6[%c0_20, %c0_21, %c0_22] : memref<1x3x1024xf32, #tpu.memory_space<vmem>>, vector<1x3x1024xf32>
    %39 = vector.shape_cast %38 : vector<1x3x1024xf32> to vector<3x1024xf32>
    %40 = vector.shape_cast %37 : vector<3x1024xf32> to vector<1x3x1024xf32>
    tpu.vector_store %arg6[%c0_20, %c0_21, %c0_22], %40 {strides = array<i32>} : memref<1x3x1024xf32, #tpu.memory_space<vmem>>, vector<1x3x1024xf32>,
    return
  }
  func.func @transform_0(%arg0: i32) -> (i32, i32, i32) {
    %c0_i32 = arith.constant 0 : i32
    %c0_i32_0 = arith.constant 0 : i32
    %c0_i32_1 = arith.constant 0 : i32
    return %arg0, %c0_i32, %c0_i32_0 : i32, i32, i32
  }
  func.func @transform_1(%arg0: i32) -> (i32, i32) {
    %c0_i32 = arith.constant 0 : i32
    %c0_i32_0 = arith.constant 0 : i32
    %c0_i32_1 = arith.constant 0 : i32
    return %c0_i32, %c0_i32_0 : i32, i32
  }
  func.func @transform_2(%arg0: i32) -> (i32, i32) {
    %c0_i32 = arith.constant 0 : i32
    %c0_i32_0 = arith.constant 0 : i32
    %c0_i32_1 = arith.constant 0 : i32
    return %c0_i32, %c0_i32_0 : i32, i32
  }
  func.func @transform_3(%arg0: i32) -> (i32, i32) {
    %c0_i32 = arith.constant 0 : i32
    %c0_i32_0 = arith.constant 0 : i32
    %c0_i32_1 = arith.constant 0 : i32
    return %c0_i32, %c0_i32_0 : i32, i32
  }
  func.func @transform_4(%arg0: i32) -> (i32, i32) {
    %c0_i32 = arith.constant 0 : i32
    %c0_i32_0 = arith.constant 0 : i32
    %c0_i32_1 = arith.constant 0 : i32
    return %c0_i32, %c0_i32_0 : i32, i32
  }
  func.func @transform_5(%arg0: i32) -> (i32, i32, i32) {
    %c0_i32 = arith.constant 0 : i32
    %c0_i32_0 = arith.constant 0 : i32
    %c0_i32_1 = arith.constant 0 : i32
    return %arg0, %c0_i32, %c0_i32_0 : i32, i32, i32
  }
}

</mosaic_0001>

<bundles_post_ra>
// kernel: decoder_forward.4
= control target key start
LH: loop header
LB: loop body
LE: loop exit
PB: predicated region body
PF: predicated region fallthrough
CT: control target
= control target key end

     0   :  { %s3542_s17 = smov 0   ;;  %s4611_s0 = inlined_call_operand.vmem [shape: bf16[2,64,4], index: 0, kind: input, shape index: {}]   ;;  %s4612_s1 = inlined_call_operand.vmem [shape: bf16[4,64], index: 1, kind: input, shape index: {}]   ;;  %s4613_s2 = inlined_call_operand.vmem [shape: f32[64,64], index: 2, kind: input, shape index: {}]   ;;  %s4614_s3 = inlined_call_operand.vmem [shape: f32[1,64], index: 3, kind: input, shape index: {}]   ;;  %s4615_s4 = inlined_call_operand.vmem [shape: f32[1,64], index: 4, kind: input, shape index: {}]   ;;  %s4616_s5 = inlined_call_operand.vmem [shape: bf16[3,192,64], index: 5, kind: input, shape index: {}]   ;;  %s4617_s6 = inlined_call_operand.vmem [shape: f32[1,64], index: 6, kind: input, shape index: {}]   ;;  %s4618_s7 = inlined_call_operand.vmem [shape: f32[1,64], index: 7, kind: input, shape index: {}]   ;;  %s4619_s8 = inlined_call_operand.vmem [shape: f32[1,64], index: 8, kind: input, shape index: {}]   ;;  %s4620_s9 = inlined_call_operand.vmem [shape: bf16[3,192,64], index: 9, kind: input, shape index: {}]   ;;  %s4621_s10 = inlined_call_operand.vmem [shape: f32[1,64], index: 10, kind: input, shape index: {}]   ;;  %s4622_s11 = inlined_call_operand.vmem [shape: bf16[2,64,64], index: 11, kind: output, shape index: {}]  }
   0x1 LB: > { %s2881_s18 = sadd.s32 4294967295, %s3475_s17   ;;  %p2885_p0 = scmp.ge.s32.totalorder %s3475_s17, 1  ;;  %s3475_s17 = sphi %s3542_s17, %s21_s17  }
   0x2   : > { %p337_p1 = scmp.lt.s32.totalorder %s3475_s17, 3 }
   0x4   : > { %p338_p2 = pnand %p2885_p0, %p337_p1 }
   0x5   : > { %v515_v0 = vld [vmem:[%s4612_s1] sm:$0x3] (!%p338_p2)  ;;  %vm549_vm0 = vcmask (!%p338_p2), 1041408   ;;  %p377_p3 = scmp.lt.s32.totalorder (!%p338_p2), %s2881_s18, 1  ;;  %vm536_vm1 = vcmask (!%p338_p2), 31744   ;;  %v500_v7 = vld [vmem:[%s4613_s2 + $0x8] sm:$0xff] (!%p338_p2)  ;;  %v394_v49 = vlaneseq (!%p338_p2) }
   0x6   : > { %341 = sbr.rel (%p338_p2) target bundleno = 2159 (0x86f), region = 64  ;;  %3311 = vmatprep.subr.msk.bf16.mxu0 (!%p338_p2), %vm549_vm0, %v515_v0  ;;  %v551_v1 = vsel (!%p338_p2), %vm549_vm0, %v515_v0, 0  ;;  %v499_v6 = vld [vmem:[%s4613_s2] sm:$0xff] (!%p338_p2)  ;;  %v4634_v9 = vmov (!%p338_p2), 0.0|0.0   ;;  %v501_v10 = vld [vmem:[%s4613_s2 + $0x10] sm:$0xff] (!%p338_p2)  ;;  %v502_v11 = vld [vmem:[%s4613_s2 + $0x18] sm:$0xff] (!%p338_p2) }
   0x7   : > { %3178 = vmatpush3.bf16.msra.mxu0 (!%p338_p2), %v551_v1  ;;  %v3567_v8 = vpack.c.bf16 (!%p338_p2), %v500_v7, %v499_v6  ;;  %v3578_v12 = vpack.c.bf16 (!%p338_p2), %v502_v11, %v501_v10  ;;  %v503_v13 = vld [vmem:[%s4613_s2 + $0x20] sm:$0xff] (!%p338_p2)  ;;  %v504_v14 = vld [vmem:[%s4613_s2 + $0x28] sm:$0xff] (!%p338_p2)  ;;  %v505_v16 = vld [vmem:[%s4613_s2 + $0x30] sm:$0xff] (!%p338_p2)  ;;  %vm4623_vm2 = vmmov (!%p338_p2), 0   ;;  %v4627_v19 = vmov (!%p338_p2), 0.0   ;;  %s3481_s29 = smov (!%p338_p2), 64  }
   0x8   : > { %3263 = vmatprep.subr.bf16.mxu0 (!%p338_p2), %v4634_v9  ;;  %v3588_v15 = vpack.c.bf16 (!%p338_p2), %v504_v14, %v503_v13  ;;  %v506_v17 = vld [vmem:[%s4613_s2 + $0x38] sm:$0xff] (!%p338_p2)  ;;  %vm4626_vm3 = vcmask (!%p338_p2), 523264   ;;  %v3646_v50 = vshrl.u32 (!%p338_p2), %v394_v49, 7  ;;  %vm4629_vm4 = vcmask (!%p338_p2), 523268   ;;  %v3335_v49 = vld [vmem:[%s4616_s5 + $0x70] sm:$0xff] (!%p338_p2)  }
   0x9   : > { %v3598_v18 = vpack.c.bf16 (!%p338_p2), %v506_v17, %v505_v16  ;;  %vm4625_vm5 = vcmask (!%p338_p2), 519168   ;;  %vm4630_vm7 = vcmask (!%p338_p2), 1046528   ;;  %vm4631_vm12 = vcmask (!%p338_p2), 1040384  }
   0xa   : > { %v3649_v51 = vsub.s32 (!%p338_p2), 0, %v3646_v50 }
   0xd   : > { %s4817_s18 = smov (!%p377_p3, %s2881_s18), 1 }
   0xe   : > { %s3126_s21 = sshll.u32 %s4817_s18, 5 }
   0xf   : > { %s381_s24 = scalar_lea.vmem %s4611_s0, %s3126_s21  ;;  %s4577_s28 = scalar_lea.vmem %s4622_s11, %s3126_s21 }
  0x10   : > { %v3325_v2 = vld [vmem:[%s381_s24] sm:$0xff]   ;;  %v3326_v3 = vld [vmem:[%s381_s24 + $0x8] sm:$0xff]   ;;  %v3327_v4 = vld [vmem:[%s381_s24 + $0x10] sm:$0xff]  }
  0x11   : > { %3179 = vmatprep.mubr.msk.bf16.mxu0 %vm536_vm1, %v3325_v2  ;;  %v3328_v5 = vld [vmem:[%s381_s24 + $0x18] sm:$0xff]  }
  0x12   : > { %3180 = vmatmul.mubr.msk.bf16.vlgmr.msra.gmra.mrb[0].mxu0 %vm536_vm1, %v3326_v3 }
  0x13   : > { %3183 = vmatprep.mubr.msk.bf16.mxu0 %vm536_vm1, %v3327_v4  ;;  %3265 = vmatpush3.bf16.msra.mxu0 %v3567_v8 }
  0x14   : > { %3266 = vmatprep.subr.bf16.mxu0 %v4634_v9 }
  0x17   : > { %3268 = vmatpush3.bf16.msra.mxu0 %v3578_v12 }
  0x18   : > { %3269 = vmatprep.subr.bf16.mxu0 %v4634_v9 }
  0x1a   : > { %3184 = vmatmul.mubr.msk.bf16.gmra.mrb[4].mxu0 %vm536_vm1, %v3328_v5 }
  0x1b   : > { %3271 = vmatpush3.bf16.msra.mxu0 %v3588_v15  ;;  %3203 = vmatprep.mubr.msk.f32.mxu0 %vm4623_vm2, %v4627_v19 }
  0x1c   : > { %3272 = vmatprep.subr.bf16.mxu0 %v4634_v9 }
  0x1f   : > { %3274 = vmatpush3.bf16.msra.mxu0 %v3598_v18 }
  0x20   : > { %3275 = vmatprep.subr.bf16.mxu0 %v4634_v9 }
  0xe5   : > { %v3604_v20 = vpop.f32.mrb[0].mxu0 }
  0xe6   : > { %v3606_v21 = vpop.f32.mrb[1].mxu0  ;;  %v624_v27 = vsel %vm4626_vm3, %v3604_v20, 0.0 }
  0xe7   : > { %v3608_v22 = vpop.f32.mrb[2].mxu0  ;;  %v621_v24 = vsel %vm4626_vm3, %v3606_v21, 0.0 }
  0xe8   : > { %v3610_v23 = vpop.f32.mrb[3].mxu0  ;;  %v626_v29 = vsel %vm4626_vm3, %v3608_v22, 0.0 }
  0xe9   : > { %v622_v25 = vsel %vm4626_vm3, %v3610_v23, 0.0 }
  0xea   : > { %v623_v26 = vadd.f32 %v622_v25, %v621_v24 }
  0xec   : > { %v625_v28 = vadd.f32 %v624_v27, %v623_v26 }
  0xed   : > { %v3620_v30 = vpop.f32.mrb[4].mxu0 }
  0xee   : > { %v3622_v31 = vpop.f32.mrb[5].mxu0  ;;  %v627_v32 = vadd.f32 %v626_v29, %v625_v28  ;;  %v632_v39 = vsel %vm4626_vm3, %v3620_v30, 0.0 }
  0xef   : > { %v628_v33 = vsel %vm4626_vm3, %v3622_v31, 0.0  ;;  %v3626_v34 = vpop.f32.mrb[6].mxu0 }
  0xf0   : > { %v629_v35 = vadd.f32 %v628_v33, %v627_v32  ;;  %v3628_v36 = vpop.f32.mrb[7].mxu0  ;;  %v634_v41 = vsel %vm4626_vm3, %v3626_v34, 0.0 }
  0xf1   : > { %v630_v37 = vsel %vm4626_vm3, %v3628_v36, 0.0 }
  0xf2   : > { %v631_v38 = vadd.f32 %v630_v37, %v629_v35 }
  0xf4   : > { %v633_v40 = vadd.f32 %v632_v39, %v631_v38 }
  0xf6   : > { %v635_v42 = vadd.f32 %v634_v41, %v633_v40 }
  0xf8   : > { %v636_v43 = vrot.slane %v635_v42, 4 }
  0xfa   : > { %v637_v44 = vadd.f32 %v636_v43, %v635_v42  ;;  %v3480_v43 = vmov 0  }
  0xfb   : > { %390 = vst.msk [vmem:[#allocation2 + $0x8] sm:$0xf] %vm4625_vm5, %v3480_v43  ;;  %388 = vst [vmem:[#allocation2] sm:$0xf] %v3480_v43  ;;  %1318 = vmatprep.subr.bf16.mxu1 %v3480_v43 }
  0xfc   : > { %v638_v45 = vrot.slane %v637_v44, 2  ;;  %391 = vst [vmem:[#allocation2 + $0x40] sm:$0xf0] %v3480_v43  ;;  %393 = vst.msk [vmem:[#allocation2 + $0x48] sm:$0xf0] %vm4629_vm4, %v3480_v43 }
  0xfe   : > { %v639_v46 = vadd.f32 %v638_v45, %v637_v44  ;;  %v3329_v44 = vld [vmem:[%s4616_s5] sm:$0xff]  }
  0xff   : > { %v3331_v45 = vld [vmem:[%s4616_s5 + $0x60] sm:$0xff]  }
 0x100   : > { %v640_v47 = vrot.slane %v639_v46, 1  ;;  %1319 = vmatpush1.bf16.msra.mxu1 %v3331_v45 }
 0x101   : > { %1320 = vmatprep.subr.bf16.mxu1 %v3480_v43 }
 0x102   : > { %v641_v48 = vadd.f32 %v640_v47, %v639_v46  ;;  %v3330_v46 = vld [vmem:[%s4616_s5 + $0x8] sm:$0xff]  }
 0x103   : > { %v3333_v47 = vld [vmem:[%s4616_s5 + $0x68] sm:$0xff]  }
 0x104   : > { %3204 = vmatmul.mubr.msk.f32.vlgmr.msra.gmra.mrb[8].mxu0 %vm4626_vm3, %v641_v48  ;;  %v3332_v48 = vld [vmem:[%s4616_s5 + $0x10] sm:$0xff]   ;;  %1321 = vmatpush1.bf16.msra.mxu1 %v3333_v47 }
 0x105   : > { %3277 = vmatpush3.bf16.msra.mxu0 %v3567_v8  ;;  %3222 = vmatprep.mubr.msk.f32.mxu0 %vm4623_vm2, %v4627_v19 }
 0x106   : > { %3278 = vmatprep.subr.bf16.mxu0 %v4634_v9  ;;  %1322 = vmatprep.subr.bf16.mxu1 %v3480_v43 }
 0x108   : > { %1323 = vmatpush1.bf16.msra.mxu1 %v3335_v49 }
 0x109   : > { %3280 = vmatpush3.bf16.msra.mxu0 %v3578_v12  ;;  %1324 = vmatprep.subr.bf16.mxu1 %v3480_v43 }
 0x10a   : > { %3281 = vmatprep.subr.bf16.mxu0 %v4634_v9 }
 0x10d   : > { %3283 = vmatpush3.bf16.msra.mxu0 %v3588_v15 }
 0x10e   : > { %3284 = vmatprep.subr.bf16.mxu0 %v4634_v9 }
 0x111   : > { %3286 = vmatpush3.bf16.msra.mxu0 %v3598_v18 }
 0x112   : > { %1467 = vmatprep.subr.bf16.mxu0 %v3480_v43 }
 0x1d7   : > { %v711_v52 = vpop.f32.mrb[8].mxu0 }
 0x1d8   : > { %v716_v53 = vmul.f32 0.0078125, %v711_v52  ;;  %v3205_v54 = vpop.f32.mrb[9].mxu0  ;;  %v3334_v52 = vld [vmem:[%s4616_s5 + $0x18] sm:$0xff]  }
 0x1d9   : > { %v3336_v54 = vld [vmem:[%s4616_s5 + $0x20] sm:$0xff]  }
 0x1da   : > { %v720_v55 = vrot.slane %v716_v53, %v3649_v51  ;;  %v3337_v53 = vld [vmem:[%s4616_s5 + $0x78] sm:$0xff]  }
 0x1db   : > { %1325 = vmatpush1.bf16.msra.mxu1 %v3337_v53 }
 0x1dc   : > { %v3653_v56 = vsub.f32 %v3606_v21, %v720_v55  ;;  %v3656_v57 = vsub.f32 %v3610_v23, %v720_v55  ;;  %v3659_v58 = vsub.f32 %v3604_v20, %v720_v55  ;;  %v3662_v59 = vsub.f32 %v3608_v22, %v720_v55  ;;  %1326 = vmatprep.subr.bf16.mxu1 %v3480_v43 }
 0x1dd   : > { %v3665_v60 = vsub.f32 %v3622_v31, %v720_v55  ;;  %v3668_v61 = vsub.f32 %v3628_v36, %v720_v55  ;;  %v3671_v62 = vsub.f32 %v3620_v30, %v720_v55  ;;  %v3674_v63 = vsub.f32 %v3626_v34, %v720_v55  ;;  %v3339_v55 = vld [vmem:[%s4616_s5 + $0x80] sm:$0xff]  }
 0x1de   : > { %v729_v0 = vmul.f32 %v3653_v56, %v3653_v56  ;;  %v730_v1 = vmul.f32 %v3656_v57, %v3656_v57  ;;  %v731_v2 = vmul.f32 %v3659_v58, %v3659_v58  ;;  %v732_v3 = vmul.f32 %v3662_v59, %v3662_v59 }
 0x1df   : > { %v733_v7 = vmul.f32 %v3665_v60, %v3665_v60  ;;  %v734_v13 = vmul.f32 %v3668_v61, %v3668_v61  ;;  %v735_v17 = vmul.f32 %v3671_v62, %v3671_v62  ;;  %v736_v26 = vmul.f32 %v3674_v63, %v3674_v63  ;;  %1327 = vmatpush1.bf16.msra.mxu1 %v3339_v55 }
 0x1e0   : > { %v737_v4 = vsel %vm4626_vm3, %v729_v0, 0.0  ;;  %v738_v5 = vsel %vm4626_vm3, %v730_v1, 0.0  ;;  %v740_v10 = vsel %vm4626_vm3, %v731_v2, 0.0  ;;  %v742_v14 = vsel %vm4626_vm3, %v732_v3, 0.0  ;;  %v3338_v0 = vld [vmem:[%s4616_s5 + $0x28] sm:$0xff]   ;;  %1328 = vmatprep.subr.bf16.mxu1 %v3480_v43  ;;  %v3340_v2 = vld [vmem:[%s4616_s5 + $0x30] sm:$0xff]  }
 0x1e1   : > { %v739_v6 = vadd.f32 %v738_v5, %v737_v4  ;;  %v744_v24 = vsel %vm4626_vm3, %v733_v7, 0.0  ;;  %v746_v27 = vsel %vm4626_vm3, %v734_v13, 0.0  ;;  %v748_v29 = vsel %vm4626_vm3, %v735_v17, 0.0  ;;  %v3341_v1 = vld [vmem:[%s4616_s5 + $0x88] sm:$0xff]   ;;  %v3343_v3 = vld [vmem:[%s4616_s5 + $0x90] sm:$0xff]   ;;  %v3342_v4 = vld [vmem:[%s4616_s5 + $0x38] sm:$0xff]  }
 0x1e2   : > { %v750_v33 = vsel %vm4626_vm3, %v736_v26, 0.0  ;;  %v3345_v5 = vld [vmem:[%s4616_s5 + $0x98] sm:$0xff]   ;;  %v3347_v7 = vld [vmem:[%s4616_s5 + $0xa0] sm:$0xff]  }
 0x1e3   : > { %v741_v11 = vadd.f32 %v740_v10, %v739_v6  ;;  %1329 = vmatpush1.bf16.msra.mxu1 %v3341_v1  ;;  %v3344_v6 = vld [vmem:[%s4616_s5 + $0x40] sm:$0xff]   ;;  %v3346_v10 = vld [vmem:[%s4616_s5 + $0x48] sm:$0xff]  }
 0x1e4   : > { %1330 = vmatprep.subr.bf16.mxu1 %v3480_v43 }
 0x1e5   : > { %v743_v16 = vadd.f32 %v742_v14, %v741_v11 }
 0x1e7   : > { %v745_v25 = vadd.f32 %v744_v24, %v743_v16  ;;  %1331 = vmatpush1.bf16.msra.mxu1 %v3343_v3 }
 0x1e8   : > { %1332 = vmatprep.subr.bf16.mxu1 %v3480_v43 }
 0x1e9   : > { %v747_v28 = vadd.f32 %v746_v27, %v745_v25  ;;  %v2900_v25 = vld [vmem:[%s4614_s3] ss:$0 sm:$0xff] }
 0x1eb   : > { %v749_v32 = vadd.f32 %v748_v29, %v747_v28  ;;  %1333 = vmatpush1.bf16.msra.mxu1 %v3345_v5 }
 0x1ec   : > { %1334 = vmatprep.subr.bf16.mxu1 %v3480_v43 }
 0x1ed   : > { %v751_v35 = vadd.f32 %v750_v33, %v749_v32  ;;  %v2901_v32 = vld [vmem:[%s4615_s4] ss:$0 sm:$0xff] }
 0x1ef   : > { %v752_v37 = vrot.slane %v751_v35, 4  ;;  %1335 = vmatpush1.bf16.msra.mxu1 %v3347_v7 }
 0x1f0   : > { %1336 = vmatprep.subr.bf16.mxu1 %v3480_v43 }
 0x1f1   : > { %v753_v38 = vadd.f32 %v752_v37, %v751_v35 }
 0x1f3   : > { %v754_v39 = vrot.slane %v753_v38, 2 }
 0x1f5   : > { %v755_v40 = vadd.f32 %v754_v39, %v753_v38 }
 0x1f7   : > { %v756_v41 = vrot.slane %v755_v40, 1 }
 0x1f9   : > { %v757_v42 = vadd.f32 %v756_v41, %v755_v40 }
 0x1fb   : > { %3223 = vmatmul.mubr.msk.f32.vlgmr.msra.gmra.mrb[10].mxu0 %vm4626_vm3, %v757_v42 }
 0x1fc   : > { %1468 = vmatpush1.bf16.msra.mxu0 %v3329_v44 }
 0x1fd   : > { %1469 = vmatprep.subr.bf16.mxu0 %v3480_v43 }
 0x200   : > { %1470 = vmatpush1.bf16.msra.mxu0 %v3330_v46 }
 0x201   : > { %1471 = vmatprep.subr.bf16.mxu0 %v3480_v43 }
 0x204   : > { %1472 = vmatpush1.bf16.msra.mxu0 %v3332_v48 }
 0x205   : > { %1473 = vmatprep.subr.bf16.mxu0 %v3480_v43 }
 0x208   : > { %1474 = vmatpush1.bf16.msra.mxu0 %v3334_v52 }
 0x209   : > { %1475 = vmatprep.subr.bf16.mxu0 %v3480_v43 }
 0x20c   : > { %1476 = vmatpush1.bf16.msra.mxu0 %v3336_v54 }
 0x20d   : > { %1477 = vmatprep.subr.bf16.mxu0 %v3480_v43 }
 0x210   : > { %1478 = vmatpush1.bf16.msra.mxu0 %v3338_v0 }
 0x211   : > { %1479 = vmatprep.subr.bf16.mxu0 %v3480_v43 }
 0x214   : > { %1480 = vmatpush1.bf16.msra.mxu0 %v3340_v2 }
 0x215   : > { %1481 = vmatprep.subr.bf16.mxu0 %v3480_v43 }
 0x218   : > { %1482 = vmatpush1.bf16.msra.mxu0 %v3342_v4 }
 0x219   : > { %1483 = vmatprep.subr.bf16.mxu0 %v3480_v43 }
 0x21c   : > { %1484 = vmatpush1.bf16.msra.mxu0 %v3344_v6 }
 0x21d   : > { %1485 = vmatprep.subr.bf16.mxu0 %v3480_v43 }
 0x220   : > { %1486 = vmatpush1.bf16.msra.mxu0 %v3346_v10 }
 0x221   : > { %1487 = vmatprep.subr.bf16.mxu0 %v3480_v43 }
 0x2ce   : > { %v827_v11 = vpop.f32.mrb[10].mxu0 }
 0x2cf   : > { %v831_v13 = vmul.f32 0.0078125, %v827_v11  ;;  %v3224_v14 = vpop.f32.mrb[11].mxu0 }
 0x2d1   : > { %v832_v16 = vadd.f32 1e-05, %v831_v13 }
 0x2d3   : > { %3401 = vrsqrt.f32 %v832_v16  ;;  %v396_v16 = vadd.s32 8, %v3646_v50 }
 0x2dd   : > { %v3402_v17 = vpop.eup %3401 }
 0x2de   : > { %v837_v24 = vrot.slane %v3402_v17, %v3649_v51  ;;  %v3826_v17 = vadd.s32 16, %v3646_v50 }
 0x2e0   : > { %v838_v26 = vmul.f32 %v837_v24, %v3653_v56  ;;  %v839_v27 = vmul.f32 %v837_v24, %v3656_v57  ;;  %v840_v28 = vmul.f32 %v837_v24, %v3659_v58  ;;  %v841_v29 = vmul.f32 %v837_v24, %v3662_v59 }
 0x2e1   : > { %v842_v33 = vmul.f32 %v837_v24, %v3665_v60  ;;  %v843_v35 = vmul.f32 %v837_v24, %v3668_v61  ;;  %v844_v37 = vmul.f32 %v837_v24, %v3671_v62  ;;  %v845_v38 = vmul.f32 %v837_v24, %v3674_v63 }
 0x2e2   : > { %v852_v39 = vmul.f32 %v2900_v25, %v838_v26  ;;  %v853_v56 = vmul.f32 %v2900_v25, %v839_v27  ;;  %v854_v40 = vmul.f32 %v2900_v25, %v840_v28  ;;  %v855_v57 = vmul.f32 %v2900_v25, %v841_v29 }
 0x2e3   : > { %v856_v41 = vmul.f32 %v2900_v25, %v842_v33  ;;  %v857_v58 = vmul.f32 %v2900_v25, %v843_v35  ;;  %v858_v42 = vmul.f32 %v2900_v25, %v844_v37  ;;  %v859_v59 = vmul.f32 %v2900_v25, %v845_v38 }
 0x2e4   : > { %v3800_v44 = vadd.f32 %v2901_v32, %v852_v39  ;;  %v3802_v45 = vadd.f32 %v2901_v32, %v853_v56  ;;  %v3804_v46 = vadd.f32 %v2901_v32, %v854_v40  ;;  %v3806_v60 = vadd.f32 %v2901_v32, %v855_v57 }
 0x2e5   : > { %v3808_v61 = vadd.f32 %v2901_v32, %v856_v41  ;;  %v3810_v62 = vadd.f32 %v2901_v32, %v857_v58  ;;  %v3815_v49 = vadd.f32 %v2901_v32, %v858_v42  ;;  %v3818_v53 = vadd.f32 %v2901_v32, %v859_v59 }
 0x2e6   : > { %v2902_v63 = vmul.f32 -1.442695, %v3800_v44  ;;  %v2903_v47 = vmul.f32 -1.442695, %v3802_v45  ;;  %v2904_v48 = vmul.f32 -1.442695, %v3804_v46 }
 0x2e7   : > { %v2905_v52 = vmul.f32 -1.442695, %v3806_v60  ;;  %v2906_v54 = vmul.f32 -1.442695, %v3808_v61  ;;  %v2907_v55 = vmul.f32 -1.442695, %v3810_v62 }
 0x2e8   : > { %3403 = vpow2.f32 %v2902_v63  ;;  %v2908_v0 = vmul.f32 -1.442695, %v3815_v49  ;;  %v2909_v1 = vmul.f32 -1.442695, %v3818_v53  ;;  %v3829_v26 = vadd.s32 24, %v3646_v50  ;;  %v3349_v63 = vld [vmem:[%s4616_s5 + $0xa8] sm:$0xff]  }
 0x2e9   : > { %3405 = vpow2.f32 %v2903_v47  ;;  %v407_v33 = vand.u32 7, %v3646_v50  ;;  %v414_v35 = vand.u32 7, %v396_v16  ;;  %v421_v37 = vand.u32 7, %v3826_v17  ;;  %1337 = vmatpush1.bf16.msra.mxu1 %v3349_v63 }
 0x2ea   : > { %3407 = vpow2.f32 %v2904_v48  ;;  %v428_v38 = vand.u32 7, %v3829_v26  ;;  %v399_v39 = vadd.s32 32, %v3646_v50  ;;  %v400_v56 = vadd.s32 40, %v3646_v50  ;;  %1338 = vmatprep.subr.bf16.mxu1 %v3480_v43 }
 0x2eb   : > { %3409 = vpow2.f32 %v2905_v52  ;;  %v3837_v40 = vadd.s32 48, %v3646_v50  ;;  %v3840_v57 = vadd.s32 56, %v3646_v50  ;;  %vm3842_vm6 = vcmp.eq.s32.totalorder %v407_v33, 7  ;;  %v3348_v50 = vld [vmem:[%s4616_s5 + $0x50] sm:$0xff]  }
 0x2ec   : > { %3411 = vpow2.f32 %v2906_v54  ;;  %v4645_v58 = vmov 0  ;;  %vm3846_vm8 = vcmp.eq.s32.totalorder %v414_v35, 7  ;;  %v4647_v42 = vmov 0  ;;  %1488 = vmatpush1.bf16.msra.mxu0 %v3348_v50 }
 0x2ed   : > { %3413 = vpow2.f32 %v2907_v55  ;;  %v4646_v58 = vsel %vm3842_vm6, 4294967295, %v4645_v58  ;;  %v4648_v42 = vsel %vm3846_vm8, 4294967295, %v4647_v42  ;;  %vm3852_vm9 = vcmp.eq.s32.totalorder %v421_v37, 7  ;;  %1489 = vmatprep.subr.bf16.mxu0 %v3480_v43 }
 0x2ee   : > { %3415 = vpow2.f32 %v2908_v0  ;;  %v4649_v59 = vmov 0  ;;  %vm3867_vm10 = vcmp.eq.s32.totalorder %v428_v38, 7  ;;  %v4651_v52 = vmov 0 }
 0x2ef   : > { %3417 = vpow2.f32 %v2909_v1  ;;  %v4650_v59 = vsel %vm3852_vm9, 4294967295, %v4649_v59  ;;  %v4652_v52 = vsel %vm3867_vm10, 4294967295, %v4651_v52  ;;  %v435_v54 = vand.u32 7, %v399_v39 }
 0x2f0   : > { %v442_v55 = vand.u32 7, %v400_v56  ;;  %vm3879_vm13 = vcmp.eq.s32.totalorder %v407_v33, 0  ;;  %vm3894_vm14 = vcmp.eq.s32.totalorder %v414_v35, 0  ;;  %vm3952_vm5 = vcmp.eq.s32.totalorder %v421_v37, 0 }
 0x2f1   : > { %vm3908_vm15 = vcmp.eq.s32.totalorder %v435_v54, 0  ;;  %vm3932_vm1 = vcmp.eq.s32.totalorder %v435_v54, 7  ;;  %vm3963_vm3 = vcmp.eq.s32.totalorder %v428_v38, 0 }
 0x2f2   : > { %v3404_v2 = vpop.eup %3403  ;;  %vm3912_vm0 = vcmp.eq.s32.totalorder %v442_v55, 0  ;;  %vm3936_vm2 = vcmp.eq.s32.totalorder %v442_v55, 7 }
 0x2f3   : > { %v3406_v3 = vpop.eup %3405  ;;  %v898_v4 = vadd.f32 1.0, %v3404_v2  ;;  %v449_v2 = vand.u32 7, %v3837_v40 }
 0x2f4   : > { %v3408_v5 = vpop.eup %3407  ;;  %v899_v6 = vadd.f32 1.0, %v3406_v3 }
 0x2f5   : > { %v3410_v7 = vpop.eup %3409  ;;  %3419 = vrcp.f32 %v898_v4  ;;  %v900_v10 = vadd.f32 1.0, %v3408_v5  ;;  %vm3972_vm4 = vcmp.eq.s32.totalorder %v449_v2, 0 }
 0x2f6   : > { %v3412_v11 = vpop.eup %3411  ;;  %3421 = vrcp.f32 %v899_v6  ;;  %v901_v13 = vadd.f32 1.0, %v3410_v7 }
 0x2f7   : > { %v3414_v14 = vpop.eup %3413  ;;  %v902_v24 = vadd.f32 1.0, %v3412_v11  ;;  %3423 = vrcp.f32 %v900_v10 }
 0x2f8   : > { %v3416_v25 = vpop.eup %3415  ;;  %v903_v27 = vadd.f32 1.0, %v3414_v14  ;;  %3425 = vrcp.f32 %v901_v13  ;;  %v4655_v14 = vmov 0 }
 0x2f9   : > { %v3418_v28 = vpop.eup %3417  ;;  %3427 = vrcp.f32 %v902_v24  ;;  %v904_v29 = vadd.f32 1.0, %v3416_v25  ;;  %v4656_v14 = vsel %vm3894_vm14, 4294967295, %v4655_v14 }
 0x2fa   : > { %3429 = vrcp.f32 %v903_v27  ;;  %v905_v32 = vadd.f32 1.0, %v3418_v28 }
 0x2fb   : > { %3431 = vrcp.f32 %v904_v29  ;;  %v4659_v29 = vmov 0 }
 0x2fc   : > { %3433 = vrcp.f32 %v905_v32  ;;  %v4660_v29 = vsel %vm3912_vm0, 4294967295, %v4659_v29  ;;  %v3351_v32 = vld [vmem:[%s4616_s5 + $0xb0] sm:$0xff]  }
 0x2fd   : > { %1339 = vmatpush1.bf16.msra.mxu1 %v3351_v32 }
 0x2fe   : > { %1340 = vmatprep.subr.bf16.mxu1 %v3480_v43 }
 0x2ff   : > { %v3420_v41 = vpop.eup %3419 }
 0x300   : > { %v3422_v47 = vpop.eup %3421  ;;  %v3863_v48 = vmul.f32 %v3420_v41, %v3800_v44 }
 0x301   : > { %v3424_v0 = vpop.eup %3423  ;;  %v3872_v1 = vmul.f32 %v3422_v47, %v3802_v45  ;;  %v456_v45 = vand.u32 7, %v3840_v57 }
 0x302   : > { %v3426_v44 = vpop.eup %3425  ;;  %v1004_v3 = vrot.slane %v3863_v48, 1  ;;  %v3877_v4 = vmul.f32 %v3424_v0, %v3804_v46  ;;  %v947_v6 = vrot.slane %v3863_v48, 7 }
 0x303   : > { %v3428_v7 = vpop.eup %3427  ;;  %v948_v10 = vrot.slane %v3872_v1, 7  ;;  %v1005_v11 = vrot.slane %v3872_v1, 1  ;;  %v1078_v46 = vpack.c.bf16 %v3872_v1, %v3863_v48  ;;  %v3892_v13 = vmul.f32 %v3426_v44, %v3806_v60 }
 0x304   : > { %v3430_v16 = vpop.eup %3429  ;;  %v3899_v24 = vmul.f32 %v3428_v7, %v3808_v61  ;;  %v1007_v27 = vrot.slane %v3877_v4, 1  ;;  %v3906_v28 = vsel %vm4631_vm12, 0.0, %v947_v6  ;;  %v4657_v60 = vmov 0  ;;  %v3350_v61 = vld [vmem:[%s4616_s5 + $0x58] sm:$0xff]  }
 0x305   : > { %v4658_v60 = vsel %vm3908_vm15, 4294967295, %v4657_v60  ;;  %v3432_v33 = vpop.eup %3431  ;;  %v1086_v35 = vrot.slane %v1078_v46, 4  ;;  %v1006_v39 = vsel %vm4630_vm7, %v1004_v3, %v1005_v11  ;;  %v3924_v56 = vmul.f32 %v3430_v16, %v3810_v62  ;;  %1490 = vmatpush1.bf16.msra.mxu0 %v3350_v61  ;;  %v3352_v62 = vld [vmem:[%s4616_s5 + $0xb8] sm:$0xff]  }
 0x306   : > { %v952_v40 = vrot.slane %v3892_v13, 7  ;;  %v1044_v57 = vsel %vm3842_vm6, 0.0, %v1006_v39  ;;  %v954_v41 = vrot.slane %v3899_v24, 7  ;;  %v1009_v50 = vrot.slane %v3892_v13, 1  ;;  %v3434_v44 = vpop.eup %3433  ;;  %3287 = vmatprep.subr.bf16.mxu0 %v4634_v9  ;;  %1341 = vmatpush1.bf16.msra.mxu1 %v3352_v62 }
 0x307   : > { %v1011_v63 = vrot.slane %v3899_v24, 1  ;;  %1093 = vrot.lane.b32.xlu0 %v1086_v35, %s3481_s29  ;;  %v956_v3 = vrot.slane %v3924_v56, 7  ;;  %v1013_v54 = vrot.slane %v3924_v56, 1  ;;  %v1079_v55 = vpack.c.bf16 %v3892_v13, %v3877_v4  ;;  %1634 = vmatprep.subr.bf16.mxu1 %v3480_v43 }
 0x308   : > { %v1080_v7 = vpack.c.bf16 %v3924_v56, %v3899_v24  ;;  %v1008_v61 = vsel %vm4630_vm7, %v1005_v11, %v1007_v27  ;;  %v1010_v32 = vsel %vm4630_vm7, %v1007_v27, %v1009_v50  ;;  %v928_v39 = vmul.f32 %v3432_v33, %v3815_v49 }
 0x309   : > { %v1012_v16 = vsel %vm4630_vm7, %v1009_v50, %v1011_v63  ;;  %v1087_v37 = vrot.slane %v1079_v55, 4  ;;  %v1045_v11 = vsel %vm3846_vm8, 0.0, %v1008_v61  ;;  %v4669_v27 = vmov 0 }
 0x30a   : > { %v1047_v17 = vsel %vm3867_vm10, 0.0, %v1012_v16  ;;  %v1089_v19 = vrot.slane %v1080_v7, 4  ;;  %v4670_v27 = vsel %vm3972_vm4, 4294967295, %v4669_v27  ;;  %vm3976_vm7 = vcmp.eq.s32.totalorder %v456_v45, 0 }
 0x30b   : > { %v4671_v49 = vmov 0  ;;  %v1046_v26 = vsel %vm3852_vm9, 0.0, %v1010_v32  ;;  %v1116_v38 = vpack.c.bf16 %v1045_v11, %v1044_v57  ;;  %v929_v33 = vmul.f32 %v3434_v44, %v3818_v53 }
 0x30c   : > { %v4672_v49 = vsel %vm3976_vm7, 4294967295, %v4671_v49  ;;  %v958_v50 = vrot.slane %v928_v39, 7  ;;  %vm3983_vm12 = vcmp.eq.s32.totalorder %v449_v2, 7  ;;  %v4673_v55 = vmov 0 }
 0x30d   : > { %v4674_v55 = vsel %vm3983_vm12, 4294967295, %v4673_v55  ;;  %vm3987_vm11 = vcmp.eq.s32.totalorder %v456_v45, 7  ;;  %v4675_v7 = vmov 0  ;;  %vm4677_vm10 = vcmask 1043456  }
 0x30e   : > { %v4676_v7 = vsel %vm3987_vm11, 4294967295, %v4675_v7  ;;  %v1090_v16 = vsel %vm4677_vm10, %v1087_v37, %v1089_v19  ;;  %v1117_v61 = vpack.c.bf16 %v1047_v17, %v1046_v26  ;;  %vm4678_vm8 = vmmov %vm4677_vm10  ;;  %v1015_v25 = vrot.slane %v928_v39, 1 }
 0x30f   : > { %v1088_v9 = vsel %vm4678_vm8, %v1086_v35, %v1087_v37  ;;  %1097 = vrot.lane.b32.xlu1 %v1090_v16, %s3481_s29  ;;  %v1124_v53 = vrot.slane %v1116_v38, 4  ;;  %v960_v2 = vrot.slane %v929_v33, 7  ;;  %v1017_v57 = vrot.slane %v929_v33, 1 }
 0x310   : > { %1095 = vrot.lane.b32.xlu0 %v1088_v9, %s3481_s29  ;;  %v1081_v45 = vpack.c.bf16 %v929_v33, %v928_v39  ;;  %v1125_v44 = vrot.slane %v1117_v61, 4  ;;  %vm4679_vm10 = vcmask 1040384   ;;  %v987_v35 = vsel %vm3879_vm13, 0.0, %v3906_v28 }
 0x311   : > { %v949_v62 = vsel %vm4679_vm10, %v947_v6, %v948_v10  ;;  %vm4680_vm8 = vmmov %vm4679_vm10  ;;  %vm4681_vm9 = vcmask 523268   ;;  %vm4682_vm6 = vcmask 1046528   ;;  %vm4684_vm10 = vcmask 1043456  }
 0x312   : > { %v955_v32 = vsel %vm4680_vm8, %v952_v40, %v954_v41  ;;  %1136 = vst.msk [vmem:[#allocation2 + $0x8] sm:$0xf0] %vm4681_vm9, %v1124_v53  ;;  %v1027_v9 = vsel %vm4682_vm6, %v1017_v57, 0.0  ;;  %v1091_v39 = vrot.slane %v1081_v45, 4  ;;  %v988_v17 = vsel %vm3894_vm14, 0.0, %v949_v62  ;;  %vm4683_vm11 = vmmov %vm4680_vm8 }
 0x313   : > { %v957_v48 = vsel %vm4683_vm11, %v954_v41, %v956_v3  ;;  %v1126_v6 = vsel %vm4684_vm10, %v1124_v53, %v1125_v44  ;;  %v1052_v37 = vpack.c.bf16 %v988_v17, %v987_v35  ;;  %v991_v28 = vsel %vm3908_vm15, 0.0, %v955_v32  ;;  %vm4686_vm6 = vmmov %vm4684_vm10 }
 0x314   : > { %v992_v11 = vsel %vm3912_vm0, 0.0, %v957_v48  ;;  %vm4685_vm9 = vcmask 523264   ;;  %v1092_v26 = vsel %vm4686_vm6, %v1089_v19, %v1091_v39  ;;  %1101 = vrot.lane.b32.xlu0 %v1091_v39, %s3481_s29  ;;  %vm4687_vm8 = vcmask 1046528  }
 0x315   : > { %1137 = vst.msk [vmem:[#allocation2 + $0x18] sm:$0xff] %vm4685_vm9, %v1126_v6  ;;  %v1014_v38 = vsel %vm4687_vm8, %v1011_v63, %v1013_v54  ;;  %vm4688_vm14 = vmmov %vm4687_vm8  ;;  %v1054_v41 = vpack.c.bf16 %v992_v11, %v991_v28  ;;  %1099 = vrot.lane.b32.xlu1 %v1092_v26, %s3481_s29  ;;  %v1061_v16 = vrot.slane %v1052_v37, 4  ;;  %v4689_v45 = vrot.slane %v3877_v4, 7 }
 0x316   : > { %v1016_v33 = vsel %vm4688_vm14, %v1013_v54, %v1015_v25  ;;  %v1048_v61 = vsel %vm3932_vm1, 0.0, %v1014_v38  ;;  %vm4691_vm14 = vmmov %vm4683_vm11  ;;  %vm4692_vm10 = vcmask 523268   ;;  %v1018_v13 = vsel %vm4687_vm8, %v1015_v25, %v1017_v57 }
 0x317   : > { %v1049_v53 = vsel %vm3936_vm2, 0.0, %v1016_v33  ;;  %v951_v19 = vsel %vm4683_vm11, %v948_v10, %v4689_v45  ;;  %v1064_v62 = vrot.slane %v1054_v41, 4  ;;  %v4690_v54 = vmov %v4689_v45  ;;  %1073 = vst.msk [vmem:[#allocation2] sm:$0xf0] %vm4692_vm10, %v1061_v16  ;;  %vm4693_vm9 = vmmov %vm4683_vm11 }
 0x318   : > { %v1118_v63 = vpack.c.bf16 %v1049_v53, %v1048_v61  ;;  %v953_v35 = vsel %vm4691_vm14, %v4690_v54, %v952_v40  ;;  %v989_v32 = vsel %vm3952_vm5, 0.0, %v951_v19  ;;  %v959_v1 = vsel %vm4693_vm9, %v956_v3, %v958_v50  ;;  %vm4694_vm6 = vmmov %vm4693_vm9 }
 0x319   : > { %v990_v39 = vsel %vm3963_vm3, 0.0, %v953_v35  ;;  %v961_v10 = vsel %vm4694_vm6, %v958_v50, %v960_v2  ;;  %v993_v40 = vsel %vm3972_vm4, 0.0, %v959_v1  ;;  %v1142_v6 = vld [vmem:[#allocation2 + $0x8] sm:$0xff]  ;;  %v1050_v28 = vsel %vm3983_vm12, 0.0, %v1018_v13 }
 0x31a   : > { %v1127_v17 = vrot.slane %v1118_v63, 4  ;;  %v1053_v4 = vpack.c.bf16 %v990_v39, %v989_v32  ;;  %v994_v48 = vsel %vm3976_vm7, 0.0, %v961_v10  ;;  %v1174_v37 = vld [vmem:[#allocation2 + $0x8] sm:$0xf0]  ;;  %vm4695_vm11 = vnez %v4676_v7 }
 0x31b   : > { %v1051_v56 = vsel %vm4695_vm11, 0.0, %v1027_v9  ;;  %v1055_v3 = vpack.c.bf16 %v994_v48, %v993_v40  ;;  %vm4696_vm14 = vcmask 523264   ;;  %v1215_v25 = vrot.slane %v1174_v37, 4 }
 0x31c   : > { %2962 = vmatprep.mubr.msk.bf16.mxu0 %vm4696_vm14, %v1142_v6  ;;  %v1062_v50 = vrot.slane %v1053_v4, 4  ;;  %vm4697_vm10 = vcmask 1043456   ;;  %v1119_v57 = vpack.c.bf16 %v1051_v56, %v1050_v28  ;;  %v4059_v11 = vld [vmem:[#allocation2 + $0x18] sm:$0xff]  ;;  %vm4698_vm9 = vmmov %vm4696_vm14  ;;  %vm1108_vm12 = vcmask 1048068   ;;  %v3353_v4 = vld [vmem:[%s4616_s5 + $0xc0] sm:$0xff]  }
 0x31d   : > { %v1128_v2 = vsel %vm4697_vm10, %v1125_v44, %v1127_v17  ;;  %v1066_v26 = vrot.slane %v1055_v3, 4  ;;  %v1216_v38 = vrot.slane %v4059_v11, 4  ;;  %vm4699_vm6 = vmmov %vm4697_vm10  ;;  %vm4704_vm10 = vcmask 519168   ;;  %v3354_v6 = vld [vmem:[%s4616_s5 + $0xc8] sm:$0xff]  }
 0x31e   : > { %1138 = vst.msk [vmem:[#allocation2 + $0x28] sm:$0xff] %vm4698_vm9, %v1128_v2  ;;  %v1065_v33 = vsel %vm4699_vm6, %v1062_v50, %v1064_v62  ;;  %vm4700_vm8 = vmmov %vm4699_vm6  ;;  %v1129_v9 = vrot.slane %v1119_v57, 4  ;;  %v4712_v39 = vmov 0.0|0.0  }
 0x31f   : > { %v1063_v41 = vsel %vm4700_vm8, %v1061_v16, %v1062_v50  ;;  %vm4701_vm7 = vmmov %vm4698_vm9  ;;  %1077 = vst.msk [vmem:[#allocation2 + $0x40] sm:$0xf] %vm4704_vm10, %v1066_v26 }
 0x320   : > { %1075 = vst.msk [vmem:[#allocation2 + $0x20] sm:$0xff] %vm4701_vm7, %v1065_v33  ;;  %vm4702_vm14 = vmmov %vm4701_vm7 }
 0x321   : > { %1074 = vst.msk [vmem:[#allocation2 + $0x10] sm:$0xff] %vm4702_vm14, %v1063_v41  ;;  %vm4703_vm4 = vmmov %vm4699_vm6 }
 0x322   : > { %v1067_v61 = vsel %vm4703_vm4, %v1064_v62, %v1066_v26  ;;  %vm4705_vm0 = vmmov %vm4703_vm4  ;;  %vm1114_vm4 = vcmask 1043968   ;;  %v3356_v26 = vld [vmem:[%s4616_s5 + $0xd8] sm:$0xff]  }
 0x323   : > { %v1217_v44 = vsel %vm4705_vm0, %v1215_v25, %v1216_v38  ;;  %vm4706_vm15 = vmmov %vm4701_vm7  ;;  %v3355_v25 = vld [vmem:[%s4616_s5 + $0xd0] sm:$0xff]  }
 0x324   : > { %1076 = vst.msk [vmem:[#allocation2 + $0x30] sm:$0xff] %vm4706_vm15, %v1067_v61  ;;  %vm4707_vm9 = vmmov %vm4705_vm0 }
 0x325   : > { %v1130_v53 = vsel %vm4707_vm9, %v1127_v17, %v1129_v9  ;;  %vm4708_vm11 = vmmov %vm4704_vm10  ;;  %v4081_v35 = vld [vmem:[#allocation2 + $0x28] sm:$0xff] }
 0x326   : > { %1140 = vst.msk [vmem:[#allocation2 + $0x48] sm:$0xf] %vm4708_vm11, %v1129_v9  ;;  %vm4709_vm6 = vmmov %vm4701_vm7  ;;  %vm1110_vm7 = vcmask 1048064   ;;  %v1220_v10 = vrot.slane %v4081_v35, 4  ;;  %v3357_v9 = vld [vmem:[%s4616_s5 + $0xe0] sm:$0xff]  }
 0x327   : > { %2946 = vmatprep.mubr.msk.bf16.mxu1 %vm4709_vm6, %v1217_v44  ;;  %vm4710_vm8 = vmmov %vm4709_vm6 }
 0x328   : > { %1139 = vst.msk [vmem:[#allocation2 + $0x38] sm:$0xff] %vm4710_vm8, %v1130_v53  ;;  %vm4711_vm15 = vmmov %vm4709_vm6 }
 0x329   : > { %vm4713_vm11 = vmmov %vm4705_vm0 }
 0x32a   : > { %v1221_v48 = vsel %vm4713_vm11, %v1216_v38, %v1220_v10  ;;  %vm4714_vm14 = vmmov %vm4709_vm6 }
 0x32b   : > { %vm4715_vm10 = vmmov %vm4709_vm6 }
 0x32c   : > { %vm4716_vm9 = vmmov %vm4705_vm0 }
 0x32d   : > { %vm4717_vm6 = vmmov %vm4705_vm0  ;;  %v1176_v38 = vld [vmem:[#allocation2 + $0x48] sm:$0xf] }
 0x32e   : > { %v1228_v41 = vrot.slane %v1176_v38, 4  ;;  %vm4719_vm11 = vmmov %vm4705_vm0 }
 0x32f   : > { %v4102_v37 = vld [vmem:[#allocation2 + $0x38] sm:$0xff] }
 0x330   : > { %v1224_v56 = vrot.slane %v4102_v37, 4 }
 0x332   : > { %v1225_v2 = vsel %vm4717_vm6, %v1220_v10, %v1224_v56  ;;  %v1229_v44 = vsel %vm4719_vm11, %v1224_v56, %v1228_v41  ;;  %vm4724_vm6 = vmmov %vm4710_vm8  ;;  %v3362_v10 = vld [vmem:[%s4616_s5 + $0x108] sm:$0xff]  }
 0x379   : > { %v1094_v16 = vpop.permute.xlu0 %1093 }
 0x37a   : > { %1109 = vst.msk [vmem:[#allocation2] sm:$0xf0] %vm1108_vm12, %v1094_v16  ;;  %v3358_v16 = vld [vmem:[%s4616_s5 + $0xe8] sm:$0xff]  }
 0x381   : > { %v1098_v45 = vpop.permute.xlu1 %1097  ;;  %v1141_v62 = vld [vmem:[#allocation2] sm:$0xff] }
 0x382   : > { %v1096_v19 = vpop.permute.xlu0 %1095  ;;  %1112 = vst.msk [vmem:[#allocation2 + $0x20] sm:$0xff] %vm1110_vm7, %v1098_v45  ;;  %1500 = vmatmul.mubr.bf16.vlgmr.msra.gmra.mrb[12].mxu0 %v1141_v62  ;;  %v1173_v32 = vld [vmem:[#allocation2] sm:$0xf0]  ;;  %v4721_v45 = vmov 0.0   ;;  %v3359_v62 = vld [vmem:[%s4616_s5 + $0xf0] sm:$0xff]  }
 0x383   : > { %1111 = vst.msk [vmem:[#allocation2 + $0x10] sm:$0xff] %vm1110_vm7, %v1096_v19  ;;  %2963 = vmatprep.mubr.msk.bf16.mxu0 %vm4711_vm15, %v4059_v11  ;;  %3289 = vmatpush3.bf16.msra.mxu0 %v3567_v8  ;;  %v1212_v13 = vrot.slane %v1173_v32, 4  ;;  %vm4718_vm15 = vmmov %vm4710_vm8  ;;  %v3361_v32 = vld [vmem:[%s4616_s5 + $0x100] sm:$0xff]  }
 0x384   : > { %3290 = vmatprep.subr.bf16.mxu0 %v4712_v39 }
 0x386   : > { %v1102_v63 = vpop.permute.xlu0 %1101 }
 0x387   : > { %v1100_v54 = vpop.permute.xlu1 %1099  ;;  %1115 = vst.msk [vmem:[#allocation2 + $0x40] sm:$0xf] %vm1114_vm4, %v1102_v63  ;;  %3292 = vmatpush3.bf16.msra.mxu0 %v3578_v12 }
 0x388   : > { %1113 = vst.msk [vmem:[#allocation2 + $0x30] sm:$0xff] %vm1110_vm7, %v1100_v54  ;;  %3293 = vmatprep.subr.bf16.mxu0 %v4712_v39  ;;  %v3360_v54 = vld [vmem:[%s4616_s5 + $0xf8] sm:$0xff]  }
 0x389   : > { %v1145_v28 = vld [vmem:[#allocation2 + $0x20] sm:$0xff] }
 0x38a   : > { %v4086_v1 = vld [vmem:[#allocation2 + $0x10] sm:$0xff]  ;;  %v1218_v3 = vrot.slane %v1145_v28, 4 }
 0x38b   : > { %v1213_v17 = vrot.slane %v4086_v1, 4  ;;  %1508 = vmatmul.mubr.bf16.gmra.mrb[16].mxu0 %v4086_v1 }
 0x38c   : > { %2964 = vmatprep.mubr.msk.bf16.mxu0 %vm4715_vm10, %v4081_v35  ;;  %3295 = vmatpush3.bf16.msra.mxu0 %v3588_v15  ;;  %vm4722_vm10 = vmmov 0  }
 0x38d   : > { %v1214_v40 = vsel %vm4705_vm0, %v1212_v13, %v1213_v17  ;;  %3296 = vmatprep.subr.bf16.mxu0 %v4712_v39  ;;  %v1219_v50 = vsel %vm4716_vm9, %v1213_v17, %v1218_v3  ;;  %vm4723_vm9 = vmmov %vm4705_vm0  ;;  %v3364_v13 = vld [vmem:[%s4616_s5 + $0x118] sm:$0xff]   ;;  %v1533_v17 = vld [vmem:[#allocation2 + $0x48] sm:$0xff] }
 0x38e   : > { %1351 = vmatmul.mubr.bf16.vlgmr.msra.gmra.mrb[0].mxu1 %v1214_v40  ;;  %v1175_v53 = vld [vmem:[#allocation2 + $0x40] sm:$0xf] }
 0x38f   : > { %1635 = vmatpush1.bf16.msra.mxu1 %v3353_v4  ;;  %2947 = vmatprep.mubr.msk.bf16.mxu1 %vm4714_vm14, %v1221_v48  ;;  %v1147_v57 = vld [vmem:[#allocation2 + $0x30] sm:$0xff]  ;;  %vm4720_vm14 = vmmov %vm4710_vm8  ;;  %v1226_v19 = vrot.slane %v1175_v53, 4  ;;  %v1532_v4 = vld [vmem:[#allocation2 + $0x40] sm:$0xff] }
 0x390   : > { %1636 = vmatprep.subr.bf16.mxu1 %v3480_v43  ;;  %3298 = vmatpush3.bf16.msra.mxu0 %v3598_v18  ;;  %v1222_v33 = vrot.slane %v1147_v57, 4 }
 0x391   : > { %3299 = vmatprep.subr.bf16.mxu0 %v4712_v39 }
 0x392   : > { %v1223_v61 = vsel %vm4705_vm0, %v1218_v3, %v1222_v33  ;;  %v1227_v63 = vsel %vm4723_vm9, %v1222_v33, %v1226_v19  ;;  %vm4727_vm0 = vmmov %vm4724_vm6 }
 0x393   : > { %1637 = vmatpush1.bf16.msra.mxu1 %v3354_v6  ;;  %1516 = vmatmul.mubr.bf16.gmra.mrb[20].mxu0 %v1145_v28  ;;  %vm4728_vm11 = vmmov %vm4727_vm0 }
 0x394   : > { %1638 = vmatprep.subr.bf16.mxu1 %v3480_v43  ;;  %2965 = vmatprep.mubr.msk.bf16.mxu0 %vm4718_vm15, %v4102_v37  ;;  %vm4726_vm15 = vmmov %vm4724_vm6 }
 0x395   : > { %vm4730_vm9 = vmmov %vm4727_vm0 }
 0x396   : > { %1359 = vmatmul.mubr.bf16.gmra.mrb[4].mxu1 %v1219_v50 }
 0x397   : > { %1639 = vmatpush1.bf16.msra.mxu1 %v3355_v25  ;;  %2948 = vmatprep.mubr.msk.bf16.mxu1 %vm4710_vm8, %v1225_v2  ;;  %vm4725_vm8 = vmmov %vm4724_vm6 }
 0x398   : > { %1640 = vmatprep.subr.bf16.mxu1 %v3480_v43 }
 0x39b   : > { %1641 = vmatpush1.bf16.msra.mxu1 %v3356_v26  ;;  %1524 = vmatmul.mubr.bf16.gmra.mrb[24].mxu0 %v1147_v57 }
 0x39c   : > { %1642 = vmatprep.subr.bf16.mxu1 %v3480_v43  ;;  %3241 = vmatprep.mubr.msk.f32.mxu0 %vm4722_vm10, %v4721_v45 }
 0x39e   : > { %1367 = vmatmul.mubr.bf16.gmra.mrb[8].mxu1 %v1223_v61 }
 0x39f   : > { %1643 = vmatpush1.bf16.msra.mxu1 %v3357_v9  ;;  %2949 = vmatprep.mubr.msk.bf16.mxu1 %vm4720_vm14, %v1229_v44  ;;  %vm4729_vm14 = vmmov %vm4727_vm0 }
 0x3a0   : > { %1644 = vmatprep.subr.bf16.mxu1 %v3480_v43 }
 0x3a3   : > { %1645 = vmatpush1.bf16.msra.mxu1 %v3358_v16 }
 0x3a4   : > { %1646 = vmatprep.subr.bf16.mxu1 %v3480_v43 }
 0x3a6   : > { %1375 = vmatmul.mubr.bf16.gmra.mrb[12].mxu1 %v1227_v63 }
 0x3a7   : > { %1647 = vmatpush1.bf16.msra.mxu1 %v3359_v62  ;;  %3002 = vmatprep.mubr.msk.bf16.mxu1 %vm4724_vm6, %v4059_v11  ;;  %v3363_v11 = vld [vmem:[%s4616_s5 + $0x110] sm:$0xff]   ;;  %vm4731_vm6 = vmmov %vm4727_vm0 }
 0x3a8   : > { %1648 = vmatprep.subr.bf16.mxu1 %v3480_v43 }
 0x3ab   : > { %1649 = vmatpush1.bf16.msra.mxu1 %v3360_v54 }
 0x3ac   : > { %1650 = vmatprep.subr.bf16.mxu1 %v3480_v43 }
 0x3af   : > { %1651 = vmatpush1.bf16.msra.mxu1 %v3361_v32 }
 0x3b0   : > { %1652 = vmatprep.subr.bf16.mxu1 %v3480_v43 }
 0x3b3   : > { %1653 = vmatpush1.bf16.msra.mxu1 %v3362_v10 }
 0x3b4   : > { %1654 = vmatprep.subr.bf16.mxu1 %v3480_v43 }
 0x3b7   : > { %1655 = vmatpush1.bf16.msra.mxu1 %v3363_v11 }
 0x3b8   : > { %1656 = vmatprep.subr.bf16.mxu1 %v3480_v43 }
 0x3bb   : > { %1657 = vmatpush1.bf16.msra.mxu1 %v3364_v13 }
 0x3bc   : > { %2366 = vmatprep.subr.bf16.mxu1 %v3480_v43 }
 0x3be   : > { %1667 = vmatmul.mubr.bf16.vlgmr.msra.gmra.mrb[16].mxu1 %v4086_v1 }
 0x3bf   : > { %3003 = vmatprep.mubr.msk.bf16.mxu1 %vm4725_vm8, %v4081_v35  ;;  %vm4732_vm8 = vmmov %vm4727_vm0 }
 0x3c6   : > { %1675 = vmatmul.mubr.bf16.gmra.mrb[20].mxu1 %v1145_v28 }
 0x3c7   : > { %3004 = vmatprep.mubr.msk.bf16.mxu1 %vm4726_vm15, %v4102_v37  ;;  %vm4733_vm15 = vmmov %vm4727_vm0 }
 0x3ce   : > { %1683 = vmatmul.mubr.bf16.gmra.mrb[24].mxu1 %v1147_v57 }
 0x3cf   : > { %3005 = vmatprep.mubr.msk.bf16.mxu1 %vm4727_vm0, %v1533_v17 }
 0x3d6   : > { %1691 = vmatmul.mubr.bf16.gmra.mrb[28].mxu1 %v1532_v4 }
 0x455   : > { %v1501_v40 = vpop.f32.mrb[12].mxu0 }
 0x456   : > { %v1503_v48 = vpop.f32.mrb[13].mxu0 }
 0x457   : > { %v1504_v6 = vpop.f32.mrb[14].mxu0 }
 0x458   : > { %v1506_v56 = vpop.f32.mrb[15].mxu0 }
 0x45e   : > { %v1509_v25 = vpop.f32.mrb[16].mxu0 }
 0x45f   : > { %v1511_v2 = vpop.f32.mrb[17].mxu0 }
 0x460   : > { %v1512_v28 = vpop.f32.mrb[18].mxu0 }
 0x461   : > { %v1352_v3 = vpop.f32.mrb[0].mxu1  ;;  %v1514_v37 = vpop.f32.mrb[19].mxu0 }
 0x462   : > { %v1502_v1 = vadd.f32 %v1501_v40, %v1352_v3  ;;  %v1354_v50 = vpop.f32.mrb[1].mxu1 }
 0x463   : > { %v1355_v35 = vpop.f32.mrb[2].mxu1 }
 0x464   : > { %v1505_v26 = vadd.f32 %v1504_v6, %v1355_v35  ;;  %v1357_v38 = vpop.f32.mrb[3].mxu1 }
 0x466   : > { %v1517_v33 = vpop.f32.mrb[20].mxu0 }
 0x467   : > { %v1519_v61 = vpop.f32.mrb[21].mxu0 }
 0x468   : > { %v1520_v53 = vpop.f32.mrb[22].mxu0 }
 0x469   : > { %v1360_v57 = vpop.f32.mrb[4].mxu1  ;;  %v1522_v62 = vpop.f32.mrb[23].mxu0 }
 0x46a   : > { %v1510_v41 = vadd.f32 %v1509_v25, %v1360_v57  ;;  %v1362_v9 = vpop.f32.mrb[5].mxu1 }
 0x46b   : > { %v1363_v44 = vpop.f32.mrb[6].mxu1 }
 0x46c   : > { %v1513_v16 = vadd.f32 %v1512_v28, %v1363_v44  ;;  %v1365_v19 = vpop.f32.mrb[7].mxu1 }
 0x46e   : > { %v1525_v54 = vpop.f32.mrb[24].mxu0 }
 0x46f   : > { %v1527_v11 = vpop.f32.mrb[25].mxu0 }
 0x470   : > { %v1528_v17 = vpop.f32.mrb[26].mxu0 }
 0x471   : > { %v1368_v63 = vpop.f32.mrb[8].mxu1  ;;  %v1530_v48 = vpop.f32.mrb[27].mxu0 }
 0x472   : > { %v1518_v32 = vadd.f32 %v1517_v33, %v1368_v63  ;;  %v1370_v10 = vpop.f32.mrb[9].mxu1  ;;  %v3006_v33 = vld [vmem:[%s4617_s6] ss:$0 sm:$0xff] }
 0x473   : > { %v1371_v13 = vpop.f32.mrb[10].mxu1 }
 0x474   : > { %v1521_v4 = vadd.f32 %v1520_v53, %v1371_v13  ;;  %v1373_v40 = vpop.f32.mrb[11].mxu1 }
 0x479   : > { %v1376_v6 = vpop.f32.mrb[12].mxu1 }
 0x47a   : > { %v1526_v56 = vadd.f32 %v1525_v54, %v1376_v6  ;;  %v1378_v3 = vpop.f32.mrb[13].mxu1 }
 0x47b   : > { %v1379_v25 = vpop.f32.mrb[14].mxu1 }
 0x47c   : > { %v1529_v50 = vadd.f32 %v1528_v17, %v1379_v25  ;;  %v1381_v2 = vpop.f32.mrb[15].mxu1 }
 0x491   : > { %v1668_v35 = vpop.f32.mrb[16].mxu1 }
 0x492   : > { %v1699_v28 = vadd.f32 %v1668_v35, %v1502_v1  ;;  %v1670_v38 = vpop.f32.mrb[17].mxu1 }
 0x493   : > { %v1671_v37 = vpop.f32.mrb[18].mxu1 }
 0x494   : > { %v1700_v57 = vadd.f32 %v1671_v37, %v1505_v26  ;;  %v1673_v9 = vpop.f32.mrb[19].mxu1  ;;  %v1714_v63 = vadd.f32 %v3006_v33, %v1699_v28 }
 0x496   : > { %v1715_v44 = vadd.f32 %v3006_v33, %v1700_v57  ;;  %v1724_v1 = vsel %vm4729_vm14, %v1714_v63, 0.0  ;;  %vm4735_vm14 = vmmov %vm4727_vm0 }
 0x498   : > { %v1725_v13 = vsel %vm4728_vm11, %v1715_v44, 0.0  ;;  %vm4734_vm11 = vmmov %vm4727_vm0 }
 0x499   : > { %v1676_v61 = vpop.f32.mrb[20].mxu1  ;;  %v1726_v40 = vadd.f32 %v1725_v13, %v1724_v1 }
 0x49a   : > { %v1701_v53 = vadd.f32 %v1676_v61, %v1510_v41  ;;  %v1678_v19 = vpop.f32.mrb[21].mxu1 }
 0x49b   : > { %v1679_v62 = vpop.f32.mrb[22].mxu1 }
 0x49c   : > { %v1716_v54 = vadd.f32 %v3006_v33, %v1701_v53  ;;  %v1702_v10 = vadd.f32 %v1679_v62, %v1513_v16  ;;  %v1681_v11 = vpop.f32.mrb[23].mxu1 }
 0x49e   : > { %v1727_v26 = vsel %vm4730_vm9, %v1716_v54, 0.0  ;;  %v1717_v17 = vadd.f32 %v3006_v33, %v1702_v10  ;;  %vm4737_vm9 = vmmov %vm4727_vm0 }
 0x49f   : > { %v1728_v25 = vadd.f32 %v1727_v26, %v1726_v40 }
 0x4a0   : > { %v1729_v41 = vsel %vm4731_vm6, %v1717_v17, 0.0  ;;  %vm4738_vm6 = vmmov %vm4727_vm0 }
 0x4a1   : > { %v1684_v48 = vpop.f32.mrb[24].mxu1  ;;  %v1730_v57 = vadd.f32 %v1729_v41, %v1728_v25 }
 0x4a2   : > { %v1703_v6 = vadd.f32 %v1684_v48, %v1518_v32  ;;  %v1686_v3 = vpop.f32.mrb[25].mxu1 }
 0x4a3   : > { %v1687_v2 = vpop.f32.mrb[26].mxu1 }
 0x4a4   : > { %v1718_v35 = vadd.f32 %v3006_v33, %v1703_v6  ;;  %v1704_v28 = vadd.f32 %v1687_v2, %v1521_v4  ;;  %v1689_v38 = vpop.f32.mrb[27].mxu1 }
 0x4a6   : > { %v1731_v16 = vsel %vm4732_vm8, %v1718_v35, 0.0  ;;  %v1719_v37 = vadd.f32 %v3006_v33, %v1704_v28  ;;  %vm4739_vm8 = vmmov %vm4727_vm0 }
 0x4a7   : > { %v1732_v9 = vadd.f32 %v1731_v16, %v1730_v57 }
 0x4a8   : > { %v1733_v53 = vsel %vm4733_vm15, %v1719_v37, 0.0  ;;  %vm4740_vm15 = vmmov %vm4727_vm0 }
 0x4a9   : > { %v1692_v61 = vpop.f32.mrb[28].mxu1  ;;  %v1734_v1 = vadd.f32 %v1733_v53, %v1732_v9 }
 0x4aa   : > { %v1705_v19 = vadd.f32 %v1692_v61, %v1526_v56  ;;  %v1694_v62 = vpop.f32.mrb[29].mxu1 }
 0x4ab   : > { %v1695_v10 = vpop.f32.mrb[30].mxu1 }
 0x4ac   : > { %v1720_v32 = vadd.f32 %v3006_v33, %v1705_v19  ;;  %v1706_v11 = vadd.f32 %v1695_v10, %v1529_v50  ;;  %v1697_v13 = vpop.f32.mrb[31].mxu1 }
 0x4ae   : > { %v1735_v26 = vsel %vm4727_vm0, %v1720_v32, 0.0  ;;  %v1721_v40 = vadd.f32 %v3006_v33, %v1706_v11 }
 0x4af   : > { %v1736_v4 = vadd.f32 %v1735_v26, %v1734_v1 }
 0x4b0   : > { %v1737_v48 = vsel %vm4734_vm11, %v1721_v40, 0.0  ;;  %vm4741_vm11 = vmmov %vm4727_vm0 }
 0x4b1   : > { %v1738_v6 = vadd.f32 %v1737_v48, %v1736_v4 }
 0x4b3   : > { %v1739_v3 = vrot.slane %v1738_v6, 4 }
 0x4b5   : > { %v1740_v25 = vadd.f32 %v1739_v3, %v1738_v6 }
 0x4b7   : > { %v1741_v2 = vrot.slane %v1740_v25, 2 }
 0x4b9   : > { %v1742_v41 = vadd.f32 %v1741_v2, %v1740_v25 }
 0x4bb   : > { %v1743_v28 = vrot.slane %v1742_v41, 1 }
 0x4bd   : > { %v1744_v38 = vadd.f32 %v1743_v28, %v1742_v41 }
 0x4bf   : > { %3242 = vmatmul.mubr.msk.f32.vlgmr.msra.gmra.mrb[28].mxu0 %vm4735_vm14, %v1744_v38  ;;  %vm4742_vm14 = vmmov %vm4727_vm0 }
 0x4c0   : > { %3301 = vmatpush3.bf16.msra.mxu0 %v3567_v8  ;;  %3260 = vmatprep.mubr.msk.f32.mxu0 %vm4722_vm10, %v4721_v45  ;;  %vm4736_vm10 = vmmov %vm4727_vm0 }
 0x4c1   : > { %3302 = vmatprep.subr.bf16.mxu0 %v4712_v39 }
 0x4c4   : > { %3304 = vmatpush3.bf16.msra.mxu0 %v3578_v12 }
 0x4c5   : > { %3305 = vmatprep.subr.bf16.mxu0 %v4712_v39 }
 0x4c8   : > { %3307 = vmatpush3.bf16.msra.mxu0 %v3588_v15 }
 0x4c9   : > { %3308 = vmatprep.subr.bf16.mxu0 %v4712_v39 }
 0x4cc   : > { %3310 = vmatpush3.bf16.msra.mxu0 %v3598_v18 }
 0x4cd   : > { %2515 = vmatprep.subr.bf16.mxu0 %v3480_v43 }
 0x592   : > { %v1814_v56 = vpop.f32.mrb[28].mxu0 }
 0x593   : > { %v1818_v50 = vmul.f32 0.0078125, %v1814_v56  ;;  %v3243_v8 = vpop.f32.mrb[29].mxu0 }
 0x595   : > { %v1822_v33 = vrot.slane %v1818_v50, %v3649_v51 }
 0x597   : > { %v4195_v45 = vsub.f32 %v1714_v63, %v1822_v33  ;;  %v4197_v16 = vsub.f32 %v1715_v44, %v1822_v33  ;;  %v4199_v12 = vsub.f32 %v1716_v54, %v1822_v33  ;;  %v4201_v57 = vsub.f32 %v1717_v17, %v1822_v33 }
 0x598   : > { %v4203_v15 = vsub.f32 %v1718_v35, %v1822_v33  ;;  %v4211_v61 = vsub.f32 %v1719_v37, %v1822_v33  ;;  %v4217_v35 = vsub.f32 %v1720_v32, %v1822_v33  ;;  %v4222_v10 = vsub.f32 %v1721_v40, %v1822_v33  ;;  %v3365_v33 = vld [vmem:[%s4620_s9] sm:$0xff]  }
 0x599   : > { %v1831_v18 = vmul.f32 %v4195_v45, %v4195_v45  ;;  %v1832_v39 = vmul.f32 %v4197_v16, %v4197_v16  ;;  %v1833_v9 = vmul.f32 %v4199_v12, %v4199_v12  ;;  %v1834_v44 = vmul.f32 %v4201_v57, %v4201_v57 }
 0x59a   : > { %v1835_v53 = vmul.f32 %v4203_v15, %v4203_v15  ;;  %v1836_v37 = vmul.f32 %v4211_v61, %v4211_v61  ;;  %v1837_v1 = vmul.f32 %v4217_v35, %v4217_v35  ;;  %v1838_v4 = vmul.f32 %v4222_v10, %v4222_v10 }
 0x59b   : > { %v1839_v63 = vsel %vm4736_vm10, %v1831_v18, 0.0  ;;  %v1840_v54 = vsel %vm4737_vm9, %v1832_v39, 0.0  ;;  %v1842_v19 = vsel %vm4738_vm6, %v1833_v9, 0.0  ;;  %v1844_v11 = vsel %vm4739_vm8, %v1834_v44, 0.0  ;;  %vm4743_vm10 = vmmov %vm4727_vm0  ;;  %v3366_v18 = vld [vmem:[%s4620_s9 + $0x60] sm:$0xff]   ;;  %v3367_v39 = vld [vmem:[%s4620_s9 + $0x8] sm:$0xff]  }
 0x59c   : > { %v1841_v17 = vadd.f32 %v1840_v54, %v1839_v63  ;;  %v1846_v32 = vsel %vm4740_vm15, %v1835_v53, 0.0  ;;  %v1848_v48 = vsel %vm4727_vm0, %v1836_v37, 0.0  ;;  %v1850_v40 = vsel %vm4741_vm11, %v1837_v1, 0.0  ;;  %2367 = vmatpush1.bf16.msra.mxu1 %v3366_v18  ;;  %v3368_v9 = vld [vmem:[%s4620_s9 + $0x68] sm:$0xff]   ;;  %v3369_v44 = vld [vmem:[%s4620_s9 + $0x10] sm:$0xff]   ;;  %v3371_v54 = vld [vmem:[%s4620_s9 + $0x18] sm:$0xff]  }
 0x59d   : > { %v1852_v25 = vsel %vm4742_vm14, %v1838_v4, 0.0  ;;  %2368 = vmatprep.subr.bf16.mxu1 %v3480_v43  ;;  %v3370_v63 = vld [vmem:[%s4620_s9 + $0x70] sm:$0xff]   ;;  %v3373_v53 = vld [vmem:[%s4620_s9 + $0x20] sm:$0xff]   ;;  %v3376_v37 = vld [vmem:[%s4620_s9 + $0x88] sm:$0xff]   ;;  %vm4744_vm9 = vcmask 1040384   ;;  %vm4746_vm8 = vcmask 1046528   ;;  %vm4747_vm15 = vnez %v4656_v14 }
 0x59e   : > { %v1843_v62 = vadd.f32 %v1842_v19, %v1841_v17  ;;  %v3372_v17 = vld [vmem:[%s4620_s9 + $0x78] sm:$0xff]   ;;  %v3374_v19 = vld [vmem:[%s4620_s9 + $0x80] sm:$0xff]   ;;  %vm4745_vm6 = vmmov %vm4744_vm9  ;;  %vm4748_vm0 = vnez %v4646_v58 }
 0x59f   : > { %v3379_v1 = vld [vmem:[%s4620_s9 + $0x38] sm:$0xff]   ;;  %v3382_v4 = vld [vmem:[%s4620_s9 + $0xa0] sm:$0xff]   ;;  %vm4749_vm11 = vmmov %vm4746_vm8 }
 0x5a0   : > { %v1845_v13 = vadd.f32 %v1844_v11, %v1843_v62  ;;  %2369 = vmatpush1.bf16.msra.mxu1 %v3368_v9  ;;  %v3375_v62 = vld [vmem:[%s4620_s9 + $0x28] sm:$0xff]   ;;  %v3377_v11 = vld [vmem:[%s4620_s9 + $0x30] sm:$0xff]   ;;  %v3387_v58 = vld [vmem:[%s4620_s9 + $0x58] sm:$0xff]  }
 0x5a1   : > { %2370 = vmatprep.subr.bf16.mxu1 %v3480_v43  ;;  %vm4751_vm14 = vmmov %vm4746_vm8 }
 0x5a2   : > { %v1847_v26 = vadd.f32 %v1846_v32, %v1845_v13  ;;  %v3378_v13 = vld [vmem:[%s4620_s9 + $0x90] sm:$0xff]   ;;  %v3380_v32 = vld [vmem:[%s4620_s9 + $0x98] sm:$0xff]  }
 0x5a4   : > { %v1849_v6 = vadd.f32 %v1848_v48, %v1847_v26  ;;  %2371 = vmatpush1.bf16.msra.mxu1 %v3370_v63  ;;  %v3381_v26 = vld [vmem:[%s4620_s9 + $0x40] sm:$0xff]   ;;  %v3383_v48 = vld [vmem:[%s4620_s9 + $0x48] sm:$0xff]  }
 0x5a5   : > { %2372 = vmatprep.subr.bf16.mxu1 %v3480_v43 }
 0x5a6   : > { %v1851_v3 = vadd.f32 %v1850_v40, %v1849_v6 }
 0x5a8   : > { %v1853_v2 = vadd.f32 %v1852_v25, %v1851_v3  ;;  %2373 = vmatpush1.bf16.msra.mxu1 %v3372_v17 }
 0x5a9   : > { %2374 = vmatprep.subr.bf16.mxu1 %v3480_v43 }
 0x5aa   : > { %v1854_v41 = vrot.slane %v1853_v2, 4 }
 0x5ac   : > { %v1855_v28 = vadd.f32 %v1854_v41, %v1853_v2  ;;  %2375 = vmatpush1.bf16.msra.mxu1 %v3374_v19 }
 0x5ad   : > { %2376 = vmatprep.subr.bf16.mxu1 %v3480_v43 }
 0x5ae   : > { %v1856_v38 = vrot.slane %v1855_v28, 2 }
 0x5b0   : > { %v1857_v56 = vadd.f32 %v1856_v38, %v1855_v28  ;;  %2377 = vmatpush1.bf16.msra.mxu1 %v3376_v37  ;;  %v3009_v28 = vld [vmem:[%s4618_s7] ss:$0 sm:$0xff] }
 0x5b1   : > { %2378 = vmatprep.subr.bf16.mxu1 %v3480_v43 }
 0x5b2   : > { %v1858_v50 = vrot.slane %v1857_v56, 1 }
 0x5b4   : > { %v1859_v8 = vadd.f32 %v1858_v50, %v1857_v56  ;;  %2379 = vmatpush1.bf16.msra.mxu1 %v3378_v13 }
 0x5b5   : > { %2380 = vmatprep.subr.bf16.mxu1 %v3480_v43 }
 0x5b6   : > { %3261 = vmatmul.mubr.msk.f32.vlgmr.msra.gmra.mrb[30].mxu0 %vm4743_vm10, %v1859_v8  ;;  %vm4752_vm10 = vnez %v4650_v59 }
 0x5b7   : > { %2516 = vmatpush1.bf16.msra.mxu0 %v3365_v33  ;;  %v3010_v33 = vld [vmem:[%s4619_s8] ss:$0 sm:$0xff] }
 0x5b8   : > { %2517 = vmatprep.subr.bf16.mxu0 %v3480_v43  ;;  %2381 = vmatpush1.bf16.msra.mxu1 %v3380_v32 }
 0x5b9   : > { %2382 = vmatprep.subr.bf16.mxu1 %v3480_v43 }
 0x5bb   : > { %2518 = vmatpush1.bf16.msra.mxu0 %v3367_v39 }
 0x5bc   : > { %2519 = vmatprep.subr.bf16.mxu0 %v3480_v43  ;;  %2383 = vmatpush1.bf16.msra.mxu1 %v3382_v4 }
 0x5bd   : > { %2384 = vmatprep.subr.bf16.mxu1 %v3480_v43 }
 0x5bf   : > { %2520 = vmatpush1.bf16.msra.mxu0 %v3369_v44 }
 0x5c0   : > { %2521 = vmatprep.subr.bf16.mxu0 %v3480_v43 }
 0x5c3   : > { %2522 = vmatpush1.bf16.msra.mxu0 %v3371_v54 }
 0x5c4   : > { %2523 = vmatprep.subr.bf16.mxu0 %v3480_v43 }
 0x5c7   : > { %2524 = vmatpush1.bf16.msra.mxu0 %v3373_v53 }
 0x5c8   : > { %2525 = vmatprep.subr.bf16.mxu0 %v3480_v43 }
 0x5cb   : > { %2526 = vmatpush1.bf16.msra.mxu0 %v3375_v62 }
 0x5cc   : > { %2527 = vmatprep.subr.bf16.mxu0 %v3480_v43 }
 0x5cf   : > { %2528 = vmatpush1.bf16.msra.mxu0 %v3377_v11 }
 0x5d0   : > { %2529 = vmatprep.subr.bf16.mxu0 %v3480_v43 }
 0x5d3   : > { %2530 = vmatpush1.bf16.msra.mxu0 %v3379_v1 }
 0x5d4   : > { %2531 = vmatprep.subr.bf16.mxu0 %v3480_v43 }
 0x5d7   : > { %2532 = vmatpush1.bf16.msra.mxu0 %v3381_v26 }
 0x5d8   : > { %2533 = vmatprep.subr.bf16.mxu0 %v3480_v43 }
 0x5db   : > { %2534 = vmatpush1.bf16.msra.mxu0 %v3383_v48 }
 0x5dc   : > { %2535 = vmatprep.subr.bf16.mxu0 %v3480_v43 }
 0x689   : > { %v1929_v6 = vpop.f32.mrb[30].mxu0 }
 0x68a   : > { %v1933_v40 = vmul.f32 0.0078125, %v1929_v6  ;;  %v3262_v3 = vpop.f32.mrb[31].mxu0 }
 0x68c   : > { %v1934_v25 = vadd.f32 1e-05, %v1933_v40 }
 0x68e   : > { %3435 = vrsqrt.f32 %v1934_v25 }
 0x698   : > { %v3436_v2 = vpop.eup %3435 }
 0x699   : > { %v1939_v41 = vrot.slane %v3436_v2, %v3649_v51 }
 0x69b   : > { %v1940_v38 = vmul.f32 %v1939_v41, %v4195_v45  ;;  %v1941_v56 = vmul.f32 %v1939_v41, %v4197_v16  ;;  %v1942_v50 = vmul.f32 %v1939_v41, %v4199_v12  ;;  %v1943_v8 = vmul.f32 %v1939_v41, %v4201_v57 }
 0x69c   : > { %v1944_v18 = vmul.f32 %v1939_v41, %v4203_v15  ;;  %v1945_v51 = vmul.f32 %v1939_v41, %v4211_v61  ;;  %v1946_v39 = vmul.f32 %v1939_v41, %v4217_v35  ;;  %v1947_v9 = vmul.f32 %v1939_v41, %v4222_v10 }
 0x69d   : > { %v1954_v44 = vmul.f32 %v3009_v28, %v1940_v38  ;;  %v1955_v45 = vmul.f32 %v3009_v28, %v1941_v56  ;;  %v1956_v63 = vmul.f32 %v3009_v28, %v1942_v50  ;;  %v1957_v16 = vmul.f32 %v3009_v28, %v1943_v8 }
 0x69e   : > { %v1958_v54 = vmul.f32 %v3009_v28, %v1944_v18  ;;  %v1959_v12 = vmul.f32 %v3009_v28, %v1945_v51  ;;  %v1960_v17 = vmul.f32 %v3009_v28, %v1946_v39  ;;  %v1961_v57 = vmul.f32 %v3009_v28, %v1947_v9 }
 0x69f   : > { %v1968_v53 = vadd.f32 %v3010_v33, %v1954_v44  ;;  %v1969_v19 = vadd.f32 %v3010_v33, %v1955_v45  ;;  %v1970_v62 = vadd.f32 %v3010_v33, %v1956_v63  ;;  %v4327_v37 = vadd.f32 %v3010_v33, %v1957_v16  ;;  %v3384_v44 = vld [vmem:[%s4620_s9 + $0xa8] sm:$0xff]   ;;  %v3385_v16 = vld [vmem:[%s4620_s9 + $0x50] sm:$0xff]  }
 0x6a0   : > { %v4329_v15 = vadd.f32 %v3010_v33, %v1958_v54  ;;  %v4331_v61 = vadd.f32 %v3010_v33, %v1959_v12  ;;  %v4333_v13 = vadd.f32 %v3010_v33, %v1960_v17  ;;  %v4336_v32 = vadd.f32 %v3010_v33, %v1961_v57  ;;  %2385 = vmatpush1.bf16.msra.mxu1 %v3384_v44 }
 0x6a1   : > { %v3011_v35 = vmul.f32 -1.442695, %v1968_v53  ;;  %v3012_v11 = vmul.f32 -1.442695, %v1969_v19  ;;  %v3013_v10 = vmul.f32 -1.442695, %v1970_v62  ;;  %2386 = vmatprep.subr.bf16.mxu1 %v3480_v43  ;;  %2536 = vmatpush1.bf16.msra.mxu0 %v3385_v16 }
 0x6a2   : > { %v3014_v1 = vmul.f32 -1.442695, %v4327_v37  ;;  %v3015_v26 = vmul.f32 -1.442695, %v4329_v15  ;;  %v3016_v4 = vmul.f32 -1.442695, %v4331_v61  ;;  %2537 = vmatprep.subr.bf16.mxu0 %v3480_v43 }
 0x6a3   : > { %3437 = vpow2.f32 %v3011_v35  ;;  %v3017_v48 = vmul.f32 -1.442695, %v4333_v13  ;;  %v3018_v6 = vmul.f32 -1.442695, %v4336_v32 }
 0x6a4   : > { %3439 = vpow2.f32 %v3012_v11 }
 0x6a5   : > { %3441 = vpow2.f32 %v3013_v10  ;;  %2538 = vmatpush1.bf16.msra.mxu0 %v3387_v58 }
 0x6a6   : > { %3443 = vpow2.f32 %v3014_v1 }
 0x6a7   : > { %3445 = vpow2.f32 %v3015_v26 }
 0x6a8   : > { %3447 = vpow2.f32 %v3016_v4 }
 0x6a9   : > { %3449 = vpow2.f32 %v3017_v48 }
 0x6aa   : > { %3451 = vpow2.f32 %v3018_v6 }
 0x6ad   : > { %v3438_v40 = vpop.eup %3437 }
 0x6ae   : > { %v3440_v3 = vpop.eup %3439  ;;  %v2000_v25 = vadd.f32 1.0, %v3438_v40 }
 0x6af   : > { %v3442_v2 = vpop.eup %3441  ;;  %v2001_v41 = vadd.f32 1.0, %v3440_v3 }
 0x6b0   : > { %v3444_v28 = vpop.eup %3443  ;;  %3453 = vrcp.f32 %v2000_v25  ;;  %v2002_v38 = vadd.f32 1.0, %v3442_v2 }
 0x6b1   : > { %v3446_v56 = vpop.eup %3445  ;;  %3455 = vrcp.f32 %v2001_v41  ;;  %v2003_v50 = vadd.f32 1.0, %v3444_v28 }
 0x6b2   : > { %v3448_v8 = vpop.eup %3447  ;;  %3457 = vrcp.f32 %v2002_v38  ;;  %v2004_v33 = vadd.f32 1.0, %v3446_v56 }
 0x6b3   : > { %v3450_v18 = vpop.eup %3449  ;;  %3459 = vrcp.f32 %v2003_v50  ;;  %v2005_v51 = vadd.f32 1.0, %v3448_v8 }
 0x6b4   : > { %v3452_v39 = vpop.eup %3451  ;;  %3461 = vrcp.f32 %v2004_v33  ;;  %v2006_v9 = vadd.f32 1.0, %v3450_v18 }
 0x6b5   : > { %3463 = vrcp.f32 %v2005_v51  ;;  %v2007_v45 = vadd.f32 1.0, %v3452_v39  ;;  %v3388_v39 = vld [vmem:[%s4620_s9 + $0xb8] sm:$0xff]  }
 0x6b6   : > { %3465 = vrcp.f32 %v2006_v9 }
 0x6b7   : > { %3467 = vrcp.f32 %v2007_v45 }
 0x6ba   : > { %v3454_v63 = vpop.eup %3453 }
 0x6bb   : > { %v3456_v54 = vpop.eup %3455  ;;  %v2024_v12 = vmul.f32 %v3454_v63, %v1968_v53 }
 0x6bc   : > { %v3458_v17 = vpop.eup %3457  ;;  %v4349_v57 = vmul.f32 %v3456_v54, %v1969_v19  ;;  %v3386_v19 = vld [vmem:[%s4620_s9 + $0xb0] sm:$0xff]  }
 0x6bd   : > { %v3460_v35 = vpop.eup %3459  ;;  %v2040_v11 = vrot.slane %v2024_v12, 7  ;;  %v2072_v10 = vrot.slane %v2024_v12, 1  ;;  %v4351_v1 = vmul.f32 %v3458_v17, %v1970_v62  ;;  %2387 = vmatpush1.bf16.msra.mxu1 %v3386_v19 }
 0x6be   : > { %v3462_v26 = vpop.eup %3461  ;;  %v2041_v4 = vrot.slane %v4349_v57, 7  ;;  %v2073_v48 = vrot.slane %v4349_v57, 1  ;;  %v2129_v6 = vpack.c.bf16 %v4349_v57, %v2024_v12  ;;  %v4358_v53 = vmul.f32 %v3460_v35, %v4327_v37  ;;  %2388 = vmatprep.subr.bf16.mxu1 %v3480_v43 }
 0x6bf   : > { %v2063_v40 = vsel %vm4744_vm9, 0.0, %v2040_v11  ;;  %v2043_v62 = vrot.slane %v4351_v1, 7  ;;  %v2075_v3 = vrot.slane %v4351_v1, 1  ;;  %v4367_v25 = vmul.f32 %v3462_v26, %v4329_v15  ;;  %v3464_v2 = vpop.eup %3463  ;;  %vm4753_vm9 = vmmov %vm4746_vm8 }
 0x6c0   : > { %v2137_v41 = vrot.slane %v2129_v6, 4  ;;  %v2042_v28 = vsel %vm4745_vm6, %v2040_v11, %v2041_v4  ;;  %v2064_v37 = vsel %vm3879_vm13, 0.0, %v2063_v40  ;;  %v2074_v38 = vsel %vm4746_vm8, %v2072_v10, %v2073_v48  ;;  %v3466_v56 = vpop.eup %3465 }
 0x6c1   : > { %v2065_v50 = vsel %vm4747_vm15, 0.0, %v2042_v28  ;;  %v2096_v8 = vsel %vm4748_vm0, 0.0, %v2074_v38  ;;  %v2045_v15 = vrot.slane %v4358_v53, 7  ;;  %v2076_v33 = vsel %vm4749_vm11, %v2073_v48, %v2075_v3  ;;  %v3468_v63 = vpop.eup %3467  ;;  %2389 = vmatpush1.bf16.msra.mxu1 %v3388_v39  ;;  %vm4758_vm11 = vmmov %vm4753_vm9 }
 0x6c2   : > { %2144 = vrot.lane.b32.xlu1 %v2137_v41, %s3481_s29  ;;  %v4381_v5 = vpack.c.bf16 %v2065_v50, %v2064_v37  ;;  %v2077_v18 = vrot.slane %v4358_v53, 1  ;;  %vm4750_vm13 = vnez %v4648_v42  ;;  %v2130_v14 = vpack.c.bf16 %v4358_v53, %v4351_v1  ;;  %2682 = vmatprep.subr.bf16.mxu1 %v3480_v43 }
 0x6c3   : > { %v2097_v51 = vsel %vm4750_vm13, 0.0, %v2076_v33  ;;  %v4395_v44 = vmul.f32 %v3464_v2, %v4331_v61  ;;  %v2047_v45 = vrot.slane %v4367_v25, 7  ;;  %v2079_v42 = vrot.slane %v4367_v25, 1 }
 0x6c4   : > { %v2164_v9 = vpack.c.bf16 %v2097_v51, %v2096_v8  ;;  %v2112_v16 = vrot.slane %v4381_v5, 4  ;;  %v2078_v54 = vsel %vm4751_vm14, %v2075_v3, %v2077_v18  ;;  %v2138_v12 = vrot.slane %v2130_v14, 4 }
 0x6c5   : > { %v4402_v17 = vmul.f32 %v3466_v56, %v4333_v13  ;;  %v2098_v57 = vsel %vm4752_vm10, 0.0, %v2078_v54  ;;  %v2049_v35 = vrot.slane %v4395_v44, 7  ;;  %v2080_v11 = vsel %vm4753_vm9, %v2077_v18, %v2079_v42  ;;  %vm4761_vm10 = vmmov %vm4753_vm9 }
 0x6c6   : > { %v2172_v61 = vrot.slane %v2164_v9, 4  ;;  %vm4754_vm6 = vcmask 523268   ;;  %vm4755_vm8 = vcmask 1043456   ;;  %v2081_v13 = vrot.slane %v4395_v44, 1 }
 0x6c7   : > { %2124 = vst.msk [vmem:[#allocation2] sm:$0xf0] %vm4754_vm6, %v2112_v16  ;;  %v2139_v10 = vsel %vm4755_vm8, %v2137_v41, %v2138_v12  ;;  %vm4756_vm15 = vnez %v4652_v52  ;;  %v2131_v59 = vpack.c.bf16 %v4395_v44, %v4367_v25  ;;  %vm4757_vm0 = vmmov %vm4754_vm6  ;;  %v2031_v48 = vmul.f32 %v3468_v63, %v4336_v32 }
 0x6c8   : > { %v2099_v1 = vsel %vm4756_vm15, 0.0, %v2080_v11  ;;  %2146 = vrot.lane.b32.xlu0 %v2139_v10, %s3481_s29  ;;  %2184 = vst.msk [vmem:[#allocation2 + $0x8] sm:$0xf0] %vm4757_vm0, %v2172_v61  ;;  %v2051_v6 = vrot.slane %v4402_v17, 7  ;;  %v2083_v19 = vrot.slane %v4402_v17, 1  ;;  %v2082_v40 = vsel %vm4758_vm11, %v2079_v42, %v2081_v13  ;;  %vm4762_vm9 = vmmov %vm4755_vm8 }
 0x6c9   : > { %v2165_v26 = vpack.c.bf16 %v2099_v1, %v2098_v57  ;;  %v2140_v3 = vrot.slane %v2131_v59, 4  ;;  %vm4759_vm13 = vcmask 1040384   ;;  %v2100_v2 = vsel %vm3932_vm1, 0.0, %v2082_v40  ;;  %vm4763_vm6 = vmmov %vm4755_vm8 }
 0x6ca   : > { %v2044_v52 = vsel %vm4759_vm13, %v2041_v4, %v2043_v62  ;;  %vm4760_vm14 = vmmov %vm4759_vm13  ;;  %v2053_v28 = vrot.slane %v2031_v48, 7  ;;  %v2084_v32 = vsel %vm4761_vm10, %v2081_v13, %v2083_v19  ;;  %v2085_v38 = vrot.slane %v2031_v48, 1 }
 0x6cb   : > { %v2046_v25 = vsel %vm4760_vm14, %v2043_v62, %v2045_v15  ;;  %v2173_v41 = vrot.slane %v2165_v26, 4  ;;  %v2141_v37 = vsel %vm4762_vm9, %v2138_v12, %v2140_v3  ;;  %v2101_v56 = vsel %vm3936_vm2, 0.0, %v2084_v32  ;;  %vm4765_vm8 = vmmov %vm4761_vm10  ;;  %v3389_v32 = vld [vmem:[%s4620_s9 + $0xc0] sm:$0xff]  }
 0x6cc   : > { %v2132_v50 = vpack.c.bf16 %v2031_v48, %v4402_v17  ;;  %2148 = vrot.lane.b32.xlu1 %v2141_v37, %s3481_s29  ;;  %v2166_v62 = vpack.c.bf16 %v2101_v56, %v2100_v2  ;;  %v2066_v47 = vsel %vm3952_vm5, 0.0, %v2044_v52  ;;  %v2067_v8 = vsel %vm3963_vm3, 0.0, %v2046_v25  ;;  %vm4766_vm15 = vmmov %vm4765_vm8 }
 0x6cd   : > { %v2174_v4 = vsel %vm4763_vm6, %v2172_v61, %v2173_v41  ;;  %vm4764_vm1 = vcmask 523264   ;;  %v2086_v33 = vsel %vm4765_vm8, %v2083_v19, %v2085_v38  ;;  %v2095_v0 = vsel %vm4766_vm15, %v2085_v38, 0.0  ;;  %vm4769_vm5 = vmmov %vm4759_vm13 }
 0x6ce   : > { %2185 = vst.msk [vmem:[#allocation2 + $0x18] sm:$0xff] %vm4764_vm1, %v2174_v4  ;;  %v2142_v18 = vrot.slane %v2132_v50, 4  ;;  %v2105_v51 = vpack.c.bf16 %v2067_v8, %v2066_v47  ;;  %vm4767_vm2 = vnez %v4674_v55  ;;  %vm4768_vm0 = vnez %v4676_v7  ;;  %vm4770_vm3 = vmmov %vm4763_vm6  ;;  %v3390_v50 = vld [vmem:[%s4620_s9 + $0xc8] sm:$0xff]   ;;  %v3391_v8 = vld [vmem:[%s4620_s9 + $0xd0] sm:$0xff]  }
 0x6cf   : > { %v2102_v14 = vsel %vm4767_vm2, 0.0, %v2086_v33  ;;  %v2103_v58 = vsel %vm4768_vm0, 0.0, %v2095_v0  ;;  %v2175_v39 = vrot.slane %v2166_v62, 4  ;;  %v2048_v46 = vsel %vm4769_vm5, %v2045_v15, %v2047_v45  ;;  %v2190_v44 = vld [vmem:[#allocation2 + $0x8] sm:$0xff]  ;;  %vm4771_vm11 = vmmov %vm4769_vm5 }
 0x6d0   : > { %v2143_v24 = vsel %vm4770_vm3, %v2140_v3, %v2142_v18  ;;  %v2167_v9 = vpack.c.bf16 %v2103_v58, %v2102_v14  ;;  %v2113_v42 = vrot.slane %v2105_v51, 4  ;;  %v2050_v63 = vsel %vm4771_vm11, %v2047_v45, %v2049_v35  ;;  %vm4772_vm13 = vmmov %vm4770_vm3  ;;  %2152 = vrot.lane.b32.xlu1 %v2142_v18, %s3481_s29  ;;  %v2222_v55 = vld [vmem:[#allocation2 + $0x8] sm:$0xf0]  ;;  %v3392_v51 = vld [vmem:[%s4620_s9 + $0xd8] sm:$0xff]  }
 0x6d1   : > { %v2176_v54 = vsel %vm4772_vm13, %v2173_v41, %v2175_v39  ;;  %2150 = vrot.lane.b32.xlu0 %v2143_v24, %s3481_s29  ;;  %vm4773_vm14 = vnez %v4658_v60  ;;  %vm4774_vm10 = vnez %v4660_v29  ;;  %vm4775_vm9 = vmmov %vm4764_vm1  ;;  %vm4781_vm0 = vnez %v4670_v27 }
 0x6d2   : > { %v2068_v7 = vsel %vm4773_vm14, 0.0, %v2048_v46  ;;  %v2069_v53 = vsel %vm4774_vm10, 0.0, %v2050_v63  ;;  %v2177_v15 = vrot.slane %v2167_v9, 4  ;;  %2186 = vst.msk [vmem:[#allocation2 + $0x28] sm:$0xff] %vm4775_vm9, %v2176_v54  ;;  %vm4776_vm6 = vmmov %vm4764_vm1  ;;  %v2263_v61 = vrot.slane %v2222_v55, 4  ;;  %v3393_v46 = vld [vmem:[%s4620_s9 + $0xe0] sm:$0xff]  }
 0x6d3   : > { %3071 = vmatprep.mubr.msk.bf16.mxu0 %vm4776_vm6, %v2190_v44  ;;  %vm4777_vm1 = vmmov %vm4770_vm3  ;;  %v2106_v12 = vpack.c.bf16 %v2069_v53, %v2068_v7  ;;  %vm4783_vm3 = vcmask 519168   ;;  %vm4784_vm11 = vnez %v4672_v49  ;;  %v3395_v54 = vld [vmem:[%s4620_s9 + $0xf0] sm:$0xff]   ;;  %v3396_v7 = vld [vmem:[%s4620_s9 + $0xf8] sm:$0xff]  }
 0x6d4   : > { %v2114_v45 = vsel %vm4777_vm1, %v2112_v16, %v2113_v42  ;;  %vm4778_vm8 = vmmov %vm4769_vm5  ;;  %2188 = vst.msk [vmem:[#allocation2 + $0x48] sm:$0xf] %vm4783_vm3, %v2177_v15  ;;  %v3397_v53 = vld [vmem:[%s4620_s9 + $0x100] sm:$0xff]  }
 0x6d5   : > { %v2052_v17 = vsel %vm4778_vm8, %v2049_v35, %v2051_v6  ;;  %vm4779_vm15 = vmmov %vm4776_vm6  ;;  %v2115_v11 = vrot.slane %v2106_v12, 4  ;;  %v4475_v16 = vld [vmem:[#allocation2 + $0x18] sm:$0xff] }
 0x6d6   : > { %2125 = vst.msk [vmem:[#allocation2 + $0x10] sm:$0xff] %vm4779_vm15, %v2114_v45  ;;  %vm4780_vm2 = vmmov %vm4769_vm5  ;;  %v2070_v29 = vsel %vm4781_vm0, 0.0, %v2052_v17  ;;  %v2264_v10 = vrot.slane %v4475_v16, 4  ;;  %v3399_v45 = vld [vmem:[%s4620_s9 + $0x110] sm:$0xff]   ;;  %v3400_v12 = vld [vmem:[%s4620_s9 + $0x118] sm:$0xff]  }
 0x6d7   : > { %v2054_v60 = vsel %vm4780_vm2, %v2051_v6, %v2053_v28  ;;  %vm4782_vm5 = vmmov %vm4777_vm1 }
 0x6d8   : > { %v2178_v57 = vsel %vm4782_vm5, %v2175_v39, %v2177_v15  ;;  %v2071_v5 = vsel %vm4784_vm11, 0.0, %v2054_v60  ;;  %vm4785_vm13 = vmmov %vm4776_vm6  ;;  %v3398_v15 = vld [vmem:[%s4620_s9 + $0x108] sm:$0xff]  }
 0x6d9   : > { %2187 = vst.msk [vmem:[#allocation2 + $0x38] sm:$0xff] %vm4785_vm13, %v2178_v57  ;;  %v2107_v35 = vpack.c.bf16 %v2071_v5, %v2070_v29  ;;  %vm4786_vm14 = vmmov %vm4777_vm1  ;;  %v4490_v40 = vld [vmem:[#allocation2 + $0x28] sm:$0xff] }
 0x6da   : > { %v2116_v13 = vsel %vm4786_vm14, %v2113_v42, %v2115_v11  ;;  %vm4787_vm10 = vmmov %vm4776_vm6  ;;  %v2268_v41 = vrot.slane %v4490_v40, 4  ;;  %v3394_v42 = vld [vmem:[%s4620_s9 + $0xe8] sm:$0xff]  }
 0x6db   : > { %2126 = vst.msk [vmem:[#allocation2 + $0x20] sm:$0xff] %vm4787_vm10, %v2116_v13  ;;  %v2117_v27 = vrot.slane %v2107_v35, 4  ;;  %vm4788_vm9 = vmmov %vm4777_vm1  ;;  %v2224_v14 = vld [vmem:[#allocation2 + $0x48] sm:$0xf] }
 0x6dc   : > { %v2265_v1 = vsel %vm4788_vm9, %v2263_v61, %v2264_v10  ;;  %vm4789_vm8 = vmmov %vm4783_vm3  ;;  %v2276_v39 = vrot.slane %v2224_v14, 4  ;;  %v2581_v17 = vld [vmem:[#allocation2 + $0x48] sm:$0xff] }
 0x6dd   : > { %3055 = vmatprep.mubr.msk.bf16.mxu1 %vm4776_vm6, %v2265_v1  ;;  %v2118_v59 = vsel %vm4777_vm1, %v2115_v11, %v2117_v27  ;;  %2128 = vst.msk [vmem:[#allocation2 + $0x40] sm:$0xf] %vm4789_vm8, %v2117_v27  ;;  %vm4790_vm15 = vmmov %vm4776_vm6 }
 0x6de   : > { %2127 = vst.msk [vmem:[#allocation2 + $0x30] sm:$0xff] %vm4790_vm15, %v2118_v59  ;;  %vm4791_vm2 = vmmov %vm4776_vm6 }
 0x6df   : > { %vm4793_vm0 = vmmov %vm4777_vm1 }
 0x6e0   : > { %v2269_v38 = vsel %vm4793_vm0, %v2264_v10, %v2268_v41  ;;  %vm4794_vm5 = vmmov %vm4791_vm2  ;;  %v2196_v4 = vld [vmem:[#allocation2 + $0x38] sm:$0xff] }
 0x6e1   : > { %v2272_v47 = vrot.slane %v2196_v4, 4  ;;  %vm4797_vm3 = vmmov %vm4793_vm0 }
 0x6e2   : > { %vm4798_vm11 = vmmov %vm4791_vm2 }
 0x6e3   : > { %v2273_v0 = vsel %vm4797_vm3, %v2268_v41, %v2272_v47  ;;  %vm4799_vm13 = vmmov %vm4791_vm2 }
 0x6e4   : > { %vm4800_vm14 = vmmov %vm4793_vm0 }
 0x6e5   : > { %vm4801_vm10 = vmmov %vm4793_vm0 }
 0x6e6   : > { %v2277_v9 = vsel %vm4801_vm10, %v2272_v47, %v2276_v39  ;;  %vm4802_vm9 = vmmov %vm4791_vm2 }
 0x6e7   : > { %vm4803_vm6 = vmmov %vm4793_vm0 }
 0x734   : > { %v2145_v49 = vpop.permute.xlu1 %2144 }
 0x735   : > { %2159 = vst.msk [vmem:[#allocation2] sm:$0xf0] %vm1108_vm12, %v2145_v49  ;;  %vm4792_vm12 = vmmov %vm4777_vm1 }
 0x736   : > { %vm4804_vm1 = vmmov %vm4791_vm2 }
 0x737   : > { %vm4805_vm8 = vmmov %vm4804_vm1 }
 0x738   : > { %vm4806_vm15 = vmmov %vm4804_vm1 }
 0x73a   : > { %v2147_v26 = vpop.permute.xlu0 %2146 }
 0x73b   : > { %2160 = vst.msk [vmem:[#allocation2 + $0x10] sm:$0xff] %vm1110_vm7, %v2147_v26 }
 0x73c   : > { %v2189_v48 = vld [vmem:[#allocation2] sm:$0xff] }
 0x73d   : > { %2548 = vmatmul.mubr.bf16.vlgmr.msra.gmra.mrb[32].mxu0 %v2189_v48  ;;  %v2221_v19 = vld [vmem:[#allocation2] sm:$0xf0] }
 0x73e   : > { %v2149_v6 = vpop.permute.xlu1 %2148  ;;  %3072 = vmatprep.mubr.msk.bf16.mxu0 %vm4791_vm2, %v4475_v16  ;;  %v2260_v3 = vrot.slane %v2221_v19, 4 }
 0x73f   : > { %2161 = vst.msk [vmem:[#allocation2 + $0x20] sm:$0xff] %vm1110_vm7, %v2149_v6 }
 0x742   : > { %v2153_v25 = vpop.permute.xlu1 %2152  ;;  %v4492_v2 = vld [vmem:[#allocation2 + $0x10] sm:$0xff] }
 0x743   : > { %v2151_v52 = vpop.permute.xlu0 %2150  ;;  %2163 = vst.msk [vmem:[#allocation2 + $0x40] sm:$0xf] %vm1114_vm4, %v2153_v25  ;;  %v2261_v28 = vrot.slane %v4492_v2, 4  ;;  %vm4796_vm4 = vmmov %vm4793_vm0 }
 0x744   : > { %2162 = vst.msk [vmem:[#allocation2 + $0x30] sm:$0xff] %vm1110_vm7, %v2151_v52  ;;  %vm4795_vm7 = vmmov %vm4791_vm2 }
 0x745   : > { %v2262_v37 = vsel %vm4792_vm12, %v2260_v3, %v2261_v28  ;;  %2556 = vmatmul.mubr.bf16.gmra.mrb[36].mxu0 %v4492_v2  ;;  %vm4807_vm2 = vmmov %vm4804_vm1  ;;  %vm4808_vm12 = vcmask 519168  }
 0x746   : > { %2399 = vmatmul.mubr.bf16.vlgmr.msra.gmra.mrb[32].mxu1 %v2262_v37  ;;  %v2193_v56 = vld [vmem:[#allocation2 + $0x20] sm:$0xff]  ;;  %3073 = vmatprep.mubr.msk.bf16.mxu0 %vm4795_vm7, %v4490_v40  ;;  %vm4809_vm0 = vmmov %vm4808_vm12 }
 0x747   : > { %2683 = vmatpush1.bf16.msra.mxu1 %v3389_v32  ;;  %3056 = vmatprep.mubr.msk.bf16.mxu1 %vm4794_vm5, %v2269_v38  ;;  %v2266_v62 = vrot.slane %v2193_v56, 4  ;;  %vm4810_vm5 = vmmov %vm4809_vm0 }
 0x748   : > { %2684 = vmatprep.subr.bf16.mxu1 %v3480_v43  ;;  %vm4811_vm7 = vmmov %vm4809_vm0 }
 0x749   : > { %v2267_v33 = vsel %vm4796_vm4, %v2261_v28, %v2266_v62  ;;  %vm4812_vm4 = vmmov %vm4809_vm0 }
 0x74a   : > { %v2223_v44 = vld [vmem:[#allocation2 + $0x40] sm:$0xf]  ;;  %vm4813_vm3 = vmmov %vm4809_vm0 }
 0x74b   : > { %2685 = vmatpush1.bf16.msra.mxu1 %v3390_v50  ;;  %v2195_v18 = vld [vmem:[#allocation2 + $0x30] sm:$0xff]  ;;  %v2274_v63 = vrot.slane %v2223_v44, 4  ;;  %v2580_v60 = vld [vmem:[#allocation2 + $0x40] sm:$0xff] }
 0x74c   : > { %2686 = vmatprep.subr.bf16.mxu1 %v3480_v43  ;;  %v2270_v58 = vrot.slane %v2195_v18, 4 }
 0x74d   : > { %2564 = vmatmul.mubr.bf16.gmra.mrb[40].mxu0 %v2193_v56 }
 0x74e   : > { %2407 = vmatmul.mubr.bf16.gmra.mrb[36].mxu1 %v2267_v33  ;;  %3074 = vmatprep.mubr.msk.bf16.mxu0 %vm4799_vm13, %v2196_v4  ;;  %v2271_v24 = vsel %vm4800_vm14, %v2266_v62, %v2270_v58  ;;  %v2275_v55 = vsel %vm4803_vm6, %v2270_v58, %v2274_v63  ;;  %vm4815_vm13 = vmmov %vm4809_vm0 }
 0x74f   : > { %2687 = vmatpush1.bf16.msra.mxu1 %v3391_v8  ;;  %3057 = vmatprep.mubr.msk.bf16.mxu1 %vm4798_vm11, %v2273_v0  ;;  %vm4814_vm11 = vmmov %vm4809_vm0 }
 0x750   : > { %2688 = vmatprep.subr.bf16.mxu1 %v3480_v43 }
 0x753   : > { %2689 = vmatpush1.bf16.msra.mxu1 %v3392_v51 }
 0x754   : > { %2690 = vmatprep.subr.bf16.mxu1 %v3480_v43 }
 0x755   : > { %2572 = vmatmul.mubr.bf16.gmra.mrb[44].mxu0 %v2195_v18 }
 0x756   : > { %2415 = vmatmul.mubr.bf16.gmra.mrb[40].mxu1 %v2271_v24 }
 0x757   : > { %2691 = vmatpush1.bf16.msra.mxu1 %v3393_v46  ;;  %3058 = vmatprep.mubr.msk.bf16.mxu1 %vm4802_vm9, %v2277_v9  ;;  %v3115_v46 = vld [vmem:[%s4621_s10] ss:$0 sm:$0xff] }
 0x758   : > { %2692 = vmatprep.subr.bf16.mxu1 %v3480_v43 }
 0x75b   : > { %2693 = vmatpush1.bf16.msra.mxu1 %v3394_v42 }
 0x75c   : > { %2694 = vmatprep.subr.bf16.mxu1 %v3480_v43 }
 0x75e   : > { %2423 = vmatmul.mubr.bf16.gmra.mrb[44].mxu1 %v2275_v55 }
 0x75f   : > { %2695 = vmatpush1.bf16.msra.mxu1 %v3395_v54  ;;  %3111 = vmatprep.mubr.msk.bf16.mxu1 %vm4804_vm1, %v4475_v16 }
 0x760   : > { %2696 = vmatprep.subr.bf16.mxu1 %v3480_v43 }
 0x763   : > { %2697 = vmatpush1.bf16.msra.mxu1 %v3396_v7 }
 0x764   : > { %2698 = vmatprep.subr.bf16.mxu1 %v3480_v43 }
 0x767   : > { %2699 = vmatpush1.bf16.msra.mxu1 %v3397_v53 }
 0x768   : > { %2700 = vmatprep.subr.bf16.mxu1 %v3480_v43 }
 0x76b   : > { %2701 = vmatpush1.bf16.msra.mxu1 %v3398_v15 }
 0x76c   : > { %2702 = vmatprep.subr.bf16.mxu1 %v3480_v43 }
 0x76f   : > { %2703 = vmatpush1.bf16.msra.mxu1 %v3399_v45 }
 0x770   : > { %2704 = vmatprep.subr.bf16.mxu1 %v3480_v43 }
 0x773   : > { %2705 = vmatpush1.bf16.msra.mxu1 %v3400_v12 }
 0x776   : > { %2715 = vmatmul.mubr.bf16.vlgmr.msra.gmra.mrb[48].mxu1 %v4492_v2 }
 0x777   : > { %3112 = vmatprep.mubr.msk.bf16.mxu1 %vm4805_vm8, %v4490_v40 }
 0x77e   : > { %2723 = vmatmul.mubr.bf16.gmra.mrb[52].mxu1 %v2193_v56 }
 0x77f   : > { %3113 = vmatprep.mubr.msk.bf16.mxu1 %vm4806_vm15, %v2196_v4 }
 0x786   : > { %2731 = vmatmul.mubr.bf16.gmra.mrb[56].mxu1 %v2195_v18 }
 0x787   : > { %3114 = vmatprep.mubr.msk.bf16.mxu1 %vm4807_vm2, %v2581_v17 }
 0x78e   : > { %2739 = vmatmul.mubr.bf16.gmra.mrb[60].mxu1 %v2580_v60 }
 0x810   : > { %v2549_v29 = vpop.f32.mrb[32].mxu0 }
 0x811   : > { %v2551_v57 = vpop.f32.mrb[33].mxu0 }
 0x812   : > { %v2552_v61 = vpop.f32.mrb[34].mxu0 }
 0x813   : > { %v2554_v11 = vpop.f32.mrb[35].mxu0 }
 0x818   : > { %v2557_v5 = vpop.f32.mrb[36].mxu0 }
 0x819   : > { %v2400_v43 = vpop.f32.mrb[32].mxu1  ;;  %v2559_v10 = vpop.f32.mrb[37].mxu0 }
 0x81a   : > { %v2550_v16 = vadd.f32 %v2549_v29, %v2400_v43  ;;  %v2402_v35 = vpop.f32.mrb[33].mxu1  ;;  %v2560_v27 = vpop.f32.mrb[38].mxu0 }
 0x81b   : > { %v2403_v13 = vpop.f32.mrb[34].mxu1  ;;  %v2562_v49 = vpop.f32.mrb[39].mxu0 }
 0x81c   : > { %v2553_v1 = vadd.f32 %v2552_v61, %v2403_v13  ;;  %v2405_v59 = vpop.f32.mrb[35].mxu1 }
 0x820   : > { %v2565_v48 = vpop.f32.mrb[40].mxu0 }
 0x821   : > { %v2408_v26 = vpop.f32.mrb[36].mxu1  ;;  %v2567_v40 = vpop.f32.mrb[41].mxu0 }
 0x822   : > { %v2558_v6 = vadd.f32 %v2557_v5, %v2408_v26  ;;  %v2410_v19 = vpop.f32.mrb[37].mxu1  ;;  %v2568_v52 = vpop.f32.mrb[42].mxu0 }
 0x823   : > { %v2411_v3 = vpop.f32.mrb[38].mxu1  ;;  %v2570_v41 = vpop.f32.mrb[43].mxu0 }
 0x824   : > { %v2561_v25 = vadd.f32 %v2560_v27, %v2411_v3  ;;  %v2413_v2 = vpop.f32.mrb[39].mxu1 }
 0x828   : > { %v2573_v32 = vpop.f32.mrb[44].mxu0 }
 0x829   : > { %v2416_v28 = vpop.f32.mrb[40].mxu1  ;;  %v2575_v56 = vpop.f32.mrb[45].mxu0 }
 0x82a   : > { %v2566_v37 = vadd.f32 %v2565_v48, %v2416_v28  ;;  %v2418_v38 = vpop.f32.mrb[41].mxu1  ;;  %v2576_v4 = vpop.f32.mrb[46].mxu0 }
 0x82b   : > { %v2419_v50 = vpop.f32.mrb[42].mxu1  ;;  %v2578_v8 = vpop.f32.mrb[47].mxu0 }
 0x82c   : > { %v2569_v62 = vadd.f32 %v2568_v52, %v2419_v50  ;;  %v2421_v47 = vpop.f32.mrb[43].mxu1 }
 0x831   : > { %v2424_v33 = vpop.f32.mrb[44].mxu1 }
 0x832   : > { %v2574_v0 = vadd.f32 %v2573_v32, %v2424_v33  ;;  %v2426_v18 = vpop.f32.mrb[45].mxu1 }
 0x833   : > { %v2427_v51 = vpop.f32.mrb[46].mxu1 }
 0x834   : > { %v2577_v14 = vadd.f32 %v2576_v4, %v2427_v51  ;;  %v2429_v58 = vpop.f32.mrb[47].mxu1 }
 0x849   : > { %v2716_v39 = vpop.f32.mrb[48].mxu1 }
 0x84a   : > { %v2747_v24 = vadd.f32 %v2716_v39, %v2550_v16  ;;  %v2718_v9 = vpop.f32.mrb[49].mxu1 }
 0x84b   : > { %v2719_v44 = vpop.f32.mrb[50].mxu1 }
 0x84c   : > { %v2762_v42 = vadd.f32 %v3115_v46, %v2747_v24  ;;  %v2748_v63 = vadd.f32 %v2719_v44, %v2553_v1  ;;  %v2721_v54 = vpop.f32.mrb[51].mxu1 }
 0x84e   : > { %v2770_v55 = vadd.f32 %v2762_v42, %v3606_v21  ;;  %v2763_v7 = vadd.f32 %v3115_v46, %v2748_v63 }
 0x850   : > { %v2778_v53 = vadd.f32 %v2770_v55, %v3606_v21  ;;  %v2771_v15 = vadd.f32 %v2763_v7, %v3610_v23 }
 0x851   : > { %v2724_v45 = vpop.f32.mrb[52].mxu1 }
 0x852   : > { %v3128_v12 = vpack.c.bf16 %v2778_v53, %v2778_v53  ;;  %v2779_v17 = vadd.f32 %v2771_v15, %v3610_v23  ;;  %v2749_v60 = vadd.f32 %v2724_v45, %v2558_v6  ;;  %v2726_v29 = vpop.f32.mrb[53].mxu1 }
 0x853   : > { %v2727_v57 = vpop.f32.mrb[54].mxu1 }
 0x854   : > { %2818 = vst.msk [vmem:[%s4577_s28] sm:$0xf] %vm4808_vm12, %v3128_v12  ;;  %v3129_v21 = vpack.c.bf16 %v2779_v17, %v2779_v17  ;;  %v2764_v61 = vadd.f32 %v3115_v46, %v2749_v60  ;;  %v2750_v11 = vadd.f32 %v2727_v57, %v2561_v25  ;;  %v2729_v43 = vpop.f32.mrb[55].mxu1 }
 0x856   : > { %2819 = vst.msk [vmem:[%s4577_s28 + $0x4] sm:$0xf] %vm4809_vm0, %v3129_v21  ;;  %v2772_v5 = vadd.f32 %v3604_v20, %v2764_v61  ;;  %v2765_v16 = vadd.f32 %v3115_v46, %v2750_v11 }
 0x858   : > { %v2780_v35 = vadd.f32 %v3604_v20, %v2772_v5  ;;  %v2773_v23 = vadd.f32 %v3608_v22, %v2765_v16 }
 0x859   : > { %v2732_v10 = vpop.f32.mrb[56].mxu1 }
 0x85a   : > { %v3130_v13 = vpack.c.bf16 %v2780_v35, %v2780_v35  ;;  %v2781_v27 = vadd.f32 %v3608_v22, %v2773_v23  ;;  %v2751_v1 = vadd.f32 %v2732_v10, %v2566_v37  ;;  %v2734_v59 = vpop.f32.mrb[57].mxu1 }
 0x85b   : > { %v2735_v49 = vpop.f32.mrb[58].mxu1 }
 0x85c   : > { %2820 = vst.msk [vmem:[%s4577_s28 + $0x8] sm:$0xf] %vm4810_vm5, %v3130_v13  ;;  %v3131_v26 = vpack.c.bf16 %v2781_v27, %v2781_v27  ;;  %v2766_v48 = vadd.f32 %v3115_v46, %v2751_v1  ;;  %v2752_v6 = vadd.f32 %v2735_v49, %v2569_v62  ;;  %v2737_v19 = vpop.f32.mrb[59].mxu1 }
 0x85e   : > { %2821 = vst.msk [vmem:[%s4577_s28 + $0xc] sm:$0xf] %vm4811_vm7, %v3131_v26  ;;  %v2774_v20 = vadd.f32 %v2766_v48, %v3622_v31  ;;  %v2767_v40 = vadd.f32 %v3115_v46, %v2752_v6 }
 0x860   : > { %v2782_v3 = vadd.f32 %v2774_v20, %v3622_v31  ;;  %v2775_v22 = vadd.f32 %v2767_v40, %v3628_v36 }
 0x861   : > { %v2740_v52 = vpop.f32.mrb[60].mxu1 }
 0x862   : > { %v3132_v25 = vpack.c.bf16 %v2782_v3, %v2782_v3  ;;  %v2783_v2 = vadd.f32 %v2775_v22, %v3628_v36  ;;  %v2753_v41 = vadd.f32 %v2740_v52, %v2574_v0  ;;  %v2742_v28 = vpop.f32.mrb[61].mxu1 }
 0x863   : > { %v2743_v32 = vpop.f32.mrb[62].mxu1 }
 0x864   : > { %2822 = vst.msk [vmem:[%s4577_s28 + $0x10] sm:$0xf] %vm4812_vm4, %v3132_v25  ;;  %v3133_v37 = vpack.c.bf16 %v2783_v2, %v2783_v2  ;;  %v2768_v38 = vadd.f32 %v3115_v46, %v2753_v41  ;;  %v2754_v56 = vadd.f32 %v2743_v32, %v2577_v14  ;;  %v2745_v50 = vpop.f32.mrb[63].mxu1 }
 0x866   : > { %2823 = vst.msk [vmem:[%s4577_s28 + $0x14] sm:$0xf] %vm4813_vm3, %v3133_v37  ;;  %v2776_v31 = vadd.f32 %v3620_v30, %v2768_v38  ;;  %v2769_v4 = vadd.f32 %v3115_v46, %v2754_v56 }
 0x868   : > { %v2784_v62 = vadd.f32 %v3620_v30, %v2776_v31  ;;  %v2777_v36 = vadd.f32 %v3626_v34, %v2769_v4 }
 0x86a   : > { %v3134_v47 = vpack.c.bf16 %v2784_v62, %v2784_v62  ;;  %v2785_v8 = vadd.f32 %v3626_v34, %v2777_v36 }
 0x86c   : > { %2824 = vst.msk [vmem:[%s4577_s28 + $0x18] sm:$0xf] %vm4814_vm11, %v3134_v47  ;;  %v3135_v33 = vpack.c.bf16 %v2785_v8, %v2785_v8 }
 0x86e   : > { %2825 = vst.msk [vmem:[%s4577_s28 + $0x1c] sm:$0xf] %vm4815_vm13, %v3135_v33 }
 0x86f PF: > { %s21_s17 = sadd.s32 1, %s3475_s17  }
 0x870   : > { %p18_p4 = scmp.ge.s32.totalorder %s21_s17, 4  }
 0x872   :  { %20 = sbr.rel (!%p18_p4) target bundleno = 1 (0x1), region = 98 }

// kernel: decoder_forward.5
= control target key start
LH: loop header
LB: loop body
LE: loop exit
PB: predicated region body
PF: predicated region fallthrough
CT: control target
= control target key end

     0   :  { %s3800_s21 = smov 0   ;;  %s4882_s0 = inlined_call_operand.vmem [shape: bf16[2,64,64], index: 0, kind: input, shape index: {}]   ;;  %s4883_s1 = inlined_call_operand.vmem [shape: f32[64,64], index: 1, kind: input, shape index: {}]   ;;  %s4884_s2 = inlined_call_operand.vmem [shape: f32[1,64], index: 2, kind: input, shape index: {}]   ;;  %s4885_s3 = inlined_call_operand.vmem [shape: f32[1,64], index: 3, kind: input, shape index: {}]   ;;  %s4886_s4 = inlined_call_operand.vmem [shape: bf16[3,192,64], index: 4, kind: input, shape index: {}]   ;;  %s4887_s5 = inlined_call_operand.vmem [shape: f32[1,64], index: 5, kind: input, shape index: {}]   ;;  %s4888_s6 = inlined_call_operand.vmem [shape: f32[1,64], index: 6, kind: input, shape index: {}]   ;;  %s4889_s7 = inlined_call_operand.vmem [shape: f32[1,64], index: 7, kind: input, shape index: {}]   ;;  %s4890_s8 = inlined_call_operand.vmem [shape: bf16[3,192,64], index: 8, kind: input, shape index: {}]   ;;  %s4891_s9 = inlined_call_operand.vmem [shape: f32[1,64], index: 9, kind: input, shape index: {}]   ;;  %s4892_s10 = inlined_call_operand.vmem [shape: bf16[64,128], index: 10, kind: input, shape index: {}]   ;;  %s4893_s11 = inlined_call_operand.vmem [shape: bf16[64,128], index: 11, kind: input, shape index: {}]   ;;  %s4894_s12 = inlined_call_operand.vmem [shape: bf16[2,64,128], index: 12, kind: output, shape index: {}]  }
   0x1 LB: > { %s3047_s22 = sadd.s32 4294967295, %s3728_s21   ;;  %p3051_p0 = scmp.ge.s32.totalorder %s3728_s21, 1  ;;  %s3728_s21 = sphi %s3800_s21, %s22_s21  }
   0x2   : > { %p362_p1 = scmp.lt.s32.totalorder %s3728_s21, 3 }
   0x4   : > { %p363_p2 = pnand %p3051_p0, %p362_p1 }
   0x5   : > { %v526_v0 = vld [vmem:[%s4883_s1] sm:$0xff] (!%p363_p2)  ;;  %v527_v1 = vld [vmem:[%s4883_s1 + $0x8] sm:$0xff] (!%p363_p2)  ;;  %v528_v2 = vld [vmem:[%s4883_s1 + $0x10] sm:$0xff] (!%p363_p2)  ;;  %v4906_v3 = vmov (!%p363_p2), 0.0|0.0   ;;  %vm4895_vm0 = vmmov (!%p363_p2), 0   ;;  %v4899_v6 = vmov (!%p363_p2), 0.0   ;;  %v421_v47 = vlaneseq (!%p363_p2) }
   0x6   : > { %366 = sbr.rel (%p363_p2) target bundleno = 2160 (0x870), region = 68  ;;  %3497 = vmatprep.subr.bf16.mxu0 (!%p363_p2), %v4906_v3  ;;  %v3818_v4 = vpack.c.bf16 (!%p363_p2), %v527_v1, %v526_v0  ;;  %v529_v5 = vld [vmem:[%s4883_s1 + $0x18] sm:$0xff] (!%p363_p2)  ;;  %3405 = vmatprep.mubr.msk.f32.mxu0 (!%p363_p2), %vm4895_vm0, %v4899_v6  ;;  %p404_p3 = scmp.lt.s32.totalorder (!%p363_p2), %s3047_s22, 1  ;;  %v530_v7 = vld [vmem:[%s4883_s1 + $0x20] sm:$0xff] (!%p363_p2)  ;;  %v531_v9 = vld [vmem:[%s4883_s1 + $0x28] sm:$0xff] (!%p363_p2)  ;;  %vm4898_vm1 = vcmask (!%p363_p2), 523264  }
   0x7   : > { %3509 = vmatprep.subr.bf16.mxu1 (!%p363_p2), %v4906_v3  ;;  %3424 = vmatprep.mubr.msk.f32.mxu1 (!%p363_p2), %vm4895_vm0, %v4899_v6  ;;  %v3832_v8 = vpack.c.bf16 (!%p363_p2), %v529_v5, %v528_v2  ;;  %v532_v10 = vld [vmem:[%s4883_s1 + $0x30] sm:$0xff] (!%p363_p2)  ;;  %v533_v11 = vld [vmem:[%s4883_s1 + $0x38] sm:$0xff] (!%p363_p2)  ;;  %v3857_v12 = vpack.c.bf16 (!%p363_p2), %v531_v9, %v530_v7  ;;  %v3907_v48 = vshrl.u32 (!%p363_p2), %v421_v47, 7  ;;  %vm4901_vm2 = vcmask (!%p363_p2), 523268   ;;  %s3734_s19 = smov (!%p363_p2), 64  }
   0x8   : > { %3499 = vmatpush3.bf16.msra.mxu0 (!%p363_p2), %v3818_v4  ;;  %3511 = vmatpush3.bf16.msra.mxu1 (!%p363_p2), %v3818_v4  ;;  %v3882_v25 = vpack.c.bf16 (!%p363_p2), %v533_v11, %v532_v10  ;;  %vm4897_vm3 = vcmask (!%p363_p2), 519168   ;;  %v3572_v47 = vld [vmem:[%s4886_s4 + $0x70] sm:$0xff] (!%p363_p2)   ;;  %vm4902_vm5 = vcmask (!%p363_p2), 1046528   ;;  %vm4903_vm10 = vcmask (!%p363_p2), 1040384  }
   0x9   : > { %3500 = vmatprep.subr.bf16.mxu0 (!%p363_p2), %v4906_v3  ;;  %3512 = vmatprep.subr.bf16.mxu1 (!%p363_p2), %v4906_v3  ;;  %v3910_v49 = vsub.s32 (!%p363_p2), 0, %v3907_v48 }
   0xc   : > { %3502 = vmatpush3.bf16.msra.mxu0 (!%p363_p2), %v3832_v8  ;;  %3514 = vmatpush3.bf16.msra.mxu1 (!%p363_p2), %v3832_v8 }
   0xd   : > { %s5090_s22 = smov (!%p404_p3, %s3047_s22), 1  ;;  %3503 = vmatprep.subr.bf16.mxu0 %v4906_v3  ;;  %3515 = vmatprep.subr.bf16.mxu1 %v4906_v3 }
   0xe   : > { %s3304_s23 = sshll.u32 %s5090_s22, 5 }
   0xf   : > { %s3854_s26 = scalar_lea.vmem %s4882_s0, %s3304_s23  ;;  %s413_s20 = scalar_lea.vmem %s4894_s12, %s3304_s23 }
  0x10   : > { %v534_v13 = vld [vmem:[%s3854_s26] sm:$0xff]   ;;  %v536_v14 = vld [vmem:[%s3854_s26 + $0x8] sm:$0xff]   ;;  %v538_v15 = vld [vmem:[%s3854_s26 + $0x10] sm:$0xff]   ;;  %3505 = vmatpush3.bf16.msra.mxu0 %v3857_v12  ;;  %3517 = vmatpush3.bf16.msra.mxu1 %v3857_v12 }
  0x11   : > { %v540_v16 = vld [vmem:[%s3854_s26 + $0x18] sm:$0xff]   ;;  %v3865_v17 = vunpack.c.l.bf16 %v534_v13  ;;  %v3867_v18 = vunpack.c.h.bf16 %v534_v13  ;;  %v3869_v19 = vunpack.c.l.bf16 %v536_v14  ;;  %v3871_v20 = vunpack.c.h.bf16 %v536_v14  ;;  %3506 = vmatprep.subr.bf16.mxu0 %v4906_v3  ;;  %3518 = vmatprep.subr.bf16.mxu1 %v4906_v3 }
  0x12   : > { %v3874_v21 = vunpack.c.l.bf16 %v538_v15  ;;  %v3876_v22 = vunpack.c.h.bf16 %v538_v15  ;;  %v3878_v23 = vunpack.c.l.bf16 %v540_v16  ;;  %v3880_v24 = vunpack.c.h.bf16 %v540_v16 }
  0x13   : > { %v553_v26 = vsel %vm4898_vm1, %v3865_v17, 0.0  ;;  %v554_v27 = vsel %vm4898_vm1, %v3867_v18, 0.0  ;;  %v556_v28 = vsel %vm4898_vm1, %v3869_v19, 0.0  ;;  %v558_v30 = vsel %vm4898_vm1, %v3871_v20, 0.0 }
  0x14   : > { %v555_v29 = vadd.f32 %v554_v27, %v553_v26  ;;  %v560_v31 = vsel %vm4898_vm1, %v3874_v21, 0.0  ;;  %v562_v32 = vsel %vm4898_vm1, %v3876_v22, 0.0  ;;  %v564_v33 = vsel %vm4898_vm1, %v3878_v23, 0.0  ;;  %3508 = vmatpush3.bf16.msra.mxu0 %v3882_v25  ;;  %3520 = vmatpush3.bf16.msra.mxu1 %v3882_v25 }
  0x15   : > { %v566_v34 = vsel %vm4898_vm1, %v3880_v24, 0.0 }
  0x16   : > { %v557_v35 = vadd.f32 %v556_v28, %v555_v29 }
  0x18   : > { %v559_v36 = vadd.f32 %v558_v30, %v557_v35 }
  0x1a   : > { %v561_v37 = vadd.f32 %v560_v31, %v559_v36 }
  0x1c   : > { %v563_v38 = vadd.f32 %v562_v32, %v561_v37 }
  0x1e   : > { %v565_v39 = vadd.f32 %v564_v33, %v563_v38 }
  0x20   : > { %v567_v40 = vadd.f32 %v566_v34, %v565_v39 }
  0x22   : > { %v568_v41 = vrot.slane %v567_v40, 4 }
  0x24   : > { %v569_v42 = vadd.f32 %v568_v41, %v567_v40  ;;  %v3733_v41 = vmov 0  }
  0x25   : > { %417 = vst.msk [vmem:[#allocation2 + $0x8] sm:$0xf] %vm4897_vm3, %v3733_v41  ;;  %415 = vst [vmem:[#allocation2] sm:$0xf] %v3733_v41  ;;  %1399 = vmatprep.subr.bf16.mxu1 %v3733_v41  ;;  %1250 = vmatprep.subr.bf16.mxu0 %v3733_v41 }
  0x26   : > { %v570_v43 = vrot.slane %v569_v42, 2  ;;  %418 = vst [vmem:[#allocation2 + $0x40] sm:$0xf0] %v3733_v41  ;;  %420 = vst.msk [vmem:[#allocation2 + $0x48] sm:$0xf0] %vm4901_vm2, %v3733_v41 }
  0x28   : > { %v571_v44 = vadd.f32 %v570_v43, %v569_v42  ;;  %v3566_v42 = vld [vmem:[%s4886_s4] sm:$0xff]  }
  0x29   : > { %v3568_v43 = vld [vmem:[%s4886_s4 + $0x60] sm:$0xff]  }
  0x2a   : > { %v572_v45 = vrot.slane %v571_v44, 1 }
  0x2c   : > { %v573_v46 = vadd.f32 %v572_v45, %v571_v44  ;;  %v3567_v44 = vld [vmem:[%s4886_s4 + $0x8] sm:$0xff]  }
  0x2d   : > { %v3570_v45 = vld [vmem:[%s4886_s4 + $0x68] sm:$0xff]  }
  0x2e   : > { %3406 = vmatmul.mubr.msk.f32.vlgmr.msra.gmra.mrb[0].mxu0 %vm4898_vm1, %v573_v46  ;;  %v3569_v46 = vld [vmem:[%s4886_s4 + $0x10] sm:$0xff]  }
  0x2f   : > { %1251 = vmatpush1.bf16.msra.mxu0 %v3568_v43 }
  0x30   : > { %1252 = vmatprep.subr.bf16.mxu0 %v3733_v41 }
  0x33   : > { %1253 = vmatpush1.bf16.msra.mxu0 %v3570_v45 }
  0x34   : > { %1254 = vmatprep.subr.bf16.mxu0 %v3733_v41 }
  0x37   : > { %1255 = vmatpush1.bf16.msra.mxu0 %v3572_v47 }
  0x38   : > { %1256 = vmatprep.subr.bf16.mxu0 %v3733_v41 }
 0x101   : > { %v643_v50 = vpop.f32.mrb[0].mxu0 }
 0x102   : > { %v648_v51 = vmul.f32 0.0078125, %v643_v50  ;;  %v3407_v52 = vpop.f32.mrb[1].mxu0  ;;  %v3571_v50 = vld [vmem:[%s4886_s4 + $0x18] sm:$0xff]  }
 0x103   : > { %v3573_v52 = vld [vmem:[%s4886_s4 + $0x20] sm:$0xff]  }
 0x104   : > { %v652_v53 = vrot.slane %v648_v51, %v3910_v49  ;;  %v3574_v51 = vld [vmem:[%s4886_s4 + $0x78] sm:$0xff]  }
 0x105   : > { %1257 = vmatpush1.bf16.msra.mxu0 %v3574_v51 }
 0x106   : > { %v3914_v54 = vsub.f32 %v3865_v17, %v652_v53  ;;  %v3917_v55 = vsub.f32 %v3867_v18, %v652_v53  ;;  %v3920_v56 = vsub.f32 %v3869_v19, %v652_v53  ;;  %v3923_v57 = vsub.f32 %v3871_v20, %v652_v53  ;;  %1258 = vmatprep.subr.bf16.mxu0 %v3733_v41 }
 0x107   : > { %v3926_v58 = vsub.f32 %v3874_v21, %v652_v53  ;;  %v3935_v62 = vsub.f32 %v3876_v22, %v652_v53  ;;  %v3942_v5 = vsub.f32 %v3878_v23, %v652_v53  ;;  %v3948_v11 = vsub.f32 %v3880_v24, %v652_v53  ;;  %v3576_v53 = vld [vmem:[%s4886_s4 + $0x80] sm:$0xff]  }
 0x108   : > { %v661_v59 = vmul.f32 %v3914_v54, %v3914_v54  ;;  %v662_v60 = vmul.f32 %v3917_v55, %v3917_v55  ;;  %v663_v61 = vmul.f32 %v3920_v56, %v3920_v56  ;;  %v664_v63 = vmul.f32 %v3923_v57, %v3923_v57 }
 0x109   : > { %v665_v7 = vmul.f32 %v3926_v58, %v3926_v58  ;;  %v666_v13 = vmul.f32 %v3935_v62, %v3935_v62  ;;  %v667_v16 = vmul.f32 %v3942_v5, %v3942_v5  ;;  %v668_v28 = vmul.f32 %v3948_v11, %v3948_v11  ;;  %1259 = vmatpush1.bf16.msra.mxu0 %v3576_v53 }
 0x10a   : > { %v669_v0 = vsel %vm4898_vm1, %v661_v59, 0.0  ;;  %v670_v1 = vsel %vm4898_vm1, %v662_v60, 0.0  ;;  %v672_v9 = vsel %vm4898_vm1, %v663_v61, 0.0  ;;  %v674_v14 = vsel %vm4898_vm1, %v664_v63, 0.0  ;;  %v3575_v59 = vld [vmem:[%s4886_s4 + $0x28] sm:$0xff]   ;;  %1260 = vmatprep.subr.bf16.mxu0 %v3733_v41  ;;  %v3577_v61 = vld [vmem:[%s4886_s4 + $0x30] sm:$0xff]  }
 0x10b   : > { %v671_v2 = vadd.f32 %v670_v1, %v669_v0  ;;  %v676_v26 = vsel %vm4898_vm1, %v665_v7, 0.0  ;;  %v678_v29 = vsel %vm4898_vm1, %v666_v13, 0.0  ;;  %v680_v31 = vsel %vm4898_vm1, %v667_v16, 0.0  ;;  %v3578_v60 = vld [vmem:[%s4886_s4 + $0x88] sm:$0xff]   ;;  %v3580_v63 = vld [vmem:[%s4886_s4 + $0x90] sm:$0xff]   ;;  %v3579_v0 = vld [vmem:[%s4886_s4 + $0x38] sm:$0xff]  }
 0x10c   : > { %v682_v33 = vsel %vm4898_vm1, %v668_v28, 0.0  ;;  %v3582_v1 = vld [vmem:[%s4886_s4 + $0x98] sm:$0xff]   ;;  %v3584_v7 = vld [vmem:[%s4886_s4 + $0xa0] sm:$0xff]  }
 0x10d   : > { %v673_v10 = vadd.f32 %v672_v9, %v671_v2  ;;  %1261 = vmatpush1.bf16.msra.mxu0 %v3578_v60  ;;  %v3581_v2 = vld [vmem:[%s4886_s4 + $0x40] sm:$0xff]   ;;  %v3583_v9 = vld [vmem:[%s4886_s4 + $0x48] sm:$0xff]  }
 0x10e   : > { %1262 = vmatprep.subr.bf16.mxu0 %v3733_v41 }
 0x10f   : > { %v675_v15 = vadd.f32 %v674_v14, %v673_v10 }
 0x111   : > { %v677_v27 = vadd.f32 %v676_v26, %v675_v15  ;;  %1263 = vmatpush1.bf16.msra.mxu0 %v3580_v63 }
 0x112   : > { %1264 = vmatprep.subr.bf16.mxu0 %v3733_v41 }
 0x113   : > { %v679_v30 = vadd.f32 %v678_v29, %v677_v27  ;;  %v3058_v27 = vld [vmem:[%s4884_s2] ss:$0 sm:$0xff] }
 0x115   : > { %v681_v32 = vadd.f32 %v680_v31, %v679_v30  ;;  %1265 = vmatpush1.bf16.msra.mxu0 %v3582_v1 }
 0x116   : > { %1266 = vmatprep.subr.bf16.mxu0 %v3733_v41 }
 0x117   : > { %v683_v34 = vadd.f32 %v682_v33, %v681_v32  ;;  %v3059_v32 = vld [vmem:[%s4885_s3] ss:$0 sm:$0xff] }
 0x119   : > { %v684_v35 = vrot.slane %v683_v34, 4  ;;  %1267 = vmatpush1.bf16.msra.mxu0 %v3584_v7 }
 0x11a   : > { %1268 = vmatprep.subr.bf16.mxu0 %v3733_v41 }
 0x11b   : > { %v685_v36 = vadd.f32 %v684_v35, %v683_v34 }
 0x11d   : > { %v686_v37 = vrot.slane %v685_v36, 2 }
 0x11f   : > { %v687_v38 = vadd.f32 %v686_v37, %v685_v36 }
 0x121   : > { %v688_v39 = vrot.slane %v687_v38, 1 }
 0x123   : > { %v689_v40 = vadd.f32 %v688_v39, %v687_v38 }
 0x125   : > { %3425 = vmatmul.mubr.msk.f32.vlgmr.msra.gmra.mrb[0].mxu1 %vm4898_vm1, %v689_v40 }
 0x126   : > { %1400 = vmatpush1.bf16.msra.mxu1 %v3566_v42 }
 0x127   : > { %1401 = vmatprep.subr.bf16.mxu1 %v3733_v41 }
 0x12a   : > { %1402 = vmatpush1.bf16.msra.mxu1 %v3567_v44 }
 0x12b   : > { %1403 = vmatprep.subr.bf16.mxu1 %v3733_v41 }
 0x12e   : > { %1404 = vmatpush1.bf16.msra.mxu1 %v3569_v46 }
 0x12f   : > { %1405 = vmatprep.subr.bf16.mxu1 %v3733_v41 }
 0x132   : > { %1406 = vmatpush1.bf16.msra.mxu1 %v3571_v50 }
 0x133   : > { %1407 = vmatprep.subr.bf16.mxu1 %v3733_v41 }
 0x136   : > { %1408 = vmatpush1.bf16.msra.mxu1 %v3573_v52 }
 0x137   : > { %1409 = vmatprep.subr.bf16.mxu1 %v3733_v41 }
 0x13a   : > { %1410 = vmatpush1.bf16.msra.mxu1 %v3575_v59 }
 0x13b   : > { %1411 = vmatprep.subr.bf16.mxu1 %v3733_v41 }
 0x13e   : > { %1412 = vmatpush1.bf16.msra.mxu1 %v3577_v61 }
 0x13f   : > { %1413 = vmatprep.subr.bf16.mxu1 %v3733_v41 }
 0x142   : > { %1414 = vmatpush1.bf16.msra.mxu1 %v3579_v0 }
 0x143   : > { %1415 = vmatprep.subr.bf16.mxu1 %v3733_v41 }
 0x146   : > { %1416 = vmatpush1.bf16.msra.mxu1 %v3581_v2 }
 0x147   : > { %1417 = vmatprep.subr.bf16.mxu1 %v3733_v41 }
 0x14a   : > { %1418 = vmatpush1.bf16.msra.mxu1 %v3583_v9 }
 0x14b   : > { %1419 = vmatprep.subr.bf16.mxu1 %v3733_v41 }
 0x1f8   : > { %v759_v10 = vpop.f32.mrb[0].mxu1 }
 0x1f9   : > { %v763_v13 = vmul.f32 0.0078125, %v759_v10  ;;  %v3426_v14 = vpop.f32.mrb[1].mxu1 }
 0x1fb   : > { %v764_v15 = vadd.f32 1e-05, %v763_v13 }
 0x1fd   : > { %3650 = vrsqrt.f32 %v764_v15  ;;  %v423_v15 = vadd.s32 8, %v3907_v48 }
 0x207   : > { %v3651_v16 = vpop.eup %3650 }
 0x208   : > { %v769_v26 = vrot.slane %v3651_v16, %v3910_v49  ;;  %v4087_v16 = vadd.s32 16, %v3907_v48 }
 0x20a   : > { %v770_v28 = vmul.f32 %v769_v26, %v3914_v54  ;;  %v771_v29 = vmul.f32 %v769_v26, %v3917_v55  ;;  %v772_v30 = vmul.f32 %v769_v26, %v3920_v56  ;;  %v773_v31 = vmul.f32 %v769_v26, %v3923_v57 }
 0x20b   : > { %v774_v33 = vmul.f32 %v769_v26, %v3926_v58  ;;  %v775_v34 = vmul.f32 %v769_v26, %v3935_v62  ;;  %v776_v35 = vmul.f32 %v769_v26, %v3942_v5  ;;  %v777_v36 = vmul.f32 %v769_v26, %v3948_v11 }
 0x20c   : > { %v784_v37 = vmul.f32 %v3058_v27, %v770_v28  ;;  %v785_v54 = vmul.f32 %v3058_v27, %v771_v29  ;;  %v786_v38 = vmul.f32 %v3058_v27, %v772_v30  ;;  %v787_v55 = vmul.f32 %v3058_v27, %v773_v31 }
 0x20d   : > { %v788_v39 = vmul.f32 %v3058_v27, %v774_v33  ;;  %v789_v56 = vmul.f32 %v3058_v27, %v775_v34  ;;  %v790_v40 = vmul.f32 %v3058_v27, %v776_v35  ;;  %v791_v57 = vmul.f32 %v3058_v27, %v777_v36 }
 0x20e   : > { %v4061_v42 = vadd.f32 %v3059_v32, %v784_v37  ;;  %v4063_v43 = vadd.f32 %v3059_v32, %v785_v54  ;;  %v4065_v44 = vadd.f32 %v3059_v32, %v786_v38  ;;  %v4067_v58 = vadd.f32 %v3059_v32, %v787_v55 }
 0x20f   : > { %v4069_v62 = vadd.f32 %v3059_v32, %v788_v39  ;;  %v4071_v5 = vadd.f32 %v3059_v32, %v789_v56  ;;  %v4076_v47 = vadd.f32 %v3059_v32, %v790_v40  ;;  %v4079_v51 = vadd.f32 %v3059_v32, %v791_v57 }
 0x210   : > { %v3060_v11 = vmul.f32 -1.442695, %v4061_v42  ;;  %v3061_v45 = vmul.f32 -1.442695, %v4063_v43  ;;  %v3062_v46 = vmul.f32 -1.442695, %v4065_v44 }
 0x211   : > { %v3063_v50 = vmul.f32 -1.442695, %v4067_v58  ;;  %v3064_v52 = vmul.f32 -1.442695, %v4069_v62  ;;  %v3065_v53 = vmul.f32 -1.442695, %v4071_v5 }
 0x212   : > { %3652 = vpow2.f32 %v3060_v11  ;;  %v3066_v59 = vmul.f32 -1.442695, %v4076_v47  ;;  %v3067_v60 = vmul.f32 -1.442695, %v4079_v51  ;;  %v4090_v28 = vadd.s32 24, %v3907_v48  ;;  %v3586_v11 = vld [vmem:[%s4886_s4 + $0xa8] sm:$0xff]  }
 0x213   : > { %3654 = vpow2.f32 %v3061_v45  ;;  %v434_v33 = vand.u32 7, %v3907_v48  ;;  %v441_v34 = vand.u32 7, %v423_v15  ;;  %v448_v35 = vand.u32 7, %v4087_v16  ;;  %1269 = vmatpush1.bf16.msra.mxu0 %v3586_v11 }
 0x214   : > { %3656 = vpow2.f32 %v3062_v46  ;;  %v455_v36 = vand.u32 7, %v4090_v28  ;;  %v426_v37 = vadd.s32 32, %v3907_v48  ;;  %v427_v54 = vadd.s32 40, %v3907_v48  ;;  %1270 = vmatprep.subr.bf16.mxu0 %v3733_v41 }
 0x215   : > { %3658 = vpow2.f32 %v3063_v50  ;;  %v4098_v38 = vadd.s32 48, %v3907_v48  ;;  %v4101_v55 = vadd.s32 56, %v3907_v48  ;;  %vm4103_vm4 = vcmp.eq.s32.totalorder %v434_v33, 7  ;;  %v3585_v48 = vld [vmem:[%s4886_s4 + $0x50] sm:$0xff]  }
 0x216   : > { %3660 = vpow2.f32 %v3064_v52  ;;  %v4917_v56 = vmov 0  ;;  %vm4107_vm6 = vcmp.eq.s32.totalorder %v441_v34, 7  ;;  %v4919_v40 = vmov 0  ;;  %1420 = vmatpush1.bf16.msra.mxu1 %v3585_v48 }
 0x217   : > { %3662 = vpow2.f32 %v3065_v53  ;;  %v4918_v56 = vsel %vm4103_vm4, 4294967295, %v4917_v56  ;;  %v4920_v40 = vsel %vm4107_vm6, 4294967295, %v4919_v40  ;;  %vm4113_vm7 = vcmp.eq.s32.totalorder %v448_v35, 7  ;;  %1421 = vmatprep.subr.bf16.mxu1 %v3733_v41 }
 0x218   : > { %3664 = vpow2.f32 %v3066_v59  ;;  %v4921_v57 = vmov 0  ;;  %vm4128_vm8 = vcmp.eq.s32.totalorder %v455_v36, 7  ;;  %v4923_v50 = vmov 0 }
 0x219   : > { %3666 = vpow2.f32 %v3067_v60  ;;  %v4922_v57 = vsel %vm4113_vm7, 4294967295, %v4921_v57  ;;  %v4924_v50 = vsel %vm4128_vm8, 4294967295, %v4923_v50  ;;  %v462_v52 = vand.u32 7, %v426_v37 }
 0x21a   : > { %v469_v53 = vand.u32 7, %v427_v54  ;;  %vm4140_vm11 = vcmp.eq.s32.totalorder %v434_v33, 0  ;;  %vm4155_vm12 = vcmp.eq.s32.totalorder %v441_v34, 0  ;;  %vm4213_vm3 = vcmp.eq.s32.totalorder %v448_v35, 0 }
 0x21b   : > { %vm4169_vm13 = vcmp.eq.s32.totalorder %v462_v52, 0  ;;  %vm4193_vm15 = vcmp.eq.s32.totalorder %v462_v52, 7  ;;  %vm4224_vm1 = vcmp.eq.s32.totalorder %v455_v36, 0 }
 0x21c   : > { %v3653_v61 = vpop.eup %3652  ;;  %vm4173_vm14 = vcmp.eq.s32.totalorder %v469_v53, 0  ;;  %vm4197_vm0 = vcmp.eq.s32.totalorder %v469_v53, 7 }
 0x21d   : > { %v3655_v63 = vpop.eup %3654  ;;  %v830_v0 = vadd.f32 1.0, %v3653_v61  ;;  %v476_v61 = vand.u32 7, %v4098_v38 }
 0x21e   : > { %v3657_v1 = vpop.eup %3656  ;;  %v831_v2 = vadd.f32 1.0, %v3655_v63 }
 0x21f   : > { %v3659_v7 = vpop.eup %3658  ;;  %3668 = vrcp.f32 %v830_v0  ;;  %v832_v9 = vadd.f32 1.0, %v3657_v1  ;;  %vm4233_vm2 = vcmp.eq.s32.totalorder %v476_v61, 0 }
 0x220   : > { %v3661_v10 = vpop.eup %3660  ;;  %3670 = vrcp.f32 %v831_v2  ;;  %v833_v13 = vadd.f32 1.0, %v3659_v7 }
 0x221   : > { %v3663_v14 = vpop.eup %3662  ;;  %v834_v26 = vadd.f32 1.0, %v3661_v10  ;;  %3672 = vrcp.f32 %v832_v9 }
 0x222   : > { %v3665_v27 = vpop.eup %3664  ;;  %v835_v29 = vadd.f32 1.0, %v3663_v14  ;;  %3674 = vrcp.f32 %v833_v13  ;;  %v4927_v14 = vmov 0 }
 0x223   : > { %v3667_v30 = vpop.eup %3666  ;;  %3676 = vrcp.f32 %v834_v26  ;;  %v836_v31 = vadd.f32 1.0, %v3665_v27  ;;  %v4928_v14 = vsel %vm4155_vm12, 4294967295, %v4927_v14 }
 0x224   : > { %3678 = vrcp.f32 %v835_v29  ;;  %v837_v32 = vadd.f32 1.0, %v3667_v30 }
 0x225   : > { %3680 = vrcp.f32 %v836_v31  ;;  %v4931_v31 = vmov 0 }
 0x226   : > { %3682 = vrcp.f32 %v837_v32  ;;  %v4932_v31 = vsel %vm4173_vm14, 4294967295, %v4931_v31  ;;  %v3588_v32 = vld [vmem:[%s4886_s4 + $0xb0] sm:$0xff]  }
 0x227   : > { %1271 = vmatpush1.bf16.msra.mxu0 %v3588_v32 }
 0x228   : > { %1272 = vmatprep.subr.bf16.mxu0 %v3733_v41 }
 0x229   : > { %v3669_v39 = vpop.eup %3668 }
 0x22a   : > { %v3671_v45 = vpop.eup %3670  ;;  %v4124_v46 = vmul.f32 %v3669_v39, %v4061_v42 }
 0x22b   : > { %v3673_v59 = vpop.eup %3672  ;;  %v4133_v60 = vmul.f32 %v3671_v45, %v4063_v43  ;;  %v483_v43 = vand.u32 7, %v4101_v55 }
 0x22c   : > { %v3675_v42 = vpop.eup %3674  ;;  %v936_v63 = vrot.slane %v4124_v46, 1  ;;  %v4138_v0 = vmul.f32 %v3673_v59, %v4065_v44  ;;  %v879_v2 = vrot.slane %v4124_v46, 7 }
 0x22d   : > { %v3677_v7 = vpop.eup %3676  ;;  %v880_v9 = vrot.slane %v4133_v60, 7  ;;  %v937_v10 = vrot.slane %v4133_v60, 1  ;;  %v1010_v44 = vpack.c.bf16 %v4133_v60, %v4124_v46  ;;  %v4153_v13 = vmul.f32 %v3675_v42, %v4067_v58 }
 0x22e   : > { %v3679_v15 = vpop.eup %3678  ;;  %v4160_v26 = vmul.f32 %v3677_v7, %v4069_v62  ;;  %v939_v29 = vrot.slane %v4138_v0, 1  ;;  %v4167_v30 = vsel %vm4903_vm10, 0.0, %v879_v2  ;;  %v4929_v58 = vmov 0  ;;  %v3587_v62 = vld [vmem:[%s4886_s4 + $0x58] sm:$0xff]  }
 0x22f   : > { %v4930_v58 = vsel %vm4169_vm13, 4294967295, %v4929_v58  ;;  %v3681_v33 = vpop.eup %3680  ;;  %v1018_v34 = vrot.slane %v1010_v44, 4  ;;  %v938_v37 = vsel %vm4902_vm5, %v936_v63, %v937_v10  ;;  %v4185_v54 = vmul.f32 %v3679_v15, %v4071_v5  ;;  %1422 = vmatpush1.bf16.msra.mxu1 %v3587_v62  ;;  %v3589_v5 = vld [vmem:[%s4886_s4 + $0xb8] sm:$0xff]  }
 0x230   : > { %v884_v38 = vrot.slane %v4153_v13, 7  ;;  %v976_v55 = vsel %vm4103_vm4, 0.0, %v938_v37  ;;  %v886_v39 = vrot.slane %v4160_v26, 7  ;;  %v941_v48 = vrot.slane %v4153_v13, 1  ;;  %v3683_v42 = vpop.eup %3682  ;;  %3521 = vmatprep.subr.bf16.mxu1 %v4906_v3  ;;  %1273 = vmatpush1.bf16.msra.mxu0 %v3589_v5 }
 0x231   : > { %v943_v11 = vrot.slane %v4160_v26, 1  ;;  %1025 = vrot.lane.b32.xlu0 %v1018_v34, %s3734_s19  ;;  %v888_v63 = vrot.slane %v4185_v54, 7  ;;  %v945_v52 = vrot.slane %v4185_v54, 1  ;;  %v1011_v53 = vpack.c.bf16 %v4153_v13, %v4138_v0  ;;  %1566 = vmatprep.subr.bf16.mxu0 %v3733_v41 }
 0x232   : > { %v1012_v7 = vpack.c.bf16 %v4185_v54, %v4160_v26  ;;  %v940_v62 = vsel %vm4902_vm5, %v937_v10, %v939_v29  ;;  %v942_v32 = vsel %vm4902_vm5, %v939_v29, %v941_v48  ;;  %v860_v37 = vmul.f32 %v3681_v33, %v4076_v47 }
 0x233   : > { %v944_v15 = vsel %vm4902_vm5, %v941_v48, %v943_v11  ;;  %v1019_v35 = vrot.slane %v1011_v53, 4  ;;  %v977_v10 = vsel %vm4107_vm6, 0.0, %v940_v62  ;;  %v4941_v29 = vmov 0 }
 0x234   : > { %v979_v16 = vsel %vm4128_vm8, 0.0, %v944_v15  ;;  %v1021_v6 = vrot.slane %v1012_v7, 4  ;;  %v4942_v29 = vsel %vm4233_vm2, 4294967295, %v4941_v29  ;;  %vm4237_vm5 = vcmp.eq.s32.totalorder %v483_v43, 0 }
 0x235   : > { %v4943_v47 = vmov 0  ;;  %v978_v28 = vsel %vm4113_vm7, 0.0, %v942_v32  ;;  %v1048_v36 = vpack.c.bf16 %v977_v10, %v976_v55  ;;  %v861_v33 = vmul.f32 %v3683_v42, %v4079_v51 }
 0x236   : > { %v4944_v47 = vsel %vm4237_vm5, 4294967295, %v4943_v47  ;;  %v890_v48 = vrot.slane %v860_v37, 7  ;;  %vm4244_vm10 = vcmp.eq.s32.totalorder %v476_v61, 7  ;;  %v4945_v53 = vmov 0 }
 0x237   : > { %v4946_v53 = vsel %vm4244_vm10, 4294967295, %v4945_v53  ;;  %vm4248_vm9 = vcmp.eq.s32.totalorder %v483_v43, 7  ;;  %v4947_v7 = vmov 0  ;;  %vm4949_vm8 = vcmask 1043456  }
 0x238   : > { %v4948_v7 = vsel %vm4248_vm9, 4294967295, %v4947_v7  ;;  %v1022_v15 = vsel %vm4949_vm8, %v1019_v35, %v1021_v6  ;;  %v1049_v62 = vpack.c.bf16 %v979_v16, %v978_v28  ;;  %vm4950_vm6 = vmmov %vm4949_vm8  ;;  %v947_v27 = vrot.slane %v860_v37, 1 }
 0x239   : > { %v1020_v3 = vsel %vm4950_vm6, %v1018_v34, %v1019_v35  ;;  %1029 = vrot.lane.b32.xlu1 %v1022_v15, %s3734_s19  ;;  %v1056_v51 = vrot.slane %v1048_v36, 4  ;;  %v892_v61 = vrot.slane %v861_v33, 7  ;;  %v949_v55 = vrot.slane %v861_v33, 1 }
 0x23a   : > { %1027 = vrot.lane.b32.xlu0 %v1020_v3, %s3734_s19  ;;  %v1013_v43 = vpack.c.bf16 %v861_v33, %v860_v37  ;;  %v1057_v42 = vrot.slane %v1049_v62, 4  ;;  %vm4951_vm8 = vcmask 1040384   ;;  %v919_v34 = vsel %vm4140_vm11, 0.0, %v4167_v30 }
 0x23b   : > { %v881_v5 = vsel %vm4951_vm8, %v879_v2, %v880_v9  ;;  %vm4952_vm6 = vmmov %vm4951_vm8  ;;  %vm4953_vm7 = vcmask 523268   ;;  %vm4954_vm4 = vcmask 1046528   ;;  %vm4956_vm8 = vcmask 1043456  }
 0x23c   : > { %v887_v32 = vsel %vm4952_vm6, %v884_v38, %v886_v39  ;;  %1068 = vst.msk [vmem:[#allocation2 + $0x8] sm:$0xf0] %vm4953_vm7, %v1056_v51  ;;  %v959_v3 = vsel %vm4954_vm4, %v949_v55, 0.0  ;;  %v1023_v37 = vrot.slane %v1013_v43, 4  ;;  %v920_v16 = vsel %vm4155_vm12, 0.0, %v881_v5  ;;  %vm4955_vm9 = vmmov %vm4952_vm6 }
 0x23d   : > { %v889_v46 = vsel %vm4955_vm9, %v886_v39, %v888_v63  ;;  %v1058_v2 = vsel %vm4956_vm8, %v1056_v51, %v1057_v42  ;;  %v984_v35 = vpack.c.bf16 %v920_v16, %v919_v34  ;;  %v923_v30 = vsel %vm4169_vm13, 0.0, %v887_v32  ;;  %vm4958_vm4 = vmmov %vm4956_vm8 }
 0x23e   : > { %v924_v10 = vsel %vm4173_vm14, 0.0, %v889_v46  ;;  %vm4957_vm7 = vcmask 523264   ;;  %v1024_v28 = vsel %vm4958_vm4, %v1021_v6, %v1023_v37  ;;  %1033 = vrot.lane.b32.xlu0 %v1023_v37, %s3734_s19  ;;  %vm4959_vm6 = vcmask 1046528  }
 0x23f   : > { %1069 = vst.msk [vmem:[#allocation2 + $0x18] sm:$0xff] %vm4957_vm7, %v1058_v2  ;;  %v946_v36 = vsel %vm4959_vm6, %v943_v11, %v945_v52  ;;  %vm4960_vm12 = vmmov %vm4959_vm6  ;;  %v986_v39 = vpack.c.bf16 %v924_v10, %v923_v30  ;;  %1031 = vrot.lane.b32.xlu1 %v1024_v28, %s3734_s19  ;;  %v993_v15 = vrot.slane %v984_v35, 4  ;;  %v4961_v43 = vrot.slane %v4138_v0, 7 }
 0x240   : > { %v948_v33 = vsel %vm4960_vm12, %v945_v52, %v947_v27  ;;  %v980_v62 = vsel %vm4193_vm15, 0.0, %v946_v36  ;;  %vm4963_vm12 = vmmov %vm4955_vm9  ;;  %vm4964_vm8 = vcmask 523268   ;;  %v950_v13 = vsel %vm4959_vm6, %v947_v27, %v949_v55 }
 0x241   : > { %v981_v51 = vsel %vm4197_vm0, 0.0, %v948_v33  ;;  %v883_v6 = vsel %vm4955_vm9, %v880_v9, %v4961_v43  ;;  %v996_v5 = vrot.slane %v986_v39, 4  ;;  %v4962_v52 = vmov %v4961_v43  ;;  %1005 = vst.msk [vmem:[#allocation2] sm:$0xf0] %vm4964_vm8, %v993_v15  ;;  %vm4965_vm7 = vmmov %vm4955_vm9 }
 0x242   : > { %v1050_v11 = vpack.c.bf16 %v981_v51, %v980_v62  ;;  %v885_v34 = vsel %vm4963_vm12, %v4962_v52, %v884_v38  ;;  %v921_v32 = vsel %vm4213_vm3, 0.0, %v883_v6  ;;  %v891_v60 = vsel %vm4965_vm7, %v888_v63, %v890_v48  ;;  %vm4966_vm4 = vmmov %vm4965_vm7 }
 0x243   : > { %v922_v37 = vsel %vm4224_vm1, 0.0, %v885_v34  ;;  %v893_v9 = vsel %vm4966_vm4, %v890_v48, %v892_v61  ;;  %v925_v38 = vsel %vm4233_vm2, 0.0, %v891_v60  ;;  %v1074_v2 = vld [vmem:[#allocation2 + $0x8] sm:$0xff]  ;;  %v982_v30 = vsel %vm4244_vm10, 0.0, %v950_v13 }
 0x244   : > { %v1059_v16 = vrot.slane %v1050_v11, 4  ;;  %v985_v0 = vpack.c.bf16 %v922_v37, %v921_v32  ;;  %v926_v46 = vsel %vm4237_vm5, 0.0, %v893_v9  ;;  %v1106_v35 = vld [vmem:[#allocation2 + $0x8] sm:$0xf0]  ;;  %vm4967_vm9 = vnez %v4948_v7 }
 0x245   : > { %v983_v54 = vsel %vm4967_vm9, 0.0, %v959_v3  ;;  %v987_v63 = vpack.c.bf16 %v926_v46, %v925_v38  ;;  %vm4968_vm12 = vcmask 523264   ;;  %v1147_v27 = vrot.slane %v1106_v35, 4 }
 0x246   : > { %3120 = vmatprep.mubr.msk.bf16.mxu1 %vm4968_vm12, %v1074_v2  ;;  %v994_v48 = vrot.slane %v985_v0, 4  ;;  %vm4969_vm8 = vcmask 1043456   ;;  %v1051_v55 = vpack.c.bf16 %v983_v54, %v982_v30  ;;  %v4320_v10 = vld [vmem:[#allocation2 + $0x18] sm:$0xff]  ;;  %vm4970_vm7 = vmmov %vm4968_vm12  ;;  %vm1040_vm10 = vcmask 1048068   ;;  %v3590_v0 = vld [vmem:[%s4886_s4 + $0xc0] sm:$0xff]  }
 0x247   : > { %v1060_v61 = vsel %vm4969_vm8, %v1057_v42, %v1059_v16  ;;  %v998_v28 = vrot.slane %v987_v63, 4  ;;  %v1148_v36 = vrot.slane %v4320_v10, 4  ;;  %vm4971_vm4 = vmmov %vm4969_vm8  ;;  %vm4976_vm8 = vcmask 519168   ;;  %v3591_v2 = vld [vmem:[%s4886_s4 + $0xc8] sm:$0xff]  }
 0x248   : > { %1070 = vst.msk [vmem:[#allocation2 + $0x28] sm:$0xff] %vm4970_vm7, %v1060_v61  ;;  %v997_v33 = vsel %vm4971_vm4, %v994_v48, %v996_v5  ;;  %vm4972_vm6 = vmmov %vm4971_vm4  ;;  %v1061_v3 = vrot.slane %v1051_v55, 4  ;;  %v4984_v37 = vmov 0.0|0.0  }
 0x249   : > { %v995_v39 = vsel %vm4972_vm6, %v993_v15, %v994_v48  ;;  %vm4973_vm5 = vmmov %vm4970_vm7  ;;  %1009 = vst.msk [vmem:[#allocation2 + $0x40] sm:$0xf] %vm4976_vm8, %v998_v28 }
 0x24a   : > { %1007 = vst.msk [vmem:[#allocation2 + $0x20] sm:$0xff] %vm4973_vm5, %v997_v33  ;;  %vm4974_vm12 = vmmov %vm4973_vm5 }
 0x24b   : > { %1006 = vst.msk [vmem:[#allocation2 + $0x10] sm:$0xff] %vm4974_vm12, %v995_v39  ;;  %vm4975_vm2 = vmmov %vm4971_vm4 }
 0x24c   : > { %v999_v62 = vsel %vm4975_vm2, %v996_v5, %v998_v28  ;;  %vm4977_vm14 = vmmov %vm4975_vm2  ;;  %v3593_v28 = vld [vmem:[%s4886_s4 + $0xd8] sm:$0xff]  }
 0x24d   : > { %v1149_v42 = vsel %vm4977_vm14, %v1147_v27, %v1148_v36  ;;  %vm4978_vm13 = vmmov %vm4973_vm5  ;;  %v3592_v27 = vld [vmem:[%s4886_s4 + $0xd0] sm:$0xff]  }
 0x24e   : > { %1008 = vst.msk [vmem:[#allocation2 + $0x30] sm:$0xff] %vm4978_vm13, %v999_v62  ;;  %vm4979_vm7 = vmmov %vm4975_vm2  ;;  %vm1046_vm2 = vcmask 1043968  }
 0x24f   : > { %v1062_v51 = vsel %vm4979_vm7, %v1059_v16, %v1061_v3  ;;  %vm4980_vm9 = vmmov %vm4976_vm8  ;;  %v4342_v34 = vld [vmem:[#allocation2 + $0x28] sm:$0xff] }
 0x250   : > { %1072 = vst.msk [vmem:[#allocation2 + $0x48] sm:$0xf] %vm4980_vm9, %v1061_v3  ;;  %vm4981_vm4 = vmmov %vm4973_vm5  ;;  %vm1042_vm5 = vcmask 1048064   ;;  %v1152_v9 = vrot.slane %v4342_v34, 4  ;;  %v3594_v3 = vld [vmem:[%s4886_s4 + $0xe0] sm:$0xff]  }
 0x251   : > { %3104 = vmatprep.mubr.msk.bf16.mxu0 %vm4981_vm4, %v1149_v42  ;;  %vm4982_vm6 = vmmov %vm4981_vm4 }
 0x252   : > { %1071 = vst.msk [vmem:[#allocation2 + $0x38] sm:$0xff] %vm4982_vm6, %v1062_v51  ;;  %vm4983_vm13 = vmmov %vm4981_vm4 }
 0x253   : > { %vm4985_vm14 = vmmov %vm4979_vm7 }
 0x254   : > { %vm4986_vm9 = vmmov %vm4979_vm7 }
 0x255   : > { %v1153_v46 = vsel %vm4986_vm9, %v1148_v36, %v1152_v9  ;;  %vm4987_vm12 = vmmov %vm4981_vm4 }
 0x256   : > { %vm4988_vm8 = vmmov %vm4981_vm4 }
 0x257   : > { %vm4989_vm4 = vmmov %vm4979_vm7  ;;  %v1108_v36 = vld [vmem:[#allocation2 + $0x48] sm:$0xf] }
 0x258   : > { %v1160_v39 = vrot.slane %v1108_v36, 4  ;;  %vm4992_vm9 = vmmov %vm4989_vm4 }
 0x259   : > { %v4363_v35 = vld [vmem:[#allocation2 + $0x38] sm:$0xff] }
 0x25a   : > { %v1156_v54 = vrot.slane %v4363_v35, 4 }
 0x25c   : > { %v1157_v61 = vsel %vm4989_vm4, %v1152_v9, %v1156_v54  ;;  %v1161_v42 = vsel %vm4992_vm9, %v1156_v54, %v1160_v39  ;;  %v3599_v9 = vld [vmem:[%s4886_s4 + $0x108] sm:$0xff]  }
 0x2a3   : > { %v1026_v15 = vpop.permute.xlu0 %1025 }
 0x2a4   : > { %1041 = vst.msk [vmem:[#allocation2] sm:$0xf0] %vm1040_vm10, %v1026_v15  ;;  %v3595_v15 = vld [vmem:[%s4886_s4 + $0xe8] sm:$0xff]  }
 0x2ab   : > { %v1030_v43 = vpop.permute.xlu1 %1029  ;;  %v1073_v5 = vld [vmem:[#allocation2] sm:$0xff] }
 0x2ac   : > { %v1028_v6 = vpop.permute.xlu0 %1027  ;;  %1044 = vst.msk [vmem:[#allocation2 + $0x20] sm:$0xff] %vm1042_vm5, %v1030_v43  ;;  %1432 = vmatmul.mubr.bf16.vlgmr.msra.gmra.mrb[4].mxu1 %v1073_v5  ;;  %v1105_v32 = vld [vmem:[#allocation2] sm:$0xf0]  ;;  %v4994_v43 = vmov 0.0   ;;  %v3596_v5 = vld [vmem:[%s4886_s4 + $0xf0] sm:$0xff]  }
 0x2ad   : > { %1043 = vst.msk [vmem:[#allocation2 + $0x10] sm:$0xff] %vm1042_vm5, %v1028_v6  ;;  %3121 = vmatprep.mubr.msk.bf16.mxu1 %vm4983_vm13, %v4320_v10  ;;  %3523 = vmatpush3.bf16.msra.mxu1 %v3818_v4  ;;  %v1144_v13 = vrot.slane %v1105_v32, 4  ;;  %vm4990_vm13 = vmmov %vm4982_vm6  ;;  %v3598_v32 = vld [vmem:[%s4886_s4 + $0x100] sm:$0xff]  }
 0x2ae   : > { %3524 = vmatprep.subr.bf16.mxu1 %v4984_v37 }
 0x2b0   : > { %v1034_v11 = vpop.permute.xlu0 %1033 }
 0x2b1   : > { %v1032_v52 = vpop.permute.xlu1 %1031  ;;  %1047 = vst.msk [vmem:[#allocation2 + $0x40] sm:$0xf] %vm1046_vm2, %v1034_v11  ;;  %3526 = vmatpush3.bf16.msra.mxu1 %v3832_v8 }
 0x2b2   : > { %1045 = vst.msk [vmem:[#allocation2 + $0x30] sm:$0xff] %vm1042_vm5, %v1032_v52  ;;  %3527 = vmatprep.subr.bf16.mxu1 %v4984_v37  ;;  %v3597_v52 = vld [vmem:[%s4886_s4 + $0xf8] sm:$0xff]  }
 0x2b3   : > { %v1077_v30 = vld [vmem:[#allocation2 + $0x20] sm:$0xff] }
 0x2b4   : > { %v4347_v60 = vld [vmem:[#allocation2 + $0x10] sm:$0xff]  ;;  %v1150_v63 = vrot.slane %v1077_v30, 4 }
 0x2b5   : > { %v1145_v16 = vrot.slane %v4347_v60, 4  ;;  %1440 = vmatmul.mubr.bf16.gmra.mrb[8].mxu1 %v4347_v60 }
 0x2b6   : > { %3122 = vmatprep.mubr.msk.bf16.mxu1 %vm4988_vm8, %v4342_v34  ;;  %3529 = vmatpush3.bf16.msra.mxu1 %v3857_v12  ;;  %vm4995_vm8 = vmmov 0  }
 0x2b7   : > { %v1146_v38 = vsel %vm4985_vm14, %v1144_v13, %v1145_v16  ;;  %3530 = vmatprep.subr.bf16.mxu1 %v4984_v37  ;;  %v1151_v48 = vsel %vm4979_vm7, %v1145_v16, %v1150_v63  ;;  %vm4991_vm14 = vmmov %vm4989_vm4  ;;  %v3601_v13 = vld [vmem:[%s4886_s4 + $0x118] sm:$0xff]   ;;  %v1465_v16 = vld [vmem:[#allocation2 + $0x48] sm:$0xff] }
 0x2b8   : > { %1283 = vmatmul.mubr.bf16.vlgmr.msra.gmra.mrb[4].mxu0 %v1146_v38  ;;  %v1107_v51 = vld [vmem:[#allocation2 + $0x40] sm:$0xf]  ;;  %vm4996_vm7 = vmmov %vm4989_vm4 }
 0x2b9   : > { %1567 = vmatpush1.bf16.msra.mxu0 %v3590_v0  ;;  %3105 = vmatprep.mubr.msk.bf16.mxu0 %vm4987_vm12, %v1153_v46  ;;  %v1079_v55 = vld [vmem:[#allocation2 + $0x30] sm:$0xff]  ;;  %vm4993_vm12 = vmmov %vm4982_vm6  ;;  %v1158_v6 = vrot.slane %v1107_v51, 4  ;;  %v1464_v0 = vld [vmem:[#allocation2 + $0x40] sm:$0xff] }
 0x2ba   : > { %1568 = vmatprep.subr.bf16.mxu0 %v3733_v41  ;;  %3532 = vmatpush3.bf16.msra.mxu1 %v3882_v25  ;;  %v1154_v33 = vrot.slane %v1079_v55, 4  ;;  %vm4997_vm4 = vmmov %vm4982_vm6 }
 0x2bb   : > { %3533 = vmatprep.subr.bf16.mxu1 %v4984_v37  ;;  %vm5001_vm9 = vmmov %vm4997_vm4 }
 0x2bc   : > { %v1155_v62 = vsel %vm4991_vm14, %v1150_v63, %v1154_v33  ;;  %v1159_v11 = vsel %vm4996_vm7, %v1154_v33, %v1158_v6  ;;  %vm5000_vm14 = vmmov %vm4997_vm4 }
 0x2bd   : > { %1569 = vmatpush1.bf16.msra.mxu0 %v3591_v2  ;;  %1448 = vmatmul.mubr.bf16.gmra.mrb[12].mxu1 %v1077_v30  ;;  %vm5003_vm7 = vmmov %vm4997_vm4 }
 0x2be   : > { %1570 = vmatprep.subr.bf16.mxu0 %v3733_v41  ;;  %3123 = vmatprep.mubr.msk.bf16.mxu1 %vm4990_vm13, %v4363_v35  ;;  %vm4999_vm13 = vmmov %vm4997_vm4 }
 0x2c0   : > { %1291 = vmatmul.mubr.bf16.gmra.mrb[8].mxu0 %v1151_v48 }
 0x2c1   : > { %1571 = vmatpush1.bf16.msra.mxu0 %v3592_v27  ;;  %3106 = vmatprep.mubr.msk.bf16.mxu0 %vm4982_vm6, %v1157_v61  ;;  %vm4998_vm6 = vmmov %vm4997_vm4 }
 0x2c2   : > { %1572 = vmatprep.subr.bf16.mxu0 %v3733_v41 }
 0x2c5   : > { %1573 = vmatpush1.bf16.msra.mxu0 %v3593_v28  ;;  %1456 = vmatmul.mubr.bf16.gmra.mrb[16].mxu1 %v1079_v55 }
 0x2c6   : > { %1574 = vmatprep.subr.bf16.mxu0 %v3733_v41  ;;  %3443 = vmatprep.mubr.msk.f32.mxu1 %vm4995_vm8, %v4994_v43 }
 0x2c8   : > { %1299 = vmatmul.mubr.bf16.gmra.mrb[12].mxu0 %v1155_v62 }
 0x2c9   : > { %1575 = vmatpush1.bf16.msra.mxu0 %v3594_v3  ;;  %3107 = vmatprep.mubr.msk.bf16.mxu0 %vm4993_vm12, %v1161_v42  ;;  %vm5002_vm12 = vmmov %vm4997_vm4 }
 0x2ca   : > { %1576 = vmatprep.subr.bf16.mxu0 %v3733_v41 }
 0x2cd   : > { %1577 = vmatpush1.bf16.msra.mxu0 %v3595_v15 }
 0x2ce   : > { %1578 = vmatprep.subr.bf16.mxu0 %v3733_v41 }
 0x2d0   : > { %1307 = vmatmul.mubr.bf16.gmra.mrb[16].mxu0 %v1159_v11 }
 0x2d1   : > { %1579 = vmatpush1.bf16.msra.mxu0 %v3596_v5  ;;  %3160 = vmatprep.mubr.msk.bf16.mxu0 %vm4997_vm4, %v4320_v10  ;;  %v3600_v10 = vld [vmem:[%s4886_s4 + $0x110] sm:$0xff]  }
 0x2d2   : > { %1580 = vmatprep.subr.bf16.mxu0 %v3733_v41 }
 0x2d5   : > { %1581 = vmatpush1.bf16.msra.mxu0 %v3597_v52 }
 0x2d6   : > { %1582 = vmatprep.subr.bf16.mxu0 %v3733_v41 }
 0x2d9   : > { %1583 = vmatpush1.bf16.msra.mxu0 %v3598_v32 }
 0x2da   : > { %1584 = vmatprep.subr.bf16.mxu0 %v3733_v41 }
 0x2dd   : > { %1585 = vmatpush1.bf16.msra.mxu0 %v3599_v9 }
 0x2de   : > { %1586 = vmatprep.subr.bf16.mxu0 %v3733_v41 }
 0x2e1   : > { %1587 = vmatpush1.bf16.msra.mxu0 %v3600_v10 }
 0x2e2   : > { %1588 = vmatprep.subr.bf16.mxu0 %v3733_v41 }
 0x2e5   : > { %1589 = vmatpush1.bf16.msra.mxu0 %v3601_v13 }
 0x2e6   : > { %2298 = vmatprep.subr.bf16.mxu0 %v3733_v41 }
 0x2e8   : > { %1599 = vmatmul.mubr.bf16.vlgmr.msra.gmra.mrb[20].mxu0 %v4347_v60 }
 0x2e9   : > { %3161 = vmatprep.mubr.msk.bf16.mxu0 %vm4998_vm6, %v4342_v34  ;;  %vm5004_vm6 = vmmov %vm4997_vm4 }
 0x2f0   : > { %1607 = vmatmul.mubr.bf16.gmra.mrb[24].mxu0 %v1077_v30 }
 0x2f1   : > { %3162 = vmatprep.mubr.msk.bf16.mxu0 %vm4999_vm13, %v4363_v35  ;;  %vm5005_vm13 = vmmov %vm4997_vm4 }
 0x2f8   : > { %1615 = vmatmul.mubr.bf16.gmra.mrb[28].mxu0 %v1079_v55 }
 0x2f9   : > { %3163 = vmatprep.mubr.msk.bf16.mxu0 %vm5000_vm14, %v1465_v16  ;;  %vm5006_vm14 = vmmov %vm4997_vm4 }
 0x300   : > { %1623 = vmatmul.mubr.bf16.gmra.mrb[32].mxu0 %v1464_v0 }
 0x37f   : > { %v1433_v38 = vpop.f32.mrb[4].mxu1 }
 0x380   : > { %v1435_v46 = vpop.f32.mrb[5].mxu1 }
 0x381   : > { %v1436_v2 = vpop.f32.mrb[6].mxu1 }
 0x382   : > { %v1438_v54 = vpop.f32.mrb[7].mxu1 }
 0x388   : > { %v1441_v27 = vpop.f32.mrb[8].mxu1 }
 0x389   : > { %v1443_v61 = vpop.f32.mrb[9].mxu1 }
 0x38a   : > { %v1444_v30 = vpop.f32.mrb[10].mxu1 }
 0x38b   : > { %v1284_v63 = vpop.f32.mrb[4].mxu0  ;;  %v1446_v35 = vpop.f32.mrb[11].mxu1 }
 0x38c   : > { %v1434_v60 = vadd.f32 %v1433_v38, %v1284_v63  ;;  %v1286_v48 = vpop.f32.mrb[5].mxu0 }
 0x38d   : > { %v1287_v34 = vpop.f32.mrb[6].mxu0 }
 0x38e   : > { %v1437_v28 = vadd.f32 %v1436_v2, %v1287_v34  ;;  %v1289_v36 = vpop.f32.mrb[7].mxu0 }
 0x390   : > { %v1449_v33 = vpop.f32.mrb[12].mxu1 }
 0x391   : > { %v1451_v62 = vpop.f32.mrb[13].mxu1 }
 0x392   : > { %v1452_v51 = vpop.f32.mrb[14].mxu1 }
 0x393   : > { %v1292_v55 = vpop.f32.mrb[8].mxu0  ;;  %v1454_v5 = vpop.f32.mrb[15].mxu1 }
 0x394   : > { %v1442_v39 = vadd.f32 %v1441_v27, %v1292_v55  ;;  %v1294_v3 = vpop.f32.mrb[9].mxu0 }
 0x395   : > { %v1295_v42 = vpop.f32.mrb[10].mxu0 }
 0x396   : > { %v1445_v15 = vadd.f32 %v1444_v30, %v1295_v42  ;;  %v1297_v6 = vpop.f32.mrb[11].mxu0 }
 0x398   : > { %v1457_v52 = vpop.f32.mrb[16].mxu1 }
 0x399   : > { %v1459_v10 = vpop.f32.mrb[17].mxu1 }
 0x39a   : > { %v1460_v16 = vpop.f32.mrb[18].mxu1 }
 0x39b   : > { %v1300_v11 = vpop.f32.mrb[12].mxu0  ;;  %v1462_v46 = vpop.f32.mrb[19].mxu1 }
 0x39c   : > { %v1450_v32 = vadd.f32 %v1449_v33, %v1300_v11  ;;  %v1302_v9 = vpop.f32.mrb[13].mxu0  ;;  %v3164_v33 = vld [vmem:[%s4887_s5] ss:$0 sm:$0xff] }
 0x39d   : > { %v1303_v13 = vpop.f32.mrb[14].mxu0 }
 0x39e   : > { %v1453_v0 = vadd.f32 %v1452_v51, %v1303_v13  ;;  %v1305_v38 = vpop.f32.mrb[15].mxu0 }
 0x3a3   : > { %v1308_v2 = vpop.f32.mrb[16].mxu0 }
 0x3a4   : > { %v1458_v54 = vadd.f32 %v1457_v52, %v1308_v2  ;;  %v1310_v63 = vpop.f32.mrb[17].mxu0 }
 0x3a5   : > { %v1311_v27 = vpop.f32.mrb[18].mxu0 }
 0x3a6   : > { %v1461_v48 = vadd.f32 %v1460_v16, %v1311_v27  ;;  %v1313_v61 = vpop.f32.mrb[19].mxu0 }
 0x3bb   : > { %v1600_v34 = vpop.f32.mrb[20].mxu0 }
 0x3bc   : > { %v1631_v30 = vadd.f32 %v1600_v34, %v1434_v60  ;;  %v1602_v36 = vpop.f32.mrb[21].mxu0 }
 0x3bd   : > { %v1603_v35 = vpop.f32.mrb[22].mxu0 }
 0x3be   : > { %v1632_v55 = vadd.f32 %v1603_v35, %v1437_v28  ;;  %v1605_v3 = vpop.f32.mrb[23].mxu0  ;;  %v1646_v11 = vadd.f32 %v3164_v33, %v1631_v30 }
 0x3c0   : > { %v1647_v42 = vadd.f32 %v3164_v33, %v1632_v55  ;;  %v1656_v60 = vsel %vm5002_vm12, %v1646_v11, 0.0  ;;  %vm5008_vm12 = vmmov %vm4997_vm4 }
 0x3c2   : > { %v1657_v13 = vsel %vm5001_vm9, %v1647_v42, 0.0  ;;  %vm5007_vm9 = vmmov %vm4997_vm4 }
 0x3c3   : > { %v1608_v62 = vpop.f32.mrb[24].mxu0  ;;  %v1658_v38 = vadd.f32 %v1657_v13, %v1656_v60 }
 0x3c4   : > { %v1633_v51 = vadd.f32 %v1608_v62, %v1442_v39  ;;  %v1610_v6 = vpop.f32.mrb[25].mxu0 }
 0x3c5   : > { %v1611_v5 = vpop.f32.mrb[26].mxu0 }
 0x3c6   : > { %v1648_v52 = vadd.f32 %v3164_v33, %v1633_v51  ;;  %v1634_v9 = vadd.f32 %v1611_v5, %v1445_v15  ;;  %v1613_v10 = vpop.f32.mrb[27].mxu0 }
 0x3c8   : > { %v1659_v28 = vsel %vm5003_vm7, %v1648_v52, 0.0  ;;  %v1649_v16 = vadd.f32 %v3164_v33, %v1634_v9  ;;  %vm5010_vm7 = vmmov %vm4997_vm4 }
 0x3c9   : > { %v1660_v27 = vadd.f32 %v1659_v28, %v1658_v38 }
 0x3ca   : > { %v1661_v39 = vsel %vm4997_vm4, %v1649_v16, 0.0 }
 0x3cb   : > { %v1616_v46 = vpop.f32.mrb[28].mxu0  ;;  %v1662_v55 = vadd.f32 %v1661_v39, %v1660_v27 }
 0x3cc   : > { %v1635_v2 = vadd.f32 %v1616_v46, %v1450_v32  ;;  %v1618_v63 = vpop.f32.mrb[29].mxu0 }
 0x3cd   : > { %v1619_v61 = vpop.f32.mrb[30].mxu0 }
 0x3ce   : > { %v1650_v34 = vadd.f32 %v3164_v33, %v1635_v2  ;;  %v1636_v30 = vadd.f32 %v1619_v61, %v1453_v0  ;;  %v1621_v36 = vpop.f32.mrb[31].mxu0 }
 0x3d0   : > { %v1663_v15 = vsel %vm5004_vm6, %v1650_v34, 0.0  ;;  %v1651_v35 = vadd.f32 %v3164_v33, %v1636_v30  ;;  %vm5011_vm6 = vmmov %vm4997_vm4 }
 0x3d1   : > { %v1664_v3 = vadd.f32 %v1663_v15, %v1662_v55 }
 0x3d2   : > { %v1665_v51 = vsel %vm5005_vm13, %v1651_v35, 0.0  ;;  %vm5012_vm13 = vmmov %vm4997_vm4 }
 0x3d3   : > { %v1624_v62 = vpop.f32.mrb[32].mxu0  ;;  %v1666_v60 = vadd.f32 %v1665_v51, %v1664_v3 }
 0x3d4   : > { %v1637_v6 = vadd.f32 %v1624_v62, %v1458_v54  ;;  %v1626_v5 = vpop.f32.mrb[33].mxu0 }
 0x3d5   : > { %v1627_v9 = vpop.f32.mrb[34].mxu0 }
 0x3d6   : > { %v1652_v32 = vadd.f32 %v3164_v33, %v1637_v6  ;;  %v1638_v10 = vadd.f32 %v1627_v9, %v1461_v48  ;;  %v1629_v13 = vpop.f32.mrb[35].mxu0 }
 0x3d8   : > { %v1667_v28 = vsel %vm5006_vm14, %v1652_v32, 0.0  ;;  %v1653_v38 = vadd.f32 %v3164_v33, %v1638_v10  ;;  %vm5013_vm14 = vmmov %vm4997_vm4 }
 0x3d9   : > { %v1668_v0 = vadd.f32 %v1667_v28, %v1666_v60 }
 0x3da   : > { %v1669_v46 = vsel %vm5007_vm9, %v1653_v38, 0.0  ;;  %vm5014_vm9 = vmmov %vm4997_vm4 }
 0x3db   : > { %v1670_v2 = vadd.f32 %v1669_v46, %v1668_v0 }
 0x3dd   : > { %v1671_v63 = vrot.slane %v1670_v2, 4 }
 0x3df   : > { %v1672_v27 = vadd.f32 %v1671_v63, %v1670_v2 }
 0x3e1   : > { %v1673_v61 = vrot.slane %v1672_v27, 2 }
 0x3e3   : > { %v1674_v39 = vadd.f32 %v1673_v61, %v1672_v27 }
 0x3e5   : > { %v1675_v30 = vrot.slane %v1674_v39, 1 }
 0x3e7   : > { %v1676_v36 = vadd.f32 %v1675_v30, %v1674_v39 }
 0x3e9   : > { %3444 = vmatmul.mubr.msk.f32.vlgmr.msra.gmra.mrb[2].mxu1 %vm5008_vm12, %v1676_v36  ;;  %vm5015_vm12 = vmmov %vm4997_vm4 }
 0x3ea   : > { %3535 = vmatpush3.bf16.msra.mxu1 %v3818_v4  ;;  %3462 = vmatprep.mubr.msk.f32.mxu1 %vm4995_vm8, %v4994_v43  ;;  %vm5009_vm8 = vmmov %vm4997_vm4 }
 0x3eb   : > { %3536 = vmatprep.subr.bf16.mxu1 %v4984_v37 }
 0x3ee   : > { %3538 = vmatpush3.bf16.msra.mxu1 %v3832_v8 }
 0x3ef   : > { %3539 = vmatprep.subr.bf16.mxu1 %v4984_v37 }
 0x3f2   : > { %3541 = vmatpush3.bf16.msra.mxu1 %v3857_v12 }
 0x3f3   : > { %3542 = vmatprep.subr.bf16.mxu1 %v4984_v37 }
 0x3f6   : > { %3544 = vmatpush3.bf16.msra.mxu1 %v3882_v25 }
 0x3f7   : > { %2447 = vmatprep.subr.bf16.mxu1 %v3733_v41 }
 0x4bc   : > { %v1746_v54 = vpop.f32.mrb[2].mxu1 }
 0x4bd   : > { %v1750_v48 = vmul.f32 0.0078125, %v1746_v54  ;;  %v3445_v4 = vpop.f32.mrb[3].mxu1 }
 0x4bf   : > { %v1754_v33 = vrot.slane %v1750_v48, %v3910_v49 }
 0x4c1   : > { %v4456_v43 = vsub.f32 %v1646_v11, %v1754_v33  ;;  %v4458_v15 = vsub.f32 %v1647_v42, %v1754_v33  ;;  %v4460_v8 = vsub.f32 %v1648_v52, %v1754_v33  ;;  %v4462_v55 = vsub.f32 %v1649_v16, %v1754_v33 }
 0x4c2   : > { %v4464_v12 = vsub.f32 %v1650_v34, %v1754_v33  ;;  %v4472_v62 = vsub.f32 %v1651_v35, %v1754_v33  ;;  %v4478_v34 = vsub.f32 %v1652_v32, %v1754_v33  ;;  %v4483_v9 = vsub.f32 %v1653_v38, %v1754_v33  ;;  %v3602_v33 = vld [vmem:[%s4890_s8] sm:$0xff]  }
 0x4c3   : > { %v1763_v25 = vmul.f32 %v4456_v43, %v4456_v43  ;;  %v1764_v37 = vmul.f32 %v4458_v15, %v4458_v15  ;;  %v1765_v3 = vmul.f32 %v4460_v8, %v4460_v8  ;;  %v1766_v42 = vmul.f32 %v4462_v55, %v4462_v55 }
 0x4c4   : > { %v1767_v51 = vmul.f32 %v4464_v12, %v4464_v12  ;;  %v1768_v35 = vmul.f32 %v4472_v62, %v4472_v62  ;;  %v1769_v60 = vmul.f32 %v4478_v34, %v4478_v34  ;;  %v1770_v0 = vmul.f32 %v4483_v9, %v4483_v9 }
 0x4c5   : > { %v1771_v11 = vsel %vm5009_vm8, %v1763_v25, 0.0  ;;  %v1772_v52 = vsel %vm5010_vm7, %v1764_v37, 0.0  ;;  %v1774_v6 = vsel %vm4997_vm4, %v1765_v3, 0.0  ;;  %v1776_v10 = vsel %vm5011_vm6, %v1766_v42, 0.0  ;;  %vm5016_vm8 = vmmov %vm4997_vm4  ;;  %v3603_v25 = vld [vmem:[%s4890_s8 + $0x60] sm:$0xff]   ;;  %v3604_v37 = vld [vmem:[%s4890_s8 + $0x8] sm:$0xff]  }
 0x4c6   : > { %v1773_v16 = vadd.f32 %v1772_v52, %v1771_v11  ;;  %v1778_v32 = vsel %vm5012_vm13, %v1767_v51, 0.0  ;;  %v1780_v46 = vsel %vm5013_vm14, %v1768_v35, 0.0  ;;  %v1782_v38 = vsel %vm5014_vm9, %v1769_v60, 0.0  ;;  %2299 = vmatpush1.bf16.msra.mxu0 %v3603_v25  ;;  %v3605_v3 = vld [vmem:[%s4890_s8 + $0x68] sm:$0xff]   ;;  %v3606_v42 = vld [vmem:[%s4890_s8 + $0x10] sm:$0xff]   ;;  %v3608_v52 = vld [vmem:[%s4890_s8 + $0x18] sm:$0xff]  }
 0x4c7   : > { %v1784_v27 = vsel %vm5015_vm12, %v1770_v0, 0.0  ;;  %2300 = vmatprep.subr.bf16.mxu0 %v3733_v41  ;;  %v3607_v11 = vld [vmem:[%s4890_s8 + $0x70] sm:$0xff]   ;;  %v3610_v51 = vld [vmem:[%s4890_s8 + $0x20] sm:$0xff]   ;;  %v3613_v35 = vld [vmem:[%s4890_s8 + $0x88] sm:$0xff]   ;;  %vm5017_vm7 = vcmask 1040384   ;;  %vm5019_vm6 = vcmask 1046528   ;;  %vm5020_vm13 = vnez %v4928_v14 }
 0x4c8   : > { %v1775_v5 = vadd.f32 %v1774_v6, %v1773_v16  ;;  %v3609_v16 = vld [vmem:[%s4890_s8 + $0x78] sm:$0xff]   ;;  %v3611_v6 = vld [vmem:[%s4890_s8 + $0x80] sm:$0xff]   ;;  %vm5018_vm4 = vmmov %vm5017_vm7  ;;  %vm5021_vm14 = vnez %v4918_v56 }
 0x4c9   : > { %v3616_v60 = vld [vmem:[%s4890_s8 + $0x38] sm:$0xff]   ;;  %v3619_v0 = vld [vmem:[%s4890_s8 + $0xa0] sm:$0xff]   ;;  %vm5022_vm9 = vmmov %vm5019_vm6 }
 0x4ca   : > { %v1777_v13 = vadd.f32 %v1776_v10, %v1775_v5  ;;  %2301 = vmatpush1.bf16.msra.mxu0 %v3605_v3  ;;  %v3612_v5 = vld [vmem:[%s4890_s8 + $0x28] sm:$0xff]   ;;  %v3614_v10 = vld [vmem:[%s4890_s8 + $0x30] sm:$0xff]   ;;  %v3624_v56 = vld [vmem:[%s4890_s8 + $0x58] sm:$0xff]  }
 0x4cb   : > { %2302 = vmatprep.subr.bf16.mxu0 %v3733_v41  ;;  %vm5024_vm12 = vmmov %vm5019_vm6 }
 0x4cc   : > { %v1779_v28 = vadd.f32 %v1778_v32, %v1777_v13  ;;  %v3615_v13 = vld [vmem:[%s4890_s8 + $0x90] sm:$0xff]   ;;  %v3617_v32 = vld [vmem:[%s4890_s8 + $0x98] sm:$0xff]  }
 0x4ce   : > { %v1781_v2 = vadd.f32 %v1780_v46, %v1779_v28  ;;  %2303 = vmatpush1.bf16.msra.mxu0 %v3607_v11  ;;  %v3618_v28 = vld [vmem:[%s4890_s8 + $0x40] sm:$0xff]   ;;  %v3620_v46 = vld [vmem:[%s4890_s8 + $0x48] sm:$0xff]  }
 0x4cf   : > { %2304 = vmatprep.subr.bf16.mxu0 %v3733_v41 }
 0x4d0   : > { %v1783_v63 = vadd.f32 %v1782_v38, %v1781_v2 }
 0x4d2   : > { %v1785_v61 = vadd.f32 %v1784_v27, %v1783_v63  ;;  %2305 = vmatpush1.bf16.msra.mxu0 %v3609_v16 }
 0x4d3   : > { %2306 = vmatprep.subr.bf16.mxu0 %v3733_v41 }
 0x4d4   : > { %v1786_v39 = vrot.slane %v1785_v61, 4 }
 0x4d6   : > { %v1787_v30 = vadd.f32 %v1786_v39, %v1785_v61  ;;  %2307 = vmatpush1.bf16.msra.mxu0 %v3611_v6 }
 0x4d7   : > { %2308 = vmatprep.subr.bf16.mxu0 %v3733_v41 }
 0x4d8   : > { %v1788_v36 = vrot.slane %v1787_v30, 2 }
 0x4da   : > { %v1789_v54 = vadd.f32 %v1788_v36, %v1787_v30  ;;  %2309 = vmatpush1.bf16.msra.mxu0 %v3613_v35  ;;  %v3167_v30 = vld [vmem:[%s4888_s6] ss:$0 sm:$0xff] }
 0x4db   : > { %2310 = vmatprep.subr.bf16.mxu0 %v3733_v41 }
 0x4dc   : > { %v1790_v48 = vrot.slane %v1789_v54, 1 }
 0x4de   : > { %v1791_v4 = vadd.f32 %v1790_v48, %v1789_v54  ;;  %2311 = vmatpush1.bf16.msra.mxu0 %v3615_v13 }
 0x4df   : > { %2312 = vmatprep.subr.bf16.mxu0 %v3733_v41 }
 0x4e0   : > { %3463 = vmatmul.mubr.msk.f32.vlgmr.msra.gmra.mrb[20].mxu1 %vm5016_vm8, %v1791_v4  ;;  %vm5025_vm8 = vnez %v4922_v57 }
 0x4e1   : > { %2448 = vmatpush1.bf16.msra.mxu1 %v3602_v33  ;;  %v3168_v33 = vld [vmem:[%s4889_s7] ss:$0 sm:$0xff] }
 0x4e2   : > { %2449 = vmatprep.subr.bf16.mxu1 %v3733_v41  ;;  %2313 = vmatpush1.bf16.msra.mxu0 %v3617_v32 }
 0x4e3   : > { %2314 = vmatprep.subr.bf16.mxu0 %v3733_v41 }
 0x4e5   : > { %2450 = vmatpush1.bf16.msra.mxu1 %v3604_v37 }
 0x4e6   : > { %2451 = vmatprep.subr.bf16.mxu1 %v3733_v41  ;;  %2315 = vmatpush1.bf16.msra.mxu0 %v3619_v0 }
 0x4e7   : > { %2316 = vmatprep.subr.bf16.mxu0 %v3733_v41 }
 0x4e9   : > { %2452 = vmatpush1.bf16.msra.mxu1 %v3606_v42 }
 0x4ea   : > { %2453 = vmatprep.subr.bf16.mxu1 %v3733_v41 }
 0x4ed   : > { %2454 = vmatpush1.bf16.msra.mxu1 %v3608_v52 }
 0x4ee   : > { %2455 = vmatprep.subr.bf16.mxu1 %v3733_v41 }
 0x4f1   : > { %2456 = vmatpush1.bf16.msra.mxu1 %v3610_v51 }
 0x4f2   : > { %2457 = vmatprep.subr.bf16.mxu1 %v3733_v41 }
 0x4f5   : > { %2458 = vmatpush1.bf16.msra.mxu1 %v3612_v5 }
 0x4f6   : > { %2459 = vmatprep.subr.bf16.mxu1 %v3733_v41 }
 0x4f9   : > { %2460 = vmatpush1.bf16.msra.mxu1 %v3614_v10 }
 0x4fa   : > { %2461 = vmatprep.subr.bf16.mxu1 %v3733_v41 }
 0x4fd   : > { %2462 = vmatpush1.bf16.msra.mxu1 %v3616_v60 }
 0x4fe   : > { %2463 = vmatprep.subr.bf16.mxu1 %v3733_v41 }
 0x501   : > { %2464 = vmatpush1.bf16.msra.mxu1 %v3618_v28 }
 0x502   : > { %2465 = vmatprep.subr.bf16.mxu1 %v3733_v41 }
 0x505   : > { %2466 = vmatpush1.bf16.msra.mxu1 %v3620_v46 }
 0x506   : > { %2467 = vmatprep.subr.bf16.mxu1 %v3733_v41 }
 0x5b3   : > { %v1861_v2 = vpop.f32.mrb[20].mxu1 }
 0x5b4   : > { %v1865_v38 = vmul.f32 0.0078125, %v1861_v2  ;;  %v3464_v63 = vpop.f32.mrb[21].mxu1 }
 0x5b6   : > { %v1866_v27 = vadd.f32 1e-05, %v1865_v38 }
 0x5b8   : > { %3684 = vrsqrt.f32 %v1866_v27 }
 0x5c2   : > { %v3685_v61 = vpop.eup %3684 }
 0x5c3   : > { %v1871_v39 = vrot.slane %v3685_v61, %v3910_v49 }
 0x5c5   : > { %v1872_v36 = vmul.f32 %v1871_v39, %v4456_v43  ;;  %v1873_v54 = vmul.f32 %v1871_v39, %v4458_v15  ;;  %v1874_v48 = vmul.f32 %v1871_v39, %v4460_v8  ;;  %v1875_v4 = vmul.f32 %v1871_v39, %v4462_v55 }
 0x5c6   : > { %v1876_v25 = vmul.f32 %v1871_v39, %v4464_v12  ;;  %v1877_v49 = vmul.f32 %v1871_v39, %v4472_v62  ;;  %v1878_v37 = vmul.f32 %v1871_v39, %v4478_v34  ;;  %v1879_v3 = vmul.f32 %v1871_v39, %v4483_v9 }
 0x5c7   : > { %v1886_v42 = vmul.f32 %v3167_v30, %v1872_v36  ;;  %v1887_v43 = vmul.f32 %v3167_v30, %v1873_v54  ;;  %v1888_v11 = vmul.f32 %v3167_v30, %v1874_v48  ;;  %v1889_v15 = vmul.f32 %v3167_v30, %v1875_v4 }
 0x5c8   : > { %v1890_v52 = vmul.f32 %v3167_v30, %v1876_v25  ;;  %v1891_v8 = vmul.f32 %v3167_v30, %v1877_v49  ;;  %v1892_v16 = vmul.f32 %v3167_v30, %v1878_v37  ;;  %v1893_v55 = vmul.f32 %v3167_v30, %v1879_v3 }
 0x5c9   : > { %v1900_v51 = vadd.f32 %v3168_v33, %v1886_v42  ;;  %v1901_v6 = vadd.f32 %v3168_v33, %v1887_v43  ;;  %v1902_v5 = vadd.f32 %v3168_v33, %v1888_v11  ;;  %v4588_v35 = vadd.f32 %v3168_v33, %v1889_v15  ;;  %v3621_v42 = vld [vmem:[%s4890_s8 + $0xa8] sm:$0xff]   ;;  %v3622_v15 = vld [vmem:[%s4890_s8 + $0x50] sm:$0xff]  }
 0x5ca   : > { %v4590_v12 = vadd.f32 %v3168_v33, %v1890_v52  ;;  %v4592_v62 = vadd.f32 %v3168_v33, %v1891_v8  ;;  %v4594_v13 = vadd.f32 %v3168_v33, %v1892_v16  ;;  %v4597_v32 = vadd.f32 %v3168_v33, %v1893_v55  ;;  %2317 = vmatpush1.bf16.msra.mxu0 %v3621_v42 }
 0x5cb   : > { %v3169_v34 = vmul.f32 -1.442695, %v1900_v51  ;;  %v3170_v10 = vmul.f32 -1.442695, %v1901_v6  ;;  %v3171_v9 = vmul.f32 -1.442695, %v1902_v5  ;;  %2318 = vmatprep.subr.bf16.mxu0 %v3733_v41  ;;  %2468 = vmatpush1.bf16.msra.mxu1 %v3622_v15 }
 0x5cc   : > { %v3172_v60 = vmul.f32 -1.442695, %v4588_v35  ;;  %v3173_v28 = vmul.f32 -1.442695, %v4590_v12  ;;  %v3174_v0 = vmul.f32 -1.442695, %v4592_v62  ;;  %2469 = vmatprep.subr.bf16.mxu1 %v3733_v41 }
 0x5cd   : > { %3686 = vpow2.f32 %v3169_v34  ;;  %v3175_v46 = vmul.f32 -1.442695, %v4594_v13  ;;  %v3176_v2 = vmul.f32 -1.442695, %v4597_v32 }
 0x5ce   : > { %3688 = vpow2.f32 %v3170_v10 }
 0x5cf   : > { %3690 = vpow2.f32 %v3171_v9  ;;  %2470 = vmatpush1.bf16.msra.mxu1 %v3624_v56 }
 0x5d0   : > { %3692 = vpow2.f32 %v3172_v60 }
 0x5d1   : > { %3694 = vpow2.f32 %v3173_v28 }
 0x5d2   : > { %3696 = vpow2.f32 %v3174_v0 }
 0x5d3   : > { %3698 = vpow2.f32 %v3175_v46 }
 0x5d4   : > { %3700 = vpow2.f32 %v3176_v2 }
 0x5d7   : > { %v3687_v38 = vpop.eup %3686 }
 0x5d8   : > { %v3689_v63 = vpop.eup %3688  ;;  %v1932_v27 = vadd.f32 1.0, %v3687_v38 }
 0x5d9   : > { %v3691_v61 = vpop.eup %3690  ;;  %v1933_v39 = vadd.f32 1.0, %v3689_v63 }
 0x5da   : > { %v3693_v30 = vpop.eup %3692  ;;  %3702 = vrcp.f32 %v1932_v27  ;;  %v1934_v36 = vadd.f32 1.0, %v3691_v61 }
 0x5db   : > { %v3695_v54 = vpop.eup %3694  ;;  %3704 = vrcp.f32 %v1933_v39  ;;  %v1935_v48 = vadd.f32 1.0, %v3693_v30 }
 0x5dc   : > { %v3697_v4 = vpop.eup %3696  ;;  %3706 = vrcp.f32 %v1934_v36  ;;  %v1936_v33 = vadd.f32 1.0, %v3695_v54 }
 0x5dd   : > { %v3699_v25 = vpop.eup %3698  ;;  %3708 = vrcp.f32 %v1935_v48  ;;  %v1937_v49 = vadd.f32 1.0, %v3697_v4 }
 0x5de   : > { %v3701_v37 = vpop.eup %3700  ;;  %3710 = vrcp.f32 %v1936_v33  ;;  %v1938_v3 = vadd.f32 1.0, %v3699_v25 }
 0x5df   : > { %3712 = vrcp.f32 %v1937_v49  ;;  %v1939_v43 = vadd.f32 1.0, %v3701_v37  ;;  %v3625_v37 = vld [vmem:[%s4890_s8 + $0xb8] sm:$0xff]  }
 0x5e0   : > { %3714 = vrcp.f32 %v1938_v3 }
 0x5e1   : > { %3716 = vrcp.f32 %v1939_v43 }
 0x5e4   : > { %v3703_v11 = vpop.eup %3702 }
 0x5e5   : > { %v3705_v52 = vpop.eup %3704  ;;  %v1956_v8 = vmul.f32 %v3703_v11, %v1900_v51 }
 0x5e6   : > { %v3707_v16 = vpop.eup %3706  ;;  %v4610_v55 = vmul.f32 %v3705_v52, %v1901_v6  ;;  %v3623_v6 = vld [vmem:[%s4890_s8 + $0xb0] sm:$0xff]  }
 0x5e7   : > { %v3709_v34 = vpop.eup %3708  ;;  %v1972_v10 = vrot.slane %v1956_v8, 7  ;;  %v2004_v9 = vrot.slane %v1956_v8, 1  ;;  %v4612_v60 = vmul.f32 %v3707_v16, %v1902_v5  ;;  %2319 = vmatpush1.bf16.msra.mxu0 %v3623_v6 }
 0x5e8   : > { %v3711_v28 = vpop.eup %3710  ;;  %v1973_v0 = vrot.slane %v4610_v55, 7  ;;  %v2005_v46 = vrot.slane %v4610_v55, 1  ;;  %v2061_v2 = vpack.c.bf16 %v4610_v55, %v1956_v8  ;;  %v4619_v51 = vmul.f32 %v3709_v34, %v4588_v35  ;;  %2320 = vmatprep.subr.bf16.mxu0 %v3733_v41 }
 0x5e9   : > { %v1995_v38 = vsel %vm5017_vm7, 0.0, %v1972_v10  ;;  %v1975_v5 = vrot.slane %v4612_v60, 7  ;;  %v2007_v63 = vrot.slane %v4612_v60, 1  ;;  %v4628_v27 = vmul.f32 %v3711_v28, %v4590_v12  ;;  %v3713_v61 = vpop.eup %3712  ;;  %vm5026_vm7 = vmmov %vm5019_vm6 }
 0x5ea   : > { %v2069_v39 = vrot.slane %v2061_v2, 4  ;;  %v1974_v30 = vsel %vm5018_vm4, %v1972_v10, %v1973_v0  ;;  %v1996_v35 = vsel %vm4140_vm11, 0.0, %v1995_v38  ;;  %v2006_v36 = vsel %vm5019_vm6, %v2004_v9, %v2005_v46  ;;  %v3715_v54 = vpop.eup %3714 }
 0x5eb   : > { %v1997_v48 = vsel %vm5020_vm13, 0.0, %v1974_v30  ;;  %v2028_v4 = vsel %vm5021_vm14, 0.0, %v2006_v36  ;;  %v1977_v12 = vrot.slane %v4619_v51, 7  ;;  %v2008_v33 = vsel %vm5022_vm9, %v2005_v46, %v2007_v63  ;;  %v3717_v11 = vpop.eup %3716  ;;  %2321 = vmatpush1.bf16.msra.mxu0 %v3625_v37  ;;  %vm5031_vm9 = vmmov %vm5026_vm7 }
 0x5ec   : > { %2076 = vrot.lane.b32.xlu1 %v2069_v39, %s3734_s19  ;;  %v4642_v1 = vpack.c.bf16 %v1997_v48, %v1996_v35  ;;  %v2009_v25 = vrot.slane %v4619_v51, 1  ;;  %vm5023_vm11 = vnez %v4920_v40  ;;  %v2062_v14 = vpack.c.bf16 %v4619_v51, %v4612_v60  ;;  %2614 = vmatprep.subr.bf16.mxu0 %v3733_v41 }
 0x5ed   : > { %v2029_v49 = vsel %vm5023_vm11, 0.0, %v2008_v33  ;;  %v4656_v42 = vmul.f32 %v3713_v61, %v4592_v62  ;;  %v1979_v43 = vrot.slane %v4628_v27, 7  ;;  %v2011_v40 = vrot.slane %v4628_v27, 1 }
 0x5ee   : > { %v2096_v3 = vpack.c.bf16 %v2029_v49, %v2028_v4  ;;  %v2044_v15 = vrot.slane %v4642_v1, 4  ;;  %v2010_v52 = vsel %vm5024_vm12, %v2007_v63, %v2009_v25  ;;  %v2070_v8 = vrot.slane %v2062_v14, 4 }
 0x5ef   : > { %v4663_v16 = vmul.f32 %v3715_v54, %v4594_v13  ;;  %v2030_v55 = vsel %vm5025_vm8, 0.0, %v2010_v52  ;;  %v1981_v34 = vrot.slane %v4656_v42, 7  ;;  %v2012_v10 = vsel %vm5026_vm7, %v2009_v25, %v2011_v40  ;;  %vm5034_vm8 = vmmov %vm5026_vm7 }
 0x5f0   : > { %v2104_v62 = vrot.slane %v2096_v3, 4  ;;  %vm5027_vm4 = vcmask 523268   ;;  %vm5028_vm6 = vcmask 1043456   ;;  %v2013_v13 = vrot.slane %v4656_v42, 1 }
 0x5f1   : > { %2056 = vst.msk [vmem:[#allocation2] sm:$0xf0] %vm5027_vm4, %v2044_v15  ;;  %v2071_v9 = vsel %vm5028_vm6, %v2069_v39, %v2070_v8  ;;  %vm5029_vm13 = vnez %v4924_v50  ;;  %v2063_v57 = vpack.c.bf16 %v4656_v42, %v4628_v27  ;;  %vm5030_vm14 = vmmov %vm5027_vm4  ;;  %v1963_v46 = vmul.f32 %v3717_v11, %v4597_v32 }
 0x5f2   : > { %v2031_v60 = vsel %vm5029_vm13, 0.0, %v2012_v10  ;;  %2078 = vrot.lane.b32.xlu0 %v2071_v9, %s3734_s19  ;;  %2116 = vst.msk [vmem:[#allocation2 + $0x8] sm:$0xf0] %vm5030_vm14, %v2104_v62  ;;  %v1983_v2 = vrot.slane %v4663_v16, 7  ;;  %v2015_v6 = vrot.slane %v4663_v16, 1  ;;  %v2014_v38 = vsel %vm5031_vm9, %v2011_v40, %v2013_v13  ;;  %vm5035_vm7 = vmmov %vm5028_vm6 }
 0x5f3   : > { %v2097_v28 = vpack.c.bf16 %v2031_v60, %v2030_v55  ;;  %v2072_v63 = vrot.slane %v2063_v57, 4  ;;  %vm5032_vm11 = vcmask 1040384   ;;  %v2032_v61 = vsel %vm4193_vm15, 0.0, %v2014_v38  ;;  %vm5036_vm4 = vmmov %vm5028_vm6 }
 0x5f4   : > { %v1976_v50 = vsel %vm5032_vm11, %v1973_v0, %v1975_v5  ;;  %vm5033_vm12 = vmmov %vm5032_vm11  ;;  %v1985_v30 = vrot.slane %v1963_v46, 7  ;;  %v2016_v32 = vsel %vm5034_vm8, %v2013_v13, %v2015_v6  ;;  %v2017_v36 = vrot.slane %v1963_v46, 1 }
 0x5f5   : > { %v1978_v27 = vsel %vm5033_vm12, %v1975_v5, %v1977_v12  ;;  %v2105_v39 = vrot.slane %v2097_v28, 4  ;;  %v2073_v35 = vsel %vm5035_vm7, %v2070_v8, %v2072_v63  ;;  %v2033_v54 = vsel %vm4197_vm0, 0.0, %v2016_v32  ;;  %vm5038_vm6 = vmmov %vm5034_vm8  ;;  %v3626_v32 = vld [vmem:[%s4890_s8 + $0xc0] sm:$0xff]  }
 0x5f6   : > { %v2064_v48 = vpack.c.bf16 %v1963_v46, %v4663_v16  ;;  %2080 = vrot.lane.b32.xlu1 %v2073_v35, %s3734_s19  ;;  %v2098_v5 = vpack.c.bf16 %v2033_v54, %v2032_v61  ;;  %v1998_v45 = vsel %vm4213_vm3, 0.0, %v1976_v50  ;;  %v1999_v4 = vsel %vm4224_vm1, 0.0, %v1978_v27  ;;  %vm5039_vm13 = vmmov %vm5038_vm6 }
 0x5f7   : > { %v2106_v0 = vsel %vm5036_vm4, %v2104_v62, %v2105_v39  ;;  %vm5037_vm15 = vcmask 523264   ;;  %v2018_v33 = vsel %vm5038_vm6, %v2015_v6, %v2017_v36  ;;  %v2027_v59 = vsel %vm5039_vm13, %v2017_v36, 0.0  ;;  %vm5042_vm3 = vmmov %vm5032_vm11 }
 0x5f8   : > { %2117 = vst.msk [vmem:[#allocation2 + $0x18] sm:$0xff] %vm5037_vm15, %v2106_v0  ;;  %v2074_v25 = vrot.slane %v2064_v48, 4  ;;  %v2037_v49 = vpack.c.bf16 %v1999_v4, %v1998_v45  ;;  %vm5040_vm0 = vnez %v4946_v53  ;;  %vm5041_vm14 = vnez %v4948_v7  ;;  %vm5043_vm1 = vmmov %vm5036_vm4  ;;  %v3627_v48 = vld [vmem:[%s4890_s8 + $0xc8] sm:$0xff]   ;;  %v3628_v4 = vld [vmem:[%s4890_s8 + $0xd0] sm:$0xff]  }
 0x5f9   : > { %v2034_v14 = vsel %vm5040_vm0, 0.0, %v2018_v33  ;;  %v2035_v56 = vsel %vm5041_vm14, 0.0, %v2027_v59  ;;  %v2107_v37 = vrot.slane %v2098_v5, 4  ;;  %v1980_v44 = vsel %vm5042_vm3, %v1977_v12, %v1979_v43  ;;  %v2122_v42 = vld [vmem:[#allocation2 + $0x8] sm:$0xff]  ;;  %vm5044_vm9 = vmmov %vm5042_vm3 }
 0x5fa   : > { %v2075_v26 = vsel %vm5043_vm1, %v2072_v63, %v2074_v25  ;;  %v2099_v3 = vpack.c.bf16 %v2035_v56, %v2034_v14  ;;  %v2045_v40 = vrot.slane %v2037_v49, 4  ;;  %v1982_v11 = vsel %vm5044_vm9, %v1979_v43, %v1981_v34  ;;  %vm5045_vm11 = vmmov %vm5043_vm1  ;;  %2084 = vrot.lane.b32.xlu1 %v2074_v25, %s3734_s19  ;;  %v2154_v53 = vld [vmem:[#allocation2 + $0x8] sm:$0xf0]  ;;  %v3629_v49 = vld [vmem:[%s4890_s8 + $0xd8] sm:$0xff]  }
 0x5fb   : > { %v2108_v52 = vsel %vm5045_vm11, %v2105_v39, %v2107_v37  ;;  %2082 = vrot.lane.b32.xlu0 %v2075_v26, %s3734_s19  ;;  %vm5046_vm12 = vnez %v4930_v58  ;;  %vm5047_vm8 = vnez %v4932_v31  ;;  %vm5048_vm7 = vmmov %vm5037_vm15  ;;  %vm5054_vm14 = vnez %v4942_v29 }
 0x5fc   : > { %v2000_v7 = vsel %vm5046_vm12, 0.0, %v1980_v44  ;;  %v2001_v51 = vsel %vm5047_vm8, 0.0, %v1982_v11  ;;  %v2109_v12 = vrot.slane %v2099_v3, 4  ;;  %2118 = vst.msk [vmem:[#allocation2 + $0x28] sm:$0xff] %vm5048_vm7, %v2108_v52  ;;  %vm5049_vm4 = vmmov %vm5048_vm7  ;;  %v2195_v62 = vrot.slane %v2154_v53, 4  ;;  %v3630_v44 = vld [vmem:[%s4890_s8 + $0xe0] sm:$0xff]  }
 0x5fd   : > { %3229 = vmatprep.mubr.msk.bf16.mxu1 %vm5049_vm4, %v2122_v42  ;;  %vm5050_vm15 = vmmov %vm5043_vm1  ;;  %v2038_v8 = vpack.c.bf16 %v2001_v51, %v2000_v7  ;;  %vm5057_vm9 = vnez %v4944_v47  ;;  %v3632_v52 = vld [vmem:[%s4890_s8 + $0xf0] sm:$0xff]   ;;  %v3633_v7 = vld [vmem:[%s4890_s8 + $0xf8] sm:$0xff]  }
 0x5fe   : > { %v2046_v43 = vsel %vm5050_vm15, %v2044_v15, %v2045_v40  ;;  %vm5051_vm6 = vmmov %vm5042_vm3  ;;  %v3634_v51 = vld [vmem:[%s4890_s8 + $0x100] sm:$0xff]  }
 0x5ff   : > { %v1984_v16 = vsel %vm5051_vm6, %v1981_v34, %v1983_v2  ;;  %vm5052_vm13 = vmmov %vm5049_vm4  ;;  %v2047_v10 = vrot.slane %v2038_v8, 4  ;;  %v4736_v15 = vld [vmem:[#allocation2 + $0x18] sm:$0xff] }
 0x600   : > { %2057 = vst.msk [vmem:[#allocation2 + $0x10] sm:$0xff] %vm5052_vm13, %v2046_v43  ;;  %vm5053_vm0 = vmmov %vm5042_vm3  ;;  %v2002_v31 = vsel %vm5054_vm14, 0.0, %v1984_v16  ;;  %v2196_v9 = vrot.slane %v4736_v15, 4  ;;  %v3636_v43 = vld [vmem:[%s4890_s8 + $0x110] sm:$0xff]   ;;  %v3637_v8 = vld [vmem:[%s4890_s8 + $0x118] sm:$0xff]  }
 0x601   : > { %v1986_v58 = vsel %vm5053_vm0, %v1983_v2, %v1985_v30  ;;  %vm5055_vm3 = vmmov %vm5043_vm1  ;;  %vm5056_vm1 = vcmask 519168  }
 0x602   : > { %v2110_v55 = vsel %vm5055_vm3, %v2107_v37, %v2109_v12  ;;  %2120 = vst.msk [vmem:[#allocation2 + $0x48] sm:$0xf] %vm5056_vm1, %v2109_v12  ;;  %v2003_v1 = vsel %vm5057_vm9, 0.0, %v1986_v58  ;;  %vm5058_vm11 = vmmov %vm5049_vm4  ;;  %v3635_v12 = vld [vmem:[%s4890_s8 + $0x108] sm:$0xff]  }
 0x603   : > { %2119 = vst.msk [vmem:[#allocation2 + $0x38] sm:$0xff] %vm5058_vm11, %v2110_v55  ;;  %v2039_v34 = vpack.c.bf16 %v2003_v1, %v2002_v31  ;;  %vm5059_vm12 = vmmov %vm5055_vm3  ;;  %v4751_v38 = vld [vmem:[#allocation2 + $0x28] sm:$0xff]  ;;  %v3640_v55 = vld [vmem:[%s4893_s11 + $0x10] sm:$0xff]  }
 0x604   : > { %v2048_v13 = vsel %vm5059_vm12, %v2045_v40, %v2047_v10  ;;  %vm5060_vm8 = vmmov %vm5049_vm4  ;;  %v2200_v39 = vrot.slane %v4751_v38, 4  ;;  %v3631_v40 = vld [vmem:[%s4890_s8 + $0xe8] sm:$0xff]  }
 0x605   : > { %2058 = vst.msk [vmem:[#allocation2 + $0x20] sm:$0xff] %vm5060_vm8, %v2048_v13  ;;  %v2049_v29 = vrot.slane %v2039_v34, 4  ;;  %vm5061_vm7 = vmmov %vm5055_vm3  ;;  %v3639_v31 = vld [vmem:[%s4893_s11 + $0x8] sm:$0xff]   ;;  %v3721_v13 = vld [vmem:[%s3854_s26 + $0x18] sm:$0xff]  }
 0x606   : > { %v2197_v60 = vsel %vm5061_vm7, %v2195_v62, %v2196_v9  ;;  %vm5062_vm15 = vmmov %vm5055_vm3  ;;  %v3641_v62 = vld [vmem:[%s4893_s11 + $0x18] sm:$0xff]   ;;  %v3719_v1 = vld [vmem:[%s3854_s26 + $0x8] sm:$0xff]  }
 0x607   : > { %3213 = vmatprep.mubr.msk.bf16.mxu0 %vm5049_vm4, %v2197_v60  ;;  %v2050_v57 = vsel %vm5062_vm15, %v2047_v10, %v2049_v29  ;;  %vm5063_vm6 = vmmov %vm5056_vm1  ;;  %v3718_v10 = vld [vmem:[%s3854_s26] sm:$0xff]   ;;  %v3643_v34 = vld [vmem:[%s4892_s10 + $0x8] sm:$0xff]  }
 0x608   : > { %2060 = vst.msk [vmem:[#allocation2 + $0x40] sm:$0xf] %vm5063_vm6, %v2049_v29  ;;  %vm5064_vm13 = vmmov %vm5049_vm4  ;;  %v3644_v29 = vld [vmem:[%s4892_s10 + $0x10] sm:$0xff]   ;;  %v3645_v60 = vld [vmem:[%s4892_s10 + $0x18] sm:$0xff]  }
 0x609   : > { %2059 = vst.msk [vmem:[#allocation2 + $0x30] sm:$0xff] %vm5064_vm13, %v2050_v57  ;;  %vm5065_vm0 = vmmov %vm5049_vm4  ;;  %v2156_v14 = vld [vmem:[#allocation2 + $0x48] sm:$0xf] }
 0x60a   : > { %vm5067_vm14 = vmmov %vm5055_vm3  ;;  %v2128_v0 = vld [vmem:[#allocation2 + $0x38] sm:$0xff]  ;;  %v2208_v37 = vrot.slane %v2156_v14, 4  ;;  %v2513_v16 = vld [vmem:[#allocation2 + $0x48] sm:$0xff] }
 0x60b   : > { %v2201_v36 = vsel %vm5067_vm14, %v2196_v9, %v2200_v39  ;;  %v2204_v45 = vrot.slane %v2128_v0, 4  ;;  %vm5072_vm9 = vmmov %vm5065_vm0  ;;  %v3720_v9 = vld [vmem:[%s3854_s26 + $0x10] sm:$0xff]  }
 0x60c   : > { %vm5073_vm11 = vmmov %vm5065_vm0 }
 0x60d   : > { %vm5078_vm15 = vmmov %vm5065_vm0 }
 0x60e   : > { %vm5079_vm6 = vmmov %vm5065_vm0 }
 0x60f   : > { %vm5080_vm13 = vmmov %vm5065_vm0 }
 0x610   : > { %vm5082_vm14 = vmmov %vm5065_vm0 }
 0x65e   : > { %v2077_v47 = vpop.permute.xlu1 %2076 }
 0x65f   : > { %2091 = vst.msk [vmem:[#allocation2] sm:$0xf0] %vm1040_vm10, %v2077_v47  ;;  %vm5066_vm10 = vmmov %vm5055_vm3 }
 0x660   : > { %vm5068_vm3 = vmmov %vm5065_vm0 }
 0x664   : > { %v2079_v28 = vpop.permute.xlu0 %2078 }
 0x665   : > { %2092 = vst.msk [vmem:[#allocation2 + $0x10] sm:$0xff] %vm1042_vm5, %v2079_v28 }
 0x666   : > { %v2121_v46 = vld [vmem:[#allocation2] sm:$0xff] }
 0x667   : > { %2480 = vmatmul.mubr.bf16.vlgmr.msra.gmra.mrb[24].mxu1 %v2121_v46  ;;  %v2153_v6 = vld [vmem:[#allocation2] sm:$0xf0] }
 0x668   : > { %v2081_v2 = vpop.permute.xlu1 %2080  ;;  %3230 = vmatprep.mubr.msk.bf16.mxu1 %vm5065_vm0, %v4736_v15  ;;  %v2192_v63 = vrot.slane %v2153_v6, 4 }
 0x669   : > { %2093 = vst.msk [vmem:[#allocation2 + $0x20] sm:$0xff] %vm1042_vm5, %v2081_v2 }
 0x66c   : > { %v2085_v27 = vpop.permute.xlu1 %2084  ;;  %v4753_v61 = vld [vmem:[#allocation2 + $0x10] sm:$0xff] }
 0x66d   : > { %v2083_v50 = vpop.permute.xlu0 %2082  ;;  %2095 = vst.msk [vmem:[#allocation2 + $0x40] sm:$0xf] %vm1046_vm2, %v2085_v27  ;;  %v2193_v30 = vrot.slane %v4753_v61, 4  ;;  %vm5070_vm2 = vmmov %vm5061_vm7 }
 0x66e   : > { %2094 = vst.msk [vmem:[#allocation2 + $0x30] sm:$0xff] %vm1042_vm5, %v2083_v50  ;;  %vm5069_vm5 = vmmov %vm5065_vm0 }
 0x66f   : > { %v2194_v35 = vsel %vm5066_vm10, %v2192_v63, %v2193_v30  ;;  %2488 = vmatmul.mubr.bf16.gmra.mrb[28].mxu1 %v4753_v61  ;;  %vm5071_vm1 = vmmov %vm5070_vm2 }
 0x670   : > { %2331 = vmatmul.mubr.bf16.vlgmr.msra.gmra.mrb[36].mxu0 %v2194_v35  ;;  %v2125_v54 = vld [vmem:[#allocation2 + $0x20] sm:$0xff]  ;;  %3231 = vmatprep.mubr.msk.bf16.mxu1 %vm5069_vm5, %v4751_v38  ;;  %v2205_v59 = vsel %vm5071_vm1, %v2200_v39, %v2204_v45  ;;  %vm5074_vm12 = vmmov %vm5071_vm1 }
 0x671   : > { %2615 = vmatpush1.bf16.msra.mxu0 %v3626_v32  ;;  %3214 = vmatprep.mubr.msk.bf16.mxu0 %vm5068_vm3, %v2201_v36  ;;  %v2198_v5 = vrot.slane %v2125_v54, 4  ;;  %vm5075_vm8 = vmmov %vm5071_vm1 }
 0x672   : > { %2616 = vmatprep.subr.bf16.mxu0 %v3733_v41  ;;  %v2209_v3 = vsel %vm5075_vm8, %v2204_v45, %v2208_v37  ;;  %vm5076_vm7 = vmmov %vm5065_vm0 }
 0x673   : > { %v2199_v33 = vsel %vm5070_vm2, %v2193_v30, %v2198_v5  ;;  %vm5077_vm4 = vmmov %vm5071_vm1 }
 0x674   : > { %v2155_v42 = vld [vmem:[#allocation2 + $0x40] sm:$0xf]  ;;  %vm5081_vm10 = vmmov %vm5065_vm0 }
 0x675   : > { %2617 = vmatpush1.bf16.msra.mxu0 %v3627_v48  ;;  %v2127_v25 = vld [vmem:[#allocation2 + $0x30] sm:$0xff]  ;;  %v2206_v11 = vrot.slane %v2155_v42, 4  ;;  %v2512_v58 = vld [vmem:[#allocation2 + $0x40] sm:$0xff]  ;;  %vm5083_vm3 = vmmov %vm5065_vm0 }
 0x676   : > { %2618 = vmatprep.subr.bf16.mxu0 %v3733_v41  ;;  %v2202_v56 = vrot.slane %v2127_v25, 4  ;;  %vm5084_vm5 = vmmov %vm5065_vm0 }
 0x677   : > { %2496 = vmatmul.mubr.bf16.gmra.mrb[32].mxu1 %v2125_v54  ;;  %vm5085_vm2 = vmmov %vm5065_vm0 }
 0x678   : > { %2339 = vmatmul.mubr.bf16.gmra.mrb[40].mxu0 %v2199_v33  ;;  %3232 = vmatprep.mubr.msk.bf16.mxu1 %vm5073_vm11, %v2128_v0  ;;  %v2203_v26 = vsel %vm5074_vm12, %v2198_v5, %v2202_v56  ;;  %v2207_v53 = vsel %vm5077_vm4, %v2202_v56, %v2206_v11  ;;  %vm5086_vm1 = vmmov %vm5065_vm0 }
 0x679   : > { %2619 = vmatpush1.bf16.msra.mxu0 %v3628_v4  ;;  %3215 = vmatprep.mubr.msk.bf16.mxu0 %vm5072_vm9, %v2205_v59  ;;  %vm5087_vm9 = vmmov %vm5065_vm0 }
 0x67a   : > { %2620 = vmatprep.subr.bf16.mxu0 %v3733_v41  ;;  %vm5088_vm11 = vmmov %vm5065_vm0 }
 0x67d   : > { %2621 = vmatpush1.bf16.msra.mxu0 %v3629_v49 }
 0x67e   : > { %2622 = vmatprep.subr.bf16.mxu0 %v3733_v41 }
 0x67f   : > { %2504 = vmatmul.mubr.bf16.gmra.mrb[36].mxu1 %v2127_v25 }
 0x680   : > { %2347 = vmatmul.mubr.bf16.gmra.mrb[44].mxu0 %v2203_v26  ;;  %3473 = vmatprep.mubr.msk.bf16.mxu1 %vm5081_vm10, %v3718_v10 }
 0x681   : > { %2623 = vmatpush1.bf16.msra.mxu0 %v3630_v44  ;;  %3216 = vmatprep.mubr.msk.bf16.mxu0 %vm5076_vm7, %v2209_v3 }
 0x682   : > { %2624 = vmatprep.subr.bf16.mxu0 %v3733_v41 }
 0x685   : > { %2625 = vmatpush1.bf16.msra.mxu0 %v3631_v40 }
 0x686   : > { %2626 = vmatprep.subr.bf16.mxu0 %v3733_v41 }
 0x688   : > { %2355 = vmatmul.mubr.bf16.gmra.mrb[48].mxu0 %v2207_v53 }
 0x689   : > { %2627 = vmatpush1.bf16.msra.mxu0 %v3632_v52  ;;  %3269 = vmatprep.mubr.msk.bf16.mxu0 %vm5078_vm15, %v4736_v15  ;;  %v3642_v15 = vld [vmem:[%s4892_s10] sm:$0xff]  }
 0x68a   : > { %2628 = vmatprep.subr.bf16.mxu0 %v3733_v41 }
 0x68d   : > { %2629 = vmatpush1.bf16.msra.mxu0 %v3633_v7 }
 0x68e   : > { %2630 = vmatprep.subr.bf16.mxu0 %v3733_v41 }
 0x691   : > { %2631 = vmatpush1.bf16.msra.mxu0 %v3634_v51 }
 0x692   : > { %2632 = vmatprep.subr.bf16.mxu0 %v3733_v41 }
 0x695   : > { %2633 = vmatpush1.bf16.msra.mxu0 %v3635_v12 }
 0x696   : > { %2634 = vmatprep.subr.bf16.mxu0 %v3733_v41 }
 0x699   : > { %2635 = vmatpush1.bf16.msra.mxu0 %v3636_v43 }
 0x69a   : > { %2636 = vmatprep.subr.bf16.mxu0 %v3733_v41  ;;  %v3638_v41 = vld [vmem:[%s4893_s11] sm:$0xff]  }
 0x69b   : > { %3465 = vmatprep.subr.bf16.mxu1 %v3638_v41 }
 0x69c   : > { %3466 = vmatpush3.bf16.msra.mxu1 %v3638_v41 }
 0x69d   : > { %2637 = vmatpush1.bf16.msra.mxu0 %v3637_v8  ;;  %3467 = vmatprep.subr.bf16.mxu1 %v3639_v31  ;;  %v3273_v8 = vld [vmem:[%s4891_s9] ss:$0 sm:$0xff] }
 0x6a0   : > { %2647 = vmatmul.mubr.bf16.vlgmr.msra.gmra.mrb[52].mxu0 %v4753_v61  ;;  %3468 = vmatpush3.bf16.msra.mxu1 %v3639_v31 }
 0x6a1   : > { %3270 = vmatprep.mubr.msk.bf16.mxu0 %vm5079_vm6, %v4751_v38  ;;  %3469 = vmatprep.subr.bf16.mxu1 %v3640_v55 }
 0x6a4   : > { %3470 = vmatpush3.bf16.msra.mxu1 %v3640_v55 }
 0x6a5   : > { %3471 = vmatprep.subr.bf16.mxu1 %v3641_v62 }
 0x6a8   : > { %2655 = vmatmul.mubr.bf16.gmra.mrb[56].mxu0 %v2125_v54  ;;  %3472 = vmatpush3.bf16.msra.mxu1 %v3641_v62 }
 0x6a9   : > { %3271 = vmatprep.mubr.msk.bf16.mxu0 %vm5080_vm13, %v2128_v0  ;;  %3481 = vmatprep.subr.bf16.mxu1 %v3642_v15 }
 0x6ab   : > { %3474 = vmatmul.mubr.msk.bf16.vlgmr.msra.gmra.mrb[40].mxu1 %vm5082_vm14, %v3719_v1 }
 0x6ac   : > { %3482 = vmatpush3.bf16.msra.mxu1 %v3642_v15  ;;  %3477 = vmatprep.mubr.msk.bf16.mxu1 %vm5083_vm3, %v3720_v9 }
 0x6ad   : > { %3483 = vmatprep.subr.bf16.mxu1 %v3643_v34 }
 0x6b0   : > { %2663 = vmatmul.mubr.bf16.gmra.mrb[60].mxu0 %v2127_v25  ;;  %3484 = vmatpush3.bf16.msra.mxu1 %v3643_v34 }
 0x6b1   : > { %3272 = vmatprep.mubr.msk.bf16.mxu0 %vm5065_vm0, %v2513_v16  ;;  %3485 = vmatprep.subr.bf16.mxu1 %v3644_v29 }
 0x6b3   : > { %3478 = vmatmul.mubr.msk.bf16.gmra.mrb[44].mxu1 %vm5084_vm5, %v3721_v13 }
 0x6b4   : > { %3486 = vmatpush3.bf16.msra.mxu1 %v3644_v29 }
 0x6b5   : > { %3487 = vmatprep.subr.bf16.mxu1 %v3645_v60 }
 0x6b8   : > { %2671 = vmatmul.mubr.bf16.gmra.mrb[64].mxu0 %v2512_v58  ;;  %3488 = vmatpush3.bf16.msra.mxu1 %v3645_v60 }
 0x73a   : > { %v2481_v57 = vpop.f32.mrb[24].mxu1 }
 0x73b   : > { %v2483_v47 = vpop.f32.mrb[25].mxu1 }
 0x73c   : > { %v2484_v28 = vpop.f32.mrb[26].mxu1 }
 0x73d   : > { %v2486_v46 = vpop.f32.mrb[27].mxu1 }
 0x742   : > { %v2489_v6 = vpop.f32.mrb[28].mxu1 }
 0x743   : > { %v2332_v2 = vpop.f32.mrb[36].mxu0  ;;  %v2491_v50 = vpop.f32.mrb[29].mxu1 }
 0x744   : > { %v2482_v38 = vadd.f32 %v2481_v57, %v2332_v2  ;;  %v2334_v63 = vpop.f32.mrb[37].mxu0  ;;  %v2492_v61 = vpop.f32.mrb[30].mxu1 }
 0x745   : > { %v2335_v27 = vpop.f32.mrb[38].mxu0  ;;  %v2494_v32 = vpop.f32.mrb[31].mxu1 }
 0x746   : > { %v2485_v39 = vadd.f32 %v2484_v28, %v2335_v27  ;;  %v2337_v30 = vpop.f32.mrb[39].mxu0 }
 0x74a   : > { %v2497_v36 = vpop.f32.mrb[32].mxu1 }
 0x74b   : > { %v2340_v35 = vpop.f32.mrb[40].mxu0  ;;  %v2499_v0 = vpop.f32.mrb[33].mxu1 }
 0x74c   : > { %v2490_v54 = vadd.f32 %v2489_v6, %v2340_v35  ;;  %v2342_v48 = vpop.f32.mrb[41].mxu0  ;;  %v2500_v45 = vpop.f32.mrb[34].mxu1 }
 0x74d   : > { %v2343_v5 = vpop.f32.mrb[42].mxu0  ;;  %v2502_v59 = vpop.f32.mrb[35].mxu1 }
 0x74e   : > { %v2493_v4 = vadd.f32 %v2492_v61, %v2343_v5  ;;  %v2345_v33 = vpop.f32.mrb[43].mxu0 }
 0x752   : > { %v2505_v49 = vpop.f32.mrb[36].mxu1 }
 0x753   : > { %v2348_v25 = vpop.f32.mrb[44].mxu0  ;;  %v2507_v37 = vpop.f32.mrb[37].mxu1 }
 0x754   : > { %v2498_v14 = vadd.f32 %v2497_v36, %v2348_v25  ;;  %v2350_v56 = vpop.f32.mrb[45].mxu0  ;;  %v2508_v26 = vpop.f32.mrb[38].mxu1 }
 0x755   : > { %v2351_v44 = vpop.f32.mrb[46].mxu0  ;;  %v2510_v40 = vpop.f32.mrb[39].mxu1 }
 0x756   : > { %v2501_v3 = vadd.f32 %v2500_v45, %v2351_v44  ;;  %v2353_v42 = vpop.f32.mrb[47].mxu0 }
 0x75b   : > { %v2356_v11 = vpop.f32.mrb[48].mxu0 }
 0x75c   : > { %v2506_v52 = vadd.f32 %v2505_v49, %v2356_v11  ;;  %v2358_v53 = vpop.f32.mrb[49].mxu0 }
 0x75d   : > { %v2359_v7 = vpop.f32.mrb[50].mxu0 }
 0x75e   : > { %v2509_v51 = vadd.f32 %v2508_v26, %v2359_v7  ;;  %v2361_v12 = vpop.f32.mrb[51].mxu0 }
 0x773   : > { %v2648_v43 = vpop.f32.mrb[52].mxu0 }
 0x774   : > { %v2679_v16 = vadd.f32 %v2648_v43, %v2482_v38  ;;  %v2650_v58 = vpop.f32.mrb[53].mxu0 }
 0x775   : > { %v2651_v41 = vpop.f32.mrb[54].mxu0 }
 0x776   : > { %v2694_v31 = vadd.f32 %v3273_v8, %v2679_v16  ;;  %v2680_v55 = vadd.f32 %v2651_v41, %v2485_v39  ;;  %v2653_v62 = vpop.f32.mrb[55].mxu0 }
 0x778   : > { %v2695_v10 = vadd.f32 %v3273_v8, %v2680_v55  ;;  %v2702_v1 = vadd.f32 %v2694_v31, %v3865_v17 }
 0x77a   : > { %v2703_v15 = vadd.f32 %v2695_v10, %v3867_v18 }
 0x77b   : > { %v2656_v34 = vpop.f32.mrb[56].mxu0 }
 0x77c   : > { %v2710_v9 = vpack.c.bf16 %v2703_v15, %v2702_v1  ;;  %v2681_v13 = vadd.f32 %v2656_v34, %v2490_v54  ;;  %v2658_v29 = vpop.f32.mrb[57].mxu0 }
 0x77d   : > { %v2659_v60 = vpop.f32.mrb[58].mxu0 }
 0x77e   : > { %v2696_v57 = vadd.f32 %v3273_v8, %v2681_v13  ;;  %v2682_v47 = vadd.f32 %v2659_v60, %v2493_v4  ;;  %v2661_v28 = vpop.f32.mrb[59].mxu0  ;;  %3489 = vmatprep.mubr.msk.bf16.mxu1 %vm5085_vm2, %v2710_v9 }
 0x780   : > { %v2697_v46 = vadd.f32 %v3273_v8, %v2682_v47  ;;  %v2704_v2 = vadd.f32 %v2696_v57, %v3869_v19 }
 0x782   : > { %v2705_v6 = vadd.f32 %v2697_v46, %v3871_v20 }
 0x783   : > { %v2664_v38 = vpop.f32.mrb[60].mxu0 }
 0x784   : > { %v2711_v63 = vpack.c.bf16 %v2705_v6, %v2704_v2  ;;  %v2683_v17 = vadd.f32 %v2664_v38, %v2498_v14  ;;  %v2666_v50 = vpop.f32.mrb[61].mxu0 }
 0x785   : > { %v2667_v18 = vpop.f32.mrb[62].mxu0 }
 0x786   : > { %v2698_v27 = vadd.f32 %v3273_v8, %v2683_v17  ;;  %v2684_v61 = vadd.f32 %v2667_v18, %v2501_v3  ;;  %v2669_v39 = vpop.f32.mrb[63].mxu0  ;;  %3490 = vmatmul.mubr.msk.bf16.vlgmr.msra.gmra.mrb[40].mxu1 %vm5086_vm1, %v2711_v63 }
 0x788   : > { %v2699_v30 = vadd.f32 %v3273_v8, %v2684_v61  ;;  %v2706_v32 = vadd.f32 %v2698_v27, %v3874_v21 }
 0x78a   : > { %v2707_v35 = vadd.f32 %v2699_v30, %v3876_v22 }
 0x78b   : > { %v2672_v36 = vpop.f32.mrb[64].mxu0 }
 0x78c   : > { %v2712_v19 = vpack.c.bf16 %v2707_v35, %v2706_v32  ;;  %v2685_v54 = vadd.f32 %v2672_v36, %v2506_v52  ;;  %v2674_v20 = vpop.f32.mrb[65].mxu0 }
 0x78d   : > { %v2675_v48 = vpop.f32.mrb[66].mxu0 }
 0x78e   : > { %v2700_v0 = vadd.f32 %v3273_v8, %v2685_v54  ;;  %v2686_v5 = vadd.f32 %v2675_v48, %v2509_v51  ;;  %v2677_v45 = vpop.f32.mrb[67].mxu0  ;;  %3493 = vmatprep.mubr.msk.bf16.mxu1 %vm5087_vm9, %v2712_v19 }
 0x790   : > { %v2701_v4 = vadd.f32 %v3273_v8, %v2686_v5  ;;  %v2708_v33 = vadd.f32 %v2700_v0, %v3878_v23 }
 0x792   : > { %v2709_v59 = vadd.f32 %v2701_v4, %v3880_v24 }
 0x794   : > { %v2713_v25 = vpack.c.bf16 %v2709_v59, %v2708_v33 }
 0x796   : > { %3494 = vmatmul.mubr.msk.bf16.gmra.mrb[44].mxu1 %vm5088_vm11, %v2713_v25 }
 0x859   : > { %v3491_v21 = vpop.f32.mrb[40].mxu1 }
 0x85a   : > { %v2921_v22 = vpop.f32.mrb[41].mxu1 }
 0x85b   : > { %v3492_v49 = vpop.f32.mrb[42].mxu1 }
 0x85c   : > { %v3322_v14 = vpack.c.bf16 %v3492_v49, %v3491_v21  ;;  %v2924_v56 = vpop.f32.mrb[43].mxu1 }
 0x85d   : > { %v3317_v37 = vpack.c.bf16 %v2924_v56, %v2921_v22 }
 0x85e   : > { %3334 = vst [vmem:[%s413_s20 + $0x8] sm:$0xff] %v3322_v14  }
 0x85f   : > { %3318 = vst [vmem:[%s413_s20] sm:$0xff] %v3317_v37  }
 0x869   : > { %v3495_v44 = vpop.f32.mrb[44].mxu1 }
 0x86a   : > { %v2937_v23 = vpop.f32.mrb[45].mxu1 }
 0x86b   : > { %v3496_v26 = vpop.f32.mrb[46].mxu1 }
 0x86c   : > { %v3332_v24 = vpack.c.bf16 %v3496_v26, %v3495_v44  ;;  %v2940_v3 = vpop.f32.mrb[47].mxu1 }
 0x86d   : > { %v3327_v42 = vpack.c.bf16 %v2940_v3, %v2937_v23 }
 0x86e   : > { %3336 = vst [vmem:[%s413_s20 + $0x18] sm:$0xff] %v3332_v24  }
 0x86f   : > { %3335 = vst [vmem:[%s413_s20 + $0x10] sm:$0xff] %v3327_v42  }
 0x870 PF: > { %s22_s21 = sadd.s32 1, %s3728_s21  }
 0x871   : > { %p19_p4 = scmp.ge.s32.totalorder %s22_s21, 4  }
 0x873   :  { %21 = sbr.rel (!%p19_p4) target bundleno = 1 (0x1), region = 102 }

// kernel: decoder_forward.6
= control target key start
LH: loop header
LB: loop body
LE: loop exit
PB: predicated region body
PF: predicated region fallthrough
CT: control target
= control target key end

     0   :  { %s7535_s21 = smov 0   ;;  %s10810_s0 = inlined_call_operand.vmem [shape: bf16[2,256,32], index: 0, kind: input, shape index: {}]   ;;  %s10811_s1 = inlined_call_operand.vmem [shape: f32[32,32], index: 1, kind: input, shape index: {}]   ;;  %s10812_s2 = inlined_call_operand.vmem [shape: f32[1,32], index: 2, kind: input, shape index: {}]   ;;  %s10813_s3 = inlined_call_operand.vmem [shape: f32[1,32], index: 3, kind: input, shape index: {}]   ;;  %s10814_s4 = inlined_call_operand.vmem [shape: bf16[3,96,32], index: 4, kind: input, shape index: {}]   ;;  %s10815_s5 = inlined_call_operand.vmem [shape: f32[1,32], index: 5, kind: input, shape index: {}]   ;;  %s10816_s6 = inlined_call_operand.vmem [shape: f32[1,32], index: 6, kind: input, shape index: {}]   ;;  %s10817_s7 = inlined_call_operand.vmem [shape: f32[1,32], index: 7, kind: input, shape index: {}]   ;;  %s10818_s8 = inlined_call_operand.vmem [shape: bf16[3,96,32], index: 8, kind: input, shape index: {}]   ;;  %s10819_s9 = inlined_call_operand.vmem [shape: f32[1,32], index: 9, kind: input, shape index: {}]   ;;  %s10820_s10 = inlined_call_operand.vmem [shape: bf16[32,64], index: 10, kind: input, shape index: {}]   ;;  %s10821_s11 = inlined_call_operand.vmem [shape: bf16[32,64], index: 11, kind: input, shape index: {}]   ;;  %s10822_s12 = inlined_call_operand.vmem [shape: bf16[2,256,64], index: 12, kind: output, shape index: {}]  }
   0x1 LB: > { %s5971_s22 = sadd.s32 4294967295, %s7462_s21   ;;  %p5975_p0 = scmp.ge.s32.totalorder %s7462_s21, 1  ;;  %s7462_s21 = sphi %s7535_s21, %s22_s21  }
   0x2   : > { %p362_p1 = scmp.lt.s32.totalorder %s7462_s21, 3 }
   0x4   : > { %p363_p2 = pnand %p5975_p0, %p362_p1 }
   0x6   : > { %366 = sbr.rel (%p363_p2) target bundleno = 2607 (0xa2f), region = 68 }
   0xd   : > { %v835_v0 = vld [vmem:[%s10811_s1] sm:$0xff]  ;;  %v836_v1 = vld [vmem:[%s10811_s1 + $0x8] sm:$0xff]  ;;  %v837_v2 = vld [vmem:[%s10811_s1 + $0x10] sm:$0xff]  ;;  %v10823_v3 = vmov 0.0|0.0   ;;  %vm10897_vm0 = vmmov 0   ;;  %v10825_v6 = vmov 0.0  }
   0xe   : > { %6922 = vmatprep.subr.bf16.mxu0 %v10823_v3  ;;  %v7553_v4 = vpack.c.bf16 %v836_v1, %v835_v0  ;;  %v838_v5 = vld [vmem:[%s10811_s1 + $0x18] sm:$0xff]  ;;  %6550 = vmatprep.mubr.msk.f32.mxu0 %vm10897_vm0, %v10825_v6  ;;  %p404_p3 = scmp.lt.s32.totalorder %s5971_s22, 1  ;;  %vm10900_vm1 = vcmask 261120   ;;  %vm10898_vm2 = vcmask 1046528   ;;  %s7467_s19 = smov 32   ;;  %vm10899_vm10 = vcmask 1040384  }
   0xf   : > { %6928 = vmatprep.subr.bf16.mxu1 %v10823_v3  ;;  %6561 = vmatprep.mubr.msk.f32.mxu1 %vm10897_vm0, %v10825_v6  ;;  %v7564_v7 = vpack.c.bf16 %v838_v5, %v837_v2  ;;  %s7468_s24 = smov 64  }
  0x10   : > { %10983 = vst [vmem:[#allocation3_spill] sm:$0xff] %v7553_v4  ;;  %6924 = vmatpush3.bf16.msra.mxu0 %v7553_v4  ;;  %s11574_s22 = smov (!%p404_p3, %s5971_s22), 1  ;;  %6930 = vmatpush3.bf16.msra.mxu1 %v7553_v4 }
  0x11   : > { %10984 = vst [vmem:[#allocation4_spill] sm:$0xff] %v7564_v7  ;;  %6925 = vmatprep.subr.bf16.mxu0 %v10823_v3  ;;  %6931 = vmatprep.subr.bf16.mxu1 %v10823_v3  ;;  %s6320_s13 = sshll.u32 %s11574_s22, 7 }
  0x12   : > { %s7577_s16 = scalar_lea.vmem %s10810_s0, %s6320_s13  ;;  %s10721_s18 = scalar_lea.vmem %s10822_s12, %s6320_s13 }
  0x13   : > { %v839_v8 = vld [vmem:[%s7577_s16] sm:$0xff]   ;;  %v841_v9 = vld [vmem:[%s7577_s16 + $0x8] sm:$0xff]   ;;  %v843_v10 = vld [vmem:[%s7577_s16 + $0x10] sm:$0xff]  }
  0x14   : > { %6927 = vmatpush3.bf16.msra.mxu0 %v7564_v7  ;;  %6933 = vmatpush3.bf16.msra.mxu1 %v7564_v7  ;;  %v7585_v11 = vunpack.c.l.bf16 %v839_v8  ;;  %v7587_v12 = vunpack.c.h.bf16 %v839_v8  ;;  %v7589_v13 = vunpack.c.l.bf16 %v841_v9  ;;  %v845_v14 = vld [vmem:[%s7577_s16 + $0x18] sm:$0xff]   ;;  %v847_v15 = vld [vmem:[%s7577_s16 + $0x20] sm:$0xff]   ;;  %v7593_v16 = vunpack.c.h.bf16 %v841_v9  ;;  %v849_v17 = vld [vmem:[%s7577_s16 + $0x28] sm:$0xff]  }
  0x15   : > { %6934 = vmatprep.subr.bf16.mxu1 %v10823_v3  ;;  %v7596_v18 = vunpack.c.l.bf16 %v843_v10  ;;  %v851_v22 = vld [vmem:[%s7577_s16 + $0x30] sm:$0xff]   ;;  %v7605_v24 = vunpack.c.h.bf16 %v843_v10  ;;  %v7607_v25 = vunpack.c.l.bf16 %v845_v14  ;;  %v7609_v26 = vunpack.c.h.bf16 %v845_v14  ;;  %v853_v50 = vld [vmem:[%s7577_s16 + $0x38] sm:$0xff]   ;;  %v855_v53 = vld [vmem:[%s7577_s16 + $0x40] sm:$0xff]  }
  0x16   : > { %10985 = vst [vmem:[#allocation5_spill] sm:$0xff] %v7585_v11  ;;  %10986 = vst [vmem:[#allocation6_spill] sm:$0xff] %v7587_v12  ;;  %v906_v19 = vsel %vm10900_vm1, %v7585_v11, 0.0  ;;  %v907_v20 = vsel %vm10900_vm1, %v7587_v12, 0.0  ;;  %v909_v21 = vsel %vm10900_vm1, %v7589_v13, 0.0  ;;  %v911_v27 = vsel %vm10900_vm1, %v7593_v16, 0.0 }
  0x17   : > { %10987 = vst [vmem:[#allocation7_spill] sm:$0xff] %v7589_v13  ;;  %10988 = vst [vmem:[#allocation8_spill] sm:$0xff] %v7593_v16  ;;  %v908_v23 = vadd.f32 %v907_v20, %v906_v19  ;;  %v7613_v28 = vunpack.c.l.bf16 %v847_v15  ;;  %v7615_v29 = vunpack.c.h.bf16 %v847_v15  ;;  %v7617_v30 = vunpack.c.l.bf16 %v849_v17  ;;  %v857_v61 = vld [vmem:[%s7577_s16 + $0x48] sm:$0xff]   ;;  %v859_v8 = vld [vmem:[%s7577_s16 + $0x50] sm:$0xff]  }
  0x18   : > { %10989 = vst [vmem:[#allocation9_spill] sm:$0xff] %v7596_v18  ;;  %10990 = vst [vmem:[#allocation10_spill] sm:$0xff] %v7605_v24  ;;  %v7619_v32 = vunpack.c.h.bf16 %v849_v17  ;;  %v7621_v33 = vunpack.c.l.bf16 %v851_v22  ;;  %v7623_v34 = vunpack.c.h.bf16 %v851_v22  ;;  %v913_v35 = vsel %vm10900_vm1, %v7596_v18, 0.0  ;;  %v861_v20 = vld [vmem:[%s7577_s16 + $0x58] sm:$0xff]  }
  0x19   : > { %10991 = vst [vmem:[#allocation11_spill] sm:$0xff] %v7607_v25  ;;  %10992 = vst [vmem:[#allocation12_spill] sm:$0xff] %v7609_v26  ;;  %v910_v31 = vadd.f32 %v909_v21, %v908_v23  ;;  %v915_v37 = vsel %vm10900_vm1, %v7605_v24, 0.0  ;;  %v917_v38 = vsel %vm10900_vm1, %v7607_v25, 0.0  ;;  %v919_v40 = vsel %vm10900_vm1, %v7609_v26, 0.0 }
  0x1a   : > { %10993 = vst [vmem:[#allocation13_spill] sm:$0xff] %v7613_v28  ;;  %10994 = vst [vmem:[#allocation14_spill] sm:$0xff] %v7615_v29  ;;  %v921_v41 = vsel %vm10900_vm1, %v7613_v28, 0.0  ;;  %v923_v42 = vsel %vm10900_vm1, %v7615_v29, 0.0  ;;  %v925_v43 = vsel %vm10900_vm1, %v7617_v30, 0.0  ;;  %v927_v44 = vsel %vm10900_vm1, %v7619_v32, 0.0 }
  0x1b   : > { %10995 = vst [vmem:[#allocation15_spill] sm:$0xff] %v7617_v30  ;;  %10996 = vst [vmem:[#allocation16_spill] sm:$0xff] %v7619_v32  ;;  %v912_v36 = vadd.f32 %v911_v27, %v910_v31  ;;  %v929_v45 = vsel %vm10900_vm1, %v7621_v33, 0.0  ;;  %v931_v46 = vsel %vm10900_vm1, %v7623_v34, 0.0  ;;  %v7647_v55 = vunpack.c.l.bf16 %v853_v50 }
  0x1c   : > { %10997 = vst [vmem:[#allocation17_spill] sm:$0xff] %v7621_v33  ;;  %10998 = vst [vmem:[#allocation18_spill] sm:$0xff] %v7623_v34  ;;  %v7649_v57 = vunpack.c.h.bf16 %v853_v50  ;;  %v7651_v59 = vunpack.c.l.bf16 %v855_v53  ;;  %v7656_v63 = vunpack.c.h.bf16 %v855_v53  ;;  %v7660_v2 = vunpack.c.l.bf16 %v857_v61  ;;  %v867_v50 = vld [vmem:[%s7577_s16 + $0x70] sm:$0xff]  }
  0x1d   : > { %v914_v39 = vadd.f32 %v913_v35, %v912_v36  ;;  %10999 = vst [vmem:[#allocation19_spill] sm:$0xff] %v7647_v55  ;;  %v933_v60 = vsel %vm10900_vm1, %v7647_v55, 0.0  ;;  %v7665_v10 = vunpack.c.h.bf16 %v857_v61  ;;  %v7669_v17 = vunpack.c.l.bf16 %v859_v8  ;;  %v863_v36 = vld [vmem:[%s7577_s16 + $0x60] sm:$0xff]  }
  0x1e   : > { %11000 = vst [vmem:[#allocation20_spill] sm:$0xff] %v7649_v57  ;;  %11001 = vst [vmem:[#allocation21_spill] sm:$0xff] %v7651_v59  ;;  %v935_v0 = vsel %vm10900_vm1, %v7649_v57, 0.0  ;;  %v937_v5 = vsel %vm10900_vm1, %v7651_v59, 0.0  ;;  %v939_v14 = vsel %vm10900_vm1, %v7656_v63, 0.0  ;;  %v941_v19 = vsel %vm10900_vm1, %v7660_v2, 0.0 }
  0x1f   : > { %v916_v47 = vadd.f32 %v915_v37, %v914_v39  ;;  %11002 = vst [vmem:[#allocation22_spill] sm:$0xff] %v7656_v63  ;;  %11003 = vst [vmem:[#allocation23_spill] sm:$0xff] %v7660_v2  ;;  %v7674_v22 = vunpack.c.h.bf16 %v859_v8  ;;  %v943_v23 = vsel %vm10900_vm1, %v7665_v10, 0.0  ;;  %v7678_v31 = vunpack.c.l.bf16 %v861_v20 }
  0x20   : > { %11004 = vst [vmem:[#allocation24_spill] sm:$0xff] %v7665_v10  ;;  %11005 = vst [vmem:[#allocation25_spill] sm:$0xff] %v7669_v17  ;;  %v945_v35 = vsel %vm10900_vm1, %v7669_v17, 0.0 }
  0x21   : > { %v918_v48 = vadd.f32 %v917_v38, %v916_v47  ;;  %11006 = vst [vmem:[#allocation26_spill] sm:$0xff] %v7674_v22  ;;  %11007 = vst [vmem:[#allocation27_spill] sm:$0xff] %v7678_v31  ;;  %v7683_v38 = vunpack.c.h.bf16 %v861_v20  ;;  %v947_v39 = vsel %vm10900_vm1, %v7674_v22, 0.0 }
  0x23   : > { %v920_v49 = vadd.f32 %v919_v40, %v918_v48  ;;  %11008 = vst [vmem:[#allocation28_spill] sm:$0xff] %v7683_v38 }
  0x25   : > { %v922_v51 = vadd.f32 %v921_v41, %v920_v49  ;;  %v7687_v41 = vunpack.c.l.bf16 %v863_v36 }
  0x27   : > { %v924_v52 = vadd.f32 %v923_v42, %v922_v51  ;;  %11009 = vst [vmem:[#allocation29_spill] sm:$0xff] %v7687_v41  ;;  %v949_v42 = vsel %vm10900_vm1, %v7678_v31, 0.0  ;;  %v953_v49 = vsel %vm10900_vm1, %v7687_v41, 0.0 }
  0x29   : > { %v926_v54 = vadd.f32 %v925_v43, %v924_v52  ;;  %v865_v43 = vld [vmem:[%s7577_s16 + $0x68] sm:$0xff]  }
  0x2a   : > { %v7696_v48 = vunpack.c.l.bf16 %v865_v43  ;;  %v7701_v52 = vunpack.c.h.bf16 %v865_v43 }
  0x2b   : > { %v928_v56 = vadd.f32 %v927_v44, %v926_v54 }
  0x2c   : > { %11011 = vst [vmem:[#allocation31_spill] sm:$0xff] %v7696_v48  ;;  %11012 = vst [vmem:[#allocation32_spill] sm:$0xff] %v7701_v52 }
  0x2d   : > { %v930_v58 = vadd.f32 %v929_v45, %v928_v56  ;;  %v7692_v45 = vunpack.c.h.bf16 %v863_v36  ;;  %v7705_v56 = vunpack.c.l.bf16 %v867_v50 }
  0x2f   : > { %v932_v62 = vadd.f32 %v931_v46, %v930_v58  ;;  %11010 = vst [vmem:[#allocation30_spill] sm:$0xff] %v7692_v45  ;;  %v951_v46 = vsel %vm10900_vm1, %v7683_v38, 0.0  ;;  %v955_v53 = vsel %vm10900_vm1, %v7692_v45, 0.0  ;;  %11013 = vst [vmem:[#allocation33_spill] sm:$0xff] %v7705_v56  ;;  %v957_v58 = vsel %vm10900_vm1, %v7696_v48, 0.0 }
  0x30   : > { %v961_v8 = vsel %vm10900_vm1, %v7705_v56, 0.0 }
  0x31   : > { %v934_v1 = vadd.f32 %v933_v60, %v932_v62  ;;  %v869_v60 = vld [vmem:[%s7577_s16 + $0x78] sm:$0xff]   ;;  %v7710_v62 = vunpack.c.h.bf16 %v867_v50 }
  0x33   : > { %v936_v9 = vadd.f32 %v935_v0, %v934_v1  ;;  %11014 = vst [vmem:[#allocation34_spill] sm:$0xff] %v7710_v62  ;;  %v959_v0 = vsel %vm10900_vm1, %v7701_v52, 0.0 }
  0x35   : > { %v938_v15 = vadd.f32 %v937_v5, %v936_v9  ;;  %v7714_v5 = vunpack.c.l.bf16 %v869_v60 }
  0x37   : > { %v940_v21 = vadd.f32 %v939_v14, %v938_v15  ;;  %11015 = vst [vmem:[#allocation35_spill] sm:$0xff] %v7714_v5  ;;  %v7718_v14 = vunpack.c.h.bf16 %v869_v60  ;;  %v963_v15 = vsel %vm10900_vm1, %v7710_v62, 0.0  ;;  %v965_v20 = vsel %vm10900_vm1, %v7714_v5, 0.0 }
  0x39   : > { %v942_v27 = vadd.f32 %v941_v19, %v940_v21  ;;  %11016 = vst [vmem:[#allocation36_spill] sm:$0xff] %v7718_v14 }
  0x3b   : > { %v944_v37 = vadd.f32 %v943_v23, %v942_v27  ;;  %v967_v23 = vsel %vm10900_vm1, %v7718_v14, 0.0 }
  0x3d   : > { %v946_v40 = vadd.f32 %v945_v35, %v944_v37 }
  0x3f   : > { %v948_v44 = vadd.f32 %v947_v39, %v946_v40 }
  0x41   : > { %v950_v47 = vadd.f32 %v949_v42, %v948_v44  ;;  %v418_v44 = vlaneseq }
  0x43   : > { %v952_v51 = vadd.f32 %v951_v46, %v950_v47  ;;  %v7727_v47 = vshrl.u32 %v418_v44, 7 }
  0x45   : > { %v954_v54 = vadd.f32 %v953_v49, %v952_v51  ;;  %v7730_v51 = vsub.s32 0, %v7727_v47 }
  0x47   : > { %v956_v61 = vadd.f32 %v955_v53, %v954_v54  ;;  %11017 = vst [vmem:[#allocation37_spill] sm:$0xff] %v7730_v51 }
  0x49   : > { %v958_v1 = vadd.f32 %v957_v58, %v956_v61 }
  0x4b   : > { %v960_v9 = vadd.f32 %v959_v0, %v958_v1 }
  0x4d   : > { %v962_v19 = vadd.f32 %v961_v8, %v960_v9 }
  0x4f   : > { %v964_v21 = vadd.f32 %v963_v15, %v962_v19 }
  0x51   : > { %v966_v27 = vadd.f32 %v965_v20, %v964_v21 }
  0x53   : > { %v968_v35 = vadd.f32 %v967_v23, %v966_v27 }
  0x55   : > { %v969_v36 = vrot.slane %v968_v35, 4 }
  0x57   : > { %v970_v37 = vadd.f32 %v969_v36, %v968_v35 }
  0x59   : > { %v971_v39 = vrot.slane %v970_v37, 2 }
  0x5b   : > { %v972_v40 = vadd.f32 %v971_v39, %v970_v37 }
  0x5d   : > { %v973_v42 = vrot.slane %v972_v40, 1 }
  0x5f   : > { %v974_v43 = vadd.f32 %v973_v42, %v972_v40 }
  0x61   : > { %6551 = vmatmul.mubr.msk.f32.vlgmr.msra.gmra.mrb[0].mxu0 %vm10900_vm1, %v974_v43 }
 0x134   : > { %v1044_v46 = vpop.f32.mrb[0].mxu0 }
 0x135   : > { %v6552_v49 = vpop.f32.mrb[1].mxu0  ;;  %v1049_v50 = vmul.f32 0.00390625, %v1044_v46 }
 0x137   : > { %v7733_v53 = vrot.slane %v1049_v50, %v7730_v51 }
 0x139   : > { %v7737_v54 = vsub.f32 %v7585_v11, %v7733_v53  ;;  %v7741_v58 = vsub.f32 %v7587_v12, %v7733_v53  ;;  %v7745_v60 = vsub.f32 %v7589_v13, %v7733_v53  ;;  %v7749_v61 = vsub.f32 %v7593_v16, %v7733_v53 }
 0x13a   : > { %v7757_v8 = vsub.f32 %v7596_v18, %v7733_v53  ;;  %v7763_v15 = vsub.f32 %v7605_v24, %v7733_v53  ;;  %v7771_v27 = vsub.f32 %v7607_v25, %v7733_v53  ;;  %v7778_v39 = vsub.f32 %v7609_v26, %v7733_v53 }
 0x13b   : > { %v1086_v0 = vmul.f32 %v7737_v54, %v7737_v54  ;;  %v1087_v1 = vmul.f32 %v7741_v58, %v7741_v58  ;;  %v1088_v9 = vmul.f32 %v7745_v60, %v7745_v60  ;;  %v1089_v19 = vmul.f32 %v7749_v61, %v7749_v61 }
 0x13c   : > { %v1090_v35 = vmul.f32 %v7757_v8, %v7757_v8  ;;  %v1091_v40 = vmul.f32 %v7763_v15, %v7763_v15  ;;  %v7785_v44 = vsub.f32 %v7613_v28, %v7733_v53  ;;  %v1092_v46 = vmul.f32 %v7771_v27, %v7771_v27 }
 0x13d   : > { %v1118_v20 = vsel %vm10900_vm1, %v1086_v0, 0.0  ;;  %v1119_v21 = vsel %vm10900_vm1, %v1087_v1, 0.0  ;;  %v1121_v36 = vsel %vm10900_vm1, %v1088_v9, 0.0  ;;  %v1123_v42 = vsel %vm10900_vm1, %v1089_v19, 0.0 }
 0x13e   : > { %v1120_v23 = vadd.f32 %v1119_v21, %v1118_v20  ;;  %v1125_v49 = vsel %vm10900_vm1, %v1090_v35, 0.0  ;;  %v7792_v0 = vsub.f32 %v7615_v29, %v7733_v53  ;;  %v1093_v1 = vmul.f32 %v7778_v39, %v7778_v39 }
 0x13f   : > { %v1127_v9 = vsel %vm10900_vm1, %v1091_v40, 0.0  ;;  %v7799_v20 = vsub.f32 %v7617_v30, %v7733_v53  ;;  %v1094_v21 = vmul.f32 %v7785_v44, %v7785_v44  ;;  %v8029_v26 = vadd.s32 232, %v7727_v47 }
 0x140   : > { %v1122_v37 = vadd.f32 %v1121_v36, %v1120_v23  ;;  %v1129_v23 = vsel %vm10900_vm1, %v1092_v46, 0.0  ;;  %v7806_v36 = vsub.f32 %v7619_v32, %v7733_v53  ;;  %v1131_v40 = vsel %vm10900_vm1, %v1093_v1, 0.0 }
 0x141   : > { %v1133_v46 = vsel %vm10900_vm1, %v1094_v21, 0.0  ;;  %11027 = vst [vmem:[#allocation45_spill] sm:$0xff] %v8029_v26  ;;  %v8035_v12 = vadd.s32 248, %v7727_v47  ;;  %v8038_v30 = vadd.s32 16, %v7727_v47  ;;  %v8041_v24 = vadd.s32 32, %v7727_v47 }
 0x142   : > { %v1124_v43 = vadd.f32 %v1123_v42, %v1122_v37  ;;  %v1095_v37 = vmul.f32 %v7792_v0, %v7792_v0  ;;  %v8044_v18 = vadd.s32 48, %v7727_v47  ;;  %v8047_v16 = vadd.s32 64, %v7727_v47 }
 0x143   : > { %11028 = vst [vmem:[#allocation46_spill] sm:$0xff] %v8035_v12  ;;  %v8050_v13 = vadd.s32 80, %v7727_v47  ;;  %v8053_v25 = vadd.s32 96, %v7727_v47  ;;  %v8101_v12 = vadd.s32 224, %v7727_v47 }
 0x144   : > { %v1126_v50 = vadd.f32 %v1125_v49, %v1124_v43  ;;  %v7813_v43 = vsub.f32 %v7621_v33, %v7733_v53  ;;  %v1096_v49 = vmul.f32 %v7799_v20, %v7799_v20  ;;  %v1135_v1 = vsel %vm10900_vm1, %v1095_v37, 0.0  ;;  %11029 = vst [vmem:[#allocation47_spill] sm:$0xff] %v8044_v18  ;;  %11030 = vst [vmem:[#allocation48_spill] sm:$0xff] %v8047_v16 }
 0x145   : > { %11031 = vst [vmem:[#allocation49_spill] sm:$0xff] %v8050_v13  ;;  %11032 = vst [vmem:[#allocation50_spill] sm:$0xff] %v8053_v25 }
 0x146   : > { %v1128_v19 = vadd.f32 %v1127_v9, %v1126_v50  ;;  %v7820_v9 = vsub.f32 %v7623_v34, %v7733_v53  ;;  %v1137_v21 = vsel %vm10900_vm1, %v1096_v49, 0.0  ;;  %11040 = vst [vmem:[#allocation58_spill] sm:$0xff] %v8101_v12 }
 0x148   : > { %v1130_v35 = vadd.f32 %v1129_v23, %v1128_v19  ;;  %v1097_v19 = vmul.f32 %v7806_v36, %v7806_v36  ;;  %v1099_v3 = vmul.f32 %v7820_v9, %v7820_v9 }
 0x14a   : > { %v1132_v42 = vadd.f32 %v1131_v40, %v1130_v35  ;;  %v7827_v35 = vsub.f32 %v7647_v55, %v7733_v53  ;;  %v1098_v40 = vmul.f32 %v7813_v43, %v7813_v43  ;;  %v1139_v37 = vsel %vm10900_vm1, %v1097_v19, 0.0 }
 0x14b   : > { %v1143_v19 = vsel %vm10900_vm1, %v1099_v3, 0.0 }
 0x14c   : > { %v1134_v50 = vadd.f32 %v1133_v46, %v1132_v42  ;;  %v7834_v46 = vsub.f32 %v7649_v57, %v7733_v53  ;;  %v1100_v6 = vmul.f32 %v7827_v35, %v7827_v35  ;;  %v1141_v49 = vsel %vm10900_vm1, %v1098_v40, 0.0 }
 0x14e   : > { %v1136_v23 = vadd.f32 %v1135_v1, %v1134_v50  ;;  %v7841_v1 = vsub.f32 %v7651_v59, %v7733_v53  ;;  %v1101_v34 = vmul.f32 %v7834_v46, %v7834_v46  ;;  %v1145_v40 = vsel %vm10900_vm1, %v1100_v6, 0.0 }
 0x150   : > { %v1138_v42 = vadd.f32 %v1137_v21, %v1136_v23  ;;  %v7848_v21 = vsub.f32 %v7656_v63, %v7733_v53  ;;  %v1102_v59 = vmul.f32 %v7841_v1, %v7841_v1  ;;  %v1147_v3 = vsel %vm10900_vm1, %v1101_v34, 0.0 }
 0x152   : > { %v1140_v50 = vadd.f32 %v1139_v37, %v1138_v42  ;;  %v7855_v37 = vsub.f32 %v7660_v2, %v7733_v53  ;;  %v1103_v63 = vmul.f32 %v7848_v21, %v7848_v21  ;;  %v1149_v6 = vsel %vm10900_vm1, %v1102_v59, 0.0 }
 0x154   : > { %v1142_v23 = vadd.f32 %v1141_v49, %v1140_v50  ;;  %v7862_v49 = vsub.f32 %v7665_v10, %v7733_v53  ;;  %v1104_v2 = vmul.f32 %v7855_v37, %v7855_v37  ;;  %v1151_v34 = vsel %vm10900_vm1, %v1103_v63, 0.0 }
 0x156   : > { %v1144_v42 = vadd.f32 %v1143_v19, %v1142_v23  ;;  %v7869_v19 = vsub.f32 %v7669_v17, %v7733_v53  ;;  %v1105_v10 = vmul.f32 %v7862_v49, %v7862_v49  ;;  %v1153_v59 = vsel %vm10900_vm1, %v1104_v2, 0.0 }
 0x158   : > { %v1146_v50 = vadd.f32 %v1145_v40, %v1144_v42  ;;  %v7876_v40 = vsub.f32 %v7674_v22, %v7733_v53  ;;  %v1106_v17 = vmul.f32 %v7869_v19, %v7869_v19  ;;  %v1155_v63 = vsel %vm10900_vm1, %v1105_v10, 0.0 }
 0x15a   : > { %v1148_v23 = vadd.f32 %v1147_v3, %v1146_v50  ;;  %v7883_v3 = vsub.f32 %v7678_v31, %v7733_v53  ;;  %v1107_v22 = vmul.f32 %v7876_v40, %v7876_v40  ;;  %v1157_v2 = vsel %vm10900_vm1, %v1106_v17, 0.0 }
 0x15c   : > { %v1150_v42 = vadd.f32 %v1149_v6, %v1148_v23  ;;  %v7890_v6 = vsub.f32 %v7683_v38, %v7733_v53  ;;  %v1108_v31 = vmul.f32 %v7883_v3, %v7883_v3  ;;  %v1159_v10 = vsel %vm10900_vm1, %v1107_v22, 0.0 }
 0x15e   : > { %v1152_v50 = vadd.f32 %v1151_v34, %v1150_v42  ;;  %v7897_v34 = vsub.f32 %v7687_v41, %v7733_v53  ;;  %v1109_v38 = vmul.f32 %v7890_v6, %v7890_v6  ;;  %v1161_v17 = vsel %vm10900_vm1, %v1108_v31, 0.0 }
 0x160   : > { %v1154_v23 = vadd.f32 %v1153_v59, %v1152_v50  ;;  %v7904_v59 = vsub.f32 %v7692_v45, %v7733_v53  ;;  %v1110_v41 = vmul.f32 %v7897_v34, %v7897_v34  ;;  %v1163_v22 = vsel %vm10900_vm1, %v1109_v38, 0.0 }
 0x162   : > { %v1156_v42 = vadd.f32 %v1155_v63, %v1154_v23  ;;  %v7911_v63 = vsub.f32 %v7696_v48, %v7733_v53  ;;  %v1111_v45 = vmul.f32 %v7904_v59, %v7904_v59  ;;  %v1165_v31 = vsel %vm10900_vm1, %v1110_v41, 0.0 }
 0x164   : > { %v1158_v50 = vadd.f32 %v1157_v2, %v1156_v42  ;;  %v7918_v2 = vsub.f32 %v7701_v52, %v7733_v53  ;;  %v1112_v48 = vmul.f32 %v7911_v63, %v7911_v63  ;;  %v1167_v38 = vsel %vm10900_vm1, %v1111_v45, 0.0 }
 0x166   : > { %v1160_v23 = vadd.f32 %v1159_v10, %v1158_v50  ;;  %v7925_v10 = vsub.f32 %v7705_v56, %v7733_v53  ;;  %v1113_v52 = vmul.f32 %v7918_v2, %v7918_v2  ;;  %v1169_v41 = vsel %vm10900_vm1, %v1112_v48, 0.0 }
 0x168   : > { %v1162_v42 = vadd.f32 %v1161_v17, %v1160_v23  ;;  %v7932_v17 = vsub.f32 %v7710_v62, %v7733_v53  ;;  %v1114_v56 = vmul.f32 %v7925_v10, %v7925_v10  ;;  %v1171_v45 = vsel %vm10900_vm1, %v1113_v52, 0.0 }
 0x16a   : > { %v1164_v50 = vadd.f32 %v1163_v22, %v1162_v42  ;;  %v7939_v22 = vsub.f32 %v7714_v5, %v7733_v53  ;;  %v1115_v62 = vmul.f32 %v7932_v17, %v7932_v17  ;;  %v1173_v5 = vsel %vm10900_vm1, %v1114_v56, 0.0 }
 0x16b   : > { %v11018_v56 = vmov 0.0  }
 0x16c   : > { %v1166_v23 = vadd.f32 %v1165_v31, %v1164_v50  ;;  %v7946_v31 = vsub.f32 %v7718_v14, %v7733_v53 }
 0x16e   : > { %v1168_v42 = vadd.f32 %v1167_v38, %v1166_v23  ;;  %v1116_v38 = vmul.f32 %v7939_v22, %v7939_v22  ;;  %v1117_v48 = vmul.f32 %v7946_v31, %v7946_v31 }
 0x170   : > { %v1170_v50 = vadd.f32 %v1169_v41, %v1168_v42  ;;  %v1175_v42 = vsel %vm10900_vm1, %v1115_v62, 0.0  ;;  %v1177_v53 = vsel %vm10900_vm1, %v1116_v38, 0.0  ;;  %v1179_v57 = vsel %vm10900_vm1, %v1117_v48, 0.0  ;;  %v7125_v38 = vld [vmem:[%s10814_s4 + $0x38] sm:$0xff]  }
 0x172   : > { %v1172_v23 = vadd.f32 %v1171_v45, %v1170_v50 }
 0x174   : > { %v1174_v33 = vadd.f32 %v1173_v5, %v1172_v23  ;;  %v7967_v5 = vadd.s32 8, %v7727_v47  ;;  %v7124_v23 = vld [vmem:[%s10814_s4 + $0x30] sm:$0xff]  }
 0x175   : > { %6564 = vmatprep.subr.bf16.mxu0 %v7124_v23 }
 0x176   : > { %v1176_v41 = vadd.f32 %v1175_v42, %v1174_v33  ;;  %v11019_v33 = vmov 0.0|0.0   ;;  %v7988_v42 = vadd.s32 88, %v7727_v47  ;;  %6565 = vmatpush3.bf16.msra.mxu0 %v7124_v23  ;;  %v8059_v23 = vadd.s32 128, %v7727_v47 }
 0x177   : > { %6566 = vmatprep.subr.bf16.mxu0 %v7125_v38 }
 0x178   : > { %v1178_v14 = vadd.f32 %v1177_v53, %v1176_v41  ;;  %v7991_v41 = vadd.s32 104, %v7727_v47  ;;  %v7994_v53 = vadd.s32 120, %v7727_v47  ;;  %11034 = vst [vmem:[#allocation52_spill] sm:$0xff] %v8059_v23 }
 0x17a   : > { %v1180_v55 = vadd.f32 %v1179_v57, %v1178_v14  ;;  %v7979_v14 = vadd.s32 72, %v7727_v47  ;;  %11020 = vst [vmem:[#allocation38_spill] sm:$0xff] %v7994_v53  ;;  %6567 = vmatpush3.bf16.msra.mxu0 %v7125_v38  ;;  %v8056_v38 = vadd.s32 112, %v7727_v47 }
 0x17c   : > { %v1181_v52 = vrot.slane %v1180_v55, 4  ;;  %11033 = vst [vmem:[#allocation51_spill] sm:$0xff] %v8056_v38 }
 0x17e   : > { %v1182_v50 = vadd.f32 %v1181_v52, %v1180_v55  ;;  %v7997_v52 = vadd.s32 136, %v7727_v47 }
 0x180   : > { %v1183_v45 = vrot.slane %v1182_v50, 2  ;;  %11021 = vst [vmem:[#allocation39_spill] sm:$0xff] %v7997_v52 }
 0x182   : > { %v1184_v29 = vadd.f32 %v1183_v45, %v1182_v50  ;;  %v8000_v50 = vadd.s32 152, %v7727_v47  ;;  %v8003_v45 = vadd.s32 168, %v7727_v47 }
 0x184   : > { %v1185_v28 = vrot.slane %v1184_v29, 1  ;;  %11022 = vst [vmem:[#allocation40_spill] sm:$0xff] %v8000_v50  ;;  %11023 = vst [vmem:[#allocation41_spill] sm:$0xff] %v8003_v45  ;;  %v8096_v50 = vld [vmem:[%s10812_s2] ss:$0 sm:$0xff] }
 0x186   : > { %v1186_v32 = vadd.f32 %v1185_v28, %v1184_v29  ;;  %v7970_v28 = vadd.s32 24, %v7727_v47  ;;  %v7973_v29 = vadd.s32 40, %v7727_v47 }
 0x188   : > { %6562 = vmatmul.mubr.msk.f32.vlgmr.msra.gmra.mrb[0].mxu1 %vm10900_vm1, %v1186_v32  ;;  %v7976_v32 = vadd.s32 56, %v7727_v47 }
 0x189   : > { %6936 = vmatpush3.bf16.msra.mxu1 %v7553_v4  ;;  %6704 = vmatprep.mubr.msk.f32.mxu1 %vm10897_vm0, %v11018_v56  ;;  %v8069_v56 = vadd.s32 176, %v7727_v47 }
 0x18a   : > { %6937 = vmatprep.subr.bf16.mxu1 %v11019_v33 }
 0x18b   : > { %11037 = vst [vmem:[#allocation55_spill] sm:$0xff] %v8069_v56 }
 0x18d   : > { %6939 = vmatpush3.bf16.msra.mxu1 %v7564_v7  ;;  %v8063_v7 = vadd.s32 144, %v7727_v47 }
 0x18e   : > { %6940 = vmatprep.subr.bf16.mxu1 %v11019_v33  ;;  %v8066_v33 = vadd.s32 160, %v7727_v47 }
 0x18f   : > { %11035 = vst [vmem:[#allocation53_spill] sm:$0xff] %v8063_v7 }
 0x190   : > { %11036 = vst [vmem:[#allocation54_spill] sm:$0xff] %v8066_v33 }
 0x25b   : > { %v1256_v57 = vpop.f32.mrb[0].mxu1 }
 0x25c   : > { %v1260_v62 = vmul.f32 0.00390625, %v1256_v57  ;;  %v6563_v55 = vpop.f32.mrb[1].mxu1  ;;  %v8006_v57 = vadd.s32 184, %v7727_v47 }
 0x25d   : > { %v8012_v55 = vadd.s32 216, %v7727_v47 }
 0x25e   : > { %v1261_v48 = vadd.f32 1e-05, %v1260_v62  ;;  %11024 = vst [vmem:[#allocation42_spill] sm:$0xff] %v8006_v57  ;;  %v8009_v62 = vadd.s32 200, %v7727_v47  ;;  %v8077_v57 = vadd.s32 208, %v7727_v47 }
 0x25f   : > { %11026 = vst [vmem:[#allocation44_spill] sm:$0xff] %v8012_v55 }
 0x260   : > { %7180 = vrsqrt.f32 %v1261_v48  ;;  %11025 = vst [vmem:[#allocation43_spill] sm:$0xff] %v8009_v62  ;;  %v7126_v48 = vld [vmem:[%s10814_s4 + $0x40] sm:$0xff]   ;;  %v8074_v62 = vadd.s32 192, %v7727_v47  ;;  %11039 = vst [vmem:[#allocation57_spill] sm:$0xff] %v8077_v57 }
 0x261   : > { %6568 = vmatprep.subr.bf16.mxu0 %v7126_v48 }
 0x262   : > { %6569 = vmatpush3.bf16.msra.mxu0 %v7126_v48  ;;  %11038 = vst [vmem:[#allocation56_spill] sm:$0xff] %v8074_v62  ;;  %v8117_v48 = vld [vmem:[%s10813_s3] ss:$0 sm:$0xff] }
 0x26a   : > { %v7181_v52 = vpop.eup %7180 }
 0x26b   : > { %v8088_v53 = vrot.slane %v7181_v52, %v7730_v51  ;;  %v8104_v52 = vadd.s32 240, %v7727_v47 }
 0x26d   : > { %11041 = vst [vmem:[#allocation59_spill] sm:$0xff] %v8104_v52  ;;  %v1267_v26 = vmul.f32 %v8088_v53, %v7737_v54  ;;  %v1268_v45 = vmul.f32 %v8088_v53, %v7741_v58  ;;  %v1269_v11 = vmul.f32 %v8088_v53, %v7745_v60  ;;  %v1270_v55 = vmul.f32 %v8088_v53, %v7749_v61 }
 0x26e   : > { %v1271_v4 = vmul.f32 %v8088_v53, %v7757_v8  ;;  %v1272_v54 = vmul.f32 %v8088_v53, %v7763_v15  ;;  %v1273_v58 = vmul.f32 %v8088_v53, %v7771_v27  ;;  %v1274_v60 = vmul.f32 %v8088_v53, %v7778_v39 }
 0x26f   : > { %v1305_v51 = vmul.f32 %v8096_v50, %v1267_v26  ;;  %v1306_v61 = vmul.f32 %v8096_v50, %v1268_v45  ;;  %v1307_v57 = vmul.f32 %v8096_v50, %v1269_v11  ;;  %v1308_v62 = vmul.f32 %v8096_v50, %v1270_v55 }
 0x270   : > { %v1309_v56 = vmul.f32 %v8096_v50, %v1271_v4  ;;  %v1310_v8 = vmul.f32 %v8096_v50, %v1272_v54  ;;  %v1311_v15 = vmul.f32 %v8096_v50, %v1273_v58  ;;  %v1312_v33 = vmul.f32 %v8096_v50, %v1274_v60 }
 0x271   : > { %v8136_v27 = vadd.f32 %v8117_v48, %v1305_v51  ;;  %v8139_v39 = vadd.f32 %v8117_v48, %v1306_v61  ;;  %v8142_v26 = vadd.f32 %v8117_v48, %v1307_v57  ;;  %v8145_v11 = vadd.f32 %v8117_v48, %v1308_v62 }
 0x272   : > { %v8148_v4 = vadd.f32 %v8117_v48, %v1309_v56  ;;  %v8151_v45 = vadd.f32 %v8117_v48, %v1310_v8  ;;  %v8154_v55 = vadd.f32 %v8117_v48, %v1311_v15  ;;  %v8157_v51 = vadd.f32 %v8117_v48, %v1312_v33 }
 0x273   : > { %v5984_v54 = vmul.f32 -1.442695, %v8136_v27  ;;  %v5985_v57 = vmul.f32 -1.442695, %v8139_v39  ;;  %v5986_v58 = vmul.f32 -1.442695, %v8142_v26  ;;  %v1275_v62 = vmul.f32 %v8088_v53, %v7785_v44 }
 0x274   : > { %v5987_v56 = vmul.f32 -1.442695, %v8145_v11  ;;  %v5988_v60 = vmul.f32 -1.442695, %v8148_v4  ;;  %v5989_v61 = vmul.f32 -1.442695, %v8151_v45  ;;  %v1276_v8 = vmul.f32 %v8088_v53, %v7792_v0 }
 0x275   : > { %7182 = vpow2.f32 %v5984_v54  ;;  %v5990_v33 = vmul.f32 -1.442695, %v8154_v55  ;;  %v5991_v15 = vmul.f32 -1.442695, %v8157_v51  ;;  %v1313_v7 = vmul.f32 %v8096_v50, %v1275_v62 }
 0x276   : > { %7184 = vpow2.f32 %v5985_v57  ;;  %v1314_v23 = vmul.f32 %v8096_v50, %v1276_v8  ;;  %v1277_v44 = vmul.f32 %v8088_v53, %v7799_v20  ;;  %v1278_v38 = vmul.f32 %v8088_v53, %v7806_v36 }
 0x277   : > { %7186 = vpow2.f32 %v5986_v58  ;;  %v8178_v25 = vadd.f32 %v8117_v48, %v1313_v7  ;;  %v1279_v0 = vmul.f32 %v8088_v53, %v7813_v43  ;;  %v1280_v54 = vmul.f32 %v8088_v53, %v7820_v9 }
 0x278   : > { %7188 = vpow2.f32 %v5987_v56  ;;  %v8185_v57 = vadd.f32 %v8117_v48, %v1314_v23  ;;  %v1315_v62 = vmul.f32 %v8096_v50, %v1277_v44  ;;  %v1316_v20 = vmul.f32 %v8096_v50, %v1278_v38 }
 0x279   : > { %7190 = vpow2.f32 %v5988_v60  ;;  %v5992_v36 = vmul.f32 -1.442695, %v8178_v25  ;;  %v1317_v7 = vmul.f32 %v8096_v50, %v1279_v0  ;;  %v1318_v58 = vmul.f32 %v8096_v50, %v1280_v54 }
 0x27a   : > { %7192 = vpow2.f32 %v5989_v61  ;;  %v5993_v43 = vmul.f32 -1.442695, %v8185_v57  ;;  %v8194_v9 = vadd.f32 %v8117_v48, %v1315_v62  ;;  %v8197_v23 = vadd.f32 %v8117_v48, %v1316_v20 }
 0x27b   : > { %7194 = vpow2.f32 %v5990_v33  ;;  %v8200_v56 = vadd.f32 %v8117_v48, %v1317_v7  ;;  %v1281_v38 = vmul.f32 %v8088_v53, %v7827_v35  ;;  %v1282_v44 = vmul.f32 %v8088_v53, %v7834_v46 }
 0x27c   : > { %7196 = vpow2.f32 %v5991_v15  ;;  %v5994_v61 = vmul.f32 -1.442695, %v8194_v9  ;;  %v5995_v8 = vmul.f32 -1.442695, %v8197_v23  ;;  %v8210_v0 = vadd.f32 %v8117_v48, %v1318_v58 }
 0x27d   : > { %7198 = vpow2.f32 %v5992_v36  ;;  %v5996_v33 = vmul.f32 -1.442695, %v8200_v56  ;;  %v1319_v54 = vmul.f32 %v8096_v50, %v1281_v38  ;;  %v1320_v35 = vmul.f32 %v8096_v50, %v1282_v44 }
 0x27e   : > { %7200 = vpow2.f32 %v5993_v43  ;;  %v1283_v15 = vmul.f32 %v8088_v53, %v7841_v1  ;;  %v1284_v62 = vmul.f32 %v8088_v53, %v7848_v21  ;;  %v1285_v36 = vmul.f32 %v8088_v53, %v7855_v37 }
 0x27f   : > { %v7183_v20 = vpop.eup %7182  ;;  %7202 = vpow2.f32 %v5994_v61  ;;  %v8220_v46 = vadd.f32 %v8117_v48, %v1319_v54  ;;  %v1286_v1 = vmul.f32 %v8088_v53, %v7862_v49  ;;  %v8229_v61 = vadd.f32 %v8117_v48, %v1320_v35 }
 0x280   : > { %v7185_v58 = vpop.eup %7184  ;;  %v1471_v43 = vadd.f32 1.0, %v7183_v20  ;;  %7204 = vpow2.f32 %v5995_v8  ;;  %v1321_v38 = vmul.f32 %v8096_v50, %v1283_v15  ;;  %v1322_v54 = vmul.f32 %v8096_v50, %v1284_v62 }
 0x281   : > { %v7187_v44 = vpop.eup %7186  ;;  %v1472_v21 = vadd.f32 1.0, %v7185_v58  ;;  %7206 = vpow2.f32 %v5996_v33  ;;  %v8233_v7 = vmul.f32 -1.442695, %v8210_v0  ;;  %v1323_v33 = vmul.f32 %v8096_v50, %v1285_v36  ;;  %v7127_v36 = vld [vmem:[%s10814_s4 + $0x48] sm:$0xff]  }
 0x282   : > { %v7189_v60 = vpop.eup %7188  ;;  %7208 = vrcp.f32 %v1471_v43  ;;  %v1473_v37 = vadd.f32 1.0, %v7187_v44  ;;  %v8236_v8 = vadd.f32 %v8117_v48, %v1321_v38  ;;  %v8239_v20 = vadd.f32 %v8117_v48, %v1322_v54  ;;  %6570 = vmatprep.subr.bf16.mxu0 %v7127_v36 }
 0x283   : > { %v7191_v15 = vpop.eup %7190  ;;  %7210 = vrcp.f32 %v1472_v21  ;;  %v1474_v49 = vadd.f32 1.0, %v7189_v60  ;;  %v8243_v58 = vmul.f32 -1.442695, %v8220_v46  ;;  %v1324_v43 = vmul.f32 %v8096_v50, %v1286_v1  ;;  %6571 = vmatpush3.bf16.msra.mxu0 %v7127_v36  ;;  %v7128_v36 = vld [vmem:[%s10814_s4 + $0x50] sm:$0xff]  }
 0x284   : > { %11042 = vst [vmem:[#allocation60_spill] sm:$0xff] %v8239_v20  ;;  %v7193_v35 = vpop.eup %7192  ;;  %7212 = vrcp.f32 %v1473_v37  ;;  %v1475_v62 = vadd.f32 1.0, %v7191_v15  ;;  %v8247_v52 = vmul.f32 -1.442695, %v8229_v61  ;;  %v8250_v60 = vmul.f32 -1.442695, %v8236_v8  ;;  %6572 = vmatprep.subr.bf16.mxu0 %v7128_v36 }
 0x285   : > { %v7195_v44 = vpop.eup %7194  ;;  %7214 = vrcp.f32 %v1474_v49  ;;  %v1476_v38 = vadd.f32 1.0, %v7193_v35  ;;  %v8256_v37 = vmul.f32 -1.442695, %v8239_v20  ;;  %v1287_v1 = vmul.f32 %v8088_v53, %v7869_v19 }
 0x286   : > { %v7197_v21 = vpop.eup %7196  ;;  %7216 = vrcp.f32 %v1475_v62  ;;  %v1477_v54 = vadd.f32 1.0, %v7195_v44  ;;  %v8261_v35 = vadd.f32 %v8117_v48, %v1323_v33  ;;  %v1288_v12 = vmul.f32 %v8088_v53, %v7876_v40 }
 0x287   : > { %v7199_v15 = vpop.eup %7198  ;;  %7218 = vrcp.f32 %v1476_v38  ;;  %v1478_v49 = vadd.f32 1.0, %v7197_v21  ;;  %v8266_v44 = vadd.f32 %v8117_v48, %v1324_v43  ;;  %v1325_v16 = vmul.f32 %v8096_v50, %v1287_v1  ;;  %6573 = vmatpush3.bf16.msra.mxu0 %v7128_v36 }
 0x288   : > { %11043 = vst [vmem:[#allocation61_spill] sm:$0xff] %v8261_v35  ;;  %v7201_v13 = vpop.eup %7200  ;;  %7220 = vrcp.f32 %v1477_v54  ;;  %v1479_v62 = vadd.f32 1.0, %v7199_v15  ;;  %v11045_v38 = vand.u32 15, %v7967_v5  ;;  %v11046_v21 = vmov 0 }
 0x289   : > { %11044 = vst [vmem:[#allocation62_spill] sm:$0xff] %v8266_v44  ;;  %v7203_v19 = vpop.eup %7202  ;;  %7222 = vrcp.f32 %v1478_v49  ;;  %v1480_v33 = vadd.f32 1.0, %v7201_v13  ;;  %v1326_v40 = vmul.f32 %v8096_v50, %v1288_v12  ;;  %v1289_v54 = vmul.f32 %v8088_v53, %v7883_v3 }
 0x28a   : > { %vm8271_vm3 = vcmp.eq.s32.totalorder %v11045_v38, 15  ;;  %v7205_v15 = vpop.eup %7204  ;;  %7224 = vrcp.f32 %v1479_v62  ;;  %v1481_v43 = vadd.f32 1.0, %v7203_v19  ;;  %v8279_v1 = vadd.f32 %v8117_v48, %v1325_v16 }
 0x28b   : > { %v11047_v21 = vsel %vm8271_vm3, 4294967295, %v11046_v21  ;;  %v1290_v5 = vmul.f32 %v8088_v53, %v7890_v6  ;;  %v7207_v49 = vpop.eup %7206  ;;  %v11050_v13 = vand.u32 15, %v7970_v28  ;;  %v11051_v12 = vmov 0 }
 0x28c   : > { %11048 = vst [vmem:[#allocation63_spill] sm:$0xff] %v11047_v21  ;;  %11049 = vst [vmem:[#allocation64_spill] sm:$0xff] %v8279_v1  ;;  %7226 = vrcp.f32 %v1480_v33  ;;  %v1482_v3 = vadd.f32 1.0, %v7205_v15  ;;  %v8293_v62 = vadd.f32 %v8117_v48, %v1326_v40  ;;  %v1327_v16 = vmul.f32 %v8096_v50, %v1289_v54  ;;  %v7209_v19 = vpop.eup %7208 }
 0x28d   : > { %vm8288_vm4 = vcmp.eq.s32.totalorder %v11050_v13, 15  ;;  %7228 = vrcp.f32 %v1481_v43  ;;  %v1483_v6 = vadd.f32 1.0, %v7207_v49  ;;  %v8297_v38 = vmul.f32 -1.442695, %v8261_v35  ;;  %v7211_v28 = vpop.eup %7210  ;;  %v7129_v49 = vld [vmem:[%s10814_s4 + $0x58] sm:$0xff]  }
 0x28e   : > { %v11052_v12 = vsel %vm8288_vm4, 4294967295, %v11051_v12  ;;  %11054 = vst [vmem:[#allocation66_spill] sm:$0xff] %v8293_v62  ;;  %v1328_v18 = vmul.f32 %v8096_v50, %v1290_v5  ;;  %v8301_v13 = vmul.f32 %v7209_v19, %v8136_v27  ;;  %v11055_v33 = vand.u32 15, %v7973_v29  ;;  %v7213_v43 = vpop.eup %7212  ;;  %6574 = vmatprep.subr.bf16.mxu0 %v7129_v49 }
 0x28f   : > { %11053 = vst [vmem:[#allocation65_spill] sm:$0xff] %v11052_v12  ;;  %v11056_v40 = vmov 0  ;;  %7230 = vrcp.f32 %v1482_v3  ;;  %v8310_v54 = vmul.f32 -1.442695, %v8266_v44  ;;  %v8313_v15 = vadd.f32 %v8117_v48, %v1327_v16  ;;  %v7215_v3 = vpop.eup %7214  ;;  %6575 = vmatpush3.bf16.msra.mxu0 %v7129_v49  ;;  %v8377_v49 = vld [vmem:[%s10814_s4] sm:$0xff]  }
 0x290   : > { %vm8305_vm5 = vcmp.eq.s32.totalorder %v11055_v33, 15  ;;  %v8316_v5 = vmul.f32 %v7211_v28, %v8139_v39  ;;  %7232 = vpow2.f32 %v8233_v7  ;;  %v8320_v29 = vmul.f32 -1.442695, %v8279_v1  ;;  %v7217_v7 = vpop.eup %7216  ;;  %11067 = vst [vmem:[#allocation70_spill] sm:$0xff] %v8377_v49  ;;  %6608 = vmatprep.subr.bf16.mxu0 %v8377_v49 }
 0x291   : > { %v11057_v40 = vsel %vm8305_vm5, 4294967295, %v11056_v40  ;;  %11059 = vst [vmem:[#allocation68_spill] sm:$0xff] %v8313_v15  ;;  %v8323_v27 = vadd.f32 %v8117_v48, %v1328_v18  ;;  %v8329_v16 = vmul.f32 %v7213_v43, %v8142_v26  ;;  %v1889_v36 = vrot.slane %v8301_v13, 1  ;;  %v7219_v43 = vpop.eup %7218 }
 0x292   : > { %11058 = vst [vmem:[#allocation67_spill] sm:$0xff] %v11057_v40  ;;  %7234 = vrcp.f32 %v1483_v6  ;;  %v8333_v39 = vmul.f32 -1.442695, %v8293_v62  ;;  %v2113_v19 = vpack.c.bf16 %v8316_v5, %v8301_v13  ;;  %v8338_v18 = vmul.f32 %v7215_v3, %v8145_v11 }
 0x293   : > { %11060 = vst [vmem:[#allocation69_spill] sm:$0xff] %v8323_v27  ;;  %v1890_v28 = vrot.slane %v8316_v5, 1  ;;  %v11061_v33 = vand.u32 15, %v7976_v32  ;;  %v11062_v26 = vmov 0  ;;  %v8349_v6 = vmul.f32 %v8088_v53, %v7897_v34  ;;  %v7221_v32 = vpop.eup %7220 }
 0x294   : > { %v1892_v62 = vrot.slane %v8329_v16, 1  ;;  %v8353_v1 = vmul.f32 %v7217_v7, %v8148_v4  ;;  %7236 = vpow2.f32 %v8243_v58  ;;  %v8357_v11 = vmul.f32 -1.442695, %v8313_v15  ;;  %2145 = vrot.lane.b32.xlu0 %v2113_v19, %s7467_s19 }
 0x295   : > { %vm8343_vm6 = vcmp.eq.s32.totalorder %v11061_v33, 15  ;;  %v1891_v34 = vsel %vm10898_vm2, %v1889_v36, %v1890_v28  ;;  %v8362_v3 = vmul.f32 %v7219_v43, %v8151_v45  ;;  %v1894_v33 = vrot.slane %v8338_v18, 1  ;;  %v7223_v36 = vpop.eup %7222 }
 0x296   : > { %v11063_v26 = vsel %vm8343_vm6, 4294967295, %v11062_v26  ;;  %v11064_v4 = vand.u32 15, %v7979_v14  ;;  %v11065_v7 = vmov 0  ;;  %v8372_v58 = vmul.f32 -1.442695, %v8323_v27  ;;  %v7225_v14 = vpop.eup %7224 }
 0x297   : > { %v1893_v45 = vsel %vm10898_vm2, %v1890_v28, %v1892_v62  ;;  %v1896_v19 = vrot.slane %v8353_v1, 1  ;;  %v8382_v43 = vmul.f32 %v7221_v32, %v8154_v55  ;;  %7238 = vpow2.f32 %v8247_v52  ;;  %v7227_v28 = vpop.eup %7226 }
 0x298   : > { %vm8367_vm7 = vcmp.eq.s32.totalorder %v11064_v4, 15  ;;  %v2114_v4 = vpack.c.bf16 %v8338_v18, %v8329_v16  ;;  %v2050_v27 = vsel %vm8271_vm3, 0.0, %v1893_v45  ;;  %v1895_v15 = vsel %vm10898_vm2, %v1892_v62, %v1894_v33  ;;  %v7229_v62 = vpop.eup %7228 }
 0x299   : > { %v11066_v7 = vsel %vm8367_vm7, 4294967295, %v11065_v7  ;;  %v1898_v44 = vrot.slane %v8362_v3, 1  ;;  %v2210_v35 = vpack.c.bf16 %v2050_v27, %v1891_v34  ;;  %v1897_v55 = vsel %vm10898_vm2, %v1894_v33, %v1896_v19 }
 0x29a   : > { %v1900_v32 = vrot.slane %v8382_v43, 1  ;;  %v8395_v52 = vmul.f32 %v7223_v36, %v8157_v51  ;;  %v11068_v20 = vand.u32 15, %v7988_v42  ;;  %v11069_v21 = vmov 0  ;;  %2147 = vrot.lane.b32.xlu0 %v2114_v4, %s7467_s19  ;;  %v7231_v42 = vpop.eup %7230 }
 0x29b   : > { %v2115_v45 = vpack.c.bf16 %v8362_v3, %v8353_v1  ;;  %v2052_v27 = vsel %vm8288_vm4, 0.0, %v1897_v55  ;;  %v8409_v34 = vmul.f32 %v7225_v14, %v8178_v25  ;;  %v8412_v51 = vmul.f32 %v7227_v28, %v8185_v57  ;;  %2242 = vrot.lane.b32.xlu1 %v2210_v35, %s7468_s24  ;;  %v7233_v49 = vpop.eup %7232 }
 0x29c   : > { %vm8399_vm8 = vcmp.eq.s32.totalorder %v11068_v20, 15  ;;  %v2211_v20 = vpack.c.bf16 %v2052_v27, %v1895_v15  ;;  %v1899_v33 = vsel %vm10898_vm2, %v1896_v19, %v1898_v44  ;;  %v1901_v36 = vsel %vm10898_vm2, %v1898_v44, %v1900_v32  ;;  %v7235_v35 = vpop.eup %7234 }
 0x29d   : > { %v11070_v21 = vsel %vm8399_vm8, 4294967295, %v11069_v21  ;;  %v1902_v4 = vrot.slane %v8395_v52, 1  ;;  %v2054_v55 = vsel %vm8305_vm5, 0.0, %v1901_v36  ;;  %v2116_v25 = vpack.c.bf16 %v8395_v52, %v8382_v43 }
 0x29e   : > { %v1904_v57 = vrot.slane %v8409_v34, 1  ;;  %v8424_v14 = vmul.f32 %v7229_v62, %v8194_v9  ;;  %v2117_v15 = vpack.c.bf16 %v8412_v51, %v8409_v34  ;;  %v1906_v19 = vrot.slane %v8412_v51, 1  ;;  %2149 = vrot.lane.b32.xlu0 %v2115_v45, %s7467_s19  ;;  %v7237_v62 = vpop.eup %7236 }
 0x29f   : > { %v1903_v44 = vsel %vm10898_vm2, %v1900_v32, %v1902_v4  ;;  %v8431_v28 = vmul.f32 %v7231_v42, %v8197_v23  ;;  %v1484_v40 = vadd.f32 1.0, %v7233_v49  ;;  %v8437_v9 = vmul.f32 %v7235_v35, %v8200_v56  ;;  %2244 = vrot.lane.b32.xlu1 %v2211_v20, %s7468_s24 }
 0x2a0   : > { %v1905_v27 = vsel %vm10898_vm2, %v1902_v4, %v1904_v57  ;;  %v1908_v36 = vrot.slane %v8424_v14, 1  ;;  %v2212_v12 = vpack.c.bf16 %v2054_v55, %v1899_v33  ;;  %v1907_v23 = vsel %vm10898_vm2, %v1904_v57, %v1906_v19 }
 0x2a1   : > { %v2056_v32 = vsel %vm8343_vm6, 0.0, %v1905_v27  ;;  %v1910_v42 = vrot.slane %v8431_v28, 1  ;;  %v2118_v4 = vpack.c.bf16 %v8431_v28, %v8424_v14  ;;  %7240 = vrcp.f32 %v1484_v40  ;;  %v7239_v49 = vpop.eup %7238 }
 0x2a2   : > { %v1909_v45 = vsel %vm10898_vm2, %v1906_v19, %v1908_v36  ;;  %v1912_v56 = vrot.slane %v8437_v9, 1  ;;  %v2213_v35 = vpack.c.bf16 %v2056_v32, %v1903_v44  ;;  %v1485_v33 = vadd.f32 1.0, %v7237_v62  ;;  %2246 = vrot.lane.b32.xlu0 %v2212_v12, %s7468_s24 }
 0x2a3   : > { %v2058_v20 = vsel %vm8367_vm7, 0.0, %v1909_v45  ;;  %7242 = vpow2.f32 %v8250_v60  ;;  %v1911_v55 = vsel %vm10898_vm2, %v1908_v36, %v1910_v42  ;;  %v1486_v19 = vadd.f32 1.0, %v7239_v49  ;;  %2151 = vrot.lane.b32.xlu1 %v2116_v25, %s7467_s19 }
 0x2a4   : > { %v1913_v57 = vsel %vm10898_vm2, %v1910_v42, %v1912_v56  ;;  %7244 = vpow2.f32 %v8256_v37  ;;  %v2214_v40 = vpack.c.bf16 %v2058_v20, %v1907_v23  ;;  %v1292_v44 = vmul.f32 %v8088_v53, %v7904_v59 }
 0x2a5   : > { %7246 = vrcp.f32 %v1485_v33  ;;  %v1329_v60 = vmul.f32 %v8096_v50, %v8349_v6  ;;  %v2060_v12 = vsel %vm8399_vm8, 0.0, %v1913_v57  ;;  %v1293_v27 = vmul.f32 %v8088_v53, %v7911_v63 }
 0x2a6   : > { %7248 = vrcp.f32 %v1486_v19  ;;  %v1294_v37 = vmul.f32 %v8088_v53, %v7918_v2  ;;  %v1330_v25 = vmul.f32 %v8096_v50, %v1292_v44  ;;  %v1295_v59 = vmul.f32 %v8088_v53, %v7925_v10  ;;  %2153 = vrot.lane.b32.xlu0 %v2117_v15, %s7467_s19 }
 0x2a7   : > { %7250 = vpow2.f32 %v8297_v38  ;;  %v8471_v36 = vadd.f32 %v8117_v48, %v1329_v60  ;;  %v1331_v6 = vmul.f32 %v8096_v50, %v1293_v27  ;;  %v1296_v2 = vmul.f32 %v8088_v53, %v7932_v17  ;;  %2248 = vrot.lane.b32.xlu1 %v2213_v35, %s7468_s24 }
 0x2a8   : > { %7252 = vpow2.f32 %v8310_v54  ;;  %v1332_v63 = vmul.f32 %v8096_v50, %v1294_v37  ;;  %v8484_v38 = vadd.f32 %v8117_v48, %v1330_v25  ;;  %v1333_v15 = vmul.f32 %v8096_v50, %v1295_v59 }
 0x2a9   : > { %7254 = vpow2.f32 %v8320_v29  ;;  %v6008_v10 = vmul.f32 -1.442695, %v8471_v36  ;;  %v11071_v54 = vand.u32 15, %v7991_v41  ;;  %v11072_v62 = vmov 0 }
 0x2aa   : > { %7256 = vpow2.f32 %v8333_v39  ;;  %v8496_v17 = vadd.f32 %v8117_v48, %v1331_v6  ;;  %v8499_v29 = vadd.f32 %v8117_v48, %v1332_v63  ;;  %v1334_v32 = vmul.f32 %v8096_v50, %v1296_v2  ;;  %2250 = vrot.lane.b32.xlu0 %v2214_v40, %s7468_s24 }
 0x2ab   : > { %vm8490_vm9 = vcmp.eq.s32.totalorder %v11071_v54, 15  ;;  %7258 = vpow2.f32 %v8357_v11  ;;  %v6009_v23 = vmul.f32 -1.442695, %v8484_v38  ;;  %v8505_v41 = vadd.f32 %v8117_v48, %v1333_v15  ;;  %v7241_v45 = vpop.eup %7240  ;;  %2155 = vrot.lane.b32.xlu1 %v2118_v4, %s7467_s19 }
 0x2ac   : > { %v11073_v62 = vsel %vm8490_vm9, 4294967295, %v11072_v62  ;;  %v1297_v42 = vmul.f32 %v8088_v53, %v7939_v22  ;;  %v2215_v39 = vpack.c.bf16 %v2060_v12, %v1911_v55  ;;  %7260 = vpow2.f32 %v8372_v58 }
 0x2ad   : > { %11074 = vst [vmem:[#allocation71_spill] sm:$0xff] %v11073_v62  ;;  %v6010_v49 = vmul.f32 -1.442695, %v8496_v17  ;;  %v8513_v35 = vadd.f32 %v8117_v48, %v1334_v32  ;;  %v7243_v11 = vpop.eup %7242  ;;  %v8517_v20 = vmul.f32 %v7241_v45, %v8210_v0  ;;  %7262 = vpow2.f32 %v6008_v10  ;;  %v11150_v62 = vld [vmem:[#allocation50_spill] sm:$0xff] }
 0x2ae   : > { %v6011_v22 = vmul.f32 -1.442695, %v8499_v29  ;;  %v1335_v33 = vmul.f32 %v8096_v50, %v1297_v42  ;;  %v11075_v55 = vand.u32 15, %v7727_v47  ;;  %v7245_v57 = vpop.eup %7244  ;;  %v1487_v19 = vadd.f32 1.0, %v7243_v11 }
 0x2af   : > { %7264 = vpow2.f32 %v6009_v23  ;;  %v6012_v40 = vmul.f32 -1.442695, %v8505_v41  ;;  %v1298_v0 = vmul.f32 %v8088_v53, %v7946_v31  ;;  %v7247_v4 = vpop.eup %7246  ;;  %v2119_v44 = vpack.c.bf16 %v8517_v20, %v8437_v9  ;;  %2252 = vrot.lane.b32.xlu1 %v2215_v39, %s7468_s24 }
 0x2b0   : > { %vm8523_vm11 = vcmp.eq.s32.totalorder %v11075_v55, 0  ;;  %v1914_v60 = vrot.slane %v8517_v20, 1  ;;  %v1488_v12 = vadd.f32 1.0, %v7245_v57  ;;  %7266 = vpow2.f32 %v6010_v49  ;;  %v7249_v47 = vpop.eup %7248  ;;  %v11081_v49 = vld [vmem:[#allocation38_spill] sm:$0xff] }
 0x2b1   : > { %v8534_v27 = vmul.f32 %v7247_v4, %v8220_v46  ;;  %7268 = vrcp.f32 %v1487_v19  ;;  %v8537_v37 = vadd.f32 %v8117_v48, %v1335_v33  ;;  %v1336_v25 = vmul.f32 %v8096_v50, %v1298_v0  ;;  %v7251_v59 = vpop.eup %7250  ;;  %2157 = vrot.lane.b32.xlu0 %v2119_v44, %s7467_s19 }
 0x2b2   : > { %v11078_v31 = vand.u32 15, %v8038_v30  ;;  %v1665_v6 = vrot.slane %v8316_v5, 7  ;;  %v8550_v46 = vmul.f32 %v7249_v47, %v8229_v61  ;;  %7270 = vrcp.f32 %v1488_v12  ;;  %v7253_v50 = vpop.eup %7252 }
 0x2b3   : > { %v8553_v63 = vmul.f32 -1.442695, %v8513_v35  ;;  %v1915_v30 = vsel %vm10898_vm2, %v1912_v56, %v1914_v60  ;;  %v1916_v2 = vrot.slane %v8534_v27, 1  ;;  %v1489_v10 = vadd.f32 1.0, %v7251_v59  ;;  %v7255_v5 = vpop.eup %7254  ;;  %v11086_v59 = vld [vmem:[#allocation39_spill] sm:$0xff] }
 0x2b4   : > { %vm8542_vm12 = vcmp.eq.s32.totalorder %v11078_v31, 0  ;;  %7272 = vpow2.f32 %v6011_v22  ;;  %v2120_v15 = vpack.c.bf16 %v8550_v46, %v8534_v27  ;;  %v1490_v54 = vadd.f32 1.0, %v7253_v50  ;;  %v7257_v32 = vpop.eup %7256 }
 0x2b5   : > { %7274 = vpow2.f32 %v6012_v40  ;;  %v1664_v61 = vrot.slane %v8301_v13, 7  ;;  %v1917_v23 = vsel %vm10898_vm2, %v1914_v60, %v1916_v2  ;;  %v1491_v42 = vadd.f32 1.0, %v7255_v5  ;;  %v7259_v56 = vpop.eup %7258 }
 0x2b6   : > { %7276 = vrcp.f32 %v1489_v10  ;;  %v8564_v45 = vadd.f32 %v8117_v48, %v1336_v25  ;;  %v2062_v39 = vsel %vm8490_vm9, 0.0, %v1917_v23  ;;  %2159 = vrot.lane.b32.xlu1 %v2120_v15, %s7467_s19  ;;  %v11082_v11 = vand.u32 15, %v11081_v49  ;;  %v7261_v55 = vpop.eup %7260  ;;  %v11094_v49 = vld [vmem:[#allocation40_spill] sm:$0xff] }
 0x2b7   : > { %v11083_v22 = vmov 0  ;;  %7278 = vrcp.f32 %v1490_v54  ;;  %v1492_v13 = vadd.f32 1.0, %v7257_v32  ;;  %v6014_v33 = vmul.f32 -1.442695, %v8537_v37  ;;  %v7263_v40 = vpop.eup %7262 }
 0x2b8   : > { %vm8571_vm13 = vcmp.eq.s32.totalorder %v11082_v11, 15  ;;  %v2216_v57 = vpack.c.bf16 %v2062_v39, %v1915_v30  ;;  %v1918_v48 = vrot.slane %v8550_v46, 1  ;;  %7280 = vrcp.f32 %v1491_v42 }
 0x2b9   : > { %v11084_v22 = vsel %vm8571_vm13, 4294967295, %v11083_v22  ;;  %v1493_v19 = vadd.f32 1.0, %v7259_v56  ;;  %7282 = vrcp.f32 %v1492_v13  ;;  %v1494_v0 = vadd.f32 1.0, %v7261_v55  ;;  %v7265_v60 = vpop.eup %7264 }
 0x2ba   : > { %11085 = vst [vmem:[#allocation38_spill] sm:$0xff] %v11084_v22  ;;  %v1666_v4 = vsel %vm10899_vm10, %v1664_v61, %v1665_v6  ;;  %v1759_v44 = vsel %vm10899_vm10, 0.0, %v1664_v61  ;;  %2254 = vrot.lane.b32.xlu0 %v2216_v57, %s7468_s24  ;;  %v1495_v12 = vadd.f32 1.0, %v7263_v40  ;;  %v1667_v25 = vrot.slane %v8329_v16, 7  ;;  %v7267_v31 = vpop.eup %7266 }
 0x2bb   : > { %7284 = vrcp.f32 %v1493_v19  ;;  %v1824_v47 = vsel %vm8523_vm11, 0.0, %v1759_v44  ;;  %v11087_v50 = vand.u32 15, %v11086_v59  ;;  %v11088_v30 = vmov 0  ;;  %v7269_v32 = vpop.eup %7268 }
 0x2bc   : > { %7286 = vrcp.f32 %v1494_v0  ;;  %v1496_v10 = vadd.f32 1.0, %v7265_v60  ;;  %v2081_v5 = vpack.c.bf16 %v1666_v4, %v1824_v47  ;;  %v1669_v15 = vrot.slane %v8338_v18, 7  ;;  %v7271_v56 = vpop.eup %7270  ;;  %v11100_v0 = vld [vmem:[#allocation41_spill] sm:$0xff] }
 0x2bd   : > { %vm8585_vm14 = vcmp.eq.s32.totalorder %v11087_v50, 15  ;;  %v11091_v54 = vand.u32 15, %v8041_v24  ;;  %v11092_v61 = vmov 0  ;;  %v1919_v16 = vsel %vm10898_vm2, %v1916_v2, %v1918_v48 }
 0x2be   : > { %v11089_v30 = vsel %vm8585_vm14, 4294967295, %v11088_v30  ;;  %7288 = vrcp.f32 %v1495_v12  ;;  %v1497_v23 = vadd.f32 1.0, %v7267_v31  ;;  %v1668_v42 = vsel %vm10899_vm10, %v1665_v6, %v1667_v25  ;;  %2097 = vst.msk [vmem:[#allocation2 + $0x8] sm:$0xff] %vm10900_vm1, %v2081_v5  ;;  %v7273_v13 = vpop.eup %7272  ;;  %v11099_v6 = vld [vmem:[#allocation60_spill] sm:$0xff] }
 0x2bf   : > { %11090 = vst [vmem:[#allocation39_spill] sm:$0xff] %v11089_v30  ;;  %vm8592_vm15 = vcmp.eq.s32.totalorder %v11091_v54, 0  ;;  %v8599_v39 = vmul.f32 %v7269_v32, %v8236_v8  ;;  %v11095_v11 = vand.u32 15, %v11094_v49  ;;  %v11096_v18 = vmov 0  ;;  %v7275_v19 = vpop.eup %7274 }
 0x2c0   : > { %v11093_v61 = vsel %vm8592_vm15, 4294967295, %v11092_v61  ;;  %7290 = vrcp.f32 %v1496_v10  ;;  %v1670_v24 = vsel %vm10899_vm10, %v1667_v25, %v1669_v15  ;;  %v1826_v2 = vsel %vm8542_vm12, 0.0, %v1668_v42  ;;  %v7277_v47 = vpop.eup %7276  ;;  %v11106_v10 = vld [vmem:[#allocation61_spill] sm:$0xff] }
 0x2c1   : > { %vm8603_vm0 = vcmp.eq.s32.totalorder %v11095_v11, 15  ;;  %v8612_v55 = vmul.f32 %v7271_v56, %v11099_v6  ;;  %7292 = vrcp.f32 %v1497_v23  ;;  %v2082_v8 = vpack.c.bf16 %v1670_v24, %v1826_v2  ;;  %v7279_v59 = vpop.eup %7278  ;;  %v11107_v23 = vld [vmem:[#allocation62_spill] sm:$0xff] }
 0x2c2   : > { %v11097_v18 = vsel %vm8603_vm0, 4294967295, %v11096_v18  ;;  %v1671_v57 = vrot.slane %v8353_v1, 7  ;;  %v1920_v40 = vrot.slane %v8599_v39, 1  ;;  %v11101_v4 = vand.u32 15, %v11100_v0  ;;  %v7281_v54 = vpop.eup %7280 }
 0x2c3   : > { %11098 = vst [vmem:[#allocation40_spill] sm:$0xff] %v11097_v18  ;;  %v11102_v44 = vmov 0  ;;  %v1498_v60 = vadd.f32 1.0, %v7273_v13  ;;  %7294 = vpow2.f32 %v8553_v63  ;;  %v6015_v12 = vmul.f32 -1.442695, %v8564_v45  ;;  %2098 = vst.msk [vmem:[#allocation2 + $0x10] sm:$0xff] %vm10900_vm1, %v2082_v8  ;;  %v7283_v11 = vpop.eup %7282 }
 0x2c4   : > { %vm8618_vm2 = vcmp.eq.s32.totalorder %v11101_v4, 15  ;;  %v2121_v25 = vpack.c.bf16 %v8612_v55, %v8599_v39  ;;  %v1922_v1 = vrot.slane %v8612_v55, 1  ;;  %v1499_v31 = vadd.f32 1.0, %v7275_v19  ;;  %v11114_v13 = vld [vmem:[#allocation64_spill] sm:$0xff]  ;;  %v11116_v4 = vld [vmem:[#allocation66_spill] sm:$0xff] }
 0x2c5   : > { %v11103_v44 = vsel %vm8618_vm2, 4294967295, %v11102_v44  ;;  %7296 = vpow2.f32 %v6014_v33  ;;  %vm11105_vm10 = vcmask 1046528   ;;  %v8630_v5 = vmul.f32 %v7277_v47, %v11106_v10  ;;  %v11108_v33 = vld [vmem:[#allocation42_spill] sm:$0xff]  ;;  %v7285_v8 = vpop.eup %7284  ;;  %v11117_v47 = vld [vmem:[#allocation43_spill] sm:$0xff] }
 0x2c6   : > { %11104 = vst [vmem:[#allocation60_spill] sm:$0xff] %v11103_v44  ;;  %v1921_v50 = vsel %vm11105_vm10, %v1918_v48, %v1920_v40  ;;  %7298 = vrcp.f32 %v1498_v60  ;;  %v10905_v63 = vrot.slane %v8362_v3, 7  ;;  %2161 = vrot.lane.b32.xlu0 %v2121_v25, %s7467_s19  ;;  %v8637_v42 = vmul.f32 %v7279_v59, %v11107_v23  ;;  %v11123_v59 = vld [vmem:[#allocation68_spill] sm:$0xff]  ;;  %v11143_v44 = vld [vmem:[#allocation49_spill] sm:$0xff] }
 0x2c7   : > { %v2064_v32 = vsel %vm8571_vm13, 0.0, %v1921_v50  ;;  %v11109_v56 = vand.u32 15, %v11108_v33  ;;  %v11110_v49 = vmov 0  ;;  %7300 = vrcp.f32 %v1499_v31  ;;  %v7287_v31 = vpop.eup %7286 }
 0x2c8   : > { %vm11113_vm10 = vcmask 1040384   ;;  %v2217_v24 = vpack.c.bf16 %v2064_v32, %v1919_v16  ;;  %v1924_v2 = vrot.slane %v8630_v5, 1  ;;  %v8650_v6 = vmul.f32 %v7281_v54, %v11114_v13  ;;  %v7289_v54 = vpop.eup %7288 }
 0x2c9   : > { %vm8641_vm1 = vcmp.eq.s32.totalorder %v11109_v56, 15  ;;  %v8646_v48 = vsel %vm11113_vm10, %v1669_v15, %v1671_v57  ;;  %7302 = vpow2.f32 %v6015_v12  ;;  %vm11115_vm9 = vcmask 1046528  }
 0x2ca   : > { %v11111_v49 = vsel %vm8641_vm1, 4294967295, %v11110_v49  ;;  %v1923_v19 = vsel %vm11115_vm9, %v1920_v40, %v1922_v1  ;;  %v2122_v0 = vpack.c.bf16 %v8637_v42, %v8630_v5  ;;  %v8656_v60 = vmul.f32 %v7283_v11, %v11116_v4  ;;  %2256 = vrot.lane.b32.xlu1 %v2217_v24, %s7468_s24  ;;  %vm11122_vm13 = vmmov %vm11115_vm9  ;;  %v7291_v56 = vpop.eup %7290  ;;  %v11128_v4 = vld [vmem:[#allocation44_spill] sm:$0xff] }
 0x2cb   : > { %11112 = vst [vmem:[#allocation41_spill] sm:$0xff] %v11111_v49  ;;  %v1926_v15 = vrot.slane %v8637_v42, 1  ;;  %v11118_v25 = vand.u32 15, %v11117_v47  ;;  %v11119_v16 = vmov 0  ;;  %v1925_v12 = vsel %vm11122_vm13, %v1922_v1, %v1924_v2  ;;  %vm11125_vm7 = vmmov %vm11122_vm13 }
 0x2cc   : > { %v1928_v40 = vrot.slane %v8650_v6, 1  ;;  %v8669_v50 = vmul.f32 %v7285_v8, %v11123_v59  ;;  %vm11124_vm9 = vcmask 1040384   ;;  %v2066_v32 = vsel %vm8585_vm14, 0.0, %v1925_v12  ;;  %vm11126_vm13 = vmmov %vm11125_vm7  ;;  %v11127_v8 = vld [vmem:[#allocation69_spill] sm:$0xff] }
 0x2cd   : > { %vm8661_vm10 = vcmp.eq.s32.totalorder %v11118_v25, 15  ;;  %v1674_v10 = vsel %vm11124_vm9, %v1671_v57, %v10905_v63  ;;  %v1927_v23 = vsel %vm11125_vm7, %v1924_v2, %v1926_v15  ;;  %v1930_v33 = vrot.slane %v8656_v60, 1  ;;  %v7293_v2 = vpop.eup %7292 }
 0x2ce   : > { %v11120_v16 = vsel %vm8661_vm10, 4294967295, %v11119_v16  ;;  %v1828_v1 = vsel %vm8592_vm15, 0.0, %v8646_v48  ;;  %v2218_v11 = vpack.c.bf16 %v2066_v32, %v1923_v19  ;;  %v1929_v24 = vsel %vm11126_vm13, %v1926_v15, %v1928_v40  ;;  %2163 = vrot.lane.b32.xlu1 %v2122_v0, %s7467_s19  ;;  %v11138_v0 = vld [vmem:[#allocation48_spill] sm:$0xff] }
 0x2cf   : > { %11121 = vst [vmem:[#allocation61_spill] sm:$0xff] %v11120_v16  ;;  %v1932_v13 = vrot.slane %v8669_v50, 1  ;;  %v8684_v57 = vmul.f32 %v7287_v31, %v11127_v8  ;;  %v11129_v47 = vand.u32 15, %v11128_v4  ;;  %v11130_v25 = vmov 0  ;;  %v11133_v31 = vld [vmem:[#allocation47_spill] sm:$0xff]  ;;  %v7295_v8 = vpop.eup %7294 }
 0x2d0   : > { %v2068_v12 = vsel %vm8603_vm0, 0.0, %v1929_v24  ;;  %v1931_v48 = vsel %vm11125_vm7, %v1928_v40, %v1930_v33  ;;  %v8696_v19 = vmul.f32 %v7289_v54, %v8471_v36  ;;  %v8699_v15 = vmul.f32 %v7291_v56, %v8484_v38  ;;  %2258 = vrot.lane.b32.xlu0 %v2218_v11, %s7468_s24  ;;  %v7297_v54 = vpop.eup %7296 }
 0x2d1   : > { %vm8688_vm9 = vcmp.eq.s32.totalorder %v11129_v47, 15  ;;  %v11134_v59 = vand.u32 15, %v11133_v31  ;;  %v11135_v32 = vmov 0  ;;  %v2123_v40 = vpack.c.bf16 %v8656_v60, %v8650_v6 }
 0x2d2   : > { %v11131_v25 = vsel %vm8688_vm9, 4294967295, %v11130_v25  ;;  %v2219_v24 = vpack.c.bf16 %v2068_v12, %v1927_v23  ;;  %v1933_v36 = vsel %vm11125_vm7, %v1930_v33, %v1932_v13  ;;  %v1934_v38 = vrot.slane %v8684_v57, 1  ;;  %v7299_v33 = vpop.eup %7298 }
 0x2d3   : > { %11132 = vst [vmem:[#allocation62_spill] sm:$0xff] %v11131_v25  ;;  %vm8703_vm13 = vcmp.eq.s32.totalorder %v11134_v59, 0  ;;  %v2070_v56 = vsel %vm8618_vm2, 0.0, %v1933_v36  ;;  %v2124_v4 = vpack.c.bf16 %v8684_v57, %v8669_v50  ;;  %v1936_v47 = vrot.slane %v8696_v19, 1 }
 0x2d4   : > { %v11136_v32 = vsel %vm8703_vm13, 4294967295, %v11135_v32  ;;  %v8719_v11 = vmul.f32 %v7293_v2, %v8496_v17  ;;  %v11139_v31 = vand.u32 15, %v11138_v0  ;;  %v11140_v23 = vmov 0  ;;  %v7301_v17 = vpop.eup %7300  ;;  %2165 = vrot.lane.b32.xlu0 %v2123_v40, %s7467_s19  ;;  %2260 = vrot.lane.b32.xlu1 %v2219_v24, %s7468_s24 }
 0x2d5   : > { %11137 = vst [vmem:[#allocation42_spill] sm:$0xff] %v11136_v32  ;;  %v2220_v12 = vpack.c.bf16 %v2070_v56, %v1931_v48  ;;  %v2125_v59 = vpack.c.bf16 %v8699_v15, %v8696_v19  ;;  %v1938_v36 = vrot.slane %v8699_v15, 1  ;;  %v1500_v63 = vadd.f32 1.0, %v7295_v8  ;;  %v7303_v56 = vpop.eup %7302 }
 0x2d6   : > { %vm8723_vm14 = vcmp.eq.s32.totalorder %v11139_v31, 0  ;;  %v11144_v30 = vand.u32 15, %v11143_v44  ;;  %v11145_v18 = vmov 0  ;;  %vm11148_vm2 = vcmask 1046528  }
 0x2d7   : > { %v11141_v23 = vsel %vm8723_vm14, 4294967295, %v11140_v23  ;;  %v1937_v2 = vsel %vm11148_vm2, %v1934_v38, %v1936_v47  ;;  %v1940_v0 = vrot.slane %v8719_v11, 1  ;;  %v8739_v31 = vmul.f32 %v7299_v33, %v8499_v29  ;;  %vm11149_vm0 = vmmov %vm11148_vm2 }
 0x2d8   : > { %11142 = vst [vmem:[#allocation64_spill] sm:$0xff] %v11141_v23  ;;  %vm8732_vm7 = vcmp.eq.s32.totalorder %v11144_v30, 0  ;;  %v1501_v48 = vadd.f32 1.0, %v7297_v54  ;;  %v1935_v44 = vsel %vm11149_vm0, %v1932_v13, %v1934_v38  ;;  %v2072_v30 = vsel %vm8641_vm1, 0.0, %v1937_v2  ;;  %vm11155_vm8 = vmmov %vm11149_vm0  ;;  %v11157_v38 = vld [vmem:[#allocation51_spill] sm:$0xff]  ;;  %2262 = vrot.lane.b32.xlu0 %v2220_v12, %s7468_s24  ;;  %2167 = vrot.lane.b32.xlu1 %v2124_v4, %s7467_s19 }
 0x2d9   : > { %v11146_v18 = vsel %vm8732_vm7, 4294967295, %v11145_v18  ;;  %7304 = vrcp.f32 %v1500_v63  ;;  %v8747_v8 = vmul.f32 %v7301_v17, %v8505_v41  ;;  %v11151_v22 = vand.u32 15, %v11150_v62  ;;  %vm11156_vm5 = vmmov %vm11149_vm0 }
 0x2da   : > { %11147 = vst [vmem:[#allocation66_spill] sm:$0xff] %v11146_v18  ;;  %v11152_v29 = vmov 0  ;;  %v1939_v54 = vsel %vm11155_vm8, %v1936_v47, %v1938_v36  ;;  %v1941_v40 = vsel %vm11156_vm5, %v1938_v36, %v1940_v0  ;;  %v2126_v13 = vpack.c.bf16 %v8739_v31, %v8719_v11  ;;  %vm11162_vm8 = vmmov %vm11156_vm5 }
 0x2db   : > { %vm8751_vm2 = vcmp.eq.s32.totalorder %v11151_v22, 0  ;;  %v1942_v24 = vrot.slane %v8739_v31, 1  ;;  %v11158_v63 = vand.u32 15, %v11157_v38  ;;  %v11159_v41 = vmov 0 }
 0x2dc   : > { %v11153_v29 = vsel %vm8751_vm2, 4294967295, %v11152_v29  ;;  %v2074_v62 = vsel %vm8661_vm10, 0.0, %v1941_v40  ;;  %v1944_v22 = vrot.slane %v8747_v8, 1  ;;  %7306 = vrcp.f32 %v1501_v48  ;;  %v11163_v48 = vld [vmem:[#allocation52_spill] sm:$0xff]  ;;  %2169 = vrot.lane.b32.xlu0 %v2125_v59, %s7467_s19 }
 0x2dd   : > { %11154 = vst [vmem:[#allocation43_spill] sm:$0xff] %v11153_v29  ;;  %vm8762_vm0 = vcmp.eq.s32.totalorder %v11158_v63, 0  ;;  %v1502_v47 = vadd.f32 1.0, %v7303_v56  ;;  %v2221_v33 = vpack.c.bf16 %v2072_v30, %v1935_v44  ;;  %v1943_v36 = vsel %vm11156_vm5, %v1940_v0, %v1942_v24 }
 0x2de   : > { %v11160_v41 = vsel %vm8762_vm0, 4294967295, %v11159_v41  ;;  %v2083_v17 = vpack.c.bf16 %v1674_v10, %v1828_v1  ;;  %v1675_v2 = vrot.slane %v8382_v43, 7  ;;  %v2222_v38 = vpack.c.bf16 %v2074_v62, %v1939_v54 }
 0x2df   : > { %11161 = vst [vmem:[#allocation68_spill] sm:$0xff] %v11160_v41  ;;  %v1945_v63 = vsel %vm11162_vm8, %v1942_v24, %v1944_v22  ;;  %7308 = vrcp.f32 %v1502_v47  ;;  %v1677_v40 = vrot.slane %v8395_v52, 7  ;;  %v11164_v56 = vand.u32 15, %v11163_v48  ;;  %v11172_v24 = vld [vmem:[#allocation53_spill] sm:$0xff]  ;;  %2264 = vrot.lane.b32.xlu1 %v2221_v33, %s7468_s24 }
 0x2e0   : > { %v11165_v44 = vmov 0  ;;  %v2076_v43 = vsel %vm8688_vm9, 0.0, %v1945_v63  ;;  %vm11168_vm5 = vcmask 261120   ;;  %v11169_v10 = vrot.slane %v8362_v3, 7  ;;  %v11177_v3 = vld [vmem:[#allocation45_spill] sm:$0xff]  ;;  %2266 = vrot.lane.b32.xlu0 %v2222_v38, %s7468_s24 }
 0x2e1   : > { %vm8779_vm10 = vcmp.eq.s32.totalorder %v11164_v56, 0  ;;  %2099 = vst.msk [vmem:[#allocation2 + $0x18] sm:$0xff] %vm11168_vm5, %v2083_v17  ;;  %vm11170_vm1 = vcmask 1040384   ;;  %v1679_v4 = vrot.slane %v8409_v34, 7  ;;  %v1681_v12 = vrot.slane %v8412_v51, 7 }
 0x2e2   : > { %v11166_v44 = vsel %vm8779_vm10, 4294967295, %v11165_v44  ;;  %v1676_v1 = vsel %vm11170_vm1, %v11169_v10, %v1675_v2  ;;  %v2223_v52 = vpack.c.bf16 %v2076_v43, %v1943_v36  ;;  %vm11171_vm8 = vmmov %vm11170_vm1  ;;  %v1683_v54 = vrot.slane %v8424_v14, 7  ;;  %v11185_v10 = vld [vmem:[#allocation54_spill] sm:$0xff] }
 0x2e3   : > { %11167 = vst [vmem:[#allocation69_spill] sm:$0xff] %v11166_v44  ;;  %v1678_v0 = vsel %vm11171_vm8, %v1675_v2, %v1677_v40  ;;  %v1830_v30 = vsel %vm8703_vm13, 0.0, %v1676_v1  ;;  %v11173_v62 = vand.u32 15, %v11172_v24  ;;  %v11174_v47 = vmov 0  ;;  %vm11182_vm5 = vmmov %vm11171_vm8  ;;  %2171 = vrot.lane.b32.xlu1 %v2126_v13, %s7467_s19 }
 0x2e4   : > { %v11178_v17 = vand.u32 15, %v11177_v3  ;;  %v11179_v34 = vmov 0  ;;  %v2084_v51 = vpack.c.bf16 %v1678_v0, %v1830_v30  ;;  %v1680_v36 = vsel %vm11182_vm5, %v1677_v40, %v1679_v4  ;;  %vm11183_vm8 = vmmov %vm11182_vm5  ;;  %v7305_v0 = vpop.eup %7304 }
 0x2e5   : > { %vm8797_vm9 = vcmp.eq.s32.totalorder %v11173_v62, 0  ;;  %v1682_v2 = vsel %vm11183_vm8, %v1679_v4, %v1681_v12  ;;  %v1685_v63 = vrot.slane %v8431_v28, 7  ;;  %v1832_v14 = vsel %vm8723_vm14, 0.0, %v1680_v36  ;;  %vm11184_vm13 = vmmov %vm11182_vm5  ;;  %v11190_v28 = vld [vmem:[#allocation46_spill] sm:$0xff] }
 0x2e6   : > { %v11175_v47 = vsel %vm8797_vm9, 4294967295, %v11174_v47  ;;  %vm8803_vm1 = vcmp.eq.s32.totalorder %v11178_v17, 15  ;;  %v1684_v48 = vsel %vm11184_vm13, %v1681_v12, %v1683_v54  ;;  %v1687_v56 = vrot.slane %v8437_v9, 7  ;;  %vm11196_vm14 = vmmov %vm11184_vm13  ;;  %v7307_v36 = vpop.eup %7306 }
 0x2e7   : > { %11176 = vst [vmem:[#allocation44_spill] sm:$0xff] %v11175_v47  ;;  %v11180_v34 = vsel %vm8803_vm1, 4294967295, %v11179_v34  ;;  %v1689_v43 = vrot.slane %v8517_v20, 7  ;;  %v11186_v1 = vand.u32 15, %v11185_v10  ;;  %v11187_v40 = vmov 0  ;;  %vm11197_vm15 = vmmov %vm11184_vm13  ;;  %v11205_v10 = vld [vmem:[#allocation56_spill] sm:$0xff]  ;;  %2268 = vrot.lane.b32.xlu1 %v2223_v52, %s7468_s24 }
 0x2e8   : > { %11181 = vst [vmem:[#allocation47_spill] sm:$0xff] %v11180_v34  ;;  %v11191_v4 = vand.u32 15, %v11190_v28  ;;  %v11192_v59 = vmov 0  ;;  %vm11195_vm6 = vcmask 261120   ;;  %v2085_v33 = vpack.c.bf16 %v1682_v2, %v1832_v14  ;;  %v11200_v14 = vld [vmem:[#allocation55_spill] sm:$0xff] }
 0x2e9   : > { %vm8819_vm5 = vcmp.eq.s32.totalorder %v11186_v1, 0  ;;  %2100 = vst.msk [vmem:[#allocation2 + $0x20] sm:$0xff] %vm11195_vm6, %v2084_v51  ;;  %v1686_v12 = vsel %vm11184_vm13, %v1683_v54, %v1685_v63  ;;  %v1834_v9 = vsel %vm8732_vm7, 0.0, %v1684_v48  ;;  %v1691_v20 = vrot.slane %v8534_v27, 7 }
 0x2ea   : > { %v11188_v40 = vsel %vm8819_vm5, 4294967295, %v11187_v40  ;;  %vm8825_vm8 = vcmp.eq.s32.totalorder %v11191_v4, 15  ;;  %v2086_v30 = vpack.c.bf16 %v1686_v12, %v1834_v9  ;;  %v1688_v24 = vsel %vm11196_vm14, %v1685_v63, %v1687_v56  ;;  %2101 = vst.msk [vmem:[#allocation2 + $0x28] sm:$0xff] %vm11195_vm6, %v2085_v33  ;;  %vm11198_vm14 = vmmov %vm11195_vm6  ;;  %v11211_v9 = vld [vmem:[#allocation57_spill] sm:$0xff] }
 0x2eb   : > { %11189 = vst [vmem:[#allocation48_spill] sm:$0xff] %v11188_v40  ;;  %v11193_v59 = vsel %vm8825_vm8, 4294967295, %v11192_v59  ;;  %v1690_v62 = vsel %vm11197_vm15, %v1687_v56, %v1689_v43  ;;  %v1693_v3 = vrot.slane %v8550_v46, 7  ;;  %v8838_v17 = vmul.f32 %v7305_v0, %v8513_v35  ;;  %vm11199_vm15 = vmmov %vm11184_vm13 }
 0x2ec   : > { %11194 = vst [vmem:[#allocation49_spill] sm:$0xff] %v11193_v59  ;;  %v1836_v54 = vsel %vm8751_vm2, 0.0, %v1688_v24  ;;  %v1692_v51 = vsel %vm11184_vm13, %v1689_v43, %v1691_v20  ;;  %v1695_v27 = vrot.slane %v8599_v39, 7  ;;  %2102 = vst.msk [vmem:[#allocation2 + $0x30] sm:$0xff] %vm11198_vm14, %v2086_v30  ;;  %v1697_v63 = vrot.slane %v8612_v55, 7  ;;  %v7309_v55 = vpop.eup %7308 }
 0x2ed   : > { %v2087_v46 = vpack.c.bf16 %v1690_v62, %v1836_v54  ;;  %v1694_v35 = vsel %vm11199_vm15, %v1691_v20, %v1693_v3  ;;  %v1838_v2 = vsel %vm8762_vm0, 0.0, %v1692_v51  ;;  %v11201_v48 = vand.u32 15, %v11200_v14  ;;  %vm11210_vm2 = vmmov %vm11199_vm15 }
 0x2ee   : > { %v11202_v56 = vmov 0  ;;  %v2127_v39 = vpack.c.bf16 %v8838_v17, %v8747_v8  ;;  %v8861_v13 = vmul.f32 %v7307_v36, %v8537_v37  ;;  %v1946_v38 = vrot.slane %v8838_v17, 1 }
 0x2ef   : > { %vm8854_vm6 = vcmp.eq.s32.totalorder %v11201_v48, 0  ;;  %v2088_v43 = vpack.c.bf16 %v1694_v35, %v1838_v2  ;;  %v11206_v1 = vand.u32 15, %v11205_v10  ;;  %v11207_v28 = vmov 0  ;;  %2103 = vst.msk [vmem:[#allocation2 + $0x38] sm:$0xff] %vm11198_vm14, %v2087_v46  ;;  %v11227_v48 = vld [vmem:[#allocation59_spill] sm:$0xff] }
 0x2f0   : > { %v11203_v56 = vsel %vm8854_vm6, 4294967295, %v11202_v56  ;;  %v1696_v4 = vsel %vm11199_vm15, %v1693_v3, %v1695_v27  ;;  %v1698_v33 = vsel %vm11210_vm2, %v1695_v27, %v1697_v63  ;;  %v1699_v12 = vrot.slane %v8630_v5, 7  ;;  %vm11217_vm2 = vmmov %vm11198_vm14  ;;  %2173 = vrot.lane.b32.xlu0 %v2127_v39, %s7467_s19 }
 0x2f1   : > { %11204 = vst [vmem:[#allocation50_spill] sm:$0xff] %v11203_v56  ;;  %vm8866_vm13 = vcmp.eq.s32.totalorder %v11206_v1, 0  ;;  %v1701_v37 = vrot.slane %v8637_v42, 7  ;;  %v11212_v20 = vand.u32 15, %v11211_v9  ;;  %v11213_v0 = vmov 0  ;;  %2104 = vst.msk [vmem:[#allocation2 + $0x40] sm:$0xff] %vm11217_vm2, %v2088_v43 }
 0x2f2   : > { %v11208_v28 = vsel %vm8866_vm13, 4294967295, %v11207_v28  ;;  %vm11216_vm7 = vcmask 1046528   ;;  %v1948_v24 = vrot.slane %v8861_v13, 1  ;;  %v8886_v62 = vmul.f32 %v7309_v55, %v8564_v45  ;;  %v11218_v42 = vld [vmem:[#allocation58_spill] sm:$0xff] }
 0x2f3   : > { %11209 = vst [vmem:[#allocation51_spill] sm:$0xff] %v11208_v28  ;;  %vm8877_vm0 = vcmp.eq.s32.totalorder %v11212_v20, 0  ;;  %v1947_v30 = vsel %vm11216_vm7, %v1944_v22, %v1946_v38  ;;  %v1840_v5 = vsel %vm8779_vm10, 0.0, %v1696_v4  ;;  %v11219_v3 = vand.u32 15, %v11218_v42  ;;  %vm11223_vm7 = vmmov %vm11199_vm15 }
 0x2f4   : > { %v11214_v0 = vsel %vm8877_vm0, 4294967295, %v11213_v0  ;;  %v11220_v54 = vmov 0  ;;  %v2089_v22 = vpack.c.bf16 %v1698_v33, %v1840_v5  ;;  %v1700_v51 = vsel %vm11223_vm7, %v1697_v63, %v1699_v12  ;;  %vm11224_vm15 = vmmov %vm11223_vm7 }
 0x2f5   : > { %11215 = vst [vmem:[#allocation52_spill] sm:$0xff] %v11214_v0  ;;  %vm8893_vm14 = vcmp.eq.s32.totalorder %v11219_v3, 0  ;;  %v1702_v45 = vsel %vm11224_vm15, %v1699_v12, %v1701_v37  ;;  %v1703_v27 = vrot.slane %v8650_v6, 7  ;;  %vm11225_vm2 = vcmask 1046528  }
 0x2f6   : > { %v11221_v54 = vsel %vm8893_vm14, 4294967295, %v11220_v54  ;;  %v1949_v36 = vsel %vm11225_vm2, %v1946_v38, %v1948_v24  ;;  %v2128_v46 = vpack.c.bf16 %v8886_v62, %v8861_v13  ;;  %v1950_v35 = vrot.slane %v8886_v62, 1 }
 0x2f7   : > { %11222 = vst [vmem:[#allocation53_spill] sm:$0xff] %v11221_v54  ;;  %v1842_v2 = vsel %vm8797_vm9, 0.0, %v1700_v51  ;;  %v2078_v52 = vsel %vm8803_vm1, 0.0, %v1949_v36  ;;  %vm11226_vm10 = vcmask 261120   ;;  %v1704_v14 = vsel %vm11223_vm7, %v1701_v37, %v1703_v27  ;;  %vm11232_vm9 = vmmov %vm11225_vm2 }
 0x2f8   : > { %2105 = vst.msk [vmem:[#allocation2 + $0x48] sm:$0xff] %vm11226_vm10, %v2089_v22  ;;  %v2090_v63 = vpack.c.bf16 %v1702_v45, %v1842_v2  ;;  %v1705_v6 = vrot.slane %v8656_v60, 7  ;;  %v11228_v39 = vand.u32 15, %v11227_v48  ;;  %v11229_v38 = vmov 0  ;;  %2175 = vrot.lane.b32.xlu1 %v2128_v46, %s7467_s19 }
 0x2f9   : > { %v2224_v43 = vpack.c.bf16 %v2078_v52, %v1947_v30  ;;  %v1951_v10 = vsel %vm11225_vm2, %v1948_v24, %v1950_v35  ;;  %v1984_v1 = vsel %vm11232_vm9, %v1950_v35, 0.0  ;;  %v1844_v55 = vsel %vm8819_vm5, 0.0, %v1704_v14  ;;  %vm11233_vm9 = vmmov %vm11223_vm7 }
 0x2fa   : > { %vm8915_vm15 = vcmp.eq.s32.totalorder %v11228_v39, 0  ;;  %v2080_v4 = vsel %vm8825_vm8, 0.0, %v1984_v1  ;;  %2106 = vst.msk [vmem:[#allocation2 + $0x50] sm:$0xff] %vm11226_vm10, %v2090_v63  ;;  %v1706_v60 = vsel %vm11223_vm7, %v1703_v27, %v1705_v6  ;;  %v1707_v33 = vrot.slane %v8669_v50, 7  ;;  %vm11234_vm2 = vmmov %vm11223_vm7 }
 0x2fb   : > { %v11230_v38 = vsel %vm8915_vm15, 4294967295, %v11229_v38  ;;  %v1709_v12 = vrot.slane %v8684_v57, 7  ;;  %2270 = vrot.lane.b32.xlu0 %v2224_v43, %s7468_s24  ;;  %v2225_v37 = vpack.c.bf16 %v2080_v4, %v1951_v10  ;;  %v2091_v9 = vpack.c.bf16 %v1706_v60, %v1844_v55  ;;  %vm11235_vm7 = vmmov %vm11234_vm2 }
 0x2fc   : > { %11231 = vst [vmem:[#allocation45_spill] sm:$0xff] %v11230_v38  ;;  %v1711_v20 = vrot.slane %v8696_v19, 7  ;;  %v1713_v30 = vrot.slane %v8699_v15, 7  ;;  %v1708_v24 = vsel %vm11233_vm9, %v1705_v6, %v1707_v33  ;;  %v1715_v42 = vrot.slane %v8719_v11, 7  ;;  %vm11236_vm5 = vmmov %vm11234_vm2 }
 0x2fd   : > { %v1710_v5 = vsel %vm11234_vm2, %v1707_v33, %v1709_v12  ;;  %v1717_v3 = vrot.slane %v8739_v31, 7  ;;  %2107 = vst.msk [vmem:[#allocation2 + $0x58] sm:$0xff] %vm11226_vm10, %v2091_v9  ;;  %v1846_v50 = vsel %vm8854_vm6, 0.0, %v1708_v24  ;;  %v1719_v19 = vrot.slane %v8747_v8, 7  ;;  %2272 = vrot.lane.b32.xlu1 %v2225_v37, %s7468_s24  ;;  %vm11237_vm9 = vmmov %vm11234_vm2  ;;  %v7131_v37 = vld [vmem:[%s10814_s4 + $0x8] sm:$0xff]  }
 0x2fe   : > { %v1712_v57 = vsel %vm11235_vm7, %v1709_v12, %v1711_v20  ;;  %v1714_v22 = vsel %vm11236_vm5, %v1711_v20, %v1713_v30  ;;  %v2092_v15 = vpack.c.bf16 %v1710_v5, %v1846_v50  ;;  %v1716_v11 = vsel %vm11237_vm9, %v1713_v30, %v1715_v42  ;;  %vm11238_vm10 = vmmov %vm11234_vm2  ;;  %v11245_v30 = vld [vmem:[#allocation70_spill] sm:$0xff]  ;;  %v7133_v50 = vld [vmem:[%s10814_s4 + $0x18] sm:$0xff]  }
 0x2ff   : > { %v1848_v51 = vsel %vm8866_vm13, 0.0, %v1712_v57  ;;  %v1718_v31 = vsel %vm11234_vm2, %v1715_v42, %v1717_v3  ;;  %v1850_v27 = vsel %vm8877_vm0, 0.0, %v1716_v11  ;;  %v1720_v36 = vsel %vm11238_vm10, %v1717_v3, %v1719_v19  ;;  %vm11242_vm10 = vmmov %vm11234_vm2  ;;  %v7132_v42 = vld [vmem:[%s10814_s4 + $0x10] sm:$0xff]  }
 0x300   : > { %v2093_v45 = vpack.c.bf16 %v1714_v22, %v1848_v51  ;;  %v1721_v46 = vrot.slane %v8838_v17, 7  ;;  %vm11239_vm5 = vcmask 261120   ;;  %v2094_v8 = vpack.c.bf16 %v1718_v31, %v1850_v27  ;;  %vm11243_vm0 = vmmov %vm11234_vm2  ;;  %v7134_v51 = vld [vmem:[%s10814_s4 + $0x20] sm:$0xff]  }
 0x301   : > { %2108 = vst.msk [vmem:[#allocation2 + $0x60] sm:$0xff] %vm11239_vm5, %v2092_v15  ;;  %v1852_v35 = vsel %vm8893_vm14, 0.0, %v1720_v36  ;;  %v1723_v2 = vrot.slane %v8861_v13, 7  ;;  %v1725_v52 = vrot.slane %v8886_v62, 7  ;;  %vm10942_vm7 = vcmask 785408   ;;  %vm11240_vm9 = vmmov %vm11239_vm5  ;;  %v7136_v36 = vld [vmem:[%s10814_s4 + $0x60] sm:$0xff]  }
 0x302   : > { %2109 = vst.msk [vmem:[#allocation2 + $0x68] sm:$0xff] %vm11240_vm9, %v2093_v45  ;;  %v1722_v63 = vsel %vm11234_vm2, %v1719_v19, %v1721_v46  ;;  %vm11241_vm13 = vmmov %vm11239_vm5  ;;  %v7469_v48 = vmov 0   ;;  %vm2193_vm2 = vcmask 523520   ;;  %v7135_v45 = vld [vmem:[%s10814_s4 + $0x28] sm:$0xff]  }
 0x303   : > { %2110 = vst.msk [vmem:[#allocation2 + $0x70] sm:$0xff] %vm11241_vm13, %v2094_v8  ;;  %v2095_v14 = vpack.c.bf16 %v1722_v63, %v1852_v35  ;;  %v1724_v17 = vsel %vm11242_vm10, %v1721_v46, %v1723_v2  ;;  %v1726_v6 = vsel %vm11243_vm0, %v1723_v2, %v1725_v52  ;;  %vm11244_vm9 = vmmov %vm11239_vm5  ;;  %vm2290_vm13 = vcmask 785920  }
 0x304   : > { %416 = vst.msk [vmem:[#allocation2] sm:$0xff] %vm10942_vm7, %v7469_v48  ;;  %417 = vst.msk [vmem:[#allocation2 + $0x88] sm:$0xff] %vm10942_vm7, %v7469_v48  ;;  %v1854_v13 = vsel %vm8915_vm15, 0.0, %v1724_v17 }
 0x305   : > { %2111 = vst.msk [vmem:[#allocation2 + $0x78] sm:$0xff] %vm11239_vm5, %v2095_v14  ;;  %v2096_v62 = vpack.c.bf16 %v1726_v6, %v1854_v13  ;;  %vm11246_vm0 = vmmov %vm11239_vm5 }
 0x306   : > { %v2146_v39 = vpop.permute.xlu0 %2145  ;;  %vm11247_vm10 = vmmov %vm11246_vm0 }
 0x307   : > { %2112 = vst.msk [vmem:[#allocation2 + $0x80] sm:$0xff] %vm11244_vm9, %v2096_v62  ;;  %vm11248_vm5 = vmmov %vm11246_vm0 }
 0x308   : > { %2194 = vst.msk [vmem:[#allocation2 + $0x8] sm:$0xff] %vm2193_vm2, %v2146_v39  ;;  %vm11249_vm9 = vmmov %vm11246_vm0 }
 0x30c   : > { %v2148_v43 = vpop.permute.xlu0 %2147 }
 0x30d   : > { %2195 = vst.msk [vmem:[#allocation2 + $0x10] sm:$0xff] %vm2193_vm2, %v2148_v43  ;;  %v2243_v10 = vpop.permute.xlu1 %2242 }
 0x30e   : > { %2291 = vst.msk [vmem:[#allocation2 + $0x8] sm:$0xff] %vm2290_vm13, %v2243_v10 }
 0x310   : > { %v2150_v1 = vpop.permute.xlu0 %2149 }
 0x311   : > { %2196 = vst.msk [vmem:[#allocation2 + $0x18] sm:$0xff] %vm2193_vm2, %v2150_v1  ;;  %v2245_v55 = vpop.permute.xlu1 %2244 }
 0x312   : > { %2292 = vst.msk [vmem:[#allocation2 + $0x10] sm:$0xff] %vm2290_vm13, %v2245_v55 }
 0x314   : > { %v2247_v4 = vpop.permute.xlu0 %2246 }
 0x315   : > { %2293 = vst.msk [vmem:[#allocation2 + $0x18] sm:$0xff] %vm2290_vm13, %v2247_v4  ;;  %v2152_v60 = vpop.permute.xlu1 %2151  ;;  %v8974_v33 = vld [vmem:[#allocation2 + $0x8] sm:$0xff] }
 0x316   : > { %2197 = vst.msk [vmem:[#allocation2 + $0x20] sm:$0xff] %vm2193_vm2, %v2152_v60  ;;  %6576 = vmatprep.mubr.msk.bf16.mxu0 %vm10942_vm7, %v8974_v33 }
 0x318   : > { %v2154_v12 = vpop.permute.xlu0 %2153 }
 0x319   : > { %2198 = vst.msk [vmem:[#allocation2 + $0x28] sm:$0xff] %vm2193_vm2, %v2154_v12  ;;  %v2249_v9 = vpop.permute.xlu1 %2248  ;;  %v8983_v20 = vld [vmem:[#allocation2 + $0x10] sm:$0xff] }
 0x31a   : > { %2294 = vst.msk [vmem:[#allocation2 + $0x20] sm:$0xff] %vm2290_vm13, %v2249_v9  ;;  %6577 = vmatmul.mubr.msk.bf16.vlgmr.msra.gmra.mrb[4].mxu0 %vm10942_vm7, %v8983_v20 }
 0x31b   : > { %6609 = vmatpush3.bf16.msra.mxu0 %v11245_v30 }
 0x31c   : > { %v2251_v24 = vpop.permute.xlu0 %2250  ;;  %v8989_v5 = vld [vmem:[#allocation2 + $0x18] sm:$0xff]  ;;  %6610 = vmatprep.subr.bf16.mxu0 %v7131_v37 }
 0x31d   : > { %2295 = vst.msk [vmem:[#allocation2 + $0x28] sm:$0xff] %vm2290_vm13, %v2251_v24  ;;  %v2156_v3 = vpop.permute.xlu1 %2155  ;;  %6580 = vmatprep.mubr.msk.bf16.mxu0 %vm10942_vm7, %v8989_v5 }
 0x31e   : > { %2199 = vst.msk [vmem:[#allocation2 + $0x30] sm:$0xff] %vm2193_vm2, %v2156_v3 }
 0x31f   : > { %6611 = vmatpush3.bf16.msra.mxu0 %v7131_v37 }
 0x320   : > { %6612 = vmatprep.subr.bf16.mxu0 %v7132_v42 }
 0x321   : > { %v2253_v22 = vpop.permute.xlu1 %2252  ;;  %v9001_v19 = vld [vmem:[#allocation2 + $0x20] sm:$0xff] }
 0x322   : > { %2296 = vst.msk [vmem:[#allocation2 + $0x30] sm:$0xff] %vm2290_vm13, %v2253_v22  ;;  %6581 = vmatmul.mubr.msk.bf16.gmra.mrb[8].mxu0 %vm10942_vm7, %v9001_v19  ;;  %v7137_v22 = vld [vmem:[%s10814_s4 + $0x68] sm:$0xff]  }
 0x323   : > { %v2158_v57 = vpop.permute.xlu0 %2157  ;;  %6613 = vmatpush3.bf16.msra.mxu0 %v7132_v42 }
 0x324   : > { %2200 = vst.msk [vmem:[#allocation2 + $0x38] sm:$0xff] %vm2193_vm2, %v2158_v57  ;;  %v9007_v15 = vld [vmem:[#allocation2 + $0x28] sm:$0xff]  ;;  %6614 = vmatprep.subr.bf16.mxu0 %v7133_v50 }
 0x325   : > { %6584 = vmatprep.mubr.msk.bf16.mxu0 %vm10942_vm7, %v9007_v15 }
 0x327   : > { %6615 = vmatpush3.bf16.msra.mxu0 %v7133_v50  ;;  %v2307_v50 = vld [vmem:[#allocation2] sm:$0xff] }
 0x328   : > { %v2160_v11 = vpop.permute.xlu1 %2159  ;;  %6616 = vmatprep.subr.bf16.mxu0 %v7134_v51 }
 0x329   : > { %2201 = vst.msk [vmem:[#allocation2 + $0x40] sm:$0xff] %vm2193_vm2, %v2160_v11  ;;  %v9019_v27 = vld [vmem:[#allocation2 + $0x30] sm:$0xff]  ;;  %v7139_v11 = vld [vmem:[%s10814_s4 + $0x78] sm:$0xff]  }
 0x32a   : > { %6585 = vmatmul.mubr.msk.bf16.gmra.mrb[12].mxu0 %vm10942_vm7, %v9019_v27 }
 0x32b   : > { %6617 = vmatpush3.bf16.msra.mxu0 %v7134_v51  ;;  %v7138_v51 = vld [vmem:[%s10814_s4 + $0x70] sm:$0xff]  }
 0x32c   : > { %v2255_v31 = vpop.permute.xlu0 %2254  ;;  %6618 = vmatprep.subr.bf16.mxu0 %v7135_v45 }
 0x32d   : > { %2297 = vst.msk [vmem:[#allocation2 + $0x38] sm:$0xff] %vm2290_vm13, %v2255_v31  ;;  %v7141_v31 = vld [vmem:[%s10814_s4 + $0x88] sm:$0xff]  }
 0x32f   : > { %6619 = vmatpush3.bf16.msra.mxu0 %v7135_v45 }
 0x330   : > { %6652 = vmatprep.subr.bf16.mxu0 %v7136_v36 }
 0x334   : > { %v9026_v8 = vld [vmem:[#allocation2 + $0x38] sm:$0xff] }
 0x335   : > { %6588 = vmatprep.mubr.msk.bf16.mxu0 %vm10942_vm7, %v9026_v8 }
 0x338   : > { %v2162_v46 = vpop.permute.xlu0 %2161 }
 0x339   : > { %2202 = vst.msk [vmem:[#allocation2 + $0x48] sm:$0xff] %vm2193_vm2, %v2162_v46 }
 0x33c   : > { %v2257_v35 = vpop.permute.xlu1 %2256 }
 0x33d   : > { %2298 = vst.msk [vmem:[#allocation2 + $0x40] sm:$0xff] %vm2290_vm13, %v2257_v35 }
 0x340   : > { %v2164_v52 = vpop.permute.xlu1 %2163 }
 0x341   : > { %2203 = vst.msk [vmem:[#allocation2 + $0x50] sm:$0xff] %vm2193_vm2, %v2164_v52 }
 0x342   : > { %v2259_v2 = vpop.permute.xlu0 %2258 }
 0x343   : > { %2299 = vst.msk [vmem:[#allocation2 + $0x48] sm:$0xff] %vm2290_vm13, %v2259_v2 }
 0x344   : > { %v9034_v17 = vld [vmem:[#allocation2 + $0x40] sm:$0xff] }
 0x345   : > { %6589 = vmatmul.mubr.msk.bf16.gmra.mrb[16].mxu0 %vm10942_vm7, %v9034_v17 }
 0x346   : > { %v2166_v63 = vpop.permute.xlu0 %2165  ;;  %v2261_v14 = vpop.permute.xlu1 %2260 }
 0x347   : > { %2204 = vst.msk [vmem:[#allocation2 + $0x58] sm:$0xff] %vm2193_vm2, %v2166_v63 }
 0x348   : > { %2300 = vst.msk [vmem:[#allocation2 + $0x50] sm:$0xff] %vm2290_vm13, %v2261_v14 }
 0x34a   : > { %v2263_v6 = vpop.permute.xlu0 %2262  ;;  %v2168_v48 = vpop.permute.xlu1 %2167  ;;  %v9040_v13 = vld [vmem:[#allocation2 + $0x48] sm:$0xff] }
 0x34b   : > { %2301 = vst.msk [vmem:[#allocation2 + $0x58] sm:$0xff] %vm2290_vm13, %v2263_v6  ;;  %6592 = vmatprep.mubr.msk.bf16.mxu0 %vm10942_vm7, %v9040_v13 }
 0x34c   : > { %2205 = vst.msk [vmem:[#allocation2 + $0x60] sm:$0xff] %vm2193_vm2, %v2168_v48 }
 0x34e   : > { %v2170_v62 = vpop.permute.xlu0 %2169 }
 0x34f   : > { %v9046_v43 = vld [vmem:[#allocation2 + $0x50] sm:$0xff]  ;;  %2206 = vst.msk [vmem:[#allocation2 + $0x68] sm:$0xff] %vm2193_vm2, %v2170_v62 }
 0x350   : > { %6593 = vmatmul.mubr.msk.bf16.gmra.mrb[20].mxu0 %vm10942_vm7, %v9046_v43 }
 0x351   : > { %v2265_v39 = vpop.permute.xlu1 %2264 }
 0x352   : > { %2302 = vst.msk [vmem:[#allocation2 + $0x60] sm:$0xff] %vm2290_vm13, %v2265_v39  ;;  %v2267_v10 = vpop.permute.xlu0 %2266  ;;  %v9052_v55 = vld [vmem:[#allocation2 + $0x58] sm:$0xff] }
 0x353   : > { %2303 = vst.msk [vmem:[#allocation2 + $0x68] sm:$0xff] %vm2290_vm13, %v2267_v10  ;;  %6596 = vmatprep.mubr.msk.bf16.mxu0 %vm10942_vm7, %v9052_v55 }
 0x355   : > { %v2172_v1 = vpop.permute.xlu1 %2171 }
 0x356   : > { %2207 = vst.msk [vmem:[#allocation2 + $0x70] sm:$0xff] %vm2193_vm2, %v2172_v1 }
 0x359   : > { %v2269_v60 = vpop.permute.xlu1 %2268  ;;  %v2319_v12 = vld [vmem:[#allocation2 + $0x60] sm:$0xff] }
 0x35a   : > { %2304 = vst.msk [vmem:[#allocation2 + $0x70] sm:$0xff] %vm2290_vm13, %v2269_v60  ;;  %6597 = vmatmul.mubr.msk.bf16.gmra.mrb[24].mxu0 %vm10942_vm7, %v2319_v12  ;;  %v2320_v9 = vld [vmem:[#allocation2 + $0x68] sm:$0xff] }
 0x35b   : > { %6600 = vmatprep.mubr.msk.bf16.mxu0 %vm10942_vm7, %v2320_v9 }
 0x361   : > { %v2321_v42 = vld [vmem:[#allocation2 + $0x70] sm:$0xff] }
 0x362   : > { %v2174_v4 = vpop.permute.xlu0 %2173  ;;  %6601 = vmatmul.mubr.msk.bf16.gmra.mrb[28].mxu0 %vm10942_vm7, %v2321_v42 }
 0x363   : > { %2208 = vst.msk [vmem:[#allocation2 + $0x78] sm:$0xff] %vm2193_vm2, %v2174_v4 }
 0x36a   : > { %v2176_v37 = vpop.permute.xlu1 %2175 }
 0x36b   : > { %2209 = vst.msk [vmem:[#allocation2 + $0x80] sm:$0xff] %vm2193_vm2, %v2176_v37 }
 0x36d   : > { %v2271_v30 = vpop.permute.xlu0 %2270 }
 0x36e   : > { %2305 = vst.msk [vmem:[#allocation2 + $0x78] sm:$0xff] %vm2290_vm13, %v2271_v30 }
 0x36f   : > { %v2273_v24 = vpop.permute.xlu1 %2272 }
 0x370   : > { %2306 = vst.msk [vmem:[#allocation2 + $0x80] sm:$0xff] %vm2290_vm13, %v2273_v24 }
 0x375   : > { %v2322_v3 = vld [vmem:[#allocation2 + $0x78] sm:$0xff] }
 0x376   : > { %6604 = vmatprep.mubr.msk.bf16.mxu0 %vm10942_vm7, %v2322_v3 }
 0x377   : > { %v2335_v57 = vld [vmem:[#allocation2 + $0x80] sm:$0xff] }
 0x378   : > { %6605 = vmatmul.mubr.msk.bf16.gmra.mrb[32].mxu0 %vm10942_vm7, %v2335_v57 }
 0x379   : > { %6620 = vmatprep.mubr.msk.bf16.mxu0 %vm10942_vm7, %v2307_v50 }
 0x380   : > { %6621 = vmatmul.mubr.msk.bf16.vlgmr.msra.gmra.mrb[4].mxu0 %vm10942_vm7, %v8974_v33  ;;  %v7140_v33 = vld [vmem:[%s10814_s4 + $0x80] sm:$0xff]  }
 0x381   : > { %6653 = vmatpush3.bf16.msra.mxu0 %v7136_v36  ;;  %6624 = vmatprep.mubr.msk.bf16.mxu0 %vm10942_vm7, %v8983_v20 }
 0x382   : > { %6654 = vmatprep.subr.bf16.mxu0 %v7137_v22 }
 0x385   : > { %6655 = vmatpush3.bf16.msra.mxu0 %v7137_v22 }
 0x386   : > { %6656 = vmatprep.subr.bf16.mxu0 %v7138_v51 }
 0x388   : > { %6625 = vmatmul.mubr.msk.bf16.gmra.mrb[8].mxu0 %vm10942_vm7, %v8989_v5 }
 0x389   : > { %6628 = vmatprep.mubr.msk.bf16.mxu0 %vm10942_vm7, %v9001_v19  ;;  %6657 = vmatpush3.bf16.msra.mxu0 %v7138_v51 }
 0x38a   : > { %6658 = vmatprep.subr.bf16.mxu0 %v7139_v11 }
 0x38d   : > { %6659 = vmatpush3.bf16.msra.mxu0 %v7139_v11 }
 0x38e   : > { %6660 = vmatprep.subr.bf16.mxu0 %v7140_v33 }
 0x390   : > { %6629 = vmatmul.mubr.msk.bf16.gmra.mrb[12].mxu0 %vm10942_vm7, %v9007_v15 }
 0x391   : > { %6632 = vmatprep.mubr.msk.bf16.mxu0 %vm10942_vm7, %v9019_v27  ;;  %6661 = vmatpush3.bf16.msra.mxu0 %v7140_v33 }
 0x392   : > { %6662 = vmatprep.subr.bf16.mxu0 %v7141_v31 }
 0x395   : > { %6663 = vmatpush3.bf16.msra.mxu0 %v7141_v31 }
 0x398   : > { %6633 = vmatmul.mubr.msk.bf16.gmra.mrb[16].mxu0 %vm10942_vm7, %v9026_v8 }
 0x399   : > { %6636 = vmatprep.mubr.msk.bf16.mxu0 %vm10942_vm7, %v9034_v17 }
 0x3a0   : > { %6637 = vmatmul.mubr.msk.bf16.gmra.mrb[20].mxu0 %vm10942_vm7, %v9040_v13 }
 0x3a1   : > { %6640 = vmatprep.mubr.msk.bf16.mxu0 %vm10942_vm7, %v9046_v43 }
 0x3a8   : > { %6641 = vmatmul.mubr.msk.bf16.gmra.mrb[24].mxu0 %vm10942_vm7, %v9052_v55 }
 0x3a9   : > { %6644 = vmatprep.mubr.msk.bf16.mxu0 %vm10942_vm7, %v2319_v12 }
 0x3b0   : > { %6645 = vmatmul.mubr.msk.bf16.gmra.mrb[28].mxu0 %vm10942_vm7, %v2320_v9 }
 0x3b1   : > { %6648 = vmatprep.mubr.msk.bf16.mxu0 %vm10942_vm7, %v2321_v42 }
 0x3b8   : > { %6649 = vmatmul.mubr.msk.bf16.gmra.mrb[32].mxu0 %vm10942_vm7, %v2322_v3 }
 0x3b9   : > { %6664 = vmatprep.mubr.msk.bf16.mxu0 %vm10942_vm7, %v8983_v20  ;;  %v2809_v20 = vld [vmem:[#allocation2 + $0x88] sm:$0xff] }
 0x3c0   : > { %6665 = vmatmul.mubr.msk.bf16.vlgmr.msra.gmra.mrb[4].mxu0 %vm10942_vm7, %v8989_v5  ;;  %v9139_v5 = vld [vmem:[%s10815_s5] ss:$0 sm:$0xff] }
 0x3c1   : > { %6668 = vmatprep.mubr.msk.bf16.mxu0 %vm10942_vm7, %v9001_v19 }
 0x3c8   : > { %6669 = vmatmul.mubr.msk.bf16.gmra.mrb[8].mxu0 %vm10942_vm7, %v9007_v15 }
 0x3c9   : > { %6672 = vmatprep.mubr.msk.bf16.mxu0 %vm10942_vm7, %v9019_v27 }
 0x3d0   : > { %6673 = vmatmul.mubr.msk.bf16.gmra.mrb[12].mxu0 %vm10942_vm7, %v9026_v8 }
 0x3d1   : > { %6676 = vmatprep.mubr.msk.bf16.mxu0 %vm10942_vm7, %v9034_v17 }
 0x3d8   : > { %6677 = vmatmul.mubr.msk.bf16.gmra.mrb[16].mxu0 %vm10942_vm7, %v9040_v13 }
 0x3d9   : > { %6680 = vmatprep.mubr.msk.bf16.mxu0 %vm10942_vm7, %v9046_v43 }
 0x3e0   : > { %6681 = vmatmul.mubr.msk.bf16.gmra.mrb[20].mxu0 %vm10942_vm7, %v9052_v55 }
 0x3e1   : > { %6684 = vmatprep.mubr.msk.bf16.mxu0 %vm10942_vm7, %v2319_v12 }
 0x3e8   : > { %6685 = vmatmul.mubr.msk.bf16.gmra.mrb[24].mxu0 %vm10942_vm7, %v2320_v9 }
 0x3e9   : > { %6688 = vmatprep.mubr.msk.bf16.mxu0 %vm10942_vm7, %v2321_v42 }
 0x3f0   : > { %6689 = vmatmul.mubr.msk.bf16.gmra.mrb[28].mxu0 %vm10942_vm7, %v2322_v3 }
 0x3f1   : > { %6692 = vmatprep.mubr.msk.bf16.mxu0 %vm10942_vm7, %v2335_v57 }
 0x3f8   : > { %6693 = vmatmul.mubr.msk.bf16.gmra.mrb[32].mxu0 %vm10942_vm7, %v2809_v20  ;;  %vm11300_vm7 = vmmov %vm11246_vm0 }
 0x493   : > { %v6666_v19 = vpop.f32.mrb[4].mxu0 }
 0x494   : > { %v2941_v15 = vpop.f32.mrb[5].mxu0  ;;  %v9145_v46 = vadd.f32 %v6666_v19, %v9139_v5 }
 0x495   : > { %v9142_v45 = vadd.f32 %v9139_v5, %v2941_v15  ;;  %v6667_v27 = vpop.f32.mrb[6].mxu0 }
 0x496   : > { %v2944_v36 = vpop.f32.mrb[7].mxu0  ;;  %v9153_v2 = vadd.f32 %v6667_v27, %v9139_v5  ;;  %v3144_v14 = vsel %vm11248_vm5, %v9145_v46, 0.0  ;;  %vm11251_vm5 = vmmov %vm11246_vm0 }
 0x497   : > { %v9148_v8 = vadd.f32 %v9139_v5, %v2944_v36  ;;  %v3141_v35 = vsel %vm11246_vm0, %v9142_v45, 0.0 }
 0x498   : > { %v3146_v13 = vsel %vm11249_vm9, %v9153_v2, 0.0  ;;  %vm11252_vm9 = vmmov %vm11246_vm0 }
 0x499   : > { %v3142_v52 = vsel %vm11247_vm10, %v9148_v8, 0.0  ;;  %vm11250_vm10 = vmmov %vm11246_vm0 }
 0x49a   : > { %v3143_v63 = vadd.f32 %v3142_v52, %v3141_v35 }
 0x49b   : > { %v6670_v17 = vpop.f32.mrb[8].mxu0 }
 0x49c   : > { %v3145_v6 = vadd.f32 %v3144_v14, %v3143_v63  ;;  %v2957_v48 = vpop.f32.mrb[9].mxu0  ;;  %v9165_v1 = vadd.f32 %v6670_v17, %v9139_v5 }
 0x49d   : > { %v9162_v62 = vadd.f32 %v9139_v5, %v2957_v48  ;;  %v6671_v39 = vpop.f32.mrb[10].mxu0 }
 0x49e   : > { %v3147_v43 = vadd.f32 %v3146_v13, %v3145_v6  ;;  %v2960_v10 = vpop.f32.mrb[11].mxu0  ;;  %v9173_v12 = vadd.f32 %v6671_v39, %v9139_v5  ;;  %v3152_v30 = vsel %vm11251_vm5, %v9165_v1, 0.0  ;;  %vm11254_vm5 = vmmov %vm11246_vm0 }
 0x49f   : > { %v3148_v55 = vsel %vm11246_vm0, %v9162_v62, 0.0  ;;  %v9170_v4 = vadd.f32 %v9139_v5, %v2960_v10 }
 0x4a0   : > { %v3149_v60 = vadd.f32 %v3148_v55, %v3147_v43  ;;  %v3154_v50 = vsel %vm11252_vm9, %v9173_v12, 0.0  ;;  %vm11255_vm9 = vmmov %vm11246_vm0 }
 0x4a1   : > { %v3150_v37 = vsel %vm11250_vm10, %v9170_v4, 0.0  ;;  %vm11253_vm10 = vmmov %vm11246_vm0 }
 0x4a2   : > { %v3151_v9 = vadd.f32 %v3150_v37, %v3149_v60 }
 0x4a3   : > { %v6674_v24 = vpop.f32.mrb[12].mxu0 }
 0x4a4   : > { %v3153_v42 = vadd.f32 %v3152_v30, %v3151_v9  ;;  %v2973_v3 = vpop.f32.mrb[13].mxu0  ;;  %v9185_v33 = vadd.f32 %v6674_v24, %v9139_v5 }
 0x4a5   : > { %v9182_v57 = vadd.f32 %v9139_v5, %v2973_v3  ;;  %v6675_v22 = vpop.f32.mrb[14].mxu0 }
 0x4a6   : > { %v3155_v51 = vadd.f32 %v3154_v50, %v3153_v42  ;;  %v2976_v11 = vpop.f32.mrb[15].mxu0  ;;  %v9193_v15 = vadd.f32 %v6675_v22, %v9139_v5  ;;  %v3160_v35 = vsel %vm11254_vm5, %v9185_v33, 0.0  ;;  %vm11257_vm5 = vmmov %vm11246_vm0 }
 0x4a7   : > { %v3156_v31 = vsel %vm11246_vm0, %v9182_v57, 0.0  ;;  %v9190_v20 = vadd.f32 %v9139_v5, %v2976_v11 }
 0x4a8   : > { %v3157_v19 = vadd.f32 %v3156_v31, %v3155_v51  ;;  %v3162_v17 = vsel %vm11255_vm9, %v9193_v15, 0.0  ;;  %vm11258_vm9 = vmmov %vm11246_vm0 }
 0x4a9   : > { %v3158_v27 = vsel %vm11253_vm10, %v9190_v20, 0.0  ;;  %vm11256_vm10 = vmmov %vm11246_vm0 }
 0x4aa   : > { %v3159_v36 = vadd.f32 %v3158_v27, %v3157_v19 }
 0x4ab   : > { %v6678_v52 = vpop.f32.mrb[16].mxu0 }
 0x4ac   : > { %v3161_v63 = vadd.f32 %v3160_v35, %v3159_v36  ;;  %v2989_v14 = vpop.f32.mrb[17].mxu0  ;;  %v9205_v43 = vadd.f32 %v6678_v52, %v9139_v5 }
 0x4ad   : > { %v9202_v6 = vadd.f32 %v9139_v5, %v2989_v14  ;;  %v6679_v48 = vpop.f32.mrb[18].mxu0 }
 0x4ae   : > { %v3163_v13 = vadd.f32 %v3162_v17, %v3161_v63  ;;  %v2992_v39 = vpop.f32.mrb[19].mxu0  ;;  %v9213_v37 = vadd.f32 %v6679_v48, %v9139_v5  ;;  %v3168_v24 = vsel %vm11257_vm5, %v9205_v43, 0.0  ;;  %vm11260_vm5 = vmmov %vm11246_vm0 }
 0x4af   : > { %v3164_v10 = vsel %vm11246_vm0, %v9202_v6, 0.0  ;;  %v9210_v55 = vadd.f32 %v9139_v5, %v2992_v39 }
 0x4b0   : > { %v3165_v60 = vadd.f32 %v3164_v10, %v3163_v13  ;;  %v3170_v22 = vsel %vm11258_vm9, %v9213_v37, 0.0  ;;  %vm11261_vm9 = vmmov %vm11246_vm0 }
 0x4b1   : > { %v3166_v9 = vsel %vm11256_vm10, %v9210_v55, 0.0  ;;  %vm11259_vm10 = vmmov %vm11246_vm0 }
 0x4b2   : > { %v3167_v30 = vadd.f32 %v3166_v9, %v3165_v60 }
 0x4b3   : > { %v6682_v42 = vpop.f32.mrb[20].mxu0 }
 0x4b4   : > { %v3169_v3 = vadd.f32 %v3168_v24, %v3167_v30  ;;  %v3005_v50 = vpop.f32.mrb[21].mxu0  ;;  %v9225_v27 = vadd.f32 %v6682_v42, %v9139_v5 }
 0x4b5   : > { %v9222_v51 = vadd.f32 %v9139_v5, %v3005_v50  ;;  %v6683_v11 = vpop.f32.mrb[22].mxu0 }
 0x4b6   : > { %v3171_v31 = vadd.f32 %v3170_v22, %v3169_v3  ;;  %v3008_v19 = vpop.f32.mrb[23].mxu0  ;;  %v9233_v63 = vadd.f32 %v6683_v11, %v9139_v5  ;;  %v3176_v48 = vsel %vm11260_vm5, %v9225_v27, 0.0  ;;  %vm11263_vm5 = vmmov %vm11246_vm0 }
 0x4b7   : > { %v3172_v36 = vsel %vm11246_vm0, %v9222_v51, 0.0  ;;  %v9230_v35 = vadd.f32 %v9139_v5, %v3008_v19 }
 0x4b8   : > { %v3173_v52 = vadd.f32 %v3172_v36, %v3171_v31  ;;  %v3178_v60 = vsel %vm11261_vm9, %v9233_v63, 0.0  ;;  %vm11264_vm9 = vmmov %vm11246_vm0 }
 0x4b9   : > { %v3174_v14 = vsel %vm11259_vm10, %v9230_v35, 0.0  ;;  %vm11262_vm10 = vmmov %vm11246_vm0 }
 0x4ba   : > { %v3175_v17 = vadd.f32 %v3174_v14, %v3173_v52 }
 0x4bb   : > { %v6686_v13 = vpop.f32.mrb[24].mxu0 }
 0x4bc   : > { %v3177_v39 = vadd.f32 %v3176_v48, %v3175_v17  ;;  %v3021_v10 = vpop.f32.mrb[25].mxu0  ;;  %v9245_v3 = vadd.f32 %v6686_v13, %v9139_v5 }
 0x4bd   : > { %v9242_v9 = vadd.f32 %v9139_v5, %v3021_v10  ;;  %v6687_v30 = vpop.f32.mrb[26].mxu0 }
 0x4be   : > { %v3179_v24 = vadd.f32 %v3178_v60, %v3177_v39  ;;  %v3024_v42 = vpop.f32.mrb[27].mxu0  ;;  %v9253_v31 = vadd.f32 %v6687_v30, %v9139_v5  ;;  %v3184_v52 = vsel %vm11263_vm5, %v9245_v3, 0.0  ;;  %vm11266_vm5 = vmmov %vm11246_vm0 }
 0x4bf   : > { %v3180_v50 = vsel %vm11246_vm0, %v9242_v9, 0.0  ;;  %v9250_v22 = vadd.f32 %v9139_v5, %v3024_v42 }
 0x4c0   : > { %v3181_v11 = vadd.f32 %v3180_v50, %v3179_v24  ;;  %v3186_v13 = vsel %vm11264_vm9, %v9253_v31, 0.0  ;;  %vm11267_vm9 = vmmov %vm11246_vm0 }
 0x4c1   : > { %v3182_v19 = vsel %vm11262_vm10, %v9250_v22, 0.0  ;;  %vm11265_vm10 = vmmov %vm11246_vm0 }
 0x4c2   : > { %v3183_v36 = vadd.f32 %v3182_v19, %v3181_v11 }
 0x4c3   : > { %v6690_v14 = vpop.f32.mrb[28].mxu0 }
 0x4c4   : > { %v3185_v17 = vadd.f32 %v3184_v52, %v3183_v36  ;;  %v3037_v48 = vpop.f32.mrb[29].mxu0  ;;  %v9265_v24 = vadd.f32 %v6690_v14, %v9139_v5 }
 0x4c5   : > { %v9262_v39 = vadd.f32 %v9139_v5, %v3037_v48  ;;  %v6691_v10 = vpop.f32.mrb[30].mxu0 }
 0x4c6   : > { %v3187_v60 = vadd.f32 %v3186_v13, %v3185_v17  ;;  %v3040_v30 = vpop.f32.mrb[31].mxu0  ;;  %v9273_v19 = vadd.f32 %v6691_v10, %v9139_v5  ;;  %v3192_v17 = vsel %vm11266_vm5, %v9265_v24, 0.0  ;;  %vm11269_vm5 = vmmov %vm11246_vm0 }
 0x4c7   : > { %v3188_v42 = vsel %vm11246_vm0, %v9262_v39, 0.0  ;;  %v9270_v50 = vadd.f32 %v9139_v5, %v3040_v30 }
 0x4c8   : > { %v3189_v11 = vadd.f32 %v3188_v42, %v3187_v60  ;;  %v3194_v54 = vsel %vm11267_vm9, %v9273_v19, 0.0  ;;  %vm11270_vm9 = vmmov %vm11246_vm0 }
 0x4c9   : > { %v3190_v36 = vsel %vm11265_vm10, %v9270_v50, 0.0  ;;  %vm11268_vm10 = vmmov %vm11246_vm0 }
 0x4ca   : > { %v3191_v52 = vadd.f32 %v3190_v36, %v3189_v11 }
 0x4cb   : > { %v6694_v48 = vpop.f32.mrb[32].mxu0 }
 0x4cc   : > { %v3193_v14 = vadd.f32 %v3192_v17, %v3191_v52  ;;  %v3053_v13 = vpop.f32.mrb[33].mxu0  ;;  %v9285_v38 = vadd.f32 %v6694_v48, %v9139_v5 }
 0x4cd   : > { %v9282_v30 = vadd.f32 %v9139_v5, %v3053_v13  ;;  %v6695_v60 = vpop.f32.mrb[34].mxu0 }
 0x4ce   : > { %v3195_v42 = vadd.f32 %v3194_v54, %v3193_v14  ;;  %v3056_v10 = vpop.f32.mrb[35].mxu0  ;;  %v9293_v17 = vadd.f32 %v6695_v60, %v9139_v5  ;;  %v3200_v54 = vsel %vm11269_vm5, %v9285_v38, 0.0  ;;  %v11272_v60 = vmov 0.0   ;;  %vm11277_vm5 = vmmov %vm11246_vm0 }
 0x4cf   : > { %v3196_v11 = vsel %vm11246_vm0, %v9282_v30, 0.0  ;;  %v9290_v36 = vadd.f32 %v9139_v5, %v3056_v10  ;;  %v11271_v5 = vld [vmem:[#allocation3_spill] sm:$0xff] }
 0x4d0   : > { %v3197_v52 = vadd.f32 %v3196_v11, %v3195_v42  ;;  %v3202_v48 = vsel %vm11270_vm9, %v9293_v17, 0.0  ;;  %vm11278_vm9 = vmmov %vm11246_vm0 }
 0x4d1   : > { %v3198_v13 = vsel %vm11268_vm10, %v9290_v36, 0.0  ;;  %vm11273_vm10 = vmmov 0  }
 0x4d2   : > { %v3199_v28 = vadd.f32 %v3198_v13, %v3197_v52  ;;  %v11274_v52 = vmov 0.0|0.0  }
 0x4d4   : > { %v3201_v14 = vadd.f32 %v3200_v54, %v3199_v28  ;;  %v11275_v28 = vld [vmem:[#allocation4_spill] sm:$0xff] }
 0x4d6   : > { %v3203_v0 = vadd.f32 %v3202_v48, %v3201_v14  ;;  %v11276_v48 = vld [vmem:[#allocation37_spill] sm:$0xff] }
 0x4d8   : > { %v3204_v40 = vrot.slane %v3203_v0, 4 }
 0x4da   : > { %v3205_v56 = vadd.f32 %v3204_v40, %v3203_v0 }
 0x4dc   : > { %v3206_v10 = vrot.slane %v3205_v56, 2 }
 0x4de   : > { %v3207_v44 = vadd.f32 %v3206_v10, %v3205_v56 }
 0x4e0   : > { %v3208_v42 = vrot.slane %v3207_v44, 1 }
 0x4e2   : > { %v3209_v11 = vadd.f32 %v3208_v42, %v3207_v44 }
 0x4e4   : > { %6705 = vmatmul.mubr.msk.f32.vlgmr.msra.gmra.mrb[2].mxu1 %vm11246_vm0, %v3209_v11 }
 0x4e5   : > { %6942 = vmatpush3.bf16.msra.mxu1 %v11271_v5  ;;  %6715 = vmatprep.mubr.msk.f32.mxu1 %vm11273_vm10, %v11272_v60  ;;  %vm11279_vm10 = vmmov %vm11246_vm0 }
 0x4e6   : > { %6943 = vmatprep.subr.bf16.mxu1 %v11274_v52 }
 0x4e9   : > { %6945 = vmatpush3.bf16.msra.mxu1 %v11275_v28 }
 0x5b7   : > { %v3279_v13 = vpop.f32.mrb[2].mxu1 }
 0x5b8   : > { %v6706_v54 = vpop.f32.mrb[3].mxu1  ;;  %v3283_v14 = vmul.f32 0.00390625, %v3279_v13 }
 0x5ba   : > { %v9308_v40 = vrot.slane %v3283_v14, %v11276_v48 }
 0x5bc   : > { %v9312_v44 = vsub.f32 %v9142_v45, %v9308_v40  ;;  %v9316_v56 = vsub.f32 %v9148_v8, %v9308_v40  ;;  %v9320_v0 = vsub.f32 %v9145_v46, %v9308_v40  ;;  %v9324_v10 = vsub.f32 %v9153_v2, %v9308_v40 }
 0x5bd   : > { %v9332_v45 = vsub.f32 %v9162_v62, %v9308_v40  ;;  %v9338_v46 = vsub.f32 %v9170_v4, %v9308_v40  ;;  %v9346_v28 = vsub.f32 %v9165_v1, %v9308_v40  ;;  %v9353_v4 = vsub.f32 %v9173_v12, %v9308_v40 }
 0x5be   : > { %v3320_v42 = vmul.f32 %v9312_v44, %v9312_v44  ;;  %v3321_v11 = vmul.f32 %v9316_v56, %v9316_v56  ;;  %v3322_v8 = vmul.f32 %v9320_v0, %v9320_v0  ;;  %v3323_v2 = vmul.f32 %v9324_v10, %v9324_v10 }
 0x5bf   : > { %v3324_v62 = vmul.f32 %v9332_v45, %v9332_v45  ;;  %v3325_v14 = vmul.f32 %v9338_v46, %v9338_v46  ;;  %v9360_v1 = vsub.f32 %v9182_v57, %v9308_v40  ;;  %v9367_v12 = vsub.f32 %v9190_v20, %v9308_v40 }
 0x5c0   : > { %v3352_v5 = vsel %vm11277_vm5, %v3320_v42, 0.0  ;;  %v3353_v60 = vsel %vm11278_vm9, %v3321_v11, 0.0  ;;  %v3355_v13 = vsel %vm11246_vm0, %v3322_v8, 0.0  ;;  %v3357_v42 = vsel %vm11279_vm10, %v3323_v2, 0.0  ;;  %vm11280_vm5 = vmmov %vm11246_vm0 }
 0x5c1   : > { %v3354_v52 = vadd.f32 %v3353_v60, %v3352_v5  ;;  %v3326_v5 = vmul.f32 %v9346_v28, %v9346_v28  ;;  %v3359_v8 = vsel %vm11280_vm5, %v3324_v62, 0.0  ;;  %vm11281_vm9 = vmmov %vm11246_vm0  ;;  %v9374_v57 = vsub.f32 %v9185_v33, %v9308_v40 }
 0x5c2   : > { %v3361_v2 = vsel %vm11281_vm9, %v3325_v14, 0.0  ;;  %v9381_v20 = vsub.f32 %v9193_v15, %v9308_v40  ;;  %vm11282_vm10 = vmmov %vm11246_vm0  ;;  %v9388_v33 = vsub.f32 %v9202_v6, %v9308_v40  ;;  %v9395_v15 = vsub.f32 %v9210_v55, %v9308_v40 }
 0x5c3   : > { %v3356_v54 = vadd.f32 %v3355_v13, %v3354_v52  ;;  %v3327_v52 = vmul.f32 %v9353_v4, %v9353_v4  ;;  %v3363_v62 = vsel %vm11246_vm0, %v3326_v5, 0.0  ;;  %vm11283_vm5 = vmmov %vm11246_vm0  ;;  %v9402_v6 = vsub.f32 %v9205_v43, %v9308_v40 }
 0x5c4   : > { %vm11284_vm9 = vmmov %vm11246_vm0  ;;  %v9409_v55 = vsub.f32 %v9213_v37, %v9308_v40  ;;  %v9416_v43 = vsub.f32 %v9222_v51, %v9308_v40  ;;  %v9423_v37 = vsub.f32 %v9230_v35, %v9308_v40  ;;  %v9430_v51 = vsub.f32 %v9225_v27, %v9308_v40 }
 0x5c5   : > { %v3358_v11 = vadd.f32 %v3357_v42, %v3356_v54  ;;  %v3328_v54 = vmul.f32 %v9360_v1, %v9360_v1  ;;  %v3365_v14 = vsel %vm11282_vm10, %v3327_v52, 0.0  ;;  %vm11285_vm10 = vmmov %vm11246_vm0  ;;  %v9437_v35 = vsub.f32 %v9233_v63, %v9308_v40 }
 0x5c6   : > { %v9444_v27 = vsub.f32 %v9242_v9, %v9308_v40  ;;  %v9451_v63 = vsub.f32 %v9250_v22, %v9308_v40  ;;  %v9458_v9 = vsub.f32 %v9245_v3, %v9308_v40  ;;  %v9465_v22 = vsub.f32 %v9253_v31, %v9308_v40 }
 0x5c7   : > { %v3360_v60 = vadd.f32 %v3359_v8, %v3358_v11  ;;  %v3329_v11 = vmul.f32 %v9367_v12, %v9367_v12  ;;  %v3367_v5 = vsel %vm11283_vm5, %v3328_v54, 0.0  ;;  %vm11286_vm5 = vmmov %vm11246_vm0  ;;  %v9472_v3 = vsub.f32 %v9262_v39, %v9308_v40 }
 0x5c8   : > { %v9479_v31 = vsub.f32 %v9270_v50, %v9308_v40  ;;  %v9486_v39 = vsub.f32 %v9265_v24, %v9308_v40  ;;  %v3315_v50 = vsub.f32 %v9273_v19, %v9308_v40  ;;  %v3319_v29 = vsub.f32 %v9293_v17, %v9308_v40 }
 0x5c9   : > { %v3362_v13 = vadd.f32 %v3361_v2, %v3360_v60  ;;  %v3330_v60 = vmul.f32 %v9374_v57, %v9374_v57  ;;  %v3369_v52 = vsel %vm11284_vm9, %v3329_v11, 0.0  ;;  %vm11287_vm9 = vmmov %vm11246_vm0 }
 0x5ca   : > { %v3346_v24 = vmul.f32 %v9486_v39, %v9486_v39 }
 0x5cb   : > { %v3364_v42 = vadd.f32 %v3363_v62, %v3362_v13  ;;  %v3331_v13 = vmul.f32 %v9381_v20, %v9381_v20  ;;  %v3371_v54 = vsel %vm11246_vm0, %v3330_v60, 0.0 }
 0x5cd   : > { %v3366_v8 = vadd.f32 %v3365_v14, %v3364_v42  ;;  %v3332_v42 = vmul.f32 %v9388_v33, %v9388_v33  ;;  %v3373_v11 = vsel %vm11285_vm10, %v3331_v13, 0.0  ;;  %vm11288_vm10 = vmmov %vm11246_vm0 }
 0x5cf   : > { %v3368_v2 = vadd.f32 %v3367_v5, %v3366_v8  ;;  %v3333_v8 = vmul.f32 %v9395_v15, %v9395_v15  ;;  %v3375_v60 = vsel %vm11286_vm5, %v3332_v42, 0.0  ;;  %vm11289_vm5 = vmmov %vm11246_vm0 }
 0x5d1   : > { %v3370_v62 = vadd.f32 %v3369_v52, %v3368_v2  ;;  %v3334_v2 = vmul.f32 %v9402_v6, %v9402_v6  ;;  %v3377_v13 = vsel %vm11287_vm9, %v3333_v8, 0.0  ;;  %vm11290_vm9 = vmmov %vm11246_vm0 }
 0x5d3   : > { %v3372_v14 = vadd.f32 %v3371_v54, %v3370_v62  ;;  %v3335_v62 = vmul.f32 %v9409_v55, %v9409_v55  ;;  %v3379_v42 = vsel %vm11246_vm0, %v3334_v2, 0.0 }
 0x5d5   : > { %v3374_v5 = vadd.f32 %v3373_v11, %v3372_v14  ;;  %v3336_v14 = vmul.f32 %v9416_v43, %v9416_v43  ;;  %v3381_v8 = vsel %vm11288_vm10, %v3335_v62, 0.0  ;;  %vm11291_vm10 = vmmov %vm11246_vm0 }
 0x5d7   : > { %v3376_v52 = vadd.f32 %v3375_v60, %v3374_v5  ;;  %v3337_v5 = vmul.f32 %v9423_v37, %v9423_v37  ;;  %v3383_v2 = vsel %vm11289_vm5, %v3336_v14, 0.0  ;;  %vm11292_vm5 = vmmov %vm11246_vm0 }
 0x5d9   : > { %v3378_v54 = vadd.f32 %v3377_v13, %v3376_v52  ;;  %v3338_v52 = vmul.f32 %v9430_v51, %v9430_v51  ;;  %v3385_v62 = vsel %vm11290_vm9, %v3337_v5, 0.0  ;;  %vm11293_vm9 = vmmov %vm11246_vm0 }
 0x5db   : > { %v3380_v11 = vadd.f32 %v3379_v42, %v3378_v54  ;;  %v3339_v54 = vmul.f32 %v9437_v35, %v9437_v35  ;;  %v3387_v14 = vsel %vm11246_vm0, %v3338_v52, 0.0 }
 0x5dd   : > { %v3382_v60 = vadd.f32 %v3381_v8, %v3380_v11  ;;  %v3340_v11 = vmul.f32 %v9444_v27, %v9444_v27  ;;  %v3389_v5 = vsel %vm11291_vm10, %v3339_v54, 0.0  ;;  %vm11294_vm10 = vmmov %vm11246_vm0 }
 0x5df   : > { %v3384_v13 = vadd.f32 %v3383_v2, %v3382_v60  ;;  %v3341_v60 = vmul.f32 %v9451_v63, %v9451_v63  ;;  %v3391_v52 = vsel %vm11292_vm5, %v3340_v11, 0.0  ;;  %vm11295_vm5 = vmmov %vm11246_vm0 }
 0x5e1   : > { %v3386_v42 = vadd.f32 %v3385_v62, %v3384_v13  ;;  %v3342_v13 = vmul.f32 %v9458_v9, %v9458_v9  ;;  %v3393_v54 = vsel %vm11293_vm9, %v3341_v60, 0.0  ;;  %vm11296_vm9 = vmmov %vm11246_vm0 }
 0x5e3   : > { %v3388_v8 = vadd.f32 %v3387_v14, %v3386_v42  ;;  %v3343_v42 = vmul.f32 %v9465_v22, %v9465_v22  ;;  %v3395_v11 = vsel %vm11246_vm0, %v3342_v13, 0.0  ;;  %v3317_v13 = vsub.f32 %v9290_v36, %v9308_v40 }
 0x5e5   : > { %v3390_v2 = vadd.f32 %v3389_v5, %v3388_v8  ;;  %v3344_v8 = vmul.f32 %v9472_v3, %v9472_v3  ;;  %v3349_v41 = vmul.f32 %v3317_v13, %v3317_v13 }
 0x5e7   : > { %v3392_v62 = vadd.f32 %v3391_v52, %v3390_v2  ;;  %v3345_v2 = vmul.f32 %v9479_v31, %v9479_v31  ;;  %v3397_v52 = vsel %vm11294_vm10, %v3343_v42, 0.0  ;;  %v3318_v42 = vsub.f32 %v9285_v38, %v9308_v40  ;;  %vm11297_vm10 = vmmov %vm11246_vm0 }
 0x5e9   : > { %v3394_v14 = vadd.f32 %v3393_v54, %v3392_v62  ;;  %v3316_v62 = vsub.f32 %v9282_v30, %v9308_v40  ;;  %v3399_v54 = vsel %vm11295_vm5, %v3344_v8, 0.0  ;;  %v3401_v19 = vsel %vm11296_vm9, %v3345_v2, 0.0  ;;  %vm11298_vm5 = vmmov %vm11246_vm0 }
 0x5ea   : > { %v3351_v2 = vmul.f32 %v3319_v29, %v3319_v29  ;;  %vm11299_vm9 = vmmov %vm11246_vm0 }
 0x5eb   : > { %v3396_v5 = vadd.f32 %v3395_v11, %v3394_v14  ;;  %v3347_v14 = vmul.f32 %v3315_v50, %v3315_v50 }
 0x5ed   : > { %v3398_v60 = vadd.f32 %v3397_v52, %v3396_v5  ;;  %v3348_v5 = vmul.f32 %v3316_v62, %v3316_v62  ;;  %v3403_v52 = vsel %vm11246_vm0, %v3346_v24, 0.0  ;;  %v3405_v8 = vsel %vm11297_vm10, %v3347_v14, 0.0  ;;  %vm11301_vm10 = vmmov %vm11246_vm0 }
 0x5ee   : > { %v3413_v24 = vsel %vm11246_vm0, %v3351_v2, 0.0 }
 0x5ef   : > { %v3400_v47 = vadd.f32 %v3399_v54, %v3398_v60  ;;  %v3350_v54 = vmul.f32 %v3318_v42, %v3318_v42  ;;  %v3407_v36 = vsel %vm11298_vm5, %v3348_v5, 0.0  ;;  %vm11310_vm5 = vcmask 1040384  }
 0x5f1   : > { %v3402_v11 = vadd.f32 %v3401_v19, %v3400_v47  ;;  %v3409_v47 = vsel %vm11299_vm9, %v3349_v41, 0.0  ;;  %v3411_v38 = vsel %vm11300_vm7, %v3350_v54, 0.0  ;;  %v7143_v54 = vld [vmem:[%s10818_s8 + $0x38] sm:$0xff]   ;;  %vm11309_vm7 = vcmask 1046528  }
 0x5f2   : > { %vm11311_vm9 = vmmov %vm11309_vm7 }
 0x5f3   : > { %v3404_v30 = vadd.f32 %v3403_v52, %v3402_v11 }
 0x5f5   : > { %v3406_v60 = vadd.f32 %v3405_v8, %v3404_v30 }
 0x5f7   : > { %v3408_v23 = vadd.f32 %v3407_v36, %v3406_v60 }
 0x5f9   : > { %v3410_v19 = vadd.f32 %v3409_v47, %v3408_v23 }
 0x5fb   : > { %v3412_v18 = vadd.f32 %v3411_v38, %v3410_v19 }
 0x5fd   : > { %v3414_v11 = vadd.f32 %v3413_v24, %v3412_v18  ;;  %v7142_v18 = vld [vmem:[%s10818_s8 + $0x30] sm:$0xff]  }
 0x5fe   : > { %6718 = vmatprep.subr.bf16.mxu1 %v7142_v18 }
 0x5ff   : > { %v3415_v52 = vrot.slane %v3414_v11, 4 }
 0x601   : > { %v3416_v17 = vadd.f32 %v3415_v52, %v3414_v11 }
 0x603   : > { %v3417_v40 = vrot.slane %v3416_v17, 2 }
 0x605   : > { %v3418_v34 = vadd.f32 %v3417_v40, %v3416_v17 }
 0x607   : > { %v3419_v14 = vrot.slane %v3418_v34, 1 }
 0x609   : > { %v3420_v30 = vadd.f32 %v3419_v14, %v3418_v34 }
 0x60b   : > { %6716 = vmatmul.mubr.msk.f32.vlgmr.msra.gmra.mrb[4].mxu1 %vm11301_vm10, %v3420_v30  ;;  %vm11315_vm10 = vmmov %vm11309_vm7 }
 0x60c   : > { %6719 = vmatpush3.bf16.msra.mxu1 %v7142_v18 }
 0x60d   : > { %6720 = vmatprep.subr.bf16.mxu1 %v7143_v54 }
 0x610   : > { %6721 = vmatpush3.bf16.msra.mxu1 %v7143_v54 }
 0x6de   : > { %v3490_v5 = vpop.f32.mrb[4].mxu1 }
 0x6df   : > { %v3494_v8 = vmul.f32 0.00390625, %v3490_v5  ;;  %v6717_v60 = vpop.f32.mrb[5].mxu1 }
 0x6e1   : > { %v3495_v36 = vadd.f32 1e-05, %v3494_v8 }
 0x6e3   : > { %7310 = vrsqrt.f32 %v3495_v36 }
 0x6ed   : > { %v7311_v23 = vpop.eup %7310 }
 0x6ee   : > { %v9516_v41 = vrot.slane %v7311_v23, %v11276_v48  ;;  %v9533_v48 = vld [vmem:[%s10816_s6] ss:$0 sm:$0xff] }
 0x6f0   : > { %v3503_v34 = vmul.f32 %v9516_v41, %v9320_v0  ;;  %v3504_v2 = vmul.f32 %v9516_v41, %v9324_v10  ;;  %v3505_v47 = vmul.f32 %v9516_v41, %v9332_v45  ;;  %v3501_v19 = vmul.f32 %v9516_v41, %v9312_v44  ;;  %v7144_v45 = vld [vmem:[%s10818_s8 + $0x40] sm:$0xff]  }
 0x6f1   : > { %v3502_v38 = vmul.f32 %v9516_v41, %v9316_v56  ;;  %v3506_v0 = vmul.f32 %v9516_v41, %v9338_v46  ;;  %v3522_v10 = vmul.f32 %v9516_v41, %v9451_v63  ;;  %v3507_v24 = vmul.f32 %v9516_v41, %v9346_v28  ;;  %6722 = vmatprep.subr.bf16.mxu1 %v7144_v45 }
 0x6f2   : > { %v3526_v44 = vmul.f32 %v9516_v41, %v9479_v31  ;;  %v3527_v56 = vmul.f32 %v9516_v41, %v9486_v39  ;;  %v3528_v11 = vmul.f32 %v9516_v41, %v3315_v50  ;;  %v3529_v46 = vmul.f32 %v9516_v41, %v3316_v62  ;;  %v9565_v39 = vld [vmem:[%s10817_s7] ss:$0 sm:$0xff]  ;;  %6723 = vmatpush3.bf16.msra.mxu1 %v7144_v45 }
 0x6f3   : > { %v3530_v63 = vmul.f32 %v9516_v41, %v3317_v13  ;;  %v3531_v52 = vmul.f32 %v9516_v41, %v3318_v42  ;;  %v3532_v17 = vmul.f32 %v9516_v41, %v3319_v29  ;;  %v3508_v40 = vmul.f32 %v9516_v41, %v9353_v4 }
 0x6f4   : > { %v3541_v28 = vmul.f32 %v9533_v48, %v3503_v34  ;;  %v3542_v31 = vmul.f32 %v9533_v48, %v3504_v2  ;;  %v3543_v14 = vmul.f32 %v9533_v48, %v3505_v47  ;;  %v3509_v50 = vmul.f32 %v9516_v41, %v9360_v1 }
 0x6f5   : > { %v3510_v29 = vmul.f32 %v9516_v41, %v9367_v12  ;;  %v3511_v4 = vmul.f32 %v9516_v41, %v9374_v57  ;;  %v3560_v62 = vmul.f32 %v9533_v48, %v3522_v10  ;;  %v3512_v13 = vmul.f32 %v9516_v41, %v9381_v20 }
 0x6f6   : > { %v3564_v42 = vmul.f32 %v9533_v48, %v3526_v44  ;;  %v3565_v30 = vmul.f32 %v9533_v48, %v3527_v56  ;;  %v3566_v5 = vmul.f32 %v9533_v48, %v3528_v11  ;;  %v3567_v1 = vmul.f32 %v9533_v48, %v3529_v46 }
 0x6f7   : > { %v3568_v8 = vmul.f32 %v9533_v48, %v3530_v63  ;;  %v3569_v12 = vmul.f32 %v9533_v48, %v3531_v52  ;;  %v3570_v57 = vmul.f32 %v9533_v48, %v3532_v17  ;;  %v3513_v60 = vmul.f32 %v9516_v41, %v9388_v33 }
 0x6f8   : > { %v9586_v36 = vadd.f32 %v9565_v39, %v3541_v28  ;;  %v9589_v20 = vadd.f32 %v9565_v39, %v3542_v31  ;;  %v9592_v23 = vadd.f32 %v9565_v39, %v3543_v14  ;;  %v3514_v18 = vmul.f32 %v9516_v41, %v9395_v15 }
 0x6f9   : > { %v3539_v54 = vmul.f32 %v9533_v48, %v3501_v19  ;;  %v3540_v34 = vmul.f32 %v9533_v48, %v3502_v38  ;;  %v3544_v2 = vmul.f32 %v9533_v48, %v3506_v0  ;;  %v3545_v33 = vmul.f32 %v9533_v48, %v3507_v24 }
 0x6fa   : > { %v6113_v47 = vmul.f32 -1.442695, %v9586_v36  ;;  %v6114_v10 = vmul.f32 -1.442695, %v9589_v20  ;;  %v6115_v44 = vmul.f32 -1.442695, %v9592_v23  ;;  %v3515_v45 = vmul.f32 %v9516_v41, %v9402_v6 }
 0x6fb   : > { %v3516_v15 = vmul.f32 %v9516_v41, %v9409_v55  ;;  %v3546_v19 = vmul.f32 %v9533_v48, %v3508_v40  ;;  %v3547_v38 = vmul.f32 %v9533_v48, %v3509_v50  ;;  %v3517_v0 = vmul.f32 %v9516_v41, %v9416_v43 }
 0x6fc   : > { %v3518_v24 = vmul.f32 %v9516_v41, %v9423_v37  ;;  %v3519_v56 = vmul.f32 %v9516_v41, %v9430_v51  ;;  %7312 = vpow2.f32 %v6113_v47  ;;  %v3548_v11 = vmul.f32 %v9533_v48, %v3510_v29 }
 0x6fd   : > { %7314 = vpow2.f32 %v6114_v10  ;;  %v9617_v6 = vadd.f32 %v9565_v39, %v3539_v54  ;;  %v9620_v55 = vadd.f32 %v9565_v39, %v3540_v34  ;;  %v9623_v46 = vadd.f32 %v9565_v39, %v3544_v2 }
 0x6fe   : > { %7316 = vpow2.f32 %v6115_v44  ;;  %v9626_v43 = vadd.f32 %v9565_v39, %v3545_v33  ;;  %v9629_v37 = vadd.f32 %v9565_v39, %v3560_v62  ;;  %v3549_v51 = vmul.f32 %v9533_v48, %v3511_v4 }
 0x6ff   : > { %v9633_v63 = vadd.f32 %v9565_v39, %v3546_v19  ;;  %v9636_v52 = vadd.f32 %v9565_v39, %v3547_v38  ;;  %v9639_v17 = vadd.f32 %v9565_v39, %v3564_v42  ;;  %v9642_v40 = vadd.f32 %v9565_v39, %v3565_v30 }
 0x700   : > { %11302 = vst [vmem:[#allocation54_spill] sm:$0xff] %v9629_v37  ;;  %v9645_v28 = vadd.f32 %v9565_v39, %v3566_v5  ;;  %v9648_v31 = vadd.f32 %v9565_v39, %v3567_v1  ;;  %v9651_v14 = vadd.f32 %v9565_v39, %v3568_v8  ;;  %v9654_v50 = vadd.f32 %v9565_v39, %v3569_v12 }
 0x701   : > { %11303 = vst [vmem:[#allocation46_spill] sm:$0xff] %v9639_v17  ;;  %11304 = vst [vmem:[#allocation55_spill] sm:$0xff] %v9642_v40  ;;  %v9657_v29 = vadd.f32 %v9565_v39, %v3570_v57  ;;  %v6111_v4 = vmul.f32 -1.442695, %v9617_v6  ;;  %v6112_v62 = vmul.f32 -1.442695, %v9620_v55  ;;  %v3520_v42 = vmul.f32 %v9516_v41, %v9437_v35 }
 0x702   : > { %11305 = vst [vmem:[#allocation56_spill] sm:$0xff] %v9645_v28  ;;  %v3550_v30 = vmul.f32 %v9533_v48, %v3512_v13  ;;  %v6116_v5 = vmul.f32 -1.442695, %v9623_v46  ;;  %v6117_v1 = vmul.f32 -1.442695, %v9626_v43  ;;  %v3521_v8 = vmul.f32 %v9516_v41, %v9444_v27 }
 0x703   : > { %v3551_v12 = vmul.f32 %v9533_v48, %v3513_v60  ;;  %7318 = vpow2.f32 %v6111_v4  ;;  %v6118_v57 = vmul.f32 -1.442695, %v9633_v63  ;;  %v3523_v54 = vmul.f32 %v9516_v41, %v9458_v9 }
 0x704   : > { %v9673_v34 = vadd.f32 %v9565_v39, %v3548_v11  ;;  %7320 = vpow2.f32 %v6112_v62  ;;  %v6119_v35 = vmul.f32 -1.442695, %v9636_v52  ;;  %v3524_v13 = vmul.f32 %v9516_v41, %v9465_v22 }
 0x705   : > { %v3525_v27 = vmul.f32 %v9516_v41, %v9472_v3  ;;  %v9681_v60 = vadd.f32 %v9565_v39, %v3549_v51  ;;  %7322 = vpow2.f32 %v6116_v5  ;;  %v3552_v33 = vmul.f32 %v9533_v48, %v3514_v18 }
 0x706   : > { %v7313_v2 = vpop.eup %7312  ;;  %v3553_v9 = vmul.f32 %v9533_v48, %v3515_v45  ;;  %v9686_v47 = vadd.f32 %v9565_v39, %v3550_v30  ;;  %7324 = vpow2.f32 %v6117_v1  ;;  %v3554_v44 = vmul.f32 %v9533_v48, %v3516_v15 }
 0x707   : > { %v7315_v10 = vpop.eup %7314  ;;  %v3707_v22 = vadd.f32 1.0, %v7313_v2  ;;  %v9690_v19 = vadd.f32 %v9565_v39, %v3551_v12  ;;  %7326 = vpow2.f32 %v6118_v57  ;;  %v3555_v41 = vmul.f32 %v9533_v48, %v3517_v0 }
 0x708   : > { %v7317_v3 = vpop.eup %7316  ;;  %v3708_v38 = vadd.f32 1.0, %v7315_v10  ;;  %v6120_v18 = vmul.f32 -1.442695, %v9673_v34  ;;  %7328 = vpow2.f32 %v6119_v35  ;;  %v3556_v45 = vmul.f32 %v9533_v48, %v3518_v24 }
 0x709   : > { %v3709_v11 = vadd.f32 1.0, %v7317_v3  ;;  %7330 = vrcp.f32 %v3707_v22  ;;  %v6121_v51 = vmul.f32 -1.442695, %v9681_v60  ;;  %v3557_v15 = vmul.f32 %v9533_v48, %v3519_v56 }
 0x70a   : > { %7332 = vrcp.f32 %v3708_v38  ;;  %v9698_v4 = vadd.f32 %v9565_v39, %v3552_v33  ;;  %v6122_v62 = vmul.f32 -1.442695, %v9686_v47  ;;  %v3558_v0 = vmul.f32 %v9533_v48, %v3520_v42 }
 0x70b   : > { %7334 = vrcp.f32 %v3709_v11  ;;  %v9703_v30 = vadd.f32 %v9565_v39, %v3553_v9  ;;  %v6123_v24 = vmul.f32 -1.442695, %v9690_v19  ;;  %v3559_v5 = vmul.f32 %v9533_v48, %v3521_v8 }
 0x70c   : > { %v3561_v1 = vmul.f32 %v9533_v48, %v3523_v54  ;;  %v9709_v56 = vadd.f32 %v9565_v39, %v3554_v44  ;;  %7336 = vpow2.f32 %v6120_v18  ;;  %v3562_v57 = vmul.f32 %v9533_v48, %v3524_v13 }
 0x70d   : > { %v7319_v12 = vpop.eup %7318  ;;  %v3563_v35 = vmul.f32 %v9533_v48, %v3525_v27  ;;  %v9714_v42 = vadd.f32 %v9565_v39, %v3555_v41  ;;  %7338 = vpow2.f32 %v6121_v51  ;;  %v9717_v33 = vadd.f32 %v9565_v39, %v3556_v45 }
 0x70e   : > { %v7321_v2 = vpop.eup %7320  ;;  %v3705_v8 = vadd.f32 1.0, %v7319_v12  ;;  %v6124_v54 = vmul.f32 -1.442695, %v9698_v4  ;;  %7340 = vpow2.f32 %v6122_v62  ;;  %v9723_v10 = vadd.f32 %v9565_v39, %v3557_v15 }
 0x70f   : > { %11306 = vst [vmem:[#allocation57_spill] sm:$0xff] %v9717_v33  ;;  %v9720_v9 = vpop.eup %7322  ;;  %v3706_v13 = vadd.f32 1.0, %v7321_v2  ;;  %v6125_v48 = vmul.f32 -1.442695, %v9703_v30  ;;  %7342 = vpow2.f32 %v6123_v24  ;;  %v9729_v44 = vadd.f32 %v9565_v39, %v3558_v0  ;;  %v7145_v24 = vld [vmem:[%s10818_s8 + $0x48] sm:$0xff]  }
 0x710   : > { %v9726_v27 = vpop.eup %7324  ;;  %v9732_v22 = vadd.f32 %v9565_v39, %v3559_v5  ;;  %7344 = vrcp.f32 %v3705_v8  ;;  %v6126_v3 = vmul.f32 -1.442695, %v9709_v56  ;;  %v9738_v38 = vadd.f32 %v9565_v39, %v3561_v1  ;;  %6724 = vmatprep.subr.bf16.mxu1 %v7145_v24 }
 0x711   : > { %v9735_v41 = vpop.eup %7326  ;;  %7346 = vrcp.f32 %v3706_v13  ;;  %v6127_v18 = vmul.f32 -1.442695, %v9714_v42  ;;  %v9744_v11 = vadd.f32 %v9565_v39, %v3562_v57  ;;  %v6128_v51 = vmul.f32 -1.442695, %v9717_v33  ;;  %6725 = vmatpush3.bf16.msra.mxu1 %v7145_v24 }
 0x712   : > { %11307 = vst [vmem:[#allocation58_spill] sm:$0xff] %v9738_v38  ;;  %v9741_v45 = vpop.eup %7328  ;;  %7348 = vpow2.f32 %v6124_v54  ;;  %v9748_v62 = vadd.f32 %v9565_v39, %v3563_v35  ;;  %v6129_v0 = vmul.f32 -1.442695, %v9723_v10  ;;  %v6130_v12 = vmul.f32 -1.442695, %v9729_v44 }
 0x713   : > { %11308 = vst [vmem:[#allocation59_spill] sm:$0xff] %v9744_v11  ;;  %v7331_v15 = vpop.eup %7330  ;;  %7350 = vpow2.f32 %v6125_v48  ;;  %v6131_v57 = vmul.f32 -1.442695, %v9732_v22  ;;  %v6132_v35 = vmul.f32 -1.442695, %v9629_v37 }
 0x714   : > { %v7333_v5 = vpop.eup %7332  ;;  %v9755_v1 = vmul.f32 %v7331_v15, %v9586_v36  ;;  %7352 = vpow2.f32 %v6126_v3  ;;  %v6133_v8 = vmul.f32 -1.442695, %v9738_v38  ;;  %v6134_v36 = vmul.f32 -1.442695, %v9744_v11 }
 0x715   : > { %v7335_v2 = vpop.eup %7334  ;;  %v3804_v39 = vmul.f32 %v7333_v5, %v9589_v20  ;;  %7354 = vpow2.f32 %v6127_v18  ;;  %v7146_v18 = vld [vmem:[%s10818_s8 + $0x50] sm:$0xff]  }
 0x716   : > { %v9762_v54 = vpop.eup %7336  ;;  %v9765_v13 = vmul.f32 %v7335_v2, %v9592_v23  ;;  %v3996_v48 = vrot.slane %v9755_v1, 1  ;;  %7356 = vpow2.f32 %v6128_v51  ;;  %v6135_v2 = vmul.f32 -1.442695, %v9748_v62  ;;  %6726 = vmatprep.subr.bf16.mxu1 %v7146_v18 }
 0x717   : > { %v9769_v3 = vpop.eup %7338  ;;  %v3870_v20 = vrot.slane %v3804_v39, 7  ;;  %v4154_v15 = vpack.c.bf16 %v3804_v39, %v9755_v1  ;;  %v3998_v5 = vrot.slane %v3804_v39, 1  ;;  %7358 = vpow2.f32 %v6129_v0  ;;  %6727 = vmatpush3.bf16.msra.mxu1 %v7146_v18 }
 0x718   : > { %v9775_v59 = vpop.eup %7340  ;;  %v10954_v23 = vrot.slane %v9765_v13, 7  ;;  %v10958_v51 = vrot.slane %v9765_v13, 1  ;;  %7360 = vpow2.f32 %v6130_v12  ;;  %v6136_v39 = vmul.f32 -1.442695, %v9639_v17 }
 0x719   : > { %v9780_v24 = vpop.eup %7342  ;;  %4187 = vrot.lane.b32.xlu1 %v4154_v15, %s7467_s19  ;;  %v6137_v0 = vmul.f32 -1.442695, %v9642_v40  ;;  %v3999_v32 = vsel %vm11309_vm7, %v3996_v48, %v3998_v5  ;;  %7362 = vpow2.f32 %v6131_v57  ;;  %v6138_v12 = vmul.f32 -1.442695, %v9645_v28 }
 0x71a   : > { %v7345_v16 = vpop.eup %7344  ;;  %v9789_v25 = vsel %vm11310_vm5, %v3870_v20, %v10954_v23  ;;  %v4001_v15 = vsel %vm11311_vm9, %v3998_v5, %v10958_v51  ;;  %7364 = vpow2.f32 %v6132_v35  ;;  %v3868_v17 = vrot.slane %v9755_v1, 7 }
 0x71b   : > { %v7347_v49 = vpop.eup %7346  ;;  %v3801_v57 = vmul.f32 %v7345_v16, %v9617_v6  ;;  %v4092_v37 = vsel %vm8288_vm4, 0.0, %v4001_v15  ;;  %7366 = vpow2.f32 %v6133_v8  ;;  %v6139_v28 = vmul.f32 -1.442695, %v9648_v31  ;;  %vm11313_vm4 = vmmov %vm11310_vm5 }
 0x71c   : > { %v7349_v11 = vpop.eup %7348  ;;  %v3802_v23 = vmul.f32 %v7347_v49, %v9620_v55  ;;  %v4250_v38 = vpack.c.bf16 %v4092_v37, %v3999_v32  ;;  %7368 = vpow2.f32 %v6134_v36  ;;  %v6140_v35 = vmul.f32 -1.442695, %v9651_v14  ;;  %vm11314_vm0 = vmmov %vm11313_vm4 }
 0x71d   : > { %v7351_v33 = vpop.eup %7350  ;;  %v3865_v5 = vrot.slane %v3801_v57, 7  ;;  %7370 = vpow2.f32 %v6135_v2  ;;  %v3993_v18 = vrot.slane %v3801_v57, 1  ;;  %v6141_v49 = vmul.f32 -1.442695, %v9654_v50  ;;  %vm11317_vm5 = vmmov %vm11314_vm0 }
 0x71e   : > { %v7353_v1 = vpop.eup %7352  ;;  %v3866_v51 = vrot.slane %v3802_v23, 7  ;;  %v4153_v16 = vpack.c.bf16 %v3802_v23, %v3801_v57  ;;  %4283 = vrot.lane.b32.xlu1 %v4250_v38, %s7468_s24  ;;  %7372 = vpow2.f32 %v6136_v39  ;;  %v3994_v6 = vrot.slane %v3802_v23, 1  ;;  %vm11318_vm9 = vmmov %vm11314_vm0 }
 0x71f   : > { %v7355_v40 = vpop.eup %7354  ;;  %v6142_v55 = vmul.f32 -1.442695, %v9657_v29  ;;  %7374 = vpow2.f32 %v6137_v0  ;;  %v3871_v32 = vsel %vm11313_vm4, %v3868_v17, %v3870_v20  ;;  %v3711_v15 = vadd.f32 1.0, %v9726_v27  ;;  %vm11323_vm4 = vmmov %vm11314_vm0 }
 0x720   : > { %v7357_v37 = vpop.eup %7356  ;;  %v3869_v8 = vsel %vm11314_vm0, %v3866_v51, %v3868_v17  ;;  %4185 = vrot.lane.b32.xlu0 %v4153_v16, %s7467_s19  ;;  %7376 = vpow2.f32 %v6138_v12  ;;  %v3995_v36 = vsel %vm11315_vm10, %v3993_v18, %v3994_v6  ;;  %v3997_v38 = vsel %vm11309_vm7, %v3994_v6, %v3996_v48  ;;  %vm11324_vm0 = vmmov %vm11309_vm7 }
 0x721   : > { %v7359_v2 = vpop.eup %7358  ;;  %7378 = vpow2.f32 %v6139_v28  ;;  %v4090_v39 = vsel %vm8271_vm3, 0.0, %v3997_v38  ;;  %v3960_v0 = vsel %vm11317_vm5, 0.0, %v3865_v5  ;;  %v3712_v17 = vadd.f32 1.0, %v9735_v41  ;;  %vm11325_vm10 = vmmov %vm11324_vm0 }
 0x722   : > { %v7361_v20 = vpop.eup %7360  ;;  %7380 = vpow2.f32 %v6140_v35  ;;  %v4249_v57 = vpack.c.bf16 %v4090_v39, %v3995_v36  ;;  %v3963_v12 = vsel %vm8542_vm12, 0.0, %v3869_v8  ;;  %v3713_v48 = vadd.f32 1.0, %v9741_v45  ;;  %vm11326_vm7 = vmmov %vm11323_vm4 }
 0x723   : > { %v7363_v18 = vpop.eup %7362  ;;  %7382 = vpow2.f32 %v6141_v49  ;;  %v4122_v28 = vpack.c.bf16 %v3871_v32, %v3963_v12  ;;  %v3867_v16 = vsel %vm11318_vm9, %v3865_v5, %v3866_v51  ;;  %v3710_v27 = vadd.f32 1.0, %v9720_v9  ;;  %vm11329_vm9 = vmmov %vm11324_vm0 }
 0x724   : > { %v7365_v6 = vpop.eup %7364  ;;  %7384 = vpow2.f32 %v6142_v55  ;;  %4281 = vrot.lane.b32.xlu0 %v4249_v57, %s7468_s24  ;;  %v3961_v35 = vsel %vm8523_vm11, 0.0, %v3960_v0  ;;  %v3714_v53 = vadd.f32 1.0, %v9762_v54  ;;  %vm11319_vm3 = vcmask 261120  }
 0x725   : > { %v7367_v41 = vpop.eup %7366  ;;  %7386 = vrcp.f32 %v3711_v15  ;;  %4138 = vst.msk [vmem:[#allocation2 + $0x10] sm:$0xff] %vm11319_vm3, %v4122_v28  ;;  %v4121_v49 = vpack.c.bf16 %v3867_v16, %v3961_v35  ;;  %v3715_v32 = vadd.f32 1.0, %v9769_v3  ;;  %v3716_v5 = vadd.f32 1.0, %v9775_v59  ;;  %vm11320_vm12 = vmmov %vm11319_vm3  ;;  %v7147_v3 = vld [vmem:[%s10818_s8 + $0x58] sm:$0xff]  }
 0x726   : > { %v7369_v45 = vpop.eup %7368  ;;  %7388 = vrcp.f32 %v3712_v17  ;;  %v3717_v58 = vadd.f32 1.0, %v9780_v24  ;;  %v3718_v54 = vadd.f32 1.0, %v7349_v11  ;;  %v3719_v36 = vadd.f32 1.0, %v7351_v33  ;;  %6728 = vmatprep.subr.bf16.mxu1 %v7147_v3  ;;  %vm11330_vm3 = vmmov %vm11324_vm0 }
 0x727   : > { %v7371_v51 = vpop.eup %7370  ;;  %7390 = vrcp.f32 %v3713_v48  ;;  %4137 = vst.msk [vmem:[#allocation2 + $0x8] sm:$0xff] %vm11320_vm12, %v4121_v49  ;;  %v3720_v23 = vadd.f32 1.0, %v7353_v1  ;;  %vm11321_vm11 = vnez %v11093_v61  ;;  %v3721_v24 = vadd.f32 1.0, %v7355_v40  ;;  %6729 = vmatpush3.bf16.msra.mxu1 %v7147_v3  ;;  %v9838_v40 = vld [vmem:[%s10818_s8] sm:$0xff]  }
 0x728   : > { %v7373_v9 = vpop.eup %7372  ;;  %7392 = vrcp.f32 %v3710_v27  ;;  %v3722_v15 = vadd.f32 1.0, %v7357_v37  ;;  %v3723_v0 = vadd.f32 1.0, %v7359_v2  ;;  %v3724_v33 = vadd.f32 1.0, %v7361_v20  ;;  %11322 = vst [vmem:[#allocation70_spill] sm:$0xff] %v9838_v40  ;;  %6762 = vmatprep.subr.bf16.mxu1 %v9838_v40  ;;  %v11370_v40 = vld [vmem:[#allocation60_spill] sm:$0xff] }
 0x729   : > { %v7375_v55 = vpop.eup %7374  ;;  %7394 = vrcp.f32 %v3714_v53  ;;  %v3725_v57 = vadd.f32 1.0, %v7363_v18  ;;  %v3726_v17 = vadd.f32 1.0, %v7365_v6  ;;  %v3727_v48 = vadd.f32 1.0, %v7367_v41 }
 0x72a   : > { %v7377_v8 = vpop.eup %7376  ;;  %7396 = vrcp.f32 %v3715_v32  ;;  %v3728_v1 = vadd.f32 1.0, %v7369_v45  ;;  %v3729_v28 = vadd.f32 1.0, %v7371_v51  ;;  %v3730_v27 = vadd.f32 1.0, %v7373_v9 }
 0x72b   : > { %v7379_v38 = vpop.eup %7378  ;;  %7398 = vrcp.f32 %v3716_v5  ;;  %v3731_v35 = vadd.f32 1.0, %v7375_v55  ;;  %v3732_v53 = vadd.f32 1.0, %v7377_v8  ;;  %vm11327_vm5 = vnez %v11063_v26 }
 0x72c   : > { %v7381_v39 = vpop.eup %7380  ;;  %7400 = vrcp.f32 %v3717_v58  ;;  %v9840_v2 = vadd.f32 1.0, %v7379_v38 }
 0x72d   : > { %v7383_v11 = vpop.eup %7382  ;;  %7402 = vrcp.f32 %v3718_v54  ;;  %v9842_v20 = vadd.f32 1.0, %v7381_v39 }
 0x72e   : > { %v7385_v12 = vpop.eup %7384  ;;  %7404 = vrcp.f32 %v3719_v36  ;;  %v9847_v41 = vadd.f32 1.0, %v7383_v11 }
 0x72f   : > { %v7387_v16 = vpop.eup %7386  ;;  %7406 = vrcp.f32 %v3720_v23  ;;  %v9849_v49 = vadd.f32 1.0, %v7385_v12 }
 0x730   : > { %v7389_v37 = vpop.eup %7388  ;;  %v9845_v18 = vmul.f32 %v7387_v16, %v9626_v43  ;;  %7408 = vrcp.f32 %v3721_v24 }
 0x731   : > { %v7391_v6 = vpop.eup %7390  ;;  %v9852_v45 = vmul.f32 %v7389_v37, %v9633_v63  ;;  %7410 = vrcp.f32 %v3722_v15 }
 0x732   : > { %v7393_v32 = vpop.eup %7392  ;;  %v9856_v51 = vmul.f32 %v7391_v6, %v9636_v52  ;;  %v10973_v5 = vrot.slane %v9845_v18, 7  ;;  %7412 = vrcp.f32 %v3723_v0  ;;  %v4004_v43 = vrot.slane %v9845_v18, 1 }
 0x733   : > { %v7395_v9 = vpop.eup %7394  ;;  %v10974_v58 = vrot.slane %v9852_v45, 7  ;;  %v4156_v55 = vpack.c.bf16 %v9852_v45, %v9845_v18  ;;  %7414 = vrcp.f32 %v3724_v33  ;;  %v9864_v63 = vmul.f32 %v7393_v32, %v9623_v46 }
 0x734   : > { %v7397_v54 = vpop.eup %7396  ;;  %v10962_v8 = vrot.slane %v9856_v51, 7  ;;  %7416 = vrcp.f32 %v3725_v57  ;;  %v4006_v52 = vrot.slane %v9852_v45, 1  ;;  %v4008_v36 = vrot.slane %v9856_v51, 1 }
 0x735   : > { %v7399_v3 = vpop.eup %7398  ;;  %4191 = vrot.lane.b32.xlu1 %v4156_v55, %s7467_s19  ;;  %7418 = vrcp.f32 %v3726_v17  ;;  %v10970_v38 = vrot.slane %v9864_v63, 7  ;;  %v4155_v23 = vpack.c.bf16 %v9864_v63, %v9765_v13  ;;  %v4002_v46 = vrot.slane %v9864_v63, 1  ;;  %v11331_v55 = vld [vmem:[#allocation67_spill] sm:$0xff] }
 0x736   : > { %v7401_v39 = vpop.eup %7400  ;;  %v9879_v24 = vsel %vm11323_vm4, %v10974_v58, %v10962_v8  ;;  %7420 = vrcp.f32 %v3727_v48  ;;  %v4007_v15 = vsel %vm11324_vm0, %v4004_v43, %v4006_v52  ;;  %v4009_v0 = vsel %vm11325_vm10, %v4006_v52, %v4008_v36  ;;  %vm11333_vm0 = vmmov %vm11323_vm4 }
 0x737   : > { %v7403_v11 = vpop.eup %7402  ;;  %7422 = vrcp.f32 %v3728_v1  ;;  %v9890_v33 = vsel %vm11326_vm7, %v10970_v38, %v10973_v5  ;;  %4189 = vrot.lane.b32.xlu0 %v4155_v23, %s7467_s19  ;;  %v9894_v57 = vmul.f32 %v7401_v39, %v9690_v19  ;;  %v4096_v17 = vsel %vm11327_vm5, 0.0, %v4009_v0  ;;  %vm11334_vm10 = vmmov %vm11330_vm3 }
 0x738   : > { %v7405_v12 = vpop.eup %7404  ;;  %7424 = vrcp.f32 %v3729_v28  ;;  %v4252_v48 = vpack.c.bf16 %v4096_v17, %v4007_v15  ;;  %v11328_v1 = vrot.slane %v9765_v13, 1  ;;  %v4005_v37 = vsel %vm11330_vm3, %v4002_v46, %v4004_v43  ;;  %vm11335_vm7 = vmmov %vm11330_vm3 }
 0x739   : > { %v7407_v6 = vpop.eup %7406  ;;  %7426 = vrcp.f32 %v3730_v27  ;;  %v10960_v32 = vrot.slane %v9894_v57, 7  ;;  %vm11332_vm12 = vnez %v11331_v55  ;;  %v9906_v52 = vmul.f32 %v7397_v54, %v9681_v60 }
 0x73a   : > { %v4003_v16 = vsel %vm11329_vm9, %v11328_v1, %v4002_v46  ;;  %v4094_v19 = vsel %vm11332_vm12, 0.0, %v4005_v37  ;;  %v7409_v26 = vpop.eup %7408  ;;  %7428 = vrcp.f32 %v3731_v35  ;;  %4287 = vrot.lane.b32.xlu1 %v4252_v48, %s7468_s24  ;;  %v9910_v23 = vmul.f32 %v7399_v3, %v9686_v47  ;;  %vm11337_vm9 = vmmov %vm11330_vm3 }
 0x73b   : > { %v4251_v28 = vpack.c.bf16 %v4094_v19, %v4003_v16  ;;  %v9913_v43 = vmul.f32 %v7395_v9, %v9673_v34  ;;  %v9915_v27 = vpop.eup %7410  ;;  %7430 = vrcp.f32 %v3732_v53  ;;  %v9918_v46 = vmul.f32 %v7409_v26, %v9714_v42 }
 0x73c   : > { %v10968_v60 = vrot.slane %v9906_v52, 7  ;;  %v4012_v54 = vrot.slane %v9906_v52, 1  ;;  %v7413_v35 = vpop.eup %7412  ;;  %7432 = vrcp.f32 %v9840_v2  ;;  %v10969_v47 = vrot.slane %v9910_v23, 7 }
 0x73d   : > { %4285 = vrot.lane.b32.xlu0 %v4251_v28, %s7468_s24  ;;  %v4158_v34 = vpack.c.bf16 %v9910_v23, %v9906_v52  ;;  %v10965_v9 = vrot.slane %v9913_v43, 7  ;;  %v7415_v53 = vpop.eup %7414  ;;  %7434 = vrcp.f32 %v9842_v20  ;;  %v10959_v42 = vrot.slane %v9918_v46, 7 }
 0x73e   : > { %v4157_v3 = vpack.c.bf16 %v9913_v43, %v9856_v51  ;;  %v4014_v39 = vrot.slane %v9910_v23, 1  ;;  %v7417_v2 = vpop.eup %7416  ;;  %7436 = vrcp.f32 %v9847_v41  ;;  %v9939_v15 = vsel %vm11323_vm4, %v10969_v47, %v10960_v32  ;;  %vm11339_vm4 = vmmov %vm11333_vm0 }
 0x73f   : > { %4195 = vrot.lane.b32.xlu1 %v4158_v34, %s7467_s19  ;;  %v9947_v20 = vsel %vm11333_vm0, %v10965_v9, %v10968_v60  ;;  %v4016_v0 = vrot.slane %v9894_v57, 1  ;;  %v9950_v17 = vpop.eup %7418  ;;  %7438 = vrcp.f32 %v9849_v49  ;;  %v9954_v41 = vmul.f32 %v7417_v2, %v9732_v22  ;;  %v11352_v60 = vld [vmem:[#allocation54_spill] sm:$0xff] }
 0x740   : > { %v4015_v48 = vsel %vm11334_vm10, %v4012_v54, %v4014_v39  ;;  %v4010_v1 = vrot.slane %v9913_v43, 1  ;;  %v7421_v16 = vpop.eup %7420  ;;  %v9961_v55 = vmul.f32 %v7405_v12, %v9703_v30  ;;  %v9964_v19 = vmul.f32 %v7407_v6, %v9709_v56  ;;  %vm11340_vm10 = vmmov %vm11330_vm3 }
 0x741   : > { %4193 = vrot.lane.b32.xlu0 %v4157_v3, %s7467_s19  ;;  %v4017_v37 = vsel %vm11335_vm7, %v4014_v39, %v4016_v0  ;;  %v9967_v49 = vmul.f32 %v7403_v11, %v9698_v4  ;;  %v7423_v22 = vpop.eup %7422  ;;  %v10966_v26 = vrot.slane %v9954_v41, 7  ;;  %vm11336_vm5 = vnez %v11070_v21  ;;  %vm11342_vm7 = vmmov %vm11330_vm3 }
 0x742   : > { %v4100_v28 = vsel %vm11336_vm5, 0.0, %v4017_v37  ;;  %v4011_v34 = vsel %vm11337_vm9, %v4008_v36, %v4010_v1  ;;  %v4013_v3 = vsel %vm11330_vm3, %v4010_v1, %v4012_v54  ;;  %v7425_v30 = vpop.eup %7424  ;;  %vm11338_vm12 = vnez %v11066_v7  ;;  %vm11343_vm5 = vmmov %vm11330_vm3 }
 0x743   : > { %v4254_v12 = vpack.c.bf16 %v4100_v28, %v4015_v48  ;;  %v4098_v56 = vsel %vm11338_vm12, 0.0, %v4013_v3  ;;  %v10964_v4 = vrot.slane %v9961_v55, 7  ;;  %v10961_v11 = vrot.slane %v9964_v19, 7  ;;  %v9980_v6 = vpop.eup %7426  ;;  %vm11344_vm9 = vmmov %vm11330_vm3 }
 0x744   : > { %v9983_v21 = vmul.f32 %v7425_v30, %v9748_v62  ;;  %v4253_v39 = vpack.c.bf16 %v4098_v56, %v4011_v34  ;;  %v4160_v36 = vpack.c.bf16 %v9964_v19, %v9961_v55  ;;  %v10963_v54 = vrot.slane %v9967_v49, 7  ;;  %v9988_v2 = vpop.eup %7428 }
 0x745   : > { %4291 = vrot.lane.b32.xlu1 %v4254_v12, %s7468_s24  ;;  %v9996_v7 = vsel %vm11339_vm4, %v10961_v11, %v10959_v42  ;;  %v4159_v62 = vpack.c.bf16 %v9967_v49, %v9894_v57  ;;  %v4020_v48 = vrot.slane %v9961_v55, 1  ;;  %v4022_v1 = vrot.slane %v9964_v19, 1  ;;  %v10002_v37 = vpop.eup %7430  ;;  %vm11349_vm4 = vmmov %vm11333_vm0 }
 0x746   : > { %v10975_v28 = vrot.slane %v9983_v21, 7  ;;  %4289 = vrot.lane.b32.xlu0 %v4253_v39, %s7468_s24  ;;  %v10011_v34 = vsel %vm11333_vm0, %v10963_v54, %v10964_v4  ;;  %v4024_v3 = vrot.slane %v9918_v46, 1  ;;  %v4018_v30 = vrot.slane %v9967_v49, 1  ;;  %v7433_v12 = vpop.eup %7432  ;;  %v11341_v39 = vld [vmem:[#allocation57_spill] sm:$0xff] }
 0x747   : > { %v4023_v56 = vsel %vm11340_vm10, %v4020_v48, %v4022_v1  ;;  %v10017_v42 = vmul.f32 %v7413_v35, %v9723_v10  ;;  %v10020_v32 = vmul.f32 %v7415_v53, %v9729_v44  ;;  %v10024_v11 = vmul.f32 %v9915_v27, %v11341_v39  ;;  %v10026_v8 = vpop.eup %7434  ;;  %v11345_v44 = vld [vmem:[#allocation38_spill] sm:$0xff]  ;;  %v11347_v27 = vld [vmem:[#allocation71_spill] sm:$0xff]  ;;  %vm11353_vm10 = vmmov %vm11343_vm5 }
 0x748   : > { %v10029_v54 = vmul.f32 %v7433_v12, %v9648_v31  ;;  %v4025_v4 = vsel %vm11342_vm7, %v4022_v1, %v4024_v3  ;;  %v4019_v9 = vsel %vm11343_vm5, %v4016_v0, %v4018_v30  ;;  %v4021_v59 = vsel %vm11344_vm9, %v4018_v30, %v4020_v48  ;;  %v10034_v10 = vpop.eup %7436  ;;  %vm11354_vm7 = vmmov %vm11343_vm5 }
 0x749   : > { %4199 = vrot.lane.b32.xlu1 %v4160_v36, %s7467_s19  ;;  %vm11346_vm3 = vnez %v11345_v44  ;;  %vm11348_vm12 = vnez %v11347_v27  ;;  %v10972_v39 = vrot.slane %v10017_v42, 7  ;;  %v10967_v31 = vrot.slane %v10020_v32, 7  ;;  %v10043_v12 = vpop.eup %7438  ;;  %vm11355_vm9 = vmmov %vm11343_vm5 }
 0x74a   : > { %v4104_v35 = vsel %vm11346_vm3, 0.0, %v4025_v4  ;;  %v4102_v53 = vsel %vm11348_vm12, 0.0, %v4021_v59  ;;  %4197 = vrot.lane.b32.xlu0 %v4159_v62, %s7467_s19  ;;  %v4162_v36 = vpack.c.bf16 %v10020_v32, %v10017_v42  ;;  %v10971_v4 = vrot.slane %v10024_v11, 7 }
 0x74b   : > { %v4256_v48 = vpack.c.bf16 %v4104_v35, %v4023_v56  ;;  %v4255_v1 = vpack.c.bf16 %v4102_v53, %v4019_v9  ;;  %v10054_v59 = vsel %vm11349_vm4, %v10967_v31, %v10966_v26  ;;  %v4161_v30 = vpack.c.bf16 %v10024_v11, %v9918_v46  ;;  %v11350_v35 = vld [vmem:[#allocation58_spill] sm:$0xff]  ;;  %v11351_v26 = vld [vmem:[#allocation59_spill] sm:$0xff]  ;;  %vm11360_vm4 = vmmov %vm11333_vm0 }
 0x74c   : > { %v4028_v44 = vrot.slane %v10017_v42, 1  ;;  %v4030_v62 = vrot.slane %v10020_v32, 1  ;;  %v4032_v9 = vrot.slane %v9954_v41, 1  ;;  %v4026_v56 = vrot.slane %v10024_v11, 1 }
 0x74d   : > { %v10064_v27 = vmul.f32 %v7421_v16, %v11350_v35  ;;  %4295 = vrot.lane.b32.xlu1 %v4256_v48, %s7468_s24  ;;  %v10072_v53 = vsel %vm11333_vm0, %v10971_v4, %v10972_v39  ;;  %v10075_v31 = vmul.f32 %v7423_v22, %v11351_v26  ;;  %v10079_v47 = vmul.f32 %v9950_v17, %v11352_v60  ;;  %v11356_v39 = vld [vmem:[#allocation40_spill] sm:$0xff]  ;;  %v11358_v26 = vld [vmem:[#allocation39_spill] sm:$0xff] }
 0x74e   : > { %v4040_v38 = vrot.slane %v9983_v21, 1  ;;  %4293 = vrot.lane.b32.xlu0 %v4255_v1, %s7468_s24  ;;  %v4031_v16 = vsel %vm11353_vm10, %v4028_v44, %v4030_v62  ;;  %v4033_v48 = vsel %vm11354_vm7, %v4030_v62, %v4032_v9  ;;  %v4027_v35 = vsel %vm11343_vm5, %v4024_v3, %v4026_v56  ;;  %vm11363_vm10 = vmmov %vm11343_vm5 }
 0x74f   : > { %v4029_v4 = vsel %vm11355_vm9, %v4026_v56, %v4028_v44  ;;  %vm11357_vm3 = vnez %v11356_v39  ;;  %vm11359_vm12 = vnez %v11358_v26  ;;  %v10977_v60 = vrot.slane %v10064_v27, 7  ;;  %v11361_v56 = vld [vmem:[#allocation55_spill] sm:$0xff]  ;;  %vm11364_vm7 = vmmov %vm11343_vm5  ;;  %v11365_v26 = vld [vmem:[#allocation46_spill] sm:$0xff] }
 0x750   : > { %v4108_v22 = vsel %vm11357_vm3, 0.0, %v4033_v48  ;;  %v4106_v5 = vsel %vm11359_vm12, 0.0, %v4029_v4  ;;  %v10978_v17 = vrot.slane %v10075_v31, 7  ;;  %v4164_v0 = vpack.c.bf16 %v10075_v31, %v10064_v27  ;;  %v11362_v48 = vld [vmem:[#allocation56_spill] sm:$0xff]  ;;  %vm11368_vm9 = vmmov %vm11364_vm7 }
 0x751   : > { %v4258_v58 = vpack.c.bf16 %v4108_v22, %v4031_v16  ;;  %v4257_v1 = vpack.c.bf16 %v4106_v5, %v4027_v35  ;;  %v10976_v62 = vrot.slane %v10079_v47, 7  ;;  %4203 = vrot.lane.b32.xlu1 %v4162_v36, %s7467_s19  ;;  %v4163_v39 = vpack.c.bf16 %v10079_v47, %v9954_v41  ;;  %vm11369_vm3 = vmmov %vm11364_vm7 }
 0x752   : > { %v10102_v3 = vsel %vm11360_vm4, %v10978_v17, %v10975_v28  ;;  %v4036_v4 = vrot.slane %v10064_v27, 1  ;;  %v4038_v5 = vrot.slane %v10075_v31, 1  ;;  %4201 = vrot.lane.b32.xlu0 %v4161_v30, %s7467_s19  ;;  %v4034_v44 = vrot.slane %v10079_v47, 1  ;;  %vm11373_vm4 = vmmov %vm11333_vm0 }
 0x753   : > { %v10114_v36 = vsel %vm11333_vm0, %v10976_v62, %v10977_v60  ;;  %v10119_v16 = vmul.f32 %v9988_v2, %v11361_v56  ;;  %v10123_v35 = vmul.f32 %v10002_v37, %v11362_v48  ;;  %v10129_v28 = vmul.f32 %v9980_v6, %v11365_v26  ;;  %v11366_v60 = vld [vmem:[#allocation41_spill] sm:$0xff] }
 0x754   : > { %v4039_v22 = vsel %vm11363_vm10, %v4036_v4, %v4038_v5  ;;  %v4041_v30 = vsel %vm11364_vm7, %v4038_v5, %v4040_v38  ;;  %v4048_v62 = vrot.slane %v10029_v54, 1  ;;  %vm11367_vm5 = vnez %v11366_v60  ;;  %vm11376_vm10 = vmmov %vm11333_vm0 }
 0x755   : > { %v4112_v17 = vsel %vm11367_vm5, 0.0, %v4041_v30  ;;  %v4035_v2 = vsel %vm11368_vm9, %v4032_v9, %v4034_v44  ;;  %v4037_v56 = vsel %vm11369_vm3, %v4034_v44, %v4036_v4  ;;  %v10981_v37 = vrot.slane %v10119_v16, 7  ;;  %4299 = vrot.lane.b32.xlu1 %v4258_v58, %s7468_s24  ;;  %vm11377_vm7 = vmmov %vm11369_vm3 }
 0x756   : > { %v4260_v48 = vpack.c.bf16 %v4112_v17, %v4039_v22  ;;  %vm11371_vm12 = vnez %v11370_v40  ;;  %v3918_v6 = vrot.slane %v10123_v35, 7  ;;  %v4166_v26 = vpack.c.bf16 %v10123_v35, %v10119_v16  ;;  %4297 = vrot.lane.b32.xlu0 %v4257_v1, %s7468_s24  ;;  %vm11378_vm5 = vmmov %vm11369_vm3 }
 0x757   : > { %v4110_v5 = vsel %vm11371_vm12, 0.0, %v4037_v56  ;;  %v10980_v9 = vrot.slane %v10129_v28, 7  ;;  %v4165_v4 = vpack.c.bf16 %v10129_v28, %v9983_v21  ;;  %v4044_v44 = vrot.slane %v10119_v16, 1  ;;  %vm11379_vm9 = vmmov %vm11369_vm3 }
 0x758   : > { %v4259_v60 = vpack.c.bf16 %v4110_v5, %v4035_v2  ;;  %v11372_v58 = vrot.slane %v10029_v54, 7  ;;  %v4046_v17 = vrot.slane %v10123_v35, 1  ;;  %v4042_v22 = vrot.slane %v10129_v28, 1  ;;  %v11448_v35 = vld [vmem:[#allocation51_spill] sm:$0xff] }
 0x759   : > { %v10159_v1 = vmul.f32 %v10034_v10, %v9654_v50  ;;  %v10166_v30 = vsel %vm11333_vm0, %v10980_v9, %v10981_v37  ;;  %v10170_v2 = vmul.f32 %v10043_v12, %v9657_v29  ;;  %v10174_v56 = vmul.f32 %v10026_v8, %v9651_v14  ;;  %4207 = vrot.lane.b32.xlu1 %v4164_v0, %s7467_s19  ;;  %v11380_v14 = vld [vmem:[#allocation62_spill] sm:$0xff] }
 0x75a   : > { %v10153_v40 = vsel %vm11373_vm4, %v3918_v6, %v11372_v58  ;;  %v11374_v5 = vrot.slane %v9852_v45, 7  ;;  %v11375_v50 = vrot.slane %v9845_v18, 7  ;;  %v4047_v58 = vsel %vm11377_vm7, %v4044_v44, %v4046_v17  ;;  %4205 = vrot.lane.b32.xlu0 %v4163_v39, %s7467_s19  ;;  %v11382_v45 = vld [vmem:[#allocation61_spill] sm:$0xff]  ;;  %vm11388_vm7 = vmmov %vm11333_vm0 }
 0x75b   : > { %v4049_v9 = vsel %vm11378_vm5, %v4046_v17, %v4048_v62  ;;  %v4043_v37 = vsel %vm11379_vm9, %v4040_v38, %v4042_v22  ;;  %v4045_v29 = vsel %vm11369_vm3, %v4042_v22, %v4044_v44  ;;  %vm11381_vm12 = vnez %v11380_v14  ;;  %vm11391_vm5 = vmmov %vm11333_vm0 }
 0x75c   : > { %v3879_v10 = vsel %vm11376_vm10, %v11375_v50, %v11374_v5  ;;  %v4116_v8 = vsel %vm11381_vm12, 0.0, %v4049_v9  ;;  %vm11383_vm4 = vnez %v11382_v45  ;;  %v3924_v12 = vrot.slane %v10159_v1, 7  ;;  %vm11392_vm9 = vmmov %vm11369_vm3 }
 0x75d   : > { %v4114_v18 = vsel %vm11383_vm4, 0.0, %v4045_v29  ;;  %v3926_v0 = vrot.slane %v10170_v2, 7  ;;  %v4262_v5 = vpack.c.bf16 %v4116_v8, %v4047_v58  ;;  %v10982_v38 = vrot.slane %v10174_v56, 7  ;;  %4303 = vrot.lane.b32.xlu1 %v4260_v48, %s7468_s24  ;;  %v11384_v58 = vld [vmem:[#allocation42_spill] sm:$0xff]  ;;  %vm11393_vm12 = vmmov %vm11369_vm3 }
 0x75e   : > { %v4261_v50 = vpack.c.bf16 %v4114_v18, %v4043_v37  ;;  %v4052_v44 = vrot.slane %v10159_v1, 1  ;;  %v4054_v9 = vrot.slane %v10170_v2, 1  ;;  %v4050_v22 = vrot.slane %v10174_v56, 1  ;;  %4301 = vrot.lane.b32.xlu0 %v4259_v60, %s7468_s24  ;;  %vm11394_vm4 = vmmov %vm11369_vm3 }
 0x75f   : > { %v3925_v37 = vsel %vm11333_vm0, %v10982_v38, %v3924_v12  ;;  %vm11385_vm10 = vnez %v11384_v58  ;;  %v11386_v14 = vrot.slane %v9864_v63, 7  ;;  %v11387_v8 = vrot.slane %v9765_v13, 7 }
 0x760   : > { %v3967_v29 = vsel %vm11385_vm10, 0.0, %v9890_v33  ;;  %v11389_v18 = vrot.slane %v9910_v23, 7  ;;  %v11390_v48 = vrot.slane %v9906_v52, 7  ;;  %v4055_v17 = vsel %vm11392_vm9, %v4052_v44, %v4054_v9 }
 0x761   : > { %v3875_v45 = vsel %vm11388_vm7, %v11387_v8, %v11386_v14  ;;  %v4088_v38 = vsel %vm11369_vm3, %v4054_v9, 0.0  ;;  %v4051_v33 = vsel %vm11393_vm12, %v4048_v62, %v4050_v22  ;;  %v4053_v63 = vsel %vm11394_vm4, %v4050_v22, %v4052_v44  ;;  %v11398_v9 = vld [vmem:[#allocation66_spill] sm:$0xff]  ;;  %4211 = vrot.lane.b32.xlu1 %v4166_v26, %s7467_s19  ;;  %vm11409_vm7 = vmmov %vm11391_vm5 }
 0x762   : > { %v3887_v39 = vsel %vm11391_vm5, %v11390_v48, %v11389_v18  ;;  %v4120_v13 = vsel %vm8825_vm8, 0.0, %v4088_v38  ;;  %v4118_v23 = vsel %vm8803_vm1, 0.0, %v4053_v63  ;;  %v4124_v8 = vpack.c.bf16 %v3879_v10, %v3967_v29  ;;  %vm11402_vm8 = vmmov %vm11391_vm5  ;;  %4209 = vrot.lane.b32.xlu0 %v4165_v4, %s7467_s19 }
 0x763   : > { %v11397_v52 = vsel %vm11321_vm11, 0.0, %v9789_v25  ;;  %v4264_v18 = vpack.c.bf16 %v4120_v13, %v4055_v17  ;;  %v4263_v48 = vpack.c.bf16 %v4118_v23, %v4051_v33  ;;  %vm11399_vm0 = vnez %v11398_v9  ;;  %v11405_v25 = vld [vmem:[#allocation64_spill] sm:$0xff]  ;;  %vm11414_vm9 = vmmov %vm11409_vm7 }
 0x764   : > { %v4123_v60 = vpack.c.bf16 %v3875_v45, %v11397_v52  ;;  %v3971_v62 = vsel %vm11399_vm0, 0.0, %v9947_v20  ;;  %v11400_v44 = vrot.slane %v9913_v43, 7  ;;  %v11401_v22 = vrot.slane %v9856_v51, 7  ;;  %v11410_v51 = vld [vmem:[#allocation68_spill] sm:$0xff]  ;;  %vm11420_vm4 = vmmov %vm11409_vm7 }
 0x765   : > { %vm11403_vm1 = vcmask 261120   ;;  %v4126_v61 = vpack.c.bf16 %v3887_v39, %v3971_v62  ;;  %vm11406_vm11 = vnez %v11405_v25  ;;  %v11407_v17 = vrot.slane %v9964_v19, 7  ;;  %v11415_v19 = vld [vmem:[#allocation43_spill] sm:$0xff]  ;;  %v11421_v13 = vld [vmem:[#allocation44_spill] sm:$0xff]  ;;  %4307 = vrot.lane.b32.xlu1 %v4262_v5, %s7468_s24 }
 0x766   : > { %v3883_v38 = vsel %vm11402_vm8, %v11401_v22, %v11400_v44  ;;  %4140 = vst.msk [vmem:[#allocation2 + $0x20] sm:$0xff] %vm11403_vm1, %v4124_v8  ;;  %vm11404_vm10 = vmmov %vm11403_vm1  ;;  %v3969_v10 = vsel %vm11406_vm11, 0.0, %v9879_v24  ;;  %v11408_v20 = vrot.slane %v9961_v55, 7  ;;  %vm11411_vm5 = vnez %v11410_v51  ;;  %4305 = vrot.lane.b32.xlu0 %v4261_v50, %s7468_s24 }
 0x767   : > { %4139 = vst.msk [vmem:[#allocation2 + $0x18] sm:$0xff] %vm11404_vm10, %v4123_v60  ;;  %v3975_v29 = vsel %vm11411_vm5, 0.0, %v10011_v34  ;;  %v4125_v26 = vpack.c.bf16 %v3883_v38, %v3969_v10  ;;  %v11412_v39 = vrot.slane %v9967_v49, 7  ;;  %v11413_v33 = vrot.slane %v9894_v57, 7  ;;  %vm11417_vm12 = vmmov %vm11403_vm1 }
 0x768   : > { %v3895_v43 = vsel %vm11409_vm7, %v11408_v20, %v11407_v17  ;;  %vm11416_vm3 = vnez %v11415_v19  ;;  %4142 = vst.msk [vmem:[#allocation2 + $0x30] sm:$0xff] %vm11417_vm12, %v4126_v61  ;;  %v11418_v58 = vrot.slane %v10020_v32, 7  ;;  %v11419_v34 = vrot.slane %v10017_v42, 7  ;;  %vm11425_vm8 = vmmov %vm11420_vm4  ;;  %v11427_v32 = vld [vmem:[#allocation69_spill] sm:$0xff] }
 0x769   : > { %v4128_v45 = vpack.c.bf16 %v3895_v43, %v3975_v29  ;;  %v3891_v24 = vsel %vm11414_vm9, %v11413_v33, %v11412_v39  ;;  %v3973_v55 = vsel %vm11416_vm3, 0.0, %v9939_v15  ;;  %vm11422_vm0 = vnez %v11421_v13  ;;  %4141 = vst.msk [vmem:[#allocation2 + $0x28] sm:$0xff] %vm11403_vm1, %v4125_v26  ;;  %vm11426_vm10 = vmmov %vm11403_vm1  ;;  %v7150_v29 = vld [vmem:[%s10818_s8 + $0x10] sm:$0xff]   ;;  %v7151_v26 = vld [vmem:[%s10818_s8 + $0x18] sm:$0xff]  }
 0x76a   : > { %v4127_v63 = vpack.c.bf16 %v3891_v24, %v3973_v55  ;;  %v3903_v4 = vsel %vm11420_vm4, %v11419_v34, %v11418_v58  ;;  %v3979_v49 = vsel %vm11422_vm0, 0.0, %v10072_v53  ;;  %v11423_v57 = vrot.slane %v10024_v11, 7  ;;  %vm11431_vm7 = vmmov %vm11420_vm4  ;;  %v7152_v33 = vld [vmem:[%s10818_s8 + $0x20] sm:$0xff]   ;;  %v7153_v55 = vld [vmem:[%s10818_s8 + $0x28] sm:$0xff]  }
 0x76b   : > { %v11424_v14 = vrot.slane %v9918_v46, 7  ;;  %4144 = vst.msk [vmem:[#allocation2 + $0x40] sm:$0xff] %vm11426_vm10, %v4128_v45  ;;  %v4130_v15 = vpack.c.bf16 %v3903_v4, %v3979_v49  ;;  %vm11428_vm11 = vnez %v11427_v32  ;;  %v11429_v8 = vrot.slane %v10075_v31, 7  ;;  %vm11433_vm5 = vmmov %vm11403_vm1  ;;  %v10387_v34 = vld [vmem:[%s10818_s8 + $0x60] sm:$0xff]  }
 0x76c   : > { %v3977_v42 = vsel %vm11428_vm11, 0.0, %v9996_v7  ;;  %v11430_v52 = vrot.slane %v10064_v27, 7  ;;  %v3983_v46 = vsel %vm8854_vm6, 0.0, %v10114_v36  ;;  %4143 = vst.msk [vmem:[#allocation2 + $0x38] sm:$0xff] %vm11433_vm5, %v4127_v63  ;;  %v11434_v62 = vrot.slane %v10079_v47, 7  ;;  %vm11436_vm9 = vmmov %vm11420_vm4  ;;  %v11437_v27 = vld [vmem:[#allocation48_spill] sm:$0xff] }
 0x76d   : > { %v3899_v23 = vsel %vm11425_vm8, %v11424_v14, %v11423_v57  ;;  %v11435_v7 = vrot.slane %v9954_v41, 7  ;;  %vm11438_vm3 = vnez %v11437_v27  ;;  %vm11439_vm12 = vmmov %vm11403_vm1  ;;  %v11440_v5 = vrot.slane %v10119_v16, 7  ;;  %v11442_v47 = vld [vmem:[#allocation52_spill] sm:$0xff] }
 0x76e   : > { %v3911_v53 = vsel %vm11431_vm7, %v11430_v52, %v11429_v8  ;;  %v4129_v60 = vpack.c.bf16 %v3899_v23, %v3977_v42  ;;  %v3981_v44 = vsel %vm11438_vm3, 0.0, %v10054_v59  ;;  %4146 = vst.msk [vmem:[#allocation2 + $0x50] sm:$0xff] %vm11439_vm12, %v4130_v15  ;;  %vm11441_vm6 = vmmov %vm11420_vm4  ;;  %vm11443_vm4 = vnez %v11442_v47 }
 0x76f   : > { %v4132_v9 = vpack.c.bf16 %v3911_v53, %v3983_v46  ;;  %v3907_v31 = vsel %vm11436_vm9, %v11435_v7, %v11434_v62  ;;  %v3919_v22 = vsel %vm11441_vm6, %v11440_v5, %v3918_v6  ;;  %v3987_v41 = vsel %vm11443_vm4, 0.0, %v10166_v30  ;;  %vm11446_vm0 = vmmov %vm11441_vm6 }
 0x770   : > { %v4131_v36 = vpack.c.bf16 %v3907_v31, %v3981_v44  ;;  %v11444_v38 = vrot.slane %v10129_v28, 7  ;;  %v11445_v61 = vrot.slane %v9983_v21, 7  ;;  %vm11447_vm8 = vmmov %vm11403_vm1  ;;  %v4134_v50 = vpack.c.bf16 %v3919_v22, %v3987_v41 }
 0x771   : > { %4145 = vst.msk [vmem:[#allocation2 + $0x48] sm:$0xff] %vm11447_vm8, %v4129_v60  ;;  %vm11449_vm10 = vnez %v11448_v35  ;;  %vm11450_vm11 = vmmov %vm11446_vm0  ;;  %v3991_v21 = vsel %vm8915_vm15, 0.0, %v3925_v37  ;;  %v11453_v10 = vrot.slane %v10174_v56, 7  ;;  %v11454_v17 = vrot.slane %v10029_v54, 7 }
 0x772   : > { %v3915_v59 = vsel %vm11446_vm0, %v11445_v61, %v11444_v38  ;;  %4148 = vst.msk [vmem:[#allocation2 + $0x60] sm:$0xff] %vm11403_vm1, %v4132_v9  ;;  %v3985_v16 = vsel %vm11449_vm10, 0.0, %v10102_v3  ;;  %v3927_v6 = vsel %vm11450_vm11, %v3924_v12, %v3926_v0  ;;  %vm11452_vm7 = vmmov %vm11403_vm1  ;;  %v3989_v43 = vsel %vm8893_vm14, 0.0, %v10153_v40  ;;  %v7162_v3 = vld [vmem:[%s10820_s10] sm:$0xff]  }
 0x773   : > { %4147 = vst.msk [vmem:[#allocation2 + $0x58] sm:$0xff] %vm11452_vm7, %v4131_v36  ;;  %v4133_v30 = vpack.c.bf16 %v3915_v59, %v3985_v16  ;;  %v4136_v25 = vpack.c.bf16 %v3927_v6, %v3991_v21  ;;  %vm11455_vm5 = vmmov %vm11446_vm0  ;;  %v11457_v12 = vpack.c.bf16 %v10170_v2, %v10159_v1  ;;  %v11459_v37 = vpack.c.bf16 %v10174_v56, %v10029_v54 }
 0x774   : > { %v3923_v20 = vsel %vm11455_vm5, %v11454_v17, %v11453_v10  ;;  %vm11458_vm15 = vmmov %vm11403_vm1  ;;  %vm11463_vm14 = vcmask 785408   ;;  %v7160_v10 = vld [vmem:[%s10821_s11] sm:$0xff]   ;;  %v7161_v17 = vld [vmem:[%s10821_s11 + $0x8] sm:$0xff]  }
 0x775   : > { %4215 = vrot.lane.b32.xlu1 %v11457_v12, %s7467_s19  ;;  %4150 = vst.msk [vmem:[#allocation2 + $0x70] sm:$0xff] %vm11458_vm15, %v4134_v50  ;;  %v4135_v0 = vpack.c.bf16 %v3923_v20, %v3989_v43  ;;  %4213 = vrot.lane.b32.xlu0 %v11459_v37, %s7467_s19  ;;  %vm11460_vm9 = vmmov %vm11403_vm1  ;;  %v7440_v20 = vld [vmem:[%s7577_s16] sm:$0xff]   ;;  %v7155_v43 = vld [vmem:[%s10818_s8 + $0x68] sm:$0xff]  }
 0x776   : > { %4149 = vst.msk [vmem:[#allocation2 + $0x68] sm:$0xff] %vm11460_vm9, %v4133_v30  ;;  %vm11461_vm3 = vmmov %vm11403_vm1  ;;  %6850 = vmatprep.subr.bf16.mxu0 %v7160_v10  ;;  %v7441_v12 = vld [vmem:[%s7577_s16 + $0x8] sm:$0xff]   ;;  %v7157_v37 = vld [vmem:[%s10818_s8 + $0x78] sm:$0xff]  }
 0x777   : > { %4152 = vst.msk [vmem:[#allocation2 + $0x80] sm:$0xff] %vm11461_vm3, %v4136_v25  ;;  %vm11462_vm12 = vmmov %vm11403_vm1  ;;  %v4345_v25 = vld [vmem:[#allocation2] sm:$0xff]  ;;  %6851 = vmatpush3.bf16.msra.mxu0 %v7160_v10 }
 0x778   : > { %4151 = vst.msk [vmem:[#allocation2 + $0x78] sm:$0xff] %vm11462_vm12, %v4135_v0  ;;  %vm11464_vm6 = vmmov %vm11463_vm14  ;;  %6852 = vmatprep.subr.bf16.mxu0 %v7161_v17  ;;  %v7156_v0 = vld [vmem:[%s10818_s8 + $0x70] sm:$0xff]  }
 0x779   : > { %4311 = vrot.lane.b32.xlu1 %v4264_v18, %s7468_s24  ;;  %4309 = vrot.lane.b32.xlu0 %v4263_v48, %s7468_s24  ;;  %v7149_v18 = vld [vmem:[%s10818_s8 + $0x8] sm:$0xff]   ;;  %vm11466_vm4 = vmmov %vm11464_vm6 }
 0x77a   : > { %v11465_v48 = vld [vmem:[#allocation70_spill] sm:$0xff]  ;;  %vm11467_vm0 = vmmov %vm11466_vm4 }
 0x77b   : > { %vm11468_vm8 = vmmov %vm11467_vm0  ;;  %6853 = vmatpush3.bf16.msra.mxu0 %v7161_v17 }
 0x77c   : > { %vm11469_vm1 = vmmov %vm11467_vm0  ;;  %6886 = vmatprep.subr.bf16.mxu0 %v7162_v3 }
 0x77d   : > { %vm11470_vm10 = vmmov %vm11467_vm0 }
 0x77e   : > { %vm11471_vm11 = vmmov %vm11467_vm0 }
 0x77f   : > { %vm11472_vm7 = vmmov %vm11467_vm0 }
 0x780   : > { %vm11473_vm5 = vmmov %vm11467_vm0 }
 0x781   : > { %vm11474_vm15 = vmmov %vm11467_vm0 }
 0x782   : > { %vm11475_vm9 = vmmov %vm11467_vm0 }
 0x783   : > { %vm11476_vm3 = vmmov %vm11467_vm0 }
 0x784   : > { %vm11477_vm12 = vmmov %vm11467_vm0 }
 0x78b   : > { %v4188_v40 = vpop.permute.xlu1 %4187 }
 0x78c   : > { %4234 = vst.msk [vmem:[#allocation2 + $0x10] sm:$0xff] %vm2193_vm2, %v4188_v40  ;;  %v7158_v40 = vld [vmem:[%s10818_s8 + $0x80] sm:$0xff]  }
 0x790   : > { %v4284_v1 = vpop.permute.xlu1 %4283 }
 0x791   : > { %4330 = vst.msk [vmem:[#allocation2 + $0x10] sm:$0xff] %vm2290_vm13, %v4284_v1  ;;  %v7159_v1 = vld [vmem:[%s10818_s8 + $0x88] sm:$0xff]  }
 0x792   : > { %v4186_v2 = vpop.permute.xlu0 %4185 }
 0x793   : > { %4233 = vst.msk [vmem:[#allocation2 + $0x8] sm:$0xff] %vm2193_vm2, %v4186_v2  ;;  %v4847_v2 = vld [vmem:[#allocation2 + $0x88] sm:$0xff] }
 0x796   : > { %v4282_v54 = vpop.permute.xlu0 %4281 }
 0x797   : > { %4329 = vst.msk [vmem:[#allocation2 + $0x8] sm:$0xff] %vm2290_vm13, %v4282_v54  ;;  %v7163_v54 = vld [vmem:[%s10820_s10 + $0x8] sm:$0xff]  }
 0x798   : > { %v10355_v56 = vld [vmem:[#allocation2 + $0x10] sm:$0xff] }
 0x79e   : > { %v10357_v51 = vld [vmem:[#allocation2 + $0x8] sm:$0xff] }
 0x79f   : > { %6730 = vmatprep.mubr.msk.bf16.mxu1 %vm11463_vm14, %v10357_v51  ;;  %vm11479_vm14 = vmmov %vm11467_vm0 }
 0x7a0   : > { %6731 = vmatmul.mubr.msk.bf16.vlgmr.msra.gmra.mrb[8].mxu1 %vm11464_vm6, %v10355_v56  ;;  %vm11481_vm6 = vcmask 261120  }
 0x7a1   : > { %6763 = vmatpush3.bf16.msra.mxu1 %v11465_v48  ;;  %6854 = vmatprep.mubr.msk.bf16.mxu0 %vm11481_vm6, %v7440_v20  ;;  %v7445_v48 = vld [vmem:[%s7577_s16 + $0x28] sm:$0xff]  }
 0x7a2   : > { %6764 = vmatprep.subr.bf16.mxu1 %v7149_v18 }
 0x7a5   : > { %6765 = vmatpush3.bf16.msra.mxu1 %v7149_v18  ;;  %v7444_v18 = vld [vmem:[%s7577_s16 + $0x20] sm:$0xff]  }
 0x7a6   : > { %6766 = vmatprep.subr.bf16.mxu1 %v7150_v29 }
 0x7a7   : > { %v4192_v45 = vpop.permute.xlu1 %4191 }
 0x7a8   : > { %4236 = vst.msk [vmem:[#allocation2 + $0x20] sm:$0xff] %vm2193_vm2, %v4192_v45  ;;  %v7448_v45 = vld [vmem:[%s7577_s16 + $0x40] sm:$0xff]  }
 0x7a9   : > { %v4190_v39 = vpop.permute.xlu0 %4189  ;;  %6767 = vmatpush3.bf16.msra.mxu1 %v7150_v29  ;;  %v7446_v29 = vld [vmem:[%s7577_s16 + $0x30] sm:$0xff]  }
 0x7aa   : > { %4235 = vst.msk [vmem:[#allocation2 + $0x18] sm:$0xff] %vm2193_vm2, %v4190_v39  ;;  %6768 = vmatprep.subr.bf16.mxu1 %v7151_v26  ;;  %v7449_v39 = vld [vmem:[%s7577_s16 + $0x48] sm:$0xff]  }
 0x7ac   : > { %v4288_v24 = vpop.permute.xlu1 %4287 }
 0x7ad   : > { %4332 = vst.msk [vmem:[#allocation2 + $0x20] sm:$0xff] %vm2290_vm13, %v4288_v24  ;;  %6769 = vmatpush3.bf16.msra.mxu1 %v7151_v26  ;;  %v7447_v26 = vld [vmem:[%s7577_s16 + $0x38] sm:$0xff]  }
 0x7ae   : > { %6770 = vmatprep.subr.bf16.mxu1 %v7152_v33  ;;  %v7451_v24 = vld [vmem:[%s7577_s16 + $0x58] sm:$0xff]  }
 0x7af   : > { %v4286_v19 = vpop.permute.xlu0 %4285 }
 0x7b0   : > { %4331 = vst.msk [vmem:[#allocation2 + $0x18] sm:$0xff] %vm2290_vm13, %v4286_v19  ;;  %v7452_v19 = vld [vmem:[%s7577_s16 + $0x60] sm:$0xff]  }
 0x7b1   : > { %v4196_v63 = vpop.permute.xlu1 %4195  ;;  %6771 = vmatpush3.bf16.msra.mxu1 %v7152_v33  ;;  %v7450_v33 = vld [vmem:[%s7577_s16 + $0x50] sm:$0xff]  }
 0x7b2   : > { %4238 = vst.msk [vmem:[#allocation2 + $0x30] sm:$0xff] %vm2193_vm2, %v4196_v63  ;;  %6772 = vmatprep.subr.bf16.mxu1 %v7153_v55  ;;  %v7454_v63 = vld [vmem:[%s7577_s16 + $0x70] sm:$0xff]  }
 0x7b3   : > { %v4194_v58 = vpop.permute.xlu0 %4193 }
 0x7b4   : > { %4237 = vst.msk [vmem:[#allocation2 + $0x28] sm:$0xff] %vm2193_vm2, %v4194_v58  ;;  %v10390_v4 = vld [vmem:[#allocation2 + $0x20] sm:$0xff]  ;;  %v7455_v58 = vld [vmem:[%s7577_s16 + $0x78] sm:$0xff]  }
 0x7b5   : > { %6773 = vmatpush3.bf16.msra.mxu1 %v7153_v55  ;;  %v7453_v55 = vld [vmem:[%s7577_s16 + $0x68] sm:$0xff]  }
 0x7b6   : > { %6806 = vmatprep.subr.bf16.mxu1 %v10387_v34 }
 0x7b7   : > { %v4292_v13 = vpop.permute.xlu1 %4291  ;;  %v10392_v49 = vld [vmem:[#allocation2 + $0x18] sm:$0xff] }
 0x7b8   : > { %4334 = vst.msk [vmem:[#allocation2 + $0x30] sm:$0xff] %vm2290_vm13, %v4292_v13  ;;  %v4290_v57 = vpop.permute.xlu0 %4289  ;;  %6734 = vmatprep.mubr.msk.bf16.mxu1 %vm11466_vm4, %v10392_v49  ;;  %vm11482_vm4 = vmmov %vm11467_vm0 }
 0x7b9   : > { %4333 = vst.msk [vmem:[#allocation2 + $0x28] sm:$0xff] %vm2290_vm13, %v4290_v57  ;;  %6735 = vmatmul.mubr.msk.bf16.gmra.mrb[12].mxu1 %vm11467_vm0, %v10390_v4 }
 0x7bb   : > { %v4200_v14 = vpop.permute.xlu1 %4199 }
 0x7bc   : > { %4240 = vst.msk [vmem:[#allocation2 + $0x40] sm:$0xff] %vm2193_vm2, %v4200_v14  ;;  %v4198_v23 = vpop.permute.xlu0 %4197 }
 0x7bd   : > { %4239 = vst.msk [vmem:[#allocation2 + $0x38] sm:$0xff] %vm2193_vm2, %v4198_v23 }
 0x7bf   : > { %v4296_v15 = vpop.permute.xlu1 %4295  ;;  %v10403_v32 = vld [vmem:[#allocation2 + $0x30] sm:$0xff] }
 0x7c0   : > { %4336 = vst.msk [vmem:[#allocation2 + $0x40] sm:$0xff] %vm2290_vm13, %v4296_v15  ;;  %v4294_v42 = vpop.permute.xlu0 %4293  ;;  %v10406_v8 = vld [vmem:[#allocation2 + $0x28] sm:$0xff] }
 0x7c1   : > { %4335 = vst.msk [vmem:[#allocation2 + $0x38] sm:$0xff] %vm2290_vm13, %v4294_v42  ;;  %6738 = vmatprep.mubr.msk.bf16.mxu1 %vm11468_vm8, %v10406_v8  ;;  %vm11483_vm8 = vmmov %vm11481_vm6  ;;  %v11526_v42 = vld [vmem:[#allocation7_spill] sm:$0xff] }
 0x7c2   : > { %6739 = vmatmul.mubr.msk.bf16.gmra.mrb[16].mxu1 %vm11469_vm1, %v10403_v32  ;;  %6855 = vmatmul.mubr.msk.bf16.vlgmr.msra.gmra.mrb[36].mxu0 %vm11483_vm8, %v7441_v12  ;;  %vm11484_vm1 = vmmov %vm11467_vm0 }
 0x7c3   : > { %v4204_v52 = vpop.permute.xlu1 %4203  ;;  %6887 = vmatpush3.bf16.msra.mxu0 %v7162_v3  ;;  %vm11496_vm6 = vmmov %vm11467_vm0 }
 0x7c4   : > { %4242 = vst.msk [vmem:[#allocation2 + $0x50] sm:$0xff] %vm2193_vm2, %v4204_v52  ;;  %v4202_v53 = vpop.permute.xlu0 %4201  ;;  %vm11498_vm8 = vmmov %vm11467_vm0  ;;  %6888 = vmatprep.subr.bf16.mxu0 %v7163_v54  ;;  %v11527_v52 = vld [vmem:[#allocation8_spill] sm:$0xff] }
 0x7c5   : > { %4241 = vst.msk [vmem:[#allocation2 + $0x48] sm:$0xff] %vm2193_vm2, %v4202_v53 }
 0x7c7   : > { %v4300_v11 = vpop.permute.xlu1 %4299  ;;  %v10415_v46 = vld [vmem:[#allocation2 + $0x40] sm:$0xff]  ;;  %6889 = vmatpush3.bf16.msra.mxu0 %v7163_v54 }
 0x7c8   : > { %4338 = vst.msk [vmem:[#allocation2 + $0x50] sm:$0xff] %vm2290_vm13, %v4300_v11  ;;  %v4298_v60 = vpop.permute.xlu0 %4297  ;;  %v10418_v9 = vld [vmem:[#allocation2 + $0x38] sm:$0xff]  ;;  %v11528_v11 = vld [vmem:[#allocation5_spill] sm:$0xff] }
 0x7c9   : > { %4337 = vst.msk [vmem:[#allocation2 + $0x48] sm:$0xff] %vm2290_vm13, %v4298_v60  ;;  %6742 = vmatprep.mubr.msk.bf16.mxu1 %vm11470_vm10, %v10418_v9  ;;  %vm11485_vm10 = vmmov %vm11467_vm0  ;;  %v11529_v60 = vld [vmem:[#allocation6_spill] sm:$0xff]  ;;  %v11539_v54 = vld [vmem:[#allocation13_spill] sm:$0xff] }
 0x7ca   : > { %6743 = vmatmul.mubr.msk.bf16.gmra.mrb[20].mxu1 %vm11471_vm11, %v10415_v46  ;;  %vm11486_vm11 = vmmov %vm11467_vm0 }
 0x7cb   : > { %v4208_v62 = vpop.permute.xlu1 %4207 }
 0x7cc   : > { %4244 = vst.msk [vmem:[#allocation2 + $0x60] sm:$0xff] %vm2193_vm2, %v4208_v62  ;;  %v4206_v7 = vpop.permute.xlu0 %4205 }
 0x7cd   : > { %4243 = vst.msk [vmem:[#allocation2 + $0x58] sm:$0xff] %vm2193_vm2, %v4206_v7 }
 0x7cf   : > { %v4304_v31 = vpop.permute.xlu1 %4303  ;;  %v10427_v27 = vld [vmem:[#allocation2 + $0x50] sm:$0xff] }
 0x7d0   : > { %4340 = vst.msk [vmem:[#allocation2 + $0x60] sm:$0xff] %vm2290_vm13, %v4304_v31  ;;  %v4302_v44 = vpop.permute.xlu0 %4301  ;;  %v10430_v36 = vld [vmem:[#allocation2 + $0x48] sm:$0xff] }
 0x7d1   : > { %4339 = vst.msk [vmem:[#allocation2 + $0x58] sm:$0xff] %vm2290_vm13, %v4302_v44  ;;  %6746 = vmatprep.mubr.msk.bf16.mxu1 %vm11472_vm7, %v10430_v36  ;;  %vm11487_vm7 = vmmov %vm11467_vm0 }
 0x7d2   : > { %6747 = vmatmul.mubr.msk.bf16.gmra.mrb[24].mxu1 %vm11473_vm5, %v10427_v27  ;;  %vm11488_vm5 = vmmov %vm11467_vm0 }
 0x7d3   : > { %v4212_v5 = vpop.permute.xlu1 %4211 }
 0x7d4   : > { %4246 = vst.msk [vmem:[#allocation2 + $0x70] sm:$0xff] %vm2193_vm2, %v4212_v5  ;;  %v4210_v22 = vpop.permute.xlu0 %4209 }
 0x7d5   : > { %4245 = vst.msk [vmem:[#allocation2 + $0x68] sm:$0xff] %vm2193_vm2, %v4210_v22 }
 0x7d7   : > { %v4308_v47 = vpop.permute.xlu1 %4307  ;;  %v10439_v41 = vld [vmem:[#allocation2 + $0x60] sm:$0xff] }
 0x7d8   : > { %4342 = vst.msk [vmem:[#allocation2 + $0x70] sm:$0xff] %vm2290_vm13, %v4308_v47  ;;  %v4306_v38 = vpop.permute.xlu0 %4305  ;;  %v10442_v61 = vld [vmem:[#allocation2 + $0x58] sm:$0xff] }
 0x7d9   : > { %4341 = vst.msk [vmem:[#allocation2 + $0x68] sm:$0xff] %vm2290_vm13, %v4306_v38  ;;  %6750 = vmatprep.mubr.msk.bf16.mxu1 %vm11474_vm15, %v10442_v61  ;;  %vm11489_vm15 = vmmov %vm11467_vm0  ;;  %v11532_v38 = vld [vmem:[#allocation11_spill] sm:$0xff] }
 0x7da   : > { %6751 = vmatmul.mubr.msk.bf16.gmra.mrb[28].mxu1 %vm11475_vm9, %v10439_v41  ;;  %vm11490_vm9 = vmmov %vm11467_vm0 }
 0x7df   : > { %v10451_v16 = vld [vmem:[#allocation2 + $0x70] sm:$0xff] }
 0x7e0   : > { %v10454_v28 = vld [vmem:[#allocation2 + $0x68] sm:$0xff] }
 0x7e1   : > { %6754 = vmatprep.mubr.msk.bf16.mxu1 %vm11476_vm3, %v10454_v28  ;;  %vm11491_vm3 = vmmov %vm11467_vm0 }
 0x7e2   : > { %6755 = vmatmul.mubr.msk.bf16.gmra.mrb[32].mxu1 %vm11477_vm12, %v10451_v16  ;;  %vm11492_vm12 = vmmov %vm11467_vm0 }
 0x7e7   : > { %v4216_v59 = vpop.permute.xlu1 %4215  ;;  %v4214_v50 = vpop.permute.xlu0 %4213 }
 0x7e8   : > { %4248 = vst.msk [vmem:[#allocation2 + $0x80] sm:$0xff] %vm2193_vm2, %v4216_v59  ;;  %4247 = vst.msk [vmem:[#allocation2 + $0x78] sm:$0xff] %vm2193_vm2, %v4214_v50  ;;  %v11533_v59 = vld [vmem:[#allocation12_spill] sm:$0xff] }
 0x7e9   : > { %vm11478_vm2 = vmmov %vm11467_vm0 }
 0x7eb   : > { %v4312_v35 = vpop.permute.xlu1 %4311  ;;  %v4310_v6 = vpop.permute.xlu0 %4309 }
 0x7ec   : > { %4344 = vst.msk [vmem:[#allocation2 + $0x80] sm:$0xff] %vm2290_vm13, %v4312_v35  ;;  %4343 = vst.msk [vmem:[#allocation2 + $0x78] sm:$0xff] %vm2290_vm13, %v4310_v6  ;;  %v11534_v35 = vld [vmem:[#allocation9_spill] sm:$0xff]  ;;  %v11535_v6 = vld [vmem:[#allocation10_spill] sm:$0xff] }
 0x7ed   : > { %vm11480_vm13 = vmmov %vm11467_vm0 }
 0x7f3   : > { %v10461_v21 = vld [vmem:[#allocation2 + $0x80] sm:$0xff]  ;;  %v10463_v30 = vld [vmem:[#allocation2 + $0x78] sm:$0xff] }
 0x7f4   : > { %6758 = vmatprep.mubr.msk.bf16.mxu1 %vm11478_vm2, %v10463_v30  ;;  %vm11493_vm2 = vmmov %vm11467_vm0 }
 0x7f5   : > { %6759 = vmatmul.mubr.msk.bf16.gmra.mrb[36].mxu1 %vm11479_vm14, %v10461_v21  ;;  %vm11494_vm14 = vmmov %vm11467_vm0 }
 0x7f6   : > { %6774 = vmatprep.mubr.msk.bf16.mxu1 %vm11480_vm13, %v4345_v25  ;;  %vm11495_vm13 = vmmov %vm11467_vm0 }
 0x7fd   : > { %6775 = vmatmul.mubr.msk.bf16.vlgmr.msra.gmra.mrb[8].mxu1 %vm11482_vm4, %v10357_v51  ;;  %vm11497_vm4 = vmmov %vm11467_vm0  ;;  %v7443_v51 = vld [vmem:[%s7577_s16 + $0x18] sm:$0xff]  }
 0x7fe   : > { %6807 = vmatpush3.bf16.msra.mxu1 %v10387_v34  ;;  %6778 = vmatprep.mubr.msk.bf16.mxu1 %vm11467_vm0, %v10355_v56  ;;  %v10594_v34 = vld [vmem:[%s10819_s9] ss:$0 sm:$0xff] }
 0x7ff   : > { %6808 = vmatprep.subr.bf16.mxu1 %v7155_v43 }
 0x802   : > { %6809 = vmatpush3.bf16.msra.mxu1 %v7155_v43 }
 0x803   : > { %6810 = vmatprep.subr.bf16.mxu1 %v7156_v0 }
 0x805   : > { %6779 = vmatmul.mubr.msk.bf16.gmra.mrb[12].mxu1 %vm11484_vm1, %v10392_v49  ;;  %vm11499_vm1 = vmmov %vm11467_vm0 }
 0x806   : > { %6782 = vmatprep.mubr.msk.bf16.mxu1 %vm11485_vm10, %v10390_v4  ;;  %6811 = vmatpush3.bf16.msra.mxu1 %v7156_v0  ;;  %vm11500_vm10 = vmmov %vm11467_vm0 }
 0x807   : > { %6812 = vmatprep.subr.bf16.mxu1 %v7157_v37 }
 0x80a   : > { %6813 = vmatpush3.bf16.msra.mxu1 %v7157_v37  ;;  %v11537_v37 = vld [vmem:[#allocation15_spill] sm:$0xff] }
 0x80b   : > { %6814 = vmatprep.subr.bf16.mxu1 %v7158_v40 }
 0x80d   : > { %6783 = vmatmul.mubr.msk.bf16.gmra.mrb[16].mxu1 %vm11486_vm11, %v10406_v8  ;;  %vm11501_vm11 = vmmov %vm11467_vm0 }
 0x80e   : > { %6786 = vmatprep.mubr.msk.bf16.mxu1 %vm11487_vm7, %v10403_v32  ;;  %6815 = vmatpush3.bf16.msra.mxu1 %v7158_v40  ;;  %vm11502_vm7 = vmmov %vm11467_vm0 }
 0x80f   : > { %6816 = vmatprep.subr.bf16.mxu1 %v7159_v1 }
 0x812   : > { %6817 = vmatpush3.bf16.msra.mxu1 %v7159_v1  ;;  %v11538_v1 = vld [vmem:[#allocation16_spill] sm:$0xff] }
 0x813   : > { %6946 = vmatprep.subr.bf16.mxu1 %v7160_v10 }
 0x815   : > { %6787 = vmatmul.mubr.msk.bf16.gmra.mrb[20].mxu1 %vm11488_vm5, %v10418_v9  ;;  %vm11503_vm5 = vmmov %vm11467_vm0 }
 0x816   : > { %6790 = vmatprep.mubr.msk.bf16.mxu1 %vm11489_vm15, %v10415_v46  ;;  %vm11504_vm15 = vmmov %vm11467_vm0 }
 0x81d   : > { %6791 = vmatmul.mubr.msk.bf16.gmra.mrb[24].mxu1 %vm11490_vm9, %v10430_v36  ;;  %vm11505_vm9 = vmmov %vm11467_vm0 }
 0x81e   : > { %6794 = vmatprep.mubr.msk.bf16.mxu1 %vm11491_vm3, %v10427_v27  ;;  %vm11506_vm3 = vmmov %vm11467_vm0 }
 0x825   : > { %6795 = vmatmul.mubr.msk.bf16.gmra.mrb[28].mxu1 %vm11492_vm12, %v10442_v61  ;;  %vm11507_vm12 = vmmov %vm11467_vm0 }
 0x826   : > { %6798 = vmatprep.mubr.msk.bf16.mxu1 %vm11493_vm2, %v10439_v41  ;;  %vm11508_vm2 = vmmov %vm11467_vm0 }
 0x82d   : > { %6799 = vmatmul.mubr.msk.bf16.gmra.mrb[32].mxu1 %vm11494_vm14, %v10454_v28  ;;  %vm11509_vm14 = vmmov %vm11467_vm0 }
 0x82e   : > { %6802 = vmatprep.mubr.msk.bf16.mxu1 %vm11495_vm13, %v10451_v16  ;;  %vm11510_vm13 = vmmov %vm11467_vm0 }
 0x835   : > { %6803 = vmatmul.mubr.msk.bf16.gmra.mrb[36].mxu1 %vm11496_vm6, %v10463_v30  ;;  %vm11511_vm6 = vmmov %vm11467_vm0 }
 0x836   : > { %6818 = vmatprep.mubr.msk.bf16.mxu1 %vm11497_vm4, %v10355_v56  ;;  %v7442_v56 = vld [vmem:[%s7577_s16 + $0x10] sm:$0xff]   ;;  %vm11512_vm4 = vcmask 261120  }
 0x83d   : > { %6819 = vmatmul.mubr.msk.bf16.vlgmr.msra.gmra.mrb[8].mxu1 %vm11467_vm0, %v10392_v49  ;;  %vm11513_vm0 = vmmov %vm11512_vm4 }
 0x83e   : > { %6822 = vmatprep.mubr.msk.bf16.mxu1 %vm11498_vm8, %v10390_v4  ;;  %6948 = vmatpush3.bf16.msra.mxu1 %v7160_v10  ;;  %vm11514_vm8 = vmmov %vm11513_vm0 }
 0x83f   : > { %6947 = vmatprep.subr.bf16.mxu1 %v7161_v17 }
 0x842   : > { %6949 = vmatpush3.bf16.msra.mxu1 %v7161_v17 }
 0x845   : > { %6823 = vmatmul.mubr.msk.bf16.gmra.mrb[12].mxu1 %vm11499_vm1, %v10406_v8  ;;  %vm11515_vm1 = vmmov %vm11513_vm0 }
 0x846   : > { %6826 = vmatprep.mubr.msk.bf16.mxu1 %vm11500_vm10, %v10403_v32  ;;  %vm11516_vm10 = vmmov %vm11513_vm0 }
 0x84d   : > { %6827 = vmatmul.mubr.msk.bf16.gmra.mrb[16].mxu1 %vm11501_vm11, %v10418_v9  ;;  %vm11517_vm11 = vmmov %vm11513_vm0 }
 0x84e   : > { %6830 = vmatprep.mubr.msk.bf16.mxu1 %vm11502_vm7, %v10415_v46  ;;  %vm11518_vm7 = vmmov %vm11513_vm0 }
 0x855   : > { %6831 = vmatmul.mubr.msk.bf16.gmra.mrb[20].mxu1 %vm11503_vm5, %v10430_v36  ;;  %vm11519_vm5 = vmmov %vm11513_vm0 }
 0x856   : > { %6834 = vmatprep.mubr.msk.bf16.mxu1 %vm11504_vm15, %v10427_v27  ;;  %vm11520_vm15 = vmmov %vm11513_vm0 }
 0x85d   : > { %6835 = vmatmul.mubr.msk.bf16.gmra.mrb[24].mxu1 %vm11505_vm9, %v10442_v61  ;;  %vm11521_vm9 = vmmov %vm11513_vm0 }
 0x85e   : > { %6838 = vmatprep.mubr.msk.bf16.mxu1 %vm11506_vm3, %v10439_v41  ;;  %vm11522_vm3 = vmmov %vm11513_vm0 }
 0x865   : > { %6839 = vmatmul.mubr.msk.bf16.gmra.mrb[28].mxu1 %vm11507_vm12, %v10454_v28  ;;  %vm11523_vm12 = vmmov %vm11513_vm0 }
 0x866   : > { %6842 = vmatprep.mubr.msk.bf16.mxu1 %vm11508_vm2, %v10451_v16  ;;  %vm11524_vm2 = vmmov %vm11513_vm0 }
 0x86d   : > { %6843 = vmatmul.mubr.msk.bf16.gmra.mrb[32].mxu1 %vm11509_vm14, %v10463_v30  ;;  %vm11525_vm14 = vmmov %vm11513_vm0 }
 0x86e   : > { %6846 = vmatprep.mubr.msk.bf16.mxu1 %vm11510_vm13, %v10461_v21  ;;  %vm11530_vm13 = vmmov %vm11513_vm0 }
 0x875   : > { %6847 = vmatmul.mubr.msk.bf16.gmra.mrb[36].mxu1 %vm11511_vm6, %v4847_v2  ;;  %vm11531_vm6 = vmmov %vm11513_vm0 }
 0x876   : > { %6858 = vmatprep.mubr.msk.bf16.mxu1 %vm11512_vm4, %v7442_v56  ;;  %vm11536_vm4 = vmmov %vm11513_vm0 }
 0x87d   : > { %6859 = vmatmul.mubr.msk.bf16.vlgmr.msra.gmra.mrb[40].mxu1 %vm11513_vm0, %v7443_v51  ;;  %v11540_v51 = vld [vmem:[#allocation14_spill] sm:$0xff] }
 0x87e   : > { %6862 = vmatprep.mubr.msk.bf16.mxu1 %vm11514_vm8, %v7444_v18  ;;  %vm11541_vm8 = vmmov %vm11513_vm0 }
 0x885   : > { %6863 = vmatmul.mubr.msk.bf16.gmra.mrb[44].mxu1 %vm11515_vm1, %v7445_v48  ;;  %vm11542_vm1 = vmmov %vm11513_vm0 }
 0x886   : > { %6866 = vmatprep.mubr.msk.bf16.mxu1 %vm11516_vm10, %v7446_v29  ;;  %vm11547_vm10 = vmmov %vm11513_vm0 }
 0x88d   : > { %6867 = vmatmul.mubr.msk.bf16.gmra.mrb[48].mxu1 %vm11517_vm11, %v7447_v26  ;;  %vm11548_vm11 = vmmov %vm11513_vm0 }
 0x88e   : > { %6870 = vmatprep.mubr.msk.bf16.mxu1 %vm11518_vm7, %v7448_v45  ;;  %vm11553_vm7 = vmmov %vm11513_vm0 }
 0x895   : > { %6871 = vmatmul.mubr.msk.bf16.gmra.mrb[52].mxu1 %vm11519_vm5, %v7449_v39  ;;  %vm11554_vm5 = vmmov %vm11513_vm0 }
 0x896   : > { %6874 = vmatprep.mubr.msk.bf16.mxu1 %vm11520_vm15, %v7450_v33  ;;  %vm11559_vm15 = vmmov %vm11513_vm0 }
 0x89d   : > { %6875 = vmatmul.mubr.msk.bf16.gmra.mrb[56].mxu1 %vm11521_vm9, %v7451_v24  ;;  %vm11560_vm9 = vmmov %vm11513_vm0 }
 0x89e   : > { %6878 = vmatprep.mubr.msk.bf16.mxu1 %vm11522_vm3, %v7452_v19  ;;  %vm11565_vm3 = vmmov %vm11513_vm0 }
 0x8a5   : > { %6879 = vmatmul.mubr.msk.bf16.gmra.mrb[60].mxu1 %vm11523_vm12, %v7453_v55  ;;  %vm11566_vm12 = vmmov %vm11513_vm0 }
 0x8a6   : > { %6882 = vmatprep.mubr.msk.bf16.mxu1 %vm11524_vm2, %v7454_v63  ;;  %vm11571_vm2 = vmmov %vm11513_vm0 }
 0x8ad   : > { %6883 = vmatmul.mubr.msk.bf16.gmra.mrb[64].mxu1 %vm11525_vm14, %v7455_v58  ;;  %v11543_v58 = vld [vmem:[#allocation19_spill] sm:$0xff]  ;;  %vm11572_vm14 = vmmov %vm11513_vm0 }
 0x910   : > { %v6820_v4 = vpop.f32.mrb[8].mxu1 }
 0x911   : > { %v5147_v13 = vadd.f32 %v6820_v4, %v10594_v34  ;;  %v4979_v49 = vpop.f32.mrb[9].mxu1 }
 0x912   : > { %v5145_v57 = vadd.f32 %v10594_v34, %v4979_v49  ;;  %v6821_v14 = vpop.f32.mrb[10].mxu1 }
 0x913   : > { %v5148_v23 = vadd.f32 %v6821_v14, %v10594_v34  ;;  %v4982_v15 = vpop.f32.mrb[11].mxu1  ;;  %v5179_v8 = vadd.f32 %v5147_v13, %v11526_v42  ;;  %v11544_v13 = vld [vmem:[#allocation20_spill] sm:$0xff] }
 0x914   : > { %v5146_v32 = vadd.f32 %v10594_v34, %v4982_v15  ;;  %v5177_v46 = vadd.f32 %v5145_v57, %v11528_v11  ;;  %v11545_v57 = vld [vmem:[#allocation17_spill] sm:$0xff] }
 0x915   : > { %v5180_v53 = vadd.f32 %v5148_v23, %v11527_v52  ;;  %v11546_v23 = vld [vmem:[#allocation18_spill] sm:$0xff] }
 0x916   : > { %v5178_v9 = vadd.f32 %v5146_v32, %v11529_v60 }
 0x917   : > { %v5210_v62 = vpack.c.bf16 %v5180_v53, %v5179_v8 }
 0x918   : > { %v5209_v7 = vpack.c.bf16 %v5178_v9, %v5177_v46  ;;  %v6824_v31 = vpop.f32.mrb[12].mxu1 }
 0x919   : > { %v5151_v27 = vadd.f32 %v6824_v31, %v10594_v34  ;;  %v4995_v44 = vpop.f32.mrb[13].mxu1 }
 0x91a   : > { %v5149_v36 = vadd.f32 %v10594_v34, %v4995_v44  ;;  %v6825_v5 = vpop.f32.mrb[14].mxu1  ;;  %6890 = vmatprep.mubr.msk.bf16.mxu0 %vm11530_vm13, %v5209_v7  ;;  %v11549_v7 = vld [vmem:[#allocation23_spill] sm:$0xff]  ;;  %vm5883_vm13 = vcmask 519168  }
 0x91b   : > { %v5152_v22 = vadd.f32 %v6825_v5, %v10594_v34  ;;  %v4998_v47 = vpop.f32.mrb[15].mxu1  ;;  %6891 = vmatmul.mubr.msk.bf16.vlgmr.msra.gmra.mrb[36].mxu0 %vm11531_vm6, %v5210_v62  ;;  %v5183_v61 = vadd.f32 %v5151_v27, %v11532_v38  ;;  %v11550_v27 = vld [vmem:[#allocation24_spill] sm:$0xff] }
 0x91c   : > { %v5150_v41 = vadd.f32 %v10594_v34, %v4998_v47  ;;  %v5181_v16 = vadd.f32 %v5149_v36, %v11534_v35  ;;  %v11551_v36 = vld [vmem:[#allocation21_spill] sm:$0xff] }
 0x91d   : > { %v5184_v50 = vadd.f32 %v5152_v22, %v11533_v59  ;;  %v11552_v22 = vld [vmem:[#allocation22_spill] sm:$0xff] }
 0x91e   : > { %v5182_v28 = vadd.f32 %v5150_v41, %v11535_v6 }
 0x91f   : > { %v5212_v21 = vpack.c.bf16 %v5184_v50, %v5183_v61 }
 0x920   : > { %v5211_v30 = vpack.c.bf16 %v5182_v28, %v5181_v16  ;;  %v6828_v25 = vpop.f32.mrb[16].mxu1 }
 0x921   : > { %v5155_v10 = vadd.f32 %v6828_v25, %v10594_v34  ;;  %v5011_v17 = vpop.f32.mrb[17].mxu1 }
 0x922   : > { %v5153_v20 = vadd.f32 %v10594_v34, %v5011_v17  ;;  %v6829_v3 = vpop.f32.mrb[18].mxu1  ;;  %6894 = vmatprep.mubr.msk.bf16.mxu0 %vm11536_vm4, %v5211_v30  ;;  %v11555_v30 = vld [vmem:[#allocation27_spill] sm:$0xff] }
 0x923   : > { %v5156_v43 = vadd.f32 %v6829_v3, %v10594_v34  ;;  %v5014_v12 = vpop.f32.mrb[19].mxu1  ;;  %6895 = vmatmul.mubr.msk.bf16.gmra.mrb[40].mxu0 %vm11513_vm0, %v5212_v21  ;;  %v5187_v40 = vadd.f32 %v5155_v10, %v11537_v37  ;;  %v11556_v10 = vld [vmem:[#allocation28_spill] sm:$0xff] }
 0x924   : > { %v5154_v0 = vadd.f32 %v10594_v34, %v5014_v12  ;;  %v5185_v56 = vadd.f32 %v5153_v20, %v11539_v54  ;;  %v11557_v20 = vld [vmem:[#allocation25_spill] sm:$0xff] }
 0x925   : > { %v5188_v2 = vadd.f32 %v5156_v43, %v11538_v1  ;;  %v11558_v43 = vld [vmem:[#allocation26_spill] sm:$0xff] }
 0x926   : > { %v5186_v18 = vadd.f32 %v5154_v0, %v11540_v51 }
 0x927   : > { %v5214_v48 = vpack.c.bf16 %v5188_v2, %v5187_v40 }
 0x928   : > { %v5213_v29 = vpack.c.bf16 %v5186_v18, %v5185_v56  ;;  %v6832_v26 = vpop.f32.mrb[20].mxu1 }
 0x929   : > { %v5159_v45 = vadd.f32 %v6832_v26, %v10594_v34  ;;  %v5027_v39 = vpop.f32.mrb[21].mxu1 }
 0x92a   : > { %v5157_v33 = vadd.f32 %v10594_v34, %v5027_v39  ;;  %v6833_v24 = vpop.f32.mrb[22].mxu1  ;;  %6898 = vmatprep.mubr.msk.bf16.mxu0 %vm11541_vm8, %v5213_v29  ;;  %v11561_v29 = vld [vmem:[#allocation31_spill] sm:$0xff] }
 0x92b   : > { %v5160_v19 = vadd.f32 %v6833_v24, %v10594_v34  ;;  %v5030_v55 = vpop.f32.mrb[23].mxu1  ;;  %6899 = vmatmul.mubr.msk.bf16.gmra.mrb[44].mxu0 %vm11542_vm1, %v5214_v48  ;;  %v5191_v4 = vadd.f32 %v5159_v45, %v11543_v58  ;;  %v11562_v45 = vld [vmem:[#allocation32_spill] sm:$0xff] }
 0x92c   : > { %v5158_v63 = vadd.f32 %v10594_v34, %v5030_v55  ;;  %v5189_v14 = vadd.f32 %v5157_v33, %v11545_v57  ;;  %v11563_v33 = vld [vmem:[#allocation29_spill] sm:$0xff] }
 0x92d   : > { %v5192_v49 = vadd.f32 %v5160_v19, %v11544_v13  ;;  %v11564_v19 = vld [vmem:[#allocation30_spill] sm:$0xff] }
 0x92e   : > { %v5190_v15 = vadd.f32 %v5158_v63, %v11546_v23 }
 0x92f   : > { %v5216_v32 = vpack.c.bf16 %v5192_v49, %v5191_v4 }
 0x930   : > { %v5215_v42 = vpack.c.bf16 %v5190_v15, %v5189_v14  ;;  %v6836_v8 = vpop.f32.mrb[24].mxu1 }
 0x931   : > { %v5163_v52 = vadd.f32 %v6836_v8, %v10594_v34  ;;  %v5043_v53 = vpop.f32.mrb[25].mxu1 }
 0x932   : > { %v5161_v11 = vadd.f32 %v10594_v34, %v5043_v53  ;;  %v6837_v46 = vpop.f32.mrb[26].mxu1  ;;  %6902 = vmatprep.mubr.msk.bf16.mxu0 %vm11547_vm10, %v5215_v42  ;;  %v11567_v42 = vld [vmem:[#allocation35_spill] sm:$0xff] }
 0x933   : > { %v5164_v60 = vadd.f32 %v6837_v46, %v10594_v34  ;;  %v5046_v9 = vpop.f32.mrb[27].mxu1  ;;  %6903 = vmatmul.mubr.msk.bf16.gmra.mrb[48].mxu0 %vm11548_vm11, %v5216_v32  ;;  %v5195_v31 = vadd.f32 %v5163_v52, %v11549_v7  ;;  %v11568_v52 = vld [vmem:[#allocation36_spill] sm:$0xff] }
 0x934   : > { %v5162_v62 = vadd.f32 %v10594_v34, %v5046_v9  ;;  %v5193_v5 = vadd.f32 %v5161_v11, %v11551_v36  ;;  %v11569_v11 = vld [vmem:[#allocation33_spill] sm:$0xff] }
 0x935   : > { %v5196_v44 = vadd.f32 %v5164_v60, %v11550_v27  ;;  %v11570_v60 = vld [vmem:[#allocation34_spill] sm:$0xff] }
 0x936   : > { %v5194_v47 = vadd.f32 %v5162_v62, %v11552_v22 }
 0x937   : > { %v5218_v41 = vpack.c.bf16 %v5196_v44, %v5195_v31 }
 0x938   : > { %v5217_v38 = vpack.c.bf16 %v5194_v47, %v5193_v5  ;;  %v6840_v61 = vpop.f32.mrb[28].mxu1 }
 0x939   : > { %v5167_v59 = vadd.f32 %v6840_v61, %v10594_v34  ;;  %v5059_v50 = vpop.f32.mrb[29].mxu1 }
 0x93a   : > { %v5165_v35 = vadd.f32 %v10594_v34, %v5059_v50  ;;  %v6841_v16 = vpop.f32.mrb[30].mxu1  ;;  %6906 = vmatprep.mubr.msk.bf16.mxu0 %vm11553_vm7, %v5217_v38 }
 0x93b   : > { %v5168_v6 = vadd.f32 %v6841_v16, %v10594_v34  ;;  %v5062_v28 = vpop.f32.mrb[31].mxu1  ;;  %6907 = vmatmul.mubr.msk.bf16.gmra.mrb[52].mxu0 %vm11554_vm5, %v5218_v41  ;;  %v5199_v25 = vadd.f32 %v5167_v59, %v11555_v30 }
 0x93c   : > { %v5166_v21 = vadd.f32 %v10594_v34, %v5062_v28  ;;  %v5197_v3 = vadd.f32 %v5165_v35, %v11557_v20 }
 0x93d   : > { %v5200_v17 = vadd.f32 %v5168_v6, %v11556_v10 }
 0x93e   : > { %v5198_v12 = vadd.f32 %v5166_v21, %v11558_v43 }
 0x93f   : > { %v5220_v0 = vpack.c.bf16 %v5200_v17, %v5199_v25 }
 0x940   : > { %v5219_v37 = vpack.c.bf16 %v5198_v12, %v5197_v3  ;;  %v6844_v40 = vpop.f32.mrb[32].mxu1 }
 0x941   : > { %v5171_v1 = vadd.f32 %v6844_v40, %v10594_v34  ;;  %v5075_v2 = vpop.f32.mrb[33].mxu1 }
 0x942   : > { %v5169_v54 = vadd.f32 %v10594_v34, %v5075_v2  ;;  %v6845_v56 = vpop.f32.mrb[34].mxu1  ;;  %6910 = vmatprep.mubr.msk.bf16.mxu0 %vm11559_vm15, %v5219_v37 }
 0x943   : > { %v5172_v51 = vadd.f32 %v6845_v56, %v10594_v34  ;;  %v5078_v18 = vpop.f32.mrb[35].mxu1  ;;  %6911 = vmatmul.mubr.msk.bf16.gmra.mrb[56].mxu0 %vm11560_vm9, %v5220_v0  ;;  %v5203_v26 = vadd.f32 %v5171_v1, %v11561_v29 }
 0x944   : > { %v5170_v48 = vadd.f32 %v10594_v34, %v5078_v18  ;;  %v5201_v24 = vadd.f32 %v5169_v54, %v11563_v33 }
 0x945   : > { %v5204_v39 = vadd.f32 %v5172_v51, %v11562_v45 }
 0x946   : > { %v5202_v55 = vadd.f32 %v5170_v48, %v11564_v19 }
 0x947   : > { %v5222_v63 = vpack.c.bf16 %v5204_v39, %v5203_v26 }
 0x948   : > { %v5221_v58 = vpack.c.bf16 %v5202_v55, %v5201_v24  ;;  %v6848_v4 = vpop.f32.mrb[36].mxu1 }
 0x949   : > { %v5175_v13 = vadd.f32 %v6848_v4, %v10594_v34  ;;  %v5091_v49 = vpop.f32.mrb[37].mxu1 }
 0x94a   : > { %v5173_v57 = vadd.f32 %v10594_v34, %v5091_v49  ;;  %v6849_v14 = vpop.f32.mrb[38].mxu1  ;;  %6914 = vmatprep.mubr.msk.bf16.mxu0 %vm11565_vm3, %v5221_v58 }
 0x94b   : > { %v5176_v23 = vadd.f32 %v6849_v14, %v10594_v34  ;;  %v5094_v15 = vpop.f32.mrb[39].mxu1  ;;  %6915 = vmatmul.mubr.msk.bf16.gmra.mrb[60].mxu0 %vm11566_vm12, %v5222_v63  ;;  %v5207_v8 = vadd.f32 %v5175_v13, %v11567_v42 }
 0x94c   : > { %v5174_v32 = vadd.f32 %v10594_v34, %v5094_v15  ;;  %v5205_v46 = vadd.f32 %v5173_v57, %v11569_v11 }
 0x94d   : > { %v5208_v53 = vadd.f32 %v5176_v23, %v11568_v52 }
 0x94e   : > { %v5206_v9 = vadd.f32 %v5174_v32, %v11570_v60 }
 0x94f   : > { %v5224_v62 = vpack.c.bf16 %v5208_v53, %v5207_v8 }
 0x950   : > { %v5223_v7 = vpack.c.bf16 %v5206_v9, %v5205_v46  ;;  %v6860_v31 = vpop.f32.mrb[40].mxu1 }
 0x951   : > { %v5423_v27 = vpop.f32.mrb[41].mxu1 }
 0x952   : > { %6918 = vmatprep.mubr.msk.bf16.mxu0 %vm11571_vm2, %v5223_v7  ;;  %v6861_v44 = vpop.f32.mrb[42].mxu1 }
 0x953   : > { %6919 = vmatmul.mubr.msk.bf16.gmra.mrb[64].mxu0 %vm11572_vm14, %v5224_v62  ;;  %v5426_v36 = vpop.f32.mrb[43].mxu1 }
 0x958   : > { %v6864_v5 = vpop.f32.mrb[44].mxu1 }
 0x959   : > { %v5439_v34 = vpop.f32.mrb[45].mxu1 }
 0x95a   : > { %v6865_v22 = vpop.f32.mrb[46].mxu1 }
 0x95b   : > { %v5442_v47 = vpop.f32.mrb[47].mxu1 }
 0x960   : > { %v10676_v41 = vpop.f32.mrb[48].mxu1 }
 0x961   : > { %v10678_v38 = vpop.f32.mrb[49].mxu1 }
 0x962   : > { %v10680_v61 = vpop.f32.mrb[50].mxu1 }
 0x963   : > { %v10682_v59 = vpop.f32.mrb[51].mxu1 }
 0x968   : > { %v10684_v50 = vpop.f32.mrb[52].mxu1 }
 0x969   : > { %v10686_v35 = vpop.f32.mrb[53].mxu1 }
 0x96a   : > { %v10688_v16 = vpop.f32.mrb[54].mxu1 }
 0x96b   : > { %v10690_v6 = vpop.f32.mrb[55].mxu1 }
 0x970   : > { %v10692_v28 = vpop.f32.mrb[56].mxu1 }
 0x971   : > { %v10694_v21 = vpop.f32.mrb[57].mxu1 }
 0x972   : > { %v10696_v30 = vpop.f32.mrb[58].mxu1 }
 0x973   : > { %v10698_v25 = vpop.f32.mrb[59].mxu1 }
 0x978   : > { %v10700_v10 = vpop.f32.mrb[60].mxu1 }
 0x979   : > { %v10702_v17 = vpop.f32.mrb[61].mxu1 }
 0x97a   : > { %v10704_v20 = vpop.f32.mrb[62].mxu1 }
 0x97b   : > { %v10706_v3 = vpop.f32.mrb[63].mxu1 }
 0x980   : > { %v10708_v43 = vpop.f32.mrb[64].mxu1 }
 0x981   : > { %v10710_v12 = vpop.f32.mrb[65].mxu1 }
 0x982   : > { %v10712_v0 = vpop.f32.mrb[66].mxu1 }
 0x983   : > { %v10714_v37 = vpop.f32.mrb[67].mxu1 }
 0x9ee   : > { %v6892_v40 = vpop.f32.mrb[36].mxu0 }
 0x9ef   : > { %v6324_v1 = vpack.c.bf16 %v6892_v40, %v6892_v40  ;;  %v5628_v2 = vpop.f32.mrb[37].mxu0 }
 0x9f0   : > { %v6322_v54 = vpack.c.bf16 %v5628_v2, %v5628_v2  ;;  %v6893_v56 = vpop.f32.mrb[38].mxu0 }
 0x9f1   : > { %5886 = vst.msk [vmem:[%s10721_s18 + $0x8] sm:$0xf] %vm5883_vm13, %v6324_v1  ;;  %v6325_v51 = vpack.c.bf16 %v6893_v56, %v6893_v56  ;;  %v5631_v18 = vpop.f32.mrb[39].mxu0 }
 0x9f2   : > { %5884 = vst.msk [vmem:[%s10721_s18] sm:$0xf] %vm5883_vm13, %v6322_v54  ;;  %v6323_v48 = vpack.c.bf16 %v5631_v18, %v5631_v18 }
 0x9f3   : > { %5887 = vst.msk [vmem:[%s10721_s18 + $0xc] sm:$0xf] %vm5883_vm13, %v6325_v51 }
 0x9f4   : > { %5885 = vst.msk [vmem:[%s10721_s18 + $0x4] sm:$0xf] %vm5883_vm13, %v6323_v48 }
 0x9f6   : > { %v6896_v29 = vpop.f32.mrb[40].mxu0 }
 0x9f7   : > { %v5653_v26 = vadd.f32 %v6896_v29, %v6860_v31  ;;  %v5644_v45 = vpop.f32.mrb[41].mxu0 }
 0x9f8   : > { %v5645_v39 = vadd.f32 %v5644_v45, %v5423_v27  ;;  %v6897_v33 = vpop.f32.mrb[42].mxu0 }
 0x9f9   : > { %v6328_v24 = vpack.c.bf16 %v5653_v26, %v5653_v26  ;;  %v5656_v19 = vadd.f32 %v6897_v33, %v6861_v44  ;;  %v5647_v55 = vpop.f32.mrb[43].mxu0 }
 0x9fa   : > { %v6326_v63 = vpack.c.bf16 %v5645_v39, %v5645_v39  ;;  %v5648_v58 = vadd.f32 %v5647_v55, %v5426_v36 }
 0x9fb   : > { %5890 = vst.msk [vmem:[%s10721_s18 + $0x18] sm:$0xf] %vm5883_vm13, %v6328_v24  ;;  %v6329_v4 = vpack.c.bf16 %v5656_v19, %v5656_v19 }
 0x9fc   : > { %5888 = vst.msk [vmem:[%s10721_s18 + $0x10] sm:$0xf] %vm5883_vm13, %v6326_v63  ;;  %v6327_v13 = vpack.c.bf16 %v5648_v58, %v5648_v58 }
 0x9fd   : > { %5891 = vst.msk [vmem:[%s10721_s18 + $0x1c] sm:$0xf] %vm5883_vm13, %v6329_v4 }
 0x9fe   : > { %5889 = vst.msk [vmem:[%s10721_s18 + $0x14] sm:$0xf] %vm5883_vm13, %v6327_v13  ;;  %v6900_v49 = vpop.f32.mrb[44].mxu0 }
 0x9ff   : > { %v5669_v57 = vadd.f32 %v6900_v49, %v6864_v5  ;;  %v5660_v14 = vpop.f32.mrb[45].mxu0 }
 0xa00   : > { %v5661_v23 = vadd.f32 %v5660_v14, %v5439_v34  ;;  %v6901_v15 = vpop.f32.mrb[46].mxu0 }
 0xa01   : > { %v6332_v32 = vpack.c.bf16 %v5669_v57, %v5669_v57  ;;  %v5672_v42 = vadd.f32 %v6901_v15, %v6865_v22  ;;  %v5663_v8 = vpop.f32.mrb[47].mxu0 }
 0xa02   : > { %v6330_v52 = vpack.c.bf16 %v5661_v23, %v5661_v23  ;;  %v5664_v53 = vadd.f32 %v5663_v8, %v5442_v47 }
 0xa03   : > { %5894 = vst.msk [vmem:[%s10721_s18 + $0x28] sm:$0xf] %vm5883_vm13, %v6332_v32  ;;  %v6333_v11 = vpack.c.bf16 %v5672_v42, %v5672_v42 }
 0xa04   : > { %5892 = vst.msk [vmem:[%s10721_s18 + $0x20] sm:$0xf] %vm5883_vm13, %v6330_v52  ;;  %v6331_v46 = vpack.c.bf16 %v5664_v53, %v5664_v53 }
 0xa05   : > { %5895 = vst.msk [vmem:[%s10721_s18 + $0x2c] sm:$0xf] %vm5883_vm13, %v6333_v11 }
 0xa06   : > { %5893 = vst.msk [vmem:[%s10721_s18 + $0x24] sm:$0xf] %vm5883_vm13, %v6331_v46  ;;  %v6904_v60 = vpop.f32.mrb[48].mxu0 }
 0xa07   : > { %v5685_v9 = vadd.f32 %v6904_v60, %v10676_v41  ;;  %v5676_v62 = vpop.f32.mrb[49].mxu0 }
 0xa08   : > { %v5677_v7 = vadd.f32 %v5676_v62, %v10678_v38  ;;  %v6905_v31 = vpop.f32.mrb[50].mxu0 }
 0xa09   : > { %v6336_v27 = vpack.c.bf16 %v5685_v9, %v5685_v9  ;;  %v5688_v44 = vadd.f32 %v6905_v31, %v10680_v61  ;;  %v5679_v36 = vpop.f32.mrb[51].mxu0 }
 0xa0a   : > { %v6334_v5 = vpack.c.bf16 %v5677_v7, %v5677_v7  ;;  %v5680_v34 = vadd.f32 %v5679_v36, %v10682_v59 }
 0xa0b   : > { %5898 = vst.msk [vmem:[%s10721_s18 + $0x38] sm:$0xf] %vm5883_vm13, %v6336_v27  ;;  %v6337_v22 = vpack.c.bf16 %v5688_v44, %v5688_v44 }
 0xa0c   : > { %5896 = vst.msk [vmem:[%s10721_s18 + $0x30] sm:$0xf] %vm5883_vm13, %v6334_v5  ;;  %v6335_v47 = vpack.c.bf16 %v5680_v34, %v5680_v34 }
 0xa0d   : > { %5899 = vst.msk [vmem:[%s10721_s18 + $0x3c] sm:$0xf] %vm5883_vm13, %v6337_v22 }
 0xa0e   : > { %5897 = vst.msk [vmem:[%s10721_s18 + $0x34] sm:$0xf] %vm5883_vm13, %v6335_v47  ;;  %v6908_v41 = vpop.f32.mrb[52].mxu0 }
 0xa0f   : > { %v5701_v38 = vadd.f32 %v6908_v41, %v10684_v50  ;;  %v5692_v61 = vpop.f32.mrb[53].mxu0 }
 0xa10   : > { %v5693_v59 = vadd.f32 %v5692_v61, %v10686_v35  ;;  %v6909_v40 = vpop.f32.mrb[54].mxu0 }
 0xa11   : > { %v6340_v1 = vpack.c.bf16 %v5701_v38, %v5701_v38  ;;  %v5704_v2 = vadd.f32 %v6909_v40, %v10688_v16  ;;  %v5695_v54 = vpop.f32.mrb[55].mxu0 }
 0xa12   : > { %v6338_v56 = vpack.c.bf16 %v5693_v59, %v5693_v59  ;;  %v5696_v51 = vadd.f32 %v5695_v54, %v10690_v6 }
 0xa13   : > { %5902 = vst.msk [vmem:[%s10721_s18 + $0x48] sm:$0xf] %vm5883_vm13, %v6340_v1  ;;  %v6341_v18 = vpack.c.bf16 %v5704_v2, %v5704_v2 }
 0xa14   : > { %5900 = vst.msk [vmem:[%s10721_s18 + $0x40] sm:$0xf] %vm5883_vm13, %v6338_v56  ;;  %v6339_v48 = vpack.c.bf16 %v5696_v51, %v5696_v51 }
 0xa15   : > { %5903 = vst.msk [vmem:[%s10721_s18 + $0x4c] sm:$0xf] %vm5883_vm13, %v6341_v18 }
 0xa16   : > { %5901 = vst.msk [vmem:[%s10721_s18 + $0x44] sm:$0xf] %vm5883_vm13, %v6339_v48  ;;  %v6912_v50 = vpop.f32.mrb[56].mxu0 }
 0xa17   : > { %v5717_v35 = vadd.f32 %v6912_v50, %v10692_v28  ;;  %v5708_v16 = vpop.f32.mrb[57].mxu0 }
 0xa18   : > { %v5709_v6 = vadd.f32 %v5708_v16, %v10694_v21  ;;  %v6913_v29 = vpop.f32.mrb[58].mxu0 }
 0xa19   : > { %v6344_v26 = vpack.c.bf16 %v5717_v35, %v5717_v35  ;;  %v5720_v45 = vadd.f32 %v6913_v29, %v10696_v30  ;;  %v5711_v39 = vpop.f32.mrb[59].mxu0 }
 0xa1a   : > { %v6342_v33 = vpack.c.bf16 %v5709_v6, %v5709_v6  ;;  %v5712_v24 = vadd.f32 %v5711_v39, %v10698_v25 }
 0xa1b   : > { %5906 = vst.msk [vmem:[%s10721_s18 + $0x58] sm:$0xf] %vm5883_vm13, %v6344_v26  ;;  %v6345_v19 = vpack.c.bf16 %v5720_v45, %v5720_v45 }
 0xa1c   : > { %5904 = vst.msk [vmem:[%s10721_s18 + $0x50] sm:$0xf] %vm5883_vm13, %v6342_v33  ;;  %v6343_v55 = vpack.c.bf16 %v5712_v24, %v5712_v24 }
 0xa1d   : > { %5907 = vst.msk [vmem:[%s10721_s18 + $0x5c] sm:$0xf] %vm5883_vm13, %v6345_v19 }
 0xa1e   : > { %5905 = vst.msk [vmem:[%s10721_s18 + $0x54] sm:$0xf] %vm5883_vm13, %v6343_v55  ;;  %v6916_v28 = vpop.f32.mrb[60].mxu0 }
 0xa1f   : > { %v5733_v21 = vadd.f32 %v6916_v28, %v10700_v10  ;;  %v5724_v30 = vpop.f32.mrb[61].mxu0 }
 0xa20   : > { %v5725_v25 = vadd.f32 %v5724_v30, %v10702_v17  ;;  %v6917_v63 = vpop.f32.mrb[62].mxu0 }
 0xa21   : > { %v6348_v58 = vpack.c.bf16 %v5733_v21, %v5733_v21  ;;  %v5736_v4 = vadd.f32 %v6917_v63, %v10704_v20  ;;  %v5727_v13 = vpop.f32.mrb[63].mxu0 }
 0xa22   : > { %v6346_v49 = vpack.c.bf16 %v5725_v25, %v5725_v25  ;;  %v5728_v57 = vadd.f32 %v5727_v13, %v10706_v3 }
 0xa23   : > { %5910 = vst.msk [vmem:[%s10721_s18 + $0x68] sm:$0xf] %vm5883_vm13, %v6348_v58  ;;  %v6349_v14 = vpack.c.bf16 %v5736_v4, %v5736_v4 }
 0xa24   : > { %5908 = vst.msk [vmem:[%s10721_s18 + $0x60] sm:$0xf] %vm5883_vm13, %v6346_v49  ;;  %v6347_v23 = vpack.c.bf16 %v5728_v57, %v5728_v57 }
 0xa25   : > { %5911 = vst.msk [vmem:[%s10721_s18 + $0x6c] sm:$0xf] %vm5883_vm13, %v6349_v14 }
 0xa26   : > { %5909 = vst.msk [vmem:[%s10721_s18 + $0x64] sm:$0xf] %vm5883_vm13, %v6347_v23  ;;  %v6920_v10 = vpop.f32.mrb[64].mxu0 }
 0xa27   : > { %v5749_v17 = vadd.f32 %v6920_v10, %v10708_v43  ;;  %v5740_v20 = vpop.f32.mrb[65].mxu0 }
 0xa28   : > { %v5741_v3 = vadd.f32 %v5740_v20, %v10710_v12  ;;  %v6921_v15 = vpop.f32.mrb[66].mxu0 }
 0xa29   : > { %v6352_v32 = vpack.c.bf16 %v5749_v17, %v5749_v17  ;;  %v5752_v42 = vadd.f32 %v6921_v15, %v10712_v0  ;;  %v5743_v8 = vpop.f32.mrb[67].mxu0 }
 0xa2a   : > { %v6350_v52 = vpack.c.bf16 %v5741_v3, %v5741_v3  ;;  %v5744_v53 = vadd.f32 %v5743_v8, %v10714_v37 }
 0xa2b   : > { %5914 = vst.msk [vmem:[%s10721_s18 + $0x78] sm:$0xf] %vm5883_vm13, %v6352_v32  ;;  %v6353_v11 = vpack.c.bf16 %v5752_v42, %v5752_v42 }
 0xa2c   : > { %5912 = vst.msk [vmem:[%s10721_s18 + $0x70] sm:$0xf] %vm5883_vm13, %v6350_v52  ;;  %v6351_v46 = vpack.c.bf16 %v5744_v53, %v5744_v53 }
 0xa2d   : > { %5915 = vst.msk [vmem:[%s10721_s18 + $0x7c] sm:$0xf] %vm5883_vm13, %v6353_v11 }
 0xa2e   : > { %5913 = vst.msk [vmem:[%s10721_s18 + $0x74] sm:$0xf] %vm5883_vm13, %v6351_v46 }
 0xa2f PF: > { %s22_s21 = sadd.s32 1, %s7462_s21  }
 0xa30   : > { %p19_p4 = scmp.ge.s32.totalorder %s22_s21, 4  }
 0xa32   :  { %21 = sbr.rel (!%p19_p4) target bundleno = 1 (0x1), region = 102 }

// kernel: decoder_forward.7
= control target key start
LH: loop header
LB: loop body
LE: loop exit
PB: predicated region body
PF: predicated region fallthrough
CT: control target
= control target key end

     0   :  { %s1126_s18 = smov 0   ;;  %s1438_s0 = inlined_call_operand.vmem [shape: bf16[2,16,1024], index: 0, kind: input, shape index: {}]   ;;  %s1439_s1 = inlined_call_operand.vmem [shape: f32[16,16], index: 1, kind: input, shape index: {}]   ;;  %s1440_s2 = inlined_call_operand.vmem [shape: f32[16,1], index: 2, kind: input, shape index: {}]   ;;  %s1441_s3 = inlined_call_operand.vmem [shape: f32[16,1], index: 3, kind: input, shape index: {}]   ;;  %s1442_s4 = inlined_call_operand.vmem [shape: bf16[3,16], index: 4, kind: input, shape index: {}]   ;;  %s1443_s5 = inlined_call_operand.vmem [shape: f32[2,3,1024], index: 5, kind: output, shape index: {}]  }
   0x1 LB: > { %s941_s19 = sadd.s32 4294967295, %s1093_s18   ;;  %p945_p0 = scmp.ge.s32.totalorder %s1093_s18, 1  ;;  %s1093_s18 = sphi %s1126_s18, %s15_s18  }
   0x2   : > { %p187_p1 = scmp.lt.s32.totalorder %s1093_s18, 3 }
   0x4   : > { %p188_p2 = pnand %p945_p0, %p187_p1 }
   0x5   : > { %p215_p3 = scmp.lt.s32.totalorder (!%p188_p2), %s941_s19, 1  ;;  %v268_v38 = vld [vmem:[%s1439_s1] sm:$0xff] (!%p188_p2)  ;;  %vm270_vm0 = vcmask (!%p188_p2), 130048   ;;  %v1188_v42 = vld [vmem:[%s1439_s1 + $0x8] sm:$0xff] (!%p188_p2)  ;;  %v1095_v43 = vmov (!%p188_p2), 0  }
   0x6   : > { %191 = sbr.rel (%p188_p2) target bundleno = 1336 (0x538), region = 40  ;;  %990 = vmatprep.mubr.msk.f32.mxu0 (!%p188_p2), %vm270_vm0, %v268_v38  ;;  %997 = vmatprep.mubr.msk.f32.mxu1 (!%p188_p2), %vm270_vm0, %v268_v38 }
   0x7   : > { %1017 = vset.pattern.permute.xlu1 (!%p188_p2), %v1095_v43  ;;  %1018 = vset.pattern.permute.xlu0 (!%p188_p2), %v1095_v43 }
   0xd   : > { %s1445_s19 = smov (!%p215_p3, %s941_s19), 1 }
   0xe   : > { %s976_s20 = sshll.u32 %s1445_s19, 6  ;;  %s977_s13 = sshll.u32 %s1445_s19, 5 }
   0xf   : > { %s219_s23 = scalar_lea.vmem %s1438_s0, %s976_s20  ;;  %s224_s16 = scalar_lea.vmem %s1443_s5, %s977_s13 }
  0x10   : > { %v1140_v0 = vld [vmem:[%s219_s23] sm:$0xff]  ;;  %v1142_v1 = vld [vmem:[%s219_s23 + $0x8] sm:$0xff]  ;;  %v1151_v7 = vld [vmem:[%s219_s23 + $0x10] sm:$0xff] }
  0x11   : > { %v234_v2 = vunpack.c.l.bf16 %v1140_v0  ;;  %v235_v3 = vunpack.c.h.bf16 %v1140_v0  ;;  %v236_v4 = vunpack.c.l.bf16 %v1142_v1  ;;  %v1147_v5 = vld [vmem:[%s219_s23 + $0x20] sm:$0xff]  ;;  %v1149_v6 = vld [vmem:[%s219_s23 + $0x28] sm:$0xff]  ;;  %v237_v8 = vunpack.c.h.bf16 %v1142_v1  ;;  %v1157_v13 = vld [vmem:[%s219_s23 + $0x30] sm:$0xff] }
  0x12   : > { %v242_v10 = vunpack.c.l.bf16 %v1147_v5  ;;  %v243_v11 = vunpack.c.h.bf16 %v1147_v5  ;;  %v244_v12 = vunpack.c.l.bf16 %v1149_v6  ;;  %v238_v14 = vunpack.c.l.bf16 %v1151_v7  ;;  %v1161_v18 = vld [vmem:[%s219_s23 + $0x18] sm:$0xff] }
  0x13   : > { %v250_v9 = vadd.f32 %v235_v3, %v234_v2  ;;  %v245_v16 = vunpack.c.h.bf16 %v1149_v6  ;;  %v239_v19 = vunpack.c.h.bf16 %v1151_v7  ;;  %v246_v21 = vunpack.c.l.bf16 %v1157_v13  ;;  %v1165_v23 = vld [vmem:[%s219_s23 + $0x38] sm:$0xff] }
  0x14   : > { %v259_v17 = vadd.f32 %v243_v11, %v242_v10  ;;  %v240_v24 = vunpack.c.l.bf16 %v1161_v18  ;;  %v247_v26 = vunpack.c.h.bf16 %v1157_v13  ;;  %v241_v28 = vunpack.c.h.bf16 %v1161_v18 }
  0x15   : > { %v251_v15 = vadd.f32 %v250_v9, %v236_v4  ;;  %v248_v30 = vunpack.c.l.bf16 %v1165_v23  ;;  %v249_v33 = vunpack.c.h.bf16 %v1165_v23 }
  0x16   : > { %v260_v22 = vadd.f32 %v259_v17, %v244_v12 }
  0x17   : > { %v252_v20 = vadd.f32 %v251_v15, %v237_v8 }
  0x18   : > { %v261_v27 = vadd.f32 %v260_v22, %v245_v16 }
  0x19   : > { %v253_v25 = vadd.f32 %v252_v20, %v238_v14 }
  0x1a   : > { %v262_v31 = vadd.f32 %v261_v27, %v246_v21 }
  0x1b   : > { %v254_v29 = vadd.f32 %v253_v25, %v239_v19 }
  0x1c   : > { %v263_v34 = vadd.f32 %v262_v31, %v247_v26 }
  0x1d   : > { %v255_v32 = vadd.f32 %v254_v29, %v240_v24 }
  0x1e   : > { %v264_v36 = vadd.f32 %v263_v34, %v248_v30 }
  0x1f   : > { %v256_v35 = vadd.f32 %v255_v32, %v241_v28 }
  0x20   : > { %v265_v37 = vadd.f32 %v264_v36, %v249_v33  ;;  %v523_v36 = vld [vmem:[%s1440_s2 + $0x8] sm:$0xff] }
  0x21   : > { %257 = vadd.xlane.f32.xlu0 %v256_v35  ;;  %v522_v35 = vld [vmem:[%s1440_s2] sm:$0xff] }
  0x25   : > { %266 = vadd.xlane.f32.xlu0 %v265_v37 }
  0xae   : > { %v258_v39 = vpop.xlane.xlu0 %257 }
  0xb2   : > { %v267_v40 = vpop.xlane.xlu0 %266 }
  0xb3   : > { %v1000_v41 = vpack.c.bf16 %v267_v40, %v258_v39 }
  0xb5   : > { %1001 = vmatprep.subr.bf16.mxu0 %v1000_v41 }
  0xb6   : > { %1003 = vmatpush3.bf16.msra.mxu0 %v1000_v41 }
  0xb9   : > { %991 = vmatmul.mubr.msk.f32.vlgmr.msra.gmra.mrb[0].mxu0 %vm270_vm0, %v1188_v42 }
  0xba   : > { %734 = vmatprep.mubr.bf16.mxu0 %v1095_v43 }
 0x18c   : > { %v992_v44 = vpop.f32.mrb[0].mxu0 }
 0x18d   : > { %v343_v45 = vpop.f32.mrb[1].mxu0  ;;  %v354_v47 = vmul.f32 0.0009765625, %v992_v44 }
 0x18e   : > { %v353_v46 = vmul.f32 0.0009765625, %v343_v45 }
 0x190   : > { %357 = vperm.xlu1 %1017, %v353_v46   ;;  %v550_v46 = vld [vmem:[%s1441_s3] sm:$0xff] }
 0x194   : > { %362 = vperm.xlu1 %1017, %v354_v47   ;;  %v551_v47 = vld [vmem:[%s1441_s3 + $0x8] sm:$0xff] }
 0x20f   : > { %v358_v48 = vpop.permute.xlu1 %357 }
 0x210   : > { %v1195_v49 = vsub.f32 %v234_v2, %v358_v48  ;;  %v1197_v50 = vsub.f32 %v235_v3, %v358_v48  ;;  %v1199_v51 = vsub.f32 %v236_v4, %v358_v48  ;;  %v1201_v52 = vsub.f32 %v237_v8, %v358_v48 }
 0x211   : > { %v1207_v56 = vsub.f32 %v238_v14, %v358_v48  ;;  %v1217_v62 = vsub.f32 %v239_v19, %v358_v48  ;;  %v1227_v4 = vsub.f32 %v240_v24, %v358_v48 }
 0x212   : > { %v381_v53 = vmul.f32 %v1195_v49, %v1195_v49  ;;  %v382_v54 = vmul.f32 %v1197_v50, %v1197_v50  ;;  %v383_v57 = vmul.f32 %v1199_v51, %v1199_v51  ;;  %v384_v63 = vmul.f32 %v1201_v52, %v1201_v52 }
 0x213   : > { %v363_v55 = vpop.permute.xlu1 %362  ;;  %v385_v5 = vmul.f32 %v1207_v56, %v1207_v56  ;;  %v387_v17 = vmul.f32 %v1227_v4, %v1227_v4 }
 0x214   : > { %v397_v58 = vadd.f32 %v382_v54, %v381_v53  ;;  %v1211_v59 = vsub.f32 %v242_v10, %v363_v55  ;;  %v1213_v60 = vsub.f32 %v243_v11, %v363_v55  ;;  %v1215_v61 = vsub.f32 %v244_v12, %v363_v55 }
 0x215   : > { %v1221_v1 = vsub.f32 %v245_v16, %v363_v55  ;;  %v1233_v7 = vsub.f32 %v246_v21, %v363_v55  ;;  %v1237_v10 = vsub.f32 %v241_v28, %v358_v48  ;;  %v386_v11 = vmul.f32 %v1217_v62, %v1217_v62 }
 0x216   : > { %v398_v0 = vadd.f32 %v397_v58, %v383_v57  ;;  %v389_v2 = vmul.f32 %v1211_v59, %v1211_v59  ;;  %v390_v3 = vmul.f32 %v1213_v60, %v1213_v60  ;;  %v391_v8 = vmul.f32 %v1215_v61, %v1215_v61 }
 0x217   : > { %v1243_v14 = vsub.f32 %v247_v26, %v363_v55  ;;  %v392_v15 = vmul.f32 %v1221_v1, %v1221_v1  ;;  %v1251_v19 = vsub.f32 %v248_v30, %v363_v55  ;;  %v393_v20 = vmul.f32 %v1233_v7, %v1233_v7 }
 0x218   : > { %v399_v6 = vadd.f32 %v398_v0, %v384_v63  ;;  %v406_v9 = vadd.f32 %v390_v3, %v389_v2  ;;  %v388_v13 = vmul.f32 %v1237_v10, %v1237_v10  ;;  %v1259_v24 = vsub.f32 %v249_v33, %v363_v55 }
 0x219   : > { %v394_v25 = vmul.f32 %v1243_v14, %v1243_v14  ;;  %v395_v28 = vmul.f32 %v1251_v19, %v1251_v19 }
 0x21a   : > { %v400_v12 = vadd.f32 %v399_v6, %v385_v5  ;;  %v407_v16 = vadd.f32 %v406_v9, %v391_v8  ;;  %v396_v30 = vmul.f32 %v1259_v24, %v1259_v24 }
 0x21c   : > { %v401_v18 = vadd.f32 %v400_v12, %v386_v11  ;;  %v408_v21 = vadd.f32 %v407_v16, %v392_v15 }
 0x21e   : > { %v402_v22 = vadd.f32 %v401_v18, %v387_v17  ;;  %v409_v26 = vadd.f32 %v408_v21, %v393_v20 }
 0x220   : > { %v403_v27 = vadd.f32 %v402_v22, %v388_v13  ;;  %v410_v29 = vadd.f32 %v409_v26, %v394_v25 }
 0x222   : > { %404 = vadd.xlane.f32.xlu0 %v403_v27  ;;  %v411_v31 = vadd.f32 %v410_v29, %v395_v28 }
 0x224   : > { %v412_v32 = vadd.f32 %v411_v31, %v396_v30 }
 0x226   : > { %413 = vadd.xlane.f32.xlu1 %v412_v32 }
 0x238   : > { %526 = vperm.xlu0 %1018, %v522_v35  }
 0x23c   : > { %531 = vperm.xlu0 %1018, %v523_v36  }
 0x2af   : > { %v405_v34 = vpop.xlane.xlu0 %404 }
 0x2b3   : > { %v414_v23 = vpop.xlane.xlu1 %413 }
 0x2b4   : > { %v1004_v33 = vpack.c.bf16 %v414_v23, %v405_v34 }
 0x2b6   : > { %1005 = vmatprep.subr.bf16.mxu1 %v1004_v33 }
 0x2b7   : > { %1007 = vmatpush3.bf16.msra.mxu1 %v1004_v33  ;;  %v1282_v48 = vpop.permute.xlu0 %526 }
 0x2ba   : > { %998 = vmatmul.mubr.msk.f32.vlgmr.msra.gmra.mrb[0].mxu1 %vm270_vm0, %v1188_v42 }
 0x2bb   : > { %775 = vmatprep.mubr.bf16.mxu1 %v1095_v43  ;;  %v1284_v53 = vpop.permute.xlu0 %531 }
 0x38d   : > { %v999_v37 = vpop.f32.mrb[0].mxu1 }
 0x38e   : > { %v491_v38 = vmul.f32 0.0009765625, %v999_v37  ;;  %v481_v39 = vpop.f32.mrb[1].mxu1 }
 0x38f   : > { %v490_v40 = vmul.f32 0.0009765625, %v481_v39 }
 0x390   : > { %v493_v41 = vadd.f32 1e-05, %v491_v38 }
 0x391   : > { %v492_v44 = vadd.f32 1e-05, %v490_v40 }
 0x392   : > { %1019 = vrsqrt.f32 %v493_v41 }
 0x393   : > { %1021 = vrsqrt.f32 %v492_v44 }
 0x39c   : > { %v1020_v42 = vpop.eup %1019 }
 0x39d   : > { %v1022_v45 = vpop.eup %1021  ;;  %503 = vperm.xlu1 %1017, %v1020_v42  }
 0x39e   : > { %498 = vperm.xlu0 %1018, %v1022_v45  }
 0x3a1   : > { %554 = vperm.xlu1 %1017, %v550_v46  }
 0x3a2   : > { %559 = vperm.xlu0 %1018, %v551_v47  }
 0x41c   : > { %v1286_v54 = vpop.permute.xlu1 %503 }
 0x41d   : > { %v1288_v55 = vpop.permute.xlu0 %498  ;;  %v515_v57 = vmul.f32 %v1286_v54, %v1213_v60  ;;  %v517_v58 = vmul.f32 %v1286_v54, %v1221_v1  ;;  %v514_v63 = vmul.f32 %v1286_v54, %v1211_v59  ;;  %v516_v0 = vmul.f32 %v1286_v54, %v1215_v61 }
 0x41e   : > { %v507_v2 = vmul.f32 %v1288_v55, %v1197_v50  ;;  %v509_v3 = vmul.f32 %v1288_v55, %v1201_v52  ;;  %v506_v5 = vmul.f32 %v1288_v55, %v1195_v49  ;;  %v508_v60 = vmul.f32 %v1288_v55, %v1199_v51 }
 0x41f   : > { %v543_v1 = vmul.f32 %v1284_v53, %v515_v57  ;;  %v545_v6 = vmul.f32 %v1284_v53, %v517_v58  ;;  %v542_v59 = vmul.f32 %v1284_v53, %v514_v63  ;;  %v544_v51 = vmul.f32 %v1284_v53, %v516_v0 }
 0x420   : > { %v1309_v8 = vpop.permute.xlu1 %554  ;;  %v535_v61 = vmul.f32 %v1282_v48, %v507_v2  ;;  %v537_v50 = vmul.f32 %v1282_v48, %v509_v3  ;;  %v534_v52 = vmul.f32 %v1282_v48, %v506_v5  ;;  %v536_v9 = vmul.f32 %v1282_v48, %v508_v60 }
 0x421   : > { %v1315_v49 = vpop.permute.xlu0 %559  ;;  %v511_v11 = vmul.f32 %v1288_v55, %v1217_v62  ;;  %v519_v12 = vmul.f32 %v1286_v54, %v1243_v14  ;;  %v513_v15 = vmul.f32 %v1288_v55, %v1237_v10  ;;  %v521_v21 = vmul.f32 %v1286_v54, %v1259_v24 }
 0x422   : > { %v1325_v16 = vadd.f32 %v1309_v8, %v535_v61  ;;  %v1328_v17 = vadd.f32 %v1315_v49, %v543_v1  ;;  %v1331_v18 = vadd.f32 %v1309_v8, %v537_v50  ;;  %v1334_v20 = vadd.f32 %v1315_v49, %v545_v6 }
 0x423   : > { %v1337_v62 = vadd.f32 %v1309_v8, %v534_v52  ;;  %v1340_v14 = vadd.f32 %v1315_v49, %v542_v59  ;;  %v1343_v10 = vadd.f32 %v1309_v8, %v536_v9  ;;  %v539_v26 = vmul.f32 %v1282_v48, %v511_v11 }
 0x424   : > { %v955_v13 = vmul.f32 -1.442695, %v1325_v16  ;;  %v963_v22 = vmul.f32 -1.442695, %v1328_v17  ;;  %v957_v25 = vmul.f32 -1.442695, %v1331_v18  ;;  %v1353_v28 = vadd.f32 %v1315_v49, %v544_v51 }
 0x425   : > { %v965_v27 = vmul.f32 -1.442695, %v1334_v20  ;;  %v547_v29 = vmul.f32 %v1284_v53, %v519_v12  ;;  %v954_v30 = vmul.f32 -1.442695, %v1337_v62  ;;  %v962_v24 = vmul.f32 -1.442695, %v1340_v14 }
 0x426   : > { %1023 = vpow2.f32 %v955_v13  ;;  %v1359_v31 = vadd.f32 %v1309_v8, %v539_v26  ;;  %v541_v34 = vmul.f32 %v1282_v48, %v513_v15  ;;  %v549_v23 = vmul.f32 %v1284_v53, %v521_v21 }
 0x427   : > { %1025 = vpow2.f32 %v963_v22  ;;  %v1362_v32 = vadd.f32 %v1315_v49, %v547_v29  ;;  %v956_v33 = vmul.f32 -1.442695, %v1343_v10  ;;  %v510_v35 = vmul.f32 %v1288_v55, %v1207_v56 }
 0x428   : > { %1027 = vpow2.f32 %v957_v25  ;;  %v964_v36 = vmul.f32 -1.442695, %v1353_v28  ;;  %v1371_v37 = vadd.f32 %v1309_v8, %v541_v34  ;;  %v1374_v38 = vadd.f32 %v1315_v49, %v549_v23 }
 0x429   : > { %1029 = vpow2.f32 %v965_v27  ;;  %v959_v39 = vmul.f32 -1.442695, %v1359_v31  ;;  %v538_v40 = vmul.f32 %v1282_v48, %v510_v35  ;;  %v967_v41 = vmul.f32 -1.442695, %v1362_v32 }
 0x42a   : > { %1031 = vpow2.f32 %v954_v30  ;;  %v961_v56 = vmul.f32 -1.442695, %v1371_v37  ;;  %v969_v42 = vmul.f32 -1.442695, %v1374_v38  ;;  %v518_v46 = vmul.f32 %v1286_v54, %v1233_v7 }
 0x42b   : > { %1033 = vpow2.f32 %v962_v24  ;;  %v1381_v44 = vadd.f32 %v1309_v8, %v538_v40  ;;  %v512_v63 = vmul.f32 %v1288_v55, %v1227_v4  ;;  %v520_v3 = vmul.f32 %v1286_v54, %v1251_v19 }
 0x42c   : > { %1035 = vpow2.f32 %v956_v33  ;;  %v546_v1 = vmul.f32 %v1284_v53, %v518_v46 }
 0x42d   : > { %1037 = vpow2.f32 %v964_v36  ;;  %v958_v45 = vmul.f32 -1.442695, %v1381_v44  ;;  %v540_v50 = vmul.f32 %v1282_v48, %v512_v63  ;;  %v548_v52 = vmul.f32 %v1284_v53, %v520_v3 }
 0x42e   : > { %1039 = vpow2.f32 %v959_v39  ;;  %v1395_v54 = vadd.f32 %v1315_v49, %v546_v1 }
 0x42f   : > { %1041 = vpow2.f32 %v967_v41  ;;  %v1398_v21 = vadd.f32 %v1309_v8, %v540_v50  ;;  %v1401_v53 = vadd.f32 %v1315_v49, %v548_v52 }
 0x430   : > { %v1024_v47 = vpop.eup %1023  ;;  %1043 = vpow2.f32 %v961_v56  ;;  %v966_v26 = vmul.f32 -1.442695, %v1395_v54 }
 0x431   : > { %v1026_v57 = vpop.eup %1025  ;;  %v627_v58 = vadd.f32 1.0, %v1024_v47  ;;  %1045 = vpow2.f32 %v969_v42  ;;  %v960_v24 = vmul.f32 -1.442695, %v1398_v21  ;;  %v968_v23 = vmul.f32 -1.442695, %v1401_v53 }
 0x432   : > { %v1028_v0 = vpop.eup %1027  ;;  %v635_v2 = vadd.f32 1.0, %v1026_v57  ;;  %1047 = vpow2.f32 %v958_v45 }
 0x433   : > { %v1030_v5 = vpop.eup %1029  ;;  %1049 = vrcp.f32 %v627_v58  ;;  %v629_v60 = vadd.f32 1.0, %v1028_v0 }
 0x434   : > { %v1032_v7 = vpop.eup %1031  ;;  %1051 = vrcp.f32 %v635_v2  ;;  %v637_v6 = vadd.f32 1.0, %v1030_v5 }
 0x435   : > { %v1034_v59 = vpop.eup %1033  ;;  %1053 = vrcp.f32 %v629_v60  ;;  %v626_v61 = vadd.f32 1.0, %v1032_v7 }
 0x436   : > { %v1036_v4 = vpop.eup %1035  ;;  %1055 = vrcp.f32 %v637_v6  ;;  %v634_v55 = vadd.f32 1.0, %v1034_v59 }
 0x437   : > { %v1038_v9 = vpop.eup %1037  ;;  %1057 = vrcp.f32 %v626_v61  ;;  %v628_v19 = vadd.f32 1.0, %v1036_v4 }
 0x438   : > { %v1040_v51 = vpop.eup %1039  ;;  %1059 = vrcp.f32 %v634_v55  ;;  %v636_v11 = vadd.f32 1.0, %v1038_v9 }
 0x439   : > { %v1042_v12 = vpop.eup %1041  ;;  %1061 = vrcp.f32 %v628_v19  ;;  %v631_v15 = vadd.f32 1.0, %v1040_v51 }
 0x43a   : > { %v1044_v48 = vpop.eup %1043  ;;  %1063 = vrcp.f32 %v636_v11  ;;  %v639_v13 = vadd.f32 1.0, %v1042_v12 }
 0x43b   : > { %v1046_v22 = vpop.eup %1045  ;;  %1065 = vrcp.f32 %v631_v15  ;;  %v633_v25 = vadd.f32 1.0, %v1044_v48 }
 0x43c   : > { %v1048_v27 = vpop.eup %1047  ;;  %1067 = vrcp.f32 %v639_v13  ;;  %v641_v29 = vadd.f32 1.0, %v1046_v22 }
 0x43d   : > { %v1050_v30 = vpop.eup %1049  ;;  %1069 = vrcp.f32 %v633_v25  ;;  %v630_v57 = vadd.f32 1.0, %v1048_v27 }
 0x43e   : > { %v1052_v8 = vpop.eup %1051  ;;  %v675_v34 = vmul.f32 %v1050_v30, %v1325_v16  ;;  %1071 = vrcp.f32 %v641_v29 }
 0x43f   : > { %v1054_v49 = vpop.eup %1053  ;;  %v683_v33 = vmul.f32 %v1052_v8, %v1328_v17  ;;  %1073 = vpow2.f32 %v966_v26 }
 0x440   : > { %v1056_v35 = vpop.eup %1055  ;;  %v677_v36 = vmul.f32 %v1054_v49, %v1331_v18  ;;  %1075 = vpow2.f32 %v960_v24 }
 0x441   : > { %v1058_v39 = vpop.eup %1057  ;;  %v692_v40 = vpack.c.bf16 %v683_v33, %v675_v34  ;;  %v685_v41 = vmul.f32 %v1056_v35, %v1334_v20  ;;  %1077 = vpow2.f32 %v968_v23 }
 0x442   : > { %v1060_v56 = vpop.eup %1059  ;;  %v674_v42 = vmul.f32 %v1058_v39, %v1337_v62  ;;  %1079 = vrcp.f32 %v630_v57 }
 0x443   : > { %v1062_v16 = vpop.eup %1061  ;;  %702 = vmatprep.subr.bf16.mxu0 %v692_v40  ;;  %v694_v45 = vpack.c.bf16 %v685_v41, %v677_v36  ;;  %v682_v46 = vmul.f32 %v1060_v56, %v1340_v14  ;;  %v690_v14 = vld [vmem:[%s1442_s4] sm:$0x3] }
 0x444   : > { %v1064_v47 = vpop.eup %1063  ;;  %v676_v17 = vmul.f32 %v1062_v16, %v1343_v10 }
 0x445   : > { %v1066_v58 = vpop.eup %1065  ;;  %743 = vmatprep.subr.bf16.mxu1 %v694_v45  ;;  %v691_v18 = vpack.c.bf16 %v682_v46, %v674_v42  ;;  %v684_v63 = vmul.f32 %v1064_v47, %v1353_v28 }
 0x446   : > { %v1068_v20 = vpop.eup %1067  ;;  %v679_v0 = vmul.f32 %v1066_v58, %v1359_v31 }
 0x447   : > { %v1070_v2 = vpop.eup %1069  ;;  %703 = vmatpush1.bf16.msra.mxu0 %v691_v18  ;;  %v693_v62 = vpack.c.bf16 %v684_v63, %v676_v17  ;;  %v687_v3 = vmul.f32 %v1068_v20, %v1362_v32 }
 0x448   : > { %v1072_v5 = vpop.eup %1071  ;;  %v681_v10 = vmul.f32 %v1070_v2, %v1371_v37 }
 0x449   : > { %v1074_v60 = vpop.eup %1073  ;;  %744 = vmatpush1.bf16.msra.mxu1 %v693_v62  ;;  %v696_v1 = vpack.c.bf16 %v687_v3, %v679_v0  ;;  %v689_v28 = vmul.f32 %v1072_v5, %v1374_v38 }
 0x44a   : > { %970 = vmatmul.mubr.msk.bf16.vlgmr.msra.gmra.mrb[4].mxu0 %vm270_vm0, %v690_v14  ;;  %v638_v31 = vadd.f32 1.0, %v1074_v60  ;;  %v1076_v7 = vpop.eup %1075 }
 0x44b   : > { %784 = vmatprep.subr.bf16.mxu0 %v696_v1  ;;  %v698_v6 = vpack.c.bf16 %v689_v28, %v681_v10  ;;  %816 = vmatprep.mubr.bf16.mxu0 %v1095_v43  ;;  %v1078_v32 = vpop.eup %1077  ;;  %v632_v59 = vadd.f32 1.0, %v1076_v7 }
 0x44c   : > { %971 = vmatmul.mubr.msk.bf16.vlgmr.msra.gmra.mrb[4].mxu1 %vm270_vm0, %v690_v14  ;;  %1081 = vrcp.f32 %v638_v31  ;;  %v640_v37 = vadd.f32 1.0, %v1078_v32  ;;  %v1080_v38 = vpop.eup %1079 }
 0x44d   : > { %825 = vmatprep.subr.bf16.mxu1 %v698_v6  ;;  %857 = vmatprep.mubr.bf16.mxu1 %v1095_v43  ;;  %1083 = vrcp.f32 %v632_v59  ;;  %v678_v61 = vmul.f32 %v1080_v38, %v1381_v44 }
 0x44e   : > { %1085 = vrcp.f32 %v640_v37 }
 0x456   : > { %v1082_v50 = vpop.eup %1081 }
 0x457   : > { %v686_v4 = vmul.f32 %v1082_v50, %v1395_v54  ;;  %v1084_v55 = vpop.eup %1083 }
 0x458   : > { %v1086_v52 = vpop.eup %1085  ;;  %v680_v19 = vmul.f32 %v1084_v55, %v1398_v21 }
 0x459   : > { %v695_v9 = vpack.c.bf16 %v686_v4, %v678_v61  ;;  %v688_v51 = vmul.f32 %v1086_v52, %v1401_v53 }
 0x45b   : > { %785 = vmatpush1.bf16.msra.mxu0 %v695_v9  ;;  %v697_v11 = vpack.c.bf16 %v688_v51, %v680_v19 }
 0x45d   : > { %826 = vmatpush1.bf16.msra.mxu1 %v697_v11 }
 0x45e   : > { %972 = vmatmul.mubr.msk.bf16.vlgmr.msra.gmra.mrb[8].mxu0 %vm270_vm0, %v690_v14 }
 0x460   : > { %973 = vmatmul.mubr.msk.bf16.vlgmr.msra.gmra.mrb[8].mxu1 %vm270_vm0, %v690_v14 }
 0x51d   : > { %v736_v43 = vpop.f32.mrb[4].mxu0 }
 0x51e   : > { %v738_v44 = vpop.f32.mrb[5].mxu0 }
 0x51f   : > { %v777_v54 = vpop.f32.mrb[4].mxu1  ;;  %v874_v12 = vcombine.low %v736_v43, %v738_v44  ;;  %v740_v15 = vpop.f32.mrb[6].mxu0 }
 0x520   : > { %v779_v21 = vpop.f32.mrb[5].mxu1  ;;  %v741_v48 = vpop.f32.mrb[7].mxu0 }
 0x521   : > { %882 = vst [vmem:[%s224_s16] sm:$0x77] %v874_v12  ;;  %v875_v13 = vcombine.low %v777_v54, %v779_v21  ;;  %v781_v53 = vpop.f32.mrb[6].mxu1 }
 0x522   : > { %v782_v22 = vpop.f32.mrb[7].mxu1 }
 0x523   : > { %883 = vst [vmem:[%s224_s16 + $0x8] sm:$0x77] %v875_v13 }
 0x531   : > { %v818_v25 = vpop.f32.mrb[8].mxu0 }
 0x532   : > { %v820_v26 = vpop.f32.mrb[9].mxu0 }
 0x533   : > { %v876_v27 = vcombine.low %v818_v25, %v820_v26  ;;  %v822_v29 = vpop.f32.mrb[10].mxu0  ;;  %v859_v30 = vpop.f32.mrb[8].mxu1 }
 0x534   : > { %v823_v24 = vpop.f32.mrb[11].mxu0  ;;  %v861_v8 = vpop.f32.mrb[9].mxu1 }
 0x535   : > { %884 = vst [vmem:[%s224_s16 + $0x10] sm:$0x77] %v876_v27  ;;  %v877_v34 = vcombine.low %v859_v30, %v861_v8  ;;  %v863_v23 = vpop.f32.mrb[10].mxu1 }
 0x536   : > { %v864_v49 = vpop.f32.mrb[11].mxu1 }
 0x537   : > { %885 = vst [vmem:[%s224_s16 + $0x18] sm:$0x77] %v877_v34 }
 0x538 PF: > { %s15_s18 = sadd.s32 1, %s1093_s18  }
 0x539   : > { %p12_p4 = scmp.ge.s32.totalorder %s15_s18, 4  }
 0x53b   :  { %14 = sbr.rel (!%p12_p4) target bundleno = 1 (0x1), region = 70 }

</bundles_post_ra>
